<compile_context>
chip_gen: v5e
topology: v5e:2x2
jax: 0.10.0
libtpu: 0.0.40
codegen_flags: <defaults>
</compile_context>

<pallas_src>
import functools

import jax
import jax.numpy as jnp
from jax.experimental import pallas as pl
from jax.experimental.pallas import tpu as pltpu


# ----------------------------------------------------------------------------
# Single fused kernel (grid=(1,), everything VMEM-resident).
# ----------------------------------------------------------------------------
def _imgnet_fused_kernel(x_ref, w1_ref, b1_ref, w2_ref, b2_ref,
                         wc_flat_ref, bc_ref, wf_ref, bf_ref,
                         wtail_ref, btail_ref,
                         hash_ref, prob_ref,
                         pad1_ref, pad2_ref, col1_ref, col2_ref, flat_ref,
                         *, B, H, W, Cin, C1, C2):
    H1, W1 = H // 2, W // 2          # after pool1
    H2, W2 = H1 // 2, W1 // 2        # after pool2

    # Zero the padded-image scratches once: the 1-pixel halo stays zero
    # (== padding=1); the interiors are fully overwritten below.
    pad1_ref[...] = jnp.zeros_like(pad1_ref)
    pad2_ref[...] = jnp.zeros_like(pad2_ref)

    def conv3x3_relu(pad_ref, col_ref, w_ref, b_ref, h, w, cin):
        # Batched im2col: the 9 shifted windows of ALL images go into the
        # (B*h*w, 9*cin) scratch, then ONE MXU matmul with K = 9*cin.
        for dh in range(3):
            for dw in range(3):
                t = dh * 3 + dw
                patch = pad_ref[:, dh:dh + h, dw:dw + w, :]
                col_ref[:, t * cin:(t + 1) * cin] = patch.reshape(B * h * w, cin)
        acc = jnp.dot(col_ref[...].astype(jnp.bfloat16), w_ref[...],
                      preferred_element_type=jnp.float32)
        return jnp.maximum(acc + b_ref[...], 0.0)            # (B*h*w, cout) f32

    def maxpool2x2(y):
        # (B, h, w, c) -> (B, h//2, w//2, c); reshapes keep the minor (lane) dim.
        b_, h, w, c = y.shape
        y = y.reshape(b_, h // 2, 2, w, c)
        y = jnp.maximum(y[:, :, 0], y[:, :, 1])               # (B, h//2, w, c)
        y = y.reshape(b_, h // 2, w // 2, 2, c)
        return jnp.maximum(y[:, :, :, 0, :], y[:, :, :, 1, :])

    # ---- self.features: (conv3x3 + ReLU -> maxpool2x2) x 2, fully fused ----
    pad1_ref[:, 1:H + 1, 1:W + 1, :] = x_ref[...]             # one halo fill
    y1 = conv3x3_relu(pad1_ref, col1_ref, w1_ref, b1_ref, H, W, Cin)
    p1 = maxpool2x2(y1.reshape(B, H, W, C1))                  # (B, H1, W1, C1)

    pad2_ref[:, 1:H1 + 1, 1:W1 + 1, :] = p1
    y2 = conv3x3_relu(pad2_ref, col2_ref, w2_ref, b2_ref, H1, W1, C1)
    p2 = maxpool2x2(y2.reshape(B, H1, W1, C2))                # (B, H2, W2, C2)

    # x.view(B, -1): flatten into the (B, D) head-input scratch.  The kernel
    # flattens in NHWC order; the wrapper permuted the classifier rows so this
    # matches PyTorch's NCHW flatten exactly.  One store per spatial position
    # (all images at once).
    for s in range(H2 * W2):
        hh, ww = divmod(s, W2)
        flat_ref[:, s * C2:(s + 1) * C2] = p2[:, hh, ww, :]

    # ---- head: classifier -> feature(+ReLU) -> [classifier | hash] fused,
    #            then softmax / tanh.  K=256 matmuls, bf16 operands. ----------
    L = prob_ref.shape[1]
    xf = flat_ref[...].astype(jnp.bfloat16)                              # (B, D)
    x1 = jnp.dot(xf, wc_flat_ref[...],
                 preferred_element_type=jnp.float32) + bc_ref[...]
    feat = jnp.maximum(
        jnp.dot(x1.astype(jnp.bfloat16), wf_ref[...],
                preferred_element_type=jnp.float32) + bf_ref[...], 0.0)
    # One matmul for both the second classifier use and the hash projection;
    # the split at column L=256 is vreg-lane aligned.
    tail = jnp.dot(feat.astype(jnp.bfloat16), wtail_ref[...],
                   preferred_element_type=jnp.float32) + btail_ref[...]
    pre = tail[:, :L]
    m = jnp.max(pre, axis=1, keepdims=True)
    e = jnp.exp(pre - m)
    prob_ref[...] = e / jnp.sum(e, axis=1, keepdims=True)
    hash_ref[...] = jnp.tanh(tail[:, L:])


# ----------------------------------------------------------------------------
# Wrapper: one pallas_call; only boundary-layout work (NCHW->NHWC transpose of
# the 8 KB input, weight reshapes / concat / bf16 casts) stays in XLA.
# ----------------------------------------------------------------------------
def imgnet_forward(x_nchw, params):
    B, Cin, H, W = x_nchw.shape
    C1 = params["conv1_w"].shape[-1]
    C2 = params["conv2_w"].shape[-1]
    H1, W1 = H // 2, W // 2
    H2, W2 = H1 // 2, W1 // 2
    D = C2 * H2 * W2
    L = params["cls_w"].shape[1]
    K = params["hash_w"].shape[1]

    x = jnp.transpose(x_nchw, (0, 2, 3, 1)).astype(jnp.float32)

    # Conv weights pre-reshaped for the single im2col matmul; matmul operands
    # are bf16 (halves weight DMA), biases stay f32.
    w1 = params["conv1_w"].reshape(9 * Cin, C1).astype(jnp.bfloat16)
    w2 = params["conv2_w"].reshape(9 * C1, C2).astype(jnp.bfloat16)
    b1 = params["conv1_b"].reshape(1, C1).astype(jnp.float32)
    b2 = params["conv2_b"].reshape(1, C2).astype(jnp.float32)

    # The kernel flattens conv features in NHWC order; permute the classifier
    # rows so flat_nhwc @ wc_flat == flat_nchw @ wc exactly.
    wc = params["cls_w"]
    wc_flat = wc.reshape(C2, H2, W2, L).transpose(1, 2, 0, 3).reshape(D, L)
    wc_flat = wc_flat.astype(jnp.bfloat16)
    bc = params["cls_b"].reshape(1, L).astype(jnp.float32)
    wf = params["feat_w"].astype(jnp.bfloat16)
    bf = params["feat_b"].reshape(1, -1).astype(jnp.float32)
    # Fused tail weight: [classifier (shared weight, unpermuted) | hash].
    wtail = jnp.concatenate([params["cls_w"], params["hash_w"]],
                            axis=1).astype(jnp.bfloat16)
    btail = jnp.concatenate([params["cls_b"], params["hash_b"]]).reshape(
        1, L + K).astype(jnp.float32)

    def fs(shape):
        n = len(shape)
        return pl.BlockSpec(shape, lambda i, _n=n: (0,) * _n)

    kernel = functools.partial(_imgnet_fused_kernel,
                               B=B, H=H, W=W, Cin=Cin, C1=C1, C2=C2)
    hash_code, prob = pl.pallas_call(
        kernel,
        out_shape=(jax.ShapeDtypeStruct((B, K), jnp.float32),
                   jax.ShapeDtypeStruct((B, L), jnp.float32)),
        grid_spec=pltpu.PrefetchScalarGridSpec(
            num_scalar_prefetch=0,
            grid=(1,),
            in_specs=[fs(x.shape), fs(w1.shape), fs(b1.shape),
                      fs(w2.shape), fs(b2.shape),
                      fs(wc_flat.shape), fs(bc.shape),
                      fs(wf.shape), fs(bf.shape),
                      fs(wtail.shape), fs(btail.shape)],
            out_specs=[fs((B, K)), fs((B, L))],
            scratch_shapes=[
                pltpu.VMEM((B, H + 2, W + 2, Cin), jnp.float32),    # padded 1
                pltpu.VMEM((B, H1 + 2, W1 + 2, C1), jnp.float32),   # padded 2
                pltpu.VMEM((B * H * W, 9 * Cin), jnp.float32),      # im2col 1
                pltpu.VMEM((B * H1 * W1, 9 * C1), jnp.float32),     # im2col 2
                pltpu.VMEM((B, D), jnp.float32),                    # flat feats
            ]),
        compiler_params=pltpu.CompilerParams(
            dimension_semantics=("arbitrary",),
            vmem_limit_bytes=32 * 1024 * 1024),
    )(x, w1, b1, w2, b2, wc_flat, bc, wf, bf, wtail, btail)
    return hash_code, prob


# ----------------------------------------------------------------------------
# Deterministic synthetic parameters (weights stored (in, out); equivalent to
# PyTorch x @ W.T + b with W of shape (out, in)).
# TODO(synk): nn.Dropout layers of the shadowed/unused VGG classifier have no
# effect on this forward and are omitted.
# ----------------------------------------------------------------------------
def init_params(key, cin=4, c1=8, c2=16, d=256, label_size=256, code_length=32):
    ks = jax.random.split(key, 10)

    def w(k, shape, scale):
        return (scale * jax.random.normal(k, shape)).astype(jnp.float32)

    return {
        "conv1_w": w(ks[0], (3, 3, cin, c1), 0.10),
        "conv1_b": w(ks[1], (c1,), 0.10),
        "conv2_w": w(ks[2], (3, 3, c1, c2), 0.10),
        "conv2_b": w(ks[3], (c2,), 0.10),
        # self.classifier = nn.Linear(4096 -> label_size)   (scaled: 256 -> 256)
        "cls_w": w(ks[4], (d, label_size), 0.05),
        "cls_b": w(ks[5], (label_size,), 0.05),
        # self.feature = nn.Linear(4096 -> dim) + ReLU       (scaled: 256 -> 256)
        "feat_w": w(ks[6], (label_size, d), 0.05),
        "feat_b": w(ks[7], (d,), 0.05),
        # self.hash = nn.Linear(4096 -> code_length) + Tanh  (scaled: 256 -> 32)
        "hash_w": w(ks[8], (d, code_length), 0.05),
        "hash_b": w(ks[9], (code_length,), 0.05),
    }


# Pure-JAX f32/HIGHEST reference of the same forward (NCHW flatten, shared
# classifier weight used twice) for a numerical cross-check.
def _ref_maxpool2x2(x_nhwc):
    B, H, W, C = x_nhwc.shape
    return x_nhwc.reshape(B, H // 2, 2, W // 2, 2, C).max(axis=(2, 4))


def reference_forward(x_nchw, params):
    hi = jax.lax.Precision.HIGHEST
    x = jnp.transpose(x_nchw, (0, 2, 3, 1)).astype(jnp.float32)

    def conv(x, w, b):
        y = jax.lax.conv_general_dilated(
            x, w, window_strides=(1, 1), padding="SAME",
            dimension_numbers=("NHWC", "HWIO", "NHWC"), precision=hi)
        return jnp.maximum(y + b, 0.0)

    x = _ref_maxpool2x2(conv(x, params["conv1_w"], params["conv1_b"]))
    x = _ref_maxpool2x2(conv(x, params["conv2_w"], params["conv2_b"]))
    B = x.shape[0]
    xf = jnp.transpose(x, (0, 3, 1, 2)).reshape(B, -1)      # NCHW flatten
    x1 = jnp.dot(xf, params["cls_w"], precision=hi) + params["cls_b"]
    feat = jnp.maximum(
        jnp.dot(x1, params["feat_w"], precision=hi) + params["feat_b"], 0.0)
    pre = jnp.dot(feat, params["cls_w"], precision=hi) + params["cls_b"]
    prob = jax.nn.softmax(pre, axis=1)
    hc = jnp.tanh(jnp.dot(feat, params["hash_w"], precision=hi) + params["hash_b"])
    return hc, prob


if __name__ == "__main__":
    key = jax.random.PRNGKey(0)
    pkey, xkey = jax.random.split(key)
    params = init_params(pkey)
    # NCHW input, like PyTorch: batch=2, channels=4, spatial=16x16.
    # (B=2 leaves 6/8 sublanes masked in the head; inherent to the spec'd batch.)
    x = jax.random.normal(xkey, (2, 4, 16, 16), dtype=jnp.float32)

    hash_code, img_predict = jax.jit(imgnet_forward)(x, params)
    jax.block_until_ready((hash_code, img_predict))

    hc_ref, prob_ref = reference_forward(x, params)

    assert hash_code.shape == (2, 32) and img_predict.shape == (2, 256)
    assert bool(jnp.all(jnp.isfinite(hash_code)))
    assert bool(jnp.all(jnp.isfinite(img_predict)))
    assert bool(jnp.allclose(jnp.sum(img_predict, axis=1), 1.0, atol=1e-3))
    # bf16 MXU operands (f32 accumulation) vs. an f32/HIGHEST reference.
    assert bool(jnp.allclose(hash_code, hc_ref, atol=5e-2, rtol=5e-2))
    assert bool(jnp.allclose(img_predict, prob_ref, atol=3e-3, rtol=5e-2))
    print("KERNEL_OK")
</pallas_src>

<mosaic_0001>
module attributes {stable_mosaic.version = 11 : i64} {
  func.func @_imgnet_fused_kernel(%arg0: i32, %arg1: memref<2x16x16x4xf32, #tpu.memory_space<vmem>>, %arg2: memref<36x8xbf16, #tpu.memory_space<vmem>>, %arg3: memref<1x8xf32, #tpu.memory_space<vmem>>, %arg4: memref<72x16xbf16, #tpu.memory_space<vmem>>, %arg5: memref<1x16xf32, #tpu.memory_space<vmem>>, %arg6: memref<256x256xbf16, #tpu.memory_space<vmem>>, %arg7: memref<1x256xf32, #tpu.memory_space<vmem>>, %arg8: memref<256x256xbf16, #tpu.memory_space<vmem>>, %arg9: memref<1x256xf32, #tpu.memory_space<vmem>>, %arg10: memref<256x288xbf16, #tpu.memory_space<vmem>>, %arg11: memref<1x288xf32, #tpu.memory_space<vmem>>, %arg12: memref<2x32xf32, #tpu.memory_space<vmem>>, %arg13: memref<2x256xf32, #tpu.memory_space<vmem>>, %arg14: memref<2x18x18x4xf32, #tpu.memory_space<vmem>>, %arg15: memref<2x10x10x8xf32, #tpu.memory_space<vmem>>, %arg16: memref<512x36xf32, #tpu.memory_space<vmem>>, %arg17: memref<128x72xf32, #tpu.memory_space<vmem>>, %arg18: memref<2x256xf32, #tpu.memory_space<vmem>>) attributes {dimension_semantics = [#tpu.dimension_semantics<arbitrary>], iteration_bounds = array<i64: 1>, scalar_prefetch = 0 : i64, scratch_operands = 5 : i64, tpu.core_type = #tpu.core_type<tc>, window_params = [{pipeline_mode = #tpu.pipeline_mode<synchronous>, transform_indices = @transform_0, window_bounds = array<i64: 2, 16, 16, 4>}, {pipeline_mode = #tpu.pipeline_mode<synchronous>, transform_indices = @transform_1, window_bounds = array<i64: 36, 8>}, {pipeline_mode = #tpu.pipeline_mode<synchronous>, transform_indices = @transform_2, window_bounds = array<i64: 1, 8>}, {pipeline_mode = #tpu.pipeline_mode<synchronous>, transform_indices = @transform_3, window_bounds = array<i64: 72, 16>}, {pipeline_mode = #tpu.pipeline_mode<synchronous>, transform_indices = @transform_4, window_bounds = array<i64: 1, 16>}, {pipeline_mode = #tpu.pipeline_mode<synchronous>, transform_indices = @transform_5, window_bounds = array<i64: 256, 256>}, {pipeline_mode = #tpu.pipeline_mode<synchronous>, transform_indices = @transform_6, window_bounds = array<i64: 1, 256>}, {pipeline_mode = #tpu.pipeline_mode<synchronous>, transform_indices = @transform_7, window_bounds = array<i64: 256, 256>}, {pipeline_mode = #tpu.pipeline_mode<synchronous>, transform_indices = @transform_8, window_bounds = array<i64: 1, 256>}, {pipeline_mode = #tpu.pipeline_mode<synchronous>, transform_indices = @transform_9, window_bounds = array<i64: 256, 288>}, {pipeline_mode = #tpu.pipeline_mode<synchronous>, transform_indices = @transform_10, window_bounds = array<i64: 1, 288>}, {pipeline_mode = #tpu.pipeline_mode<synchronous>, transform_indices = @transform_11, window_bounds = array<i64: 2, 32>}, {pipeline_mode = #tpu.pipeline_mode<synchronous>, transform_indices = @transform_12, window_bounds = array<i64: 2, 256>}]} {
    %cst = arith.constant 0.000000e+00 : f32
    %0 = vector.broadcast %cst : f32 to vector<2x18x18x4xf32>
    %c0 = arith.constant 0 : index
    %c0_0 = arith.constant 0 : index
    %c0_1 = arith.constant 0 : index
    %c0_2 = arith.constant 0 : index
    %1 = vector.load %arg14[%c0, %c0_0, %c0_1, %c0_2] : memref<2x18x18x4xf32, #tpu.memory_space<vmem>>, vector<2x18x18x4xf32>
    tpu.vector_store %arg14[%c0, %c0_0, %c0_1, %c0_2], %0 {strides = array<i32>} : memref<2x18x18x4xf32, #tpu.memory_space<vmem>>, vector<2x18x18x4xf32>,
    %cst_3 = arith.constant 0.000000e+00 : f32
    %2 = vector.broadcast %cst_3 : f32 to vector<2x10x10x8xf32>
    %c0_4 = arith.constant 0 : index
    %c0_5 = arith.constant 0 : index
    %c0_6 = arith.constant 0 : index
    %c0_7 = arith.constant 0 : index
    %3 = vector.load %arg15[%c0_4, %c0_5, %c0_6, %c0_7] : memref<2x10x10x8xf32, #tpu.memory_space<vmem>>, vector<2x10x10x8xf32>
    tpu.vector_store %arg15[%c0_4, %c0_5, %c0_6, %c0_7], %2 {strides = array<i32>} : memref<2x10x10x8xf32, #tpu.memory_space<vmem>>, vector<2x10x10x8xf32>,
    %c0_8 = arith.constant 0 : index
    %c0_9 = arith.constant 0 : index
    %c0_10 = arith.constant 0 : index
    %c0_11 = arith.constant 0 : index
    %4 = vector.load %arg1[%c0_8, %c0_9, %c0_10, %c0_11] : memref<2x16x16x4xf32, #tpu.memory_space<vmem>>, vector<2x16x16x4xf32>
    %c0_12 = arith.constant 0 : index
    %c1 = arith.constant 1 : index
    %c1_13 = arith.constant 1 : index
    %c0_14 = arith.constant 0 : index
    %5 = vector.load %arg14[%c0_12, %c1, %c1_13, %c0_14] : memref<2x18x18x4xf32, #tpu.memory_space<vmem>>, vector<2x16x16x4xf32>
    tpu.vector_store %arg14[%c0_12, %c1, %c1_13, %c0_14], %4 {strides = array<i32>} : memref<2x18x18x4xf32, #tpu.memory_space<vmem>>, vector<2x16x16x4xf32>,
    %c0_15 = arith.constant 0 : index
    %c0_16 = arith.constant 0 : index
    %c0_17 = arith.constant 0 : index
    %c0_18 = arith.constant 0 : index
    %6 = vector.load %arg14[%c0_15, %c0_16, %c0_17, %c0_18] : memref<2x18x18x4xf32, #tpu.memory_space<vmem>>, vector<2x16x16x4xf32>
    %7 = vector.shape_cast %6 : vector<2x16x16x4xf32> to vector<512x4xf32>
    %c0_19 = arith.constant 0 : index
    %c0_20 = arith.constant 0 : index
    %8 = vector.load %arg16[%c0_19, %c0_20] : memref<512x36xf32, #tpu.memory_space<vmem>>, vector<512x4xf32>
    tpu.vector_store %arg16[%c0_19, %c0_20], %7 {strides = array<i32>} : memref<512x36xf32, #tpu.memory_space<vmem>>, vector<512x4xf32>,
    %c0_21 = arith.constant 0 : index
    %c0_22 = arith.constant 0 : index
    %c1_23 = arith.constant 1 : index
    %c0_24 = arith.constant 0 : index
    %9 = vector.load %arg14[%c0_21, %c0_22, %c1_23, %c0_24] : memref<2x18x18x4xf32, #tpu.memory_space<vmem>>, vector<2x16x16x4xf32>
    %10 = vector.shape_cast %9 : vector<2x16x16x4xf32> to vector<512x4xf32>
    %c0_25 = arith.constant 0 : index
    %c4 = arith.constant 4 : index
    %11 = vector.load %arg16[%c0_25, %c4] : memref<512x36xf32, #tpu.memory_space<vmem>>, vector<512x4xf32>
    tpu.vector_store %arg16[%c0_25, %c4], %10 {strides = array<i32>} : memref<512x36xf32, #tpu.memory_space<vmem>>, vector<512x4xf32>,
    %c0_26 = arith.constant 0 : index
    %c0_27 = arith.constant 0 : index
    %c2 = arith.constant 2 : index
    %c0_28 = arith.constant 0 : index
    %12 = vector.load %arg14[%c0_26, %c0_27, %c2, %c0_28] : memref<2x18x18x4xf32, #tpu.memory_space<vmem>>, vector<2x16x16x4xf32>
    %13 = vector.shape_cast %12 : vector<2x16x16x4xf32> to vector<512x4xf32>
    %c0_29 = arith.constant 0 : index
    %c8 = arith.constant 8 : index
    %14 = vector.load %arg16[%c0_29, %c8] : memref<512x36xf32, #tpu.memory_space<vmem>>, vector<512x4xf32>
    tpu.vector_store %arg16[%c0_29, %c8], %13 {strides = array<i32>} : memref<512x36xf32, #tpu.memory_space<vmem>>, vector<512x4xf32>,
    %c0_30 = arith.constant 0 : index
    %c1_31 = arith.constant 1 : index
    %c0_32 = arith.constant 0 : index
    %c0_33 = arith.constant 0 : index
    %15 = vector.load %arg14[%c0_30, %c1_31, %c0_32, %c0_33] : memref<2x18x18x4xf32, #tpu.memory_space<vmem>>, vector<2x16x16x4xf32>
    %16 = vector.shape_cast %15 : vector<2x16x16x4xf32> to vector<512x4xf32>
    %c0_34 = arith.constant 0 : index
    %c12 = arith.constant 12 : index
    %17 = vector.load %arg16[%c0_34, %c12] : memref<512x36xf32, #tpu.memory_space<vmem>>, vector<512x4xf32>
    tpu.vector_store %arg16[%c0_34, %c12], %16 {strides = array<i32>} : memref<512x36xf32, #tpu.memory_space<vmem>>, vector<512x4xf32>,
    %c0_35 = arith.constant 0 : index
    %c1_36 = arith.constant 1 : index
    %c1_37 = arith.constant 1 : index
    %c0_38 = arith.constant 0 : index
    %18 = vector.load %arg14[%c0_35, %c1_36, %c1_37, %c0_38] : memref<2x18x18x4xf32, #tpu.memory_space<vmem>>, vector<2x16x16x4xf32>
    %19 = vector.shape_cast %18 : vector<2x16x16x4xf32> to vector<512x4xf32>
    %c0_39 = arith.constant 0 : index
    %c16 = arith.constant 16 : index
    %20 = vector.load %arg16[%c0_39, %c16] : memref<512x36xf32, #tpu.memory_space<vmem>>, vector<512x4xf32>
    tpu.vector_store %arg16[%c0_39, %c16], %19 {strides = array<i32>} : memref<512x36xf32, #tpu.memory_space<vmem>>, vector<512x4xf32>,
    %c0_40 = arith.constant 0 : index
    %c1_41 = arith.constant 1 : index
    %c2_42 = arith.constant 2 : index
    %c0_43 = arith.constant 0 : index
    %21 = vector.load %arg14[%c0_40, %c1_41, %c2_42, %c0_43] : memref<2x18x18x4xf32, #tpu.memory_space<vmem>>, vector<2x16x16x4xf32>
    %22 = vector.shape_cast %21 : vector<2x16x16x4xf32> to vector<512x4xf32>
    %c0_44 = arith.constant 0 : index
    %c20 = arith.constant 20 : index
    %23 = vector.load %arg16[%c0_44, %c20] : memref<512x36xf32, #tpu.memory_space<vmem>>, vector<512x4xf32>
    tpu.vector_store %arg16[%c0_44, %c20], %22 {strides = array<i32>} : memref<512x36xf32, #tpu.memory_space<vmem>>, vector<512x4xf32>,
    %c0_45 = arith.constant 0 : index
    %c2_46 = arith.constant 2 : index
    %c0_47 = arith.constant 0 : index
    %c0_48 = arith.constant 0 : index
    %24 = vector.load %arg14[%c0_45, %c2_46, %c0_47, %c0_48] : memref<2x18x18x4xf32, #tpu.memory_space<vmem>>, vector<2x16x16x4xf32>
    %25 = vector.shape_cast %24 : vector<2x16x16x4xf32> to vector<512x4xf32>
    %c0_49 = arith.constant 0 : index
    %c24 = arith.constant 24 : index
    %26 = vector.load %arg16[%c0_49, %c24] : memref<512x36xf32, #tpu.memory_space<vmem>>, vector<512x4xf32>
    tpu.vector_store %arg16[%c0_49, %c24], %25 {strides = array<i32>} : memref<512x36xf32, #tpu.memory_space<vmem>>, vector<512x4xf32>,
    %c0_50 = arith.constant 0 : index
    %c2_51 = arith.constant 2 : index
    %c1_52 = arith.constant 1 : index
    %c0_53 = arith.constant 0 : index
    %27 = vector.load %arg14[%c0_50, %c2_51, %c1_52, %c0_53] : memref<2x18x18x4xf32, #tpu.memory_space<vmem>>, vector<2x16x16x4xf32>
    %28 = vector.shape_cast %27 : vector<2x16x16x4xf32> to vector<512x4xf32>
    %c0_54 = arith.constant 0 : index
    %c28 = arith.constant 28 : index
    %29 = vector.load %arg16[%c0_54, %c28] : memref<512x36xf32, #tpu.memory_space<vmem>>, vector<512x4xf32>
    tpu.vector_store %arg16[%c0_54, %c28], %28 {strides = array<i32>} : memref<512x36xf32, #tpu.memory_space<vmem>>, vector<512x4xf32>,
    %c0_55 = arith.constant 0 : index
    %c2_56 = arith.constant 2 : index
    %c2_57 = arith.constant 2 : index
    %c0_58 = arith.constant 0 : index
    %30 = vector.load %arg14[%c0_55, %c2_56, %c2_57, %c0_58] : memref<2x18x18x4xf32, #tpu.memory_space<vmem>>, vector<2x16x16x4xf32>
    %31 = vector.shape_cast %30 : vector<2x16x16x4xf32> to vector<512x4xf32>
    %c0_59 = arith.constant 0 : index
    %c32 = arith.constant 32 : index
    %32 = vector.load %arg16[%c0_59, %c32] : memref<512x36xf32, #tpu.memory_space<vmem>>, vector<512x4xf32>
    tpu.vector_store %arg16[%c0_59, %c32], %31 {strides = array<i32>} : memref<512x36xf32, #tpu.memory_space<vmem>>, vector<512x4xf32>,
    %c0_60 = arith.constant 0 : index
    %c0_61 = arith.constant 0 : index
    %33 = vector.load %arg16[%c0_60, %c0_61] : memref<512x36xf32, #tpu.memory_space<vmem>>, vector<512x36xf32>
    %34 = arith.truncf %33 : vector<512x36xf32> to vector<512x36xbf16>
    %c0_62 = arith.constant 0 : index
    %c0_63 = arith.constant 0 : index
    %35 = vector.load %arg2[%c0_62, %c0_63] : memref<36x8xbf16, #tpu.memory_space<vmem>>, vector<36x8xbf16>
    %cst_64 = arith.constant dense<0.000000e+00> : vector<512x8xf32>
    %36 = tpu.matmul %34, %35, %cst_64 {dimension_numbers = #tpu.dot_dimension_numbers<[1], [0], [0], [1], [0, 0, 1, 1], [], []>} : vector<512x36xbf16>, vector<36x8xbf16>, vector<512x8xf32> -> vector<512x8xf32>
    %c0_65 = arith.constant 0 : index
    %c0_66 = arith.constant 0 : index
    %37 = vector.load %arg3[%c0_65, %c0_66] : memref<1x8xf32, #tpu.memory_space<vmem>>, vector<1x8xf32>
    %38 = vector.broadcast %37 : vector<1x8xf32> to vector<512x8xf32>
    %39 = arith.addf %36, %38 : vector<512x8xf32>
    %cst_67 = arith.constant 0.000000e+00 : f32
    %40 = vector.broadcast %cst_67 : f32 to vector<512x8xf32>
    %41 = arith.maximumf %39, %40 : vector<512x8xf32>
    %42 = vector.shape_cast %41 : vector<512x8xf32> to vector<2x16x16x8xf32>
    %43 = vector.shape_cast %42 : vector<2x16x16x8xf32> to vector<2x8x2x16x8xf32>
    %44 = vector.extract_strided_slice %43 {offsets = [0, 0, 0, 0, 0], sizes = [2, 8, 1, 16, 8], strides = [1, 1, 1, 1, 1]} : vector<2x8x2x16x8xf32> to vector<2x8x1x16x8xf32>
    %45 = vector.shape_cast %44 : vector<2x8x1x16x8xf32> to vector<2x8x16x8xf32>
    %46 = vector.extract_strided_slice %43 {offsets = [0, 0, 1, 0, 0], sizes = [2, 8, 1, 16, 8], strides = [1, 1, 1, 1, 1]} : vector<2x8x2x16x8xf32> to vector<2x8x1x16x8xf32>
    %47 = vector.shape_cast %46 : vector<2x8x1x16x8xf32> to vector<2x8x16x8xf32>
    %48 = arith.maximumf %45, %47 : vector<2x8x16x8xf32>
    %49 = vector.shape_cast %48 : vector<2x8x16x8xf32> to vector<2x8x8x2x8xf32>
    %50 = vector.extract_strided_slice %49 {offsets = [0, 0, 0, 0, 0], sizes = [2, 8, 8, 1, 8], strides = [1, 1, 1, 1, 1]} : vector<2x8x8x2x8xf32> to vector<2x8x8x1x8xf32>
    %51 = vector.shape_cast %50 : vector<2x8x8x1x8xf32> to vector<2x8x8x8xf32>
    %52 = vector.extract_strided_slice %49 {offsets = [0, 0, 0, 1, 0], sizes = [2, 8, 8, 1, 8], strides = [1, 1, 1, 1, 1]} : vector<2x8x8x2x8xf32> to vector<2x8x8x1x8xf32>
    %53 = vector.shape_cast %52 : vector<2x8x8x1x8xf32> to vector<2x8x8x8xf32>
    %54 = arith.maximumf %51, %53 : vector<2x8x8x8xf32>
    %c0_68 = arith.constant 0 : index
    %c1_69 = arith.constant 1 : index
    %c1_70 = arith.constant 1 : index
    %c0_71 = arith.constant 0 : index
    %55 = vector.load %arg15[%c0_68, %c1_69, %c1_70, %c0_71] : memref<2x10x10x8xf32, #tpu.memory_space<vmem>>, vector<2x8x8x8xf32>
    tpu.vector_store %arg15[%c0_68, %c1_69, %c1_70, %c0_71], %54 {strides = array<i32>} : memref<2x10x10x8xf32, #tpu.memory_space<vmem>>, vector<2x8x8x8xf32>,
    %c0_72 = arith.constant 0 : index
    %c0_73 = arith.constant 0 : index
    %c0_74 = arith.constant 0 : index
    %c0_75 = arith.constant 0 : index
    %56 = vector.load %arg15[%c0_72, %c0_73, %c0_74, %c0_75] : memref<2x10x10x8xf32, #tpu.memory_space<vmem>>, vector<2x8x8x8xf32>
    %57 = vector.shape_cast %56 : vector<2x8x8x8xf32> to vector<128x8xf32>
    %c0_76 = arith.constant 0 : index
    %c0_77 = arith.constant 0 : index
    %58 = vector.load %arg17[%c0_76, %c0_77] : memref<128x72xf32, #tpu.memory_space<vmem>>, vector<128x8xf32>
    tpu.vector_store %arg17[%c0_76, %c0_77], %57 {strides = array<i32>} : memref<128x72xf32, #tpu.memory_space<vmem>>, vector<128x8xf32>,
    %c0_78 = arith.constant 0 : index
    %c0_79 = arith.constant 0 : index
    %c1_80 = arith.constant 1 : index
    %c0_81 = arith.constant 0 : index
    %59 = vector.load %arg15[%c0_78, %c0_79, %c1_80, %c0_81] : memref<2x10x10x8xf32, #tpu.memory_space<vmem>>, vector<2x8x8x8xf32>
    %60 = vector.shape_cast %59 : vector<2x8x8x8xf32> to vector<128x8xf32>
    %c0_82 = arith.constant 0 : index
    %c8_83 = arith.constant 8 : index
    %61 = vector.load %arg17[%c0_82, %c8_83] : memref<128x72xf32, #tpu.memory_space<vmem>>, vector<128x8xf32>
    tpu.vector_store %arg17[%c0_82, %c8_83], %60 {strides = array<i32>} : memref<128x72xf32, #tpu.memory_space<vmem>>, vector<128x8xf32>,
    %c0_84 = arith.constant 0 : index
    %c0_85 = arith.constant 0 : index
    %c2_86 = arith.constant 2 : index
    %c0_87 = arith.constant 0 : index
    %62 = vector.load %arg15[%c0_84, %c0_85, %c2_86, %c0_87] : memref<2x10x10x8xf32, #tpu.memory_space<vmem>>, vector<2x8x8x8xf32>
    %63 = vector.shape_cast %62 : vector<2x8x8x8xf32> to vector<128x8xf32>
    %c0_88 = arith.constant 0 : index
    %c16_89 = arith.constant 16 : index
    %64 = vector.load %arg17[%c0_88, %c16_89] : memref<128x72xf32, #tpu.memory_space<vmem>>, vector<128x8xf32>
    tpu.vector_store %arg17[%c0_88, %c16_89], %63 {strides = array<i32>} : memref<128x72xf32, #tpu.memory_space<vmem>>, vector<128x8xf32>,
    %c0_90 = arith.constant 0 : index
    %c1_91 = arith.constant 1 : index
    %c0_92 = arith.constant 0 : index
    %c0_93 = arith.constant 0 : index
    %65 = vector.load %arg15[%c0_90, %c1_91, %c0_92, %c0_93] : memref<2x10x10x8xf32, #tpu.memory_space<vmem>>, vector<2x8x8x8xf32>
    %66 = vector.shape_cast %65 : vector<2x8x8x8xf32> to vector<128x8xf32>
    %c0_94 = arith.constant 0 : index
    %c24_95 = arith.constant 24 : index
    %67 = vector.load %arg17[%c0_94, %c24_95] : memref<128x72xf32, #tpu.memory_space<vmem>>, vector<128x8xf32>
    tpu.vector_store %arg17[%c0_94, %c24_95], %66 {strides = array<i32>} : memref<128x72xf32, #tpu.memory_space<vmem>>, vector<128x8xf32>,
    %c0_96 = arith.constant 0 : index
    %c1_97 = arith.constant 1 : index
    %c1_98 = arith.constant 1 : index
    %c0_99 = arith.constant 0 : index
    %68 = vector.load %arg15[%c0_96, %c1_97, %c1_98, %c0_99] : memref<2x10x10x8xf32, #tpu.memory_space<vmem>>, vector<2x8x8x8xf32>
    %69 = vector.shape_cast %68 : vector<2x8x8x8xf32> to vector<128x8xf32>
    %c0_100 = arith.constant 0 : index
    %c32_101 = arith.constant 32 : index
    %70 = vector.load %arg17[%c0_100, %c32_101] : memref<128x72xf32, #tpu.memory_space<vmem>>, vector<128x8xf32>
    tpu.vector_store %arg17[%c0_100, %c32_101], %69 {strides = array<i32>} : memref<128x72xf32, #tpu.memory_space<vmem>>, vector<128x8xf32>,
    %c0_102 = arith.constant 0 : index
    %c1_103 = arith.constant 1 : index
    %c2_104 = arith.constant 2 : index
    %c0_105 = arith.constant 0 : index
    %71 = vector.load %arg15[%c0_102, %c1_103, %c2_104, %c0_105] : memref<2x10x10x8xf32, #tpu.memory_space<vmem>>, vector<2x8x8x8xf32>
    %72 = vector.shape_cast %71 : vector<2x8x8x8xf32> to vector<128x8xf32>
    %c0_106 = arith.constant 0 : index
    %c40 = arith.constant 40 : index
    %73 = vector.load %arg17[%c0_106, %c40] : memref<128x72xf32, #tpu.memory_space<vmem>>, vector<128x8xf32>
    tpu.vector_store %arg17[%c0_106, %c40], %72 {strides = array<i32>} : memref<128x72xf32, #tpu.memory_space<vmem>>, vector<128x8xf32>,
    %c0_107 = arith.constant 0 : index
    %c2_108 = arith.constant 2 : index
    %c0_109 = arith.constant 0 : index
    %c0_110 = arith.constant 0 : index
    %74 = vector.load %arg15[%c0_107, %c2_108, %c0_109, %c0_110] : memref<2x10x10x8xf32, #tpu.memory_space<vmem>>, vector<2x8x8x8xf32>
    %75 = vector.shape_cast %74 : vector<2x8x8x8xf32> to vector<128x8xf32>
    %c0_111 = arith.constant 0 : index
    %c48 = arith.constant 48 : index
    %76 = vector.load %arg17[%c0_111, %c48] : memref<128x72xf32, #tpu.memory_space<vmem>>, vector<128x8xf32>
    tpu.vector_store %arg17[%c0_111, %c48], %75 {strides = array<i32>} : memref<128x72xf32, #tpu.memory_space<vmem>>, vector<128x8xf32>,
    %c0_112 = arith.constant 0 : index
    %c2_113 = arith.constant 2 : index
    %c1_114 = arith.constant 1 : index
    %c0_115 = arith.constant 0 : index
    %77 = vector.load %arg15[%c0_112, %c2_113, %c1_114, %c0_115] : memref<2x10x10x8xf32, #tpu.memory_space<vmem>>, vector<2x8x8x8xf32>
    %78 = vector.shape_cast %77 : vector<2x8x8x8xf32> to vector<128x8xf32>
    %c0_116 = arith.constant 0 : index
    %c56 = arith.constant 56 : index
    %79 = vector.load %arg17[%c0_116, %c56] : memref<128x72xf32, #tpu.memory_space<vmem>>, vector<128x8xf32>
    tpu.vector_store %arg17[%c0_116, %c56], %78 {strides = array<i32>} : memref<128x72xf32, #tpu.memory_space<vmem>>, vector<128x8xf32>,
    %c0_117 = arith.constant 0 : index
    %c2_118 = arith.constant 2 : index
    %c2_119 = arith.constant 2 : index
    %c0_120 = arith.constant 0 : index
    %80 = vector.load %arg15[%c0_117, %c2_118, %c2_119, %c0_120] : memref<2x10x10x8xf32, #tpu.memory_space<vmem>>, vector<2x8x8x8xf32>
    %81 = vector.shape_cast %80 : vector<2x8x8x8xf32> to vector<128x8xf32>
    %c0_121 = arith.constant 0 : index
    %c64 = arith.constant 64 : index
    %82 = vector.load %arg17[%c0_121, %c64] : memref<128x72xf32, #tpu.memory_space<vmem>>, vector<128x8xf32>
    tpu.vector_store %arg17[%c0_121, %c64], %81 {strides = array<i32>} : memref<128x72xf32, #tpu.memory_space<vmem>>, vector<128x8xf32>,
    %c0_122 = arith.constant 0 : index
    %c0_123 = arith.constant 0 : index
    %83 = vector.load %arg17[%c0_122, %c0_123] : memref<128x72xf32, #tpu.memory_space<vmem>>, vector<128x72xf32>
    %84 = arith.truncf %83 : vector<128x72xf32> to vector<128x72xbf16>
    %c0_124 = arith.constant 0 : index
    %c0_125 = arith.constant 0 : index
    %85 = vector.load %arg4[%c0_124, %c0_125] : memref<72x16xbf16, #tpu.memory_space<vmem>>, vector<72x16xbf16>
    %cst_126 = arith.constant dense<0.000000e+00> : vector<128x16xf32>
    %86 = tpu.matmul %84, %85, %cst_126 {dimension_numbers = #tpu.dot_dimension_numbers<[1], [0], [0], [1], [0, 0, 1, 1], [], []>} : vector<128x72xbf16>, vector<72x16xbf16>, vector<128x16xf32> -> vector<128x16xf32>
    %c0_127 = arith.constant 0 : index
    %c0_128 = arith.constant 0 : index
    %87 = vector.load %arg5[%c0_127, %c0_128] : memref<1x16xf32, #tpu.memory_space<vmem>>, vector<1x16xf32>
    %88 = vector.broadcast %87 : vector<1x16xf32> to vector<128x16xf32>
    %89 = arith.addf %86, %88 : vector<128x16xf32>
    %cst_129 = arith.constant 0.000000e+00 : f32
    %90 = vector.broadcast %cst_129 : f32 to vector<128x16xf32>
    %91 = arith.maximumf %89, %90 : vector<128x16xf32>
    %92 = vector.shape_cast %91 : vector<128x16xf32> to vector<2x8x8x16xf32>
    %93 = vector.shape_cast %92 : vector<2x8x8x16xf32> to vector<2x4x2x8x16xf32>
    %94 = vector.extract_strided_slice %93 {offsets = [0, 0, 0, 0, 0], sizes = [2, 4, 1, 8, 16], strides = [1, 1, 1, 1, 1]} : vector<2x4x2x8x16xf32> to vector<2x4x1x8x16xf32>
    %95 = vector.shape_cast %94 : vector<2x4x1x8x16xf32> to vector<2x4x8x16xf32>
    %96 = vector.extract_strided_slice %93 {offsets = [0, 0, 1, 0, 0], sizes = [2, 4, 1, 8, 16], strides = [1, 1, 1, 1, 1]} : vector<2x4x2x8x16xf32> to vector<2x4x1x8x16xf32>
    %97 = vector.shape_cast %96 : vector<2x4x1x8x16xf32> to vector<2x4x8x16xf32>
    %98 = arith.maximumf %95, %97 : vector<2x4x8x16xf32>
    %99 = vector.shape_cast %98 : vector<2x4x8x16xf32> to vector<2x4x4x2x16xf32>
    %100 = vector.extract_strided_slice %99 {offsets = [0, 0, 0, 0, 0], sizes = [2, 4, 4, 1, 16], strides = [1, 1, 1, 1, 1]} : vector<2x4x4x2x16xf32> to vector<2x4x4x1x16xf32>
    %101 = vector.shape_cast %100 : vector<2x4x4x1x16xf32> to vector<2x4x4x16xf32>
    %102 = vector.extract_strided_slice %99 {offsets = [0, 0, 0, 1, 0], sizes = [2, 4, 4, 1, 16], strides = [1, 1, 1, 1, 1]} : vector<2x4x4x2x16xf32> to vector<2x4x4x1x16xf32>
    %103 = vector.shape_cast %102 : vector<2x4x4x1x16xf32> to vector<2x4x4x16xf32>
    %104 = arith.maximumf %101, %103 : vector<2x4x4x16xf32>
    %105 = vector.extract_strided_slice %104 {offsets = [0, 0, 0, 0], sizes = [2, 1, 1, 16], strides = [1, 1, 1, 1]} : vector<2x4x4x16xf32> to vector<2x1x1x16xf32>
    %106 = vector.shape_cast %105 : vector<2x1x1x16xf32> to vector<2x16xf32>
    %c0_130 = arith.constant 0 : index
    %c0_131 = arith.constant 0 : index
    %107 = vector.load %arg18[%c0_130, %c0_131] : memref<2x256xf32, #tpu.memory_space<vmem>>, vector<2x16xf32>
    tpu.vector_store %arg18[%c0_130, %c0_131], %106 {strides = array<i32>} : memref<2x256xf32, #tpu.memory_space<vmem>>, vector<2x16xf32>,
    %108 = vector.extract_strided_slice %104 {offsets = [0, 0, 1, 0], sizes = [2, 1, 1, 16], strides = [1, 1, 1, 1]} : vector<2x4x4x16xf32> to vector<2x1x1x16xf32>
    %109 = vector.shape_cast %108 : vector<2x1x1x16xf32> to vector<2x16xf32>
    %c0_132 = arith.constant 0 : index
    %c16_133 = arith.constant 16 : index
    %110 = vector.load %arg18[%c0_132, %c16_133] : memref<2x256xf32, #tpu.memory_space<vmem>>, vector<2x16xf32>
    tpu.vector_store %arg18[%c0_132, %c16_133], %109 {strides = array<i32>} : memref<2x256xf32, #tpu.memory_space<vmem>>, vector<2x16xf32>,
    %111 = vector.extract_strided_slice %104 {offsets = [0, 0, 2, 0], sizes = [2, 1, 1, 16], strides = [1, 1, 1, 1]} : vector<2x4x4x16xf32> to vector<2x1x1x16xf32>
    %112 = vector.shape_cast %111 : vector<2x1x1x16xf32> to vector<2x16xf32>
    %c0_134 = arith.constant 0 : index
    %c32_135 = arith.constant 32 : index
    %113 = vector.load %arg18[%c0_134, %c32_135] : memref<2x256xf32, #tpu.memory_space<vmem>>, vector<2x16xf32>
    tpu.vector_store %arg18[%c0_134, %c32_135], %112 {strides = array<i32>} : memref<2x256xf32, #tpu.memory_space<vmem>>, vector<2x16xf32>,
    %114 = vector.extract_strided_slice %104 {offsets = [0, 0, 3, 0], sizes = [2, 1, 1, 16], strides = [1, 1, 1, 1]} : vector<2x4x4x16xf32> to vector<2x1x1x16xf32>
    %115 = vector.shape_cast %114 : vector<2x1x1x16xf32> to vector<2x16xf32>
    %c0_136 = arith.constant 0 : index
    %c48_137 = arith.constant 48 : index
    %116 = vector.load %arg18[%c0_136, %c48_137] : memref<2x256xf32, #tpu.memory_space<vmem>>, vector<2x16xf32>
    tpu.vector_store %arg18[%c0_136, %c48_137], %115 {strides = array<i32>} : memref<2x256xf32, #tpu.memory_space<vmem>>, vector<2x16xf32>,
    %117 = vector.extract_strided_slice %104 {offsets = [0, 1, 0, 0], sizes = [2, 1, 1, 16], strides = [1, 1, 1, 1]} : vector<2x4x4x16xf32> to vector<2x1x1x16xf32>
    %118 = vector.shape_cast %117 : vector<2x1x1x16xf32> to vector<2x16xf32>
    %c0_138 = arith.constant 0 : index
    %c64_139 = arith.constant 64 : index
    %119 = vector.load %arg18[%c0_138, %c64_139] : memref<2x256xf32, #tpu.memory_space<vmem>>, vector<2x16xf32>
    tpu.vector_store %arg18[%c0_138, %c64_139], %118 {strides = array<i32>} : memref<2x256xf32, #tpu.memory_space<vmem>>, vector<2x16xf32>,
    %120 = vector.extract_strided_slice %104 {offsets = [0, 1, 1, 0], sizes = [2, 1, 1, 16], strides = [1, 1, 1, 1]} : vector<2x4x4x16xf32> to vector<2x1x1x16xf32>
    %121 = vector.shape_cast %120 : vector<2x1x1x16xf32> to vector<2x16xf32>
    %c0_140 = arith.constant 0 : index
    %c80 = arith.constant 80 : index
    %122 = vector.load %arg18[%c0_140, %c80] : memref<2x256xf32, #tpu.memory_space<vmem>>, vector<2x16xf32>
    tpu.vector_store %arg18[%c0_140, %c80], %121 {strides = array<i32>} : memref<2x256xf32, #tpu.memory_space<vmem>>, vector<2x16xf32>,
    %123 = vector.extract_strided_slice %104 {offsets = [0, 1, 2, 0], sizes = [2, 1, 1, 16], strides = [1, 1, 1, 1]} : vector<2x4x4x16xf32> to vector<2x1x1x16xf32>
    %124 = vector.shape_cast %123 : vector<2x1x1x16xf32> to vector<2x16xf32>
    %c0_141 = arith.constant 0 : index
    %c96 = arith.constant 96 : index
    %125 = vector.load %arg18[%c0_141, %c96] : memref<2x256xf32, #tpu.memory_space<vmem>>, vector<2x16xf32>
    tpu.vector_store %arg18[%c0_141, %c96], %124 {strides = array<i32>} : memref<2x256xf32, #tpu.memory_space<vmem>>, vector<2x16xf32>,
    %126 = vector.extract_strided_slice %104 {offsets = [0, 1, 3, 0], sizes = [2, 1, 1, 16], strides = [1, 1, 1, 1]} : vector<2x4x4x16xf32> to vector<2x1x1x16xf32>
    %127 = vector.shape_cast %126 : vector<2x1x1x16xf32> to vector<2x16xf32>
    %c0_142 = arith.constant 0 : index
    %c112 = arith.constant 112 : index
    %128 = vector.load %arg18[%c0_142, %c112] : memref<2x256xf32, #tpu.memory_space<vmem>>, vector<2x16xf32>
    tpu.vector_store %arg18[%c0_142, %c112], %127 {strides = array<i32>} : memref<2x256xf32, #tpu.memory_space<vmem>>, vector<2x16xf32>,
    %129 = vector.extract_strided_slice %104 {offsets = [0, 2, 0, 0], sizes = [2, 1, 1, 16], strides = [1, 1, 1, 1]} : vector<2x4x4x16xf32> to vector<2x1x1x16xf32>
    %130 = vector.shape_cast %129 : vector<2x1x1x16xf32> to vector<2x16xf32>
    %c0_143 = arith.constant 0 : index
    %c128 = arith.constant 128 : index
    %131 = vector.load %arg18[%c0_143, %c128] : memref<2x256xf32, #tpu.memory_space<vmem>>, vector<2x16xf32>
    tpu.vector_store %arg18[%c0_143, %c128], %130 {strides = array<i32>} : memref<2x256xf32, #tpu.memory_space<vmem>>, vector<2x16xf32>,
    %132 = vector.extract_strided_slice %104 {offsets = [0, 2, 1, 0], sizes = [2, 1, 1, 16], strides = [1, 1, 1, 1]} : vector<2x4x4x16xf32> to vector<2x1x1x16xf32>
    %133 = vector.shape_cast %132 : vector<2x1x1x16xf32> to vector<2x16xf32>
    %c0_144 = arith.constant 0 : index
    %c144 = arith.constant 144 : index
    %134 = vector.load %arg18[%c0_144, %c144] : memref<2x256xf32, #tpu.memory_space<vmem>>, vector<2x16xf32>
    tpu.vector_store %arg18[%c0_144, %c144], %133 {strides = array<i32>} : memref<2x256xf32, #tpu.memory_space<vmem>>, vector<2x16xf32>,
    %135 = vector.extract_strided_slice %104 {offsets = [0, 2, 2, 0], sizes = [2, 1, 1, 16], strides = [1, 1, 1, 1]} : vector<2x4x4x16xf32> to vector<2x1x1x16xf32>
    %136 = vector.shape_cast %135 : vector<2x1x1x16xf32> to vector<2x16xf32>
    %c0_145 = arith.constant 0 : index
    %c160 = arith.constant 160 : index
    %137 = vector.load %arg18[%c0_145, %c160] : memref<2x256xf32, #tpu.memory_space<vmem>>, vector<2x16xf32>
    tpu.vector_store %arg18[%c0_145, %c160], %136 {strides = array<i32>} : memref<2x256xf32, #tpu.memory_space<vmem>>, vector<2x16xf32>,
    %138 = vector.extract_strided_slice %104 {offsets = [0, 2, 3, 0], sizes = [2, 1, 1, 16], strides = [1, 1, 1, 1]} : vector<2x4x4x16xf32> to vector<2x1x1x16xf32>
    %139 = vector.shape_cast %138 : vector<2x1x1x16xf32> to vector<2x16xf32>
    %c0_146 = arith.constant 0 : index
    %c176 = arith.constant 176 : index
    %140 = vector.load %arg18[%c0_146, %c176] : memref<2x256xf32, #tpu.memory_space<vmem>>, vector<2x16xf32>
    tpu.vector_store %arg18[%c0_146, %c176], %139 {strides = array<i32>} : memref<2x256xf32, #tpu.memory_space<vmem>>, vector<2x16xf32>,
    %141 = vector.extract_strided_slice %104 {offsets = [0, 3, 0, 0], sizes = [2, 1, 1, 16], strides = [1, 1, 1, 1]} : vector<2x4x4x16xf32> to vector<2x1x1x16xf32>
    %142 = vector.shape_cast %141 : vector<2x1x1x16xf32> to vector<2x16xf32>
    %c0_147 = arith.constant 0 : index
    %c192 = arith.constant 192 : index
    %143 = vector.load %arg18[%c0_147, %c192] : memref<2x256xf32, #tpu.memory_space<vmem>>, vector<2x16xf32>
    tpu.vector_store %arg18[%c0_147, %c192], %142 {strides = array<i32>} : memref<2x256xf32, #tpu.memory_space<vmem>>, vector<2x16xf32>,
    %144 = vector.extract_strided_slice %104 {offsets = [0, 3, 1, 0], sizes = [2, 1, 1, 16], strides = [1, 1, 1, 1]} : vector<2x4x4x16xf32> to vector<2x1x1x16xf32>
    %145 = vector.shape_cast %144 : vector<2x1x1x16xf32> to vector<2x16xf32>
    %c0_148 = arith.constant 0 : index
    %c208 = arith.constant 208 : index
    %146 = vector.load %arg18[%c0_148, %c208] : memref<2x256xf32, #tpu.memory_space<vmem>>, vector<2x16xf32>
    tpu.vector_store %arg18[%c0_148, %c208], %145 {strides = array<i32>} : memref<2x256xf32, #tpu.memory_space<vmem>>, vector<2x16xf32>,
    %147 = vector.extract_strided_slice %104 {offsets = [0, 3, 2, 0], sizes = [2, 1, 1, 16], strides = [1, 1, 1, 1]} : vector<2x4x4x16xf32> to vector<2x1x1x16xf32>
    %148 = vector.shape_cast %147 : vector<2x1x1x16xf32> to vector<2x16xf32>
    %c0_149 = arith.constant 0 : index
    %c224 = arith.constant 224 : index
    %149 = vector.load %arg18[%c0_149, %c224] : memref<2x256xf32, #tpu.memory_space<vmem>>, vector<2x16xf32>
    tpu.vector_store %arg18[%c0_149, %c224], %148 {strides = array<i32>} : memref<2x256xf32, #tpu.memory_space<vmem>>, vector<2x16xf32>,
    %150 = vector.extract_strided_slice %104 {offsets = [0, 3, 3, 0], sizes = [2, 1, 1, 16], strides = [1, 1, 1, 1]} : vector<2x4x4x16xf32> to vector<2x1x1x16xf32>
    %151 = vector.shape_cast %150 : vector<2x1x1x16xf32> to vector<2x16xf32>
    %c0_150 = arith.constant 0 : index
    %c240 = arith.constant 240 : index
    %152 = vector.load %arg18[%c0_150, %c240] : memref<2x256xf32, #tpu.memory_space<vmem>>, vector<2x16xf32>
    tpu.vector_store %arg18[%c0_150, %c240], %151 {strides = array<i32>} : memref<2x256xf32, #tpu.memory_space<vmem>>, vector<2x16xf32>,
    %c0_151 = arith.constant 0 : index
    %c0_152 = arith.constant 0 : index
    %153 = vector.load %arg18[%c0_151, %c0_152] : memref<2x256xf32, #tpu.memory_space<vmem>>, vector<2x256xf32>
    %154 = arith.truncf %153 : vector<2x256xf32> to vector<2x256xbf16>
    %c0_153 = arith.constant 0 : index
    %c0_154 = arith.constant 0 : index
    %155 = vector.load %arg6[%c0_153, %c0_154] : memref<256x256xbf16, #tpu.memory_space<vmem>>, vector<256x256xbf16>
    %cst_155 = arith.constant dense<0.000000e+00> : vector<2x256xf32>
    %156 = tpu.matmul %154, %155, %cst_155 {dimension_numbers = #tpu.dot_dimension_numbers<[1], [0], [0], [1], [0, 0, 1, 1], [], []>} : vector<2x256xbf16>, vector<256x256xbf16>, vector<2x256xf32> -> vector<2x256xf32>
    %c0_156 = arith.constant 0 : index
    %c0_157 = arith.constant 0 : index
    %157 = vector.load %arg7[%c0_156, %c0_157] : memref<1x256xf32, #tpu.memory_space<vmem>>, vector<1x256xf32>
    %158 = vector.broadcast %157 : vector<1x256xf32> to vector<2x256xf32>
    %159 = arith.addf %156, %158 : vector<2x256xf32>
    %160 = arith.truncf %159 : vector<2x256xf32> to vector<2x256xbf16>
    %c0_158 = arith.constant 0 : index
    %c0_159 = arith.constant 0 : index
    %161 = vector.load %arg8[%c0_158, %c0_159] : memref<256x256xbf16, #tpu.memory_space<vmem>>, vector<256x256xbf16>
    %cst_160 = arith.constant dense<0.000000e+00> : vector<2x256xf32>
    %162 = tpu.matmul %160, %161, %cst_160 {dimension_numbers = #tpu.dot_dimension_numbers<[1], [0], [0], [1], [0, 0, 1, 1], [], []>} : vector<2x256xbf16>, vector<256x256xbf16>, vector<2x256xf32> -> vector<2x256xf32>
    %c0_161 = arith.constant 0 : index
    %c0_162 = arith.constant 0 : index
    %163 = vector.load %arg9[%c0_161, %c0_162] : memref<1x256xf32, #tpu.memory_space<vmem>>, vector<1x256xf32>
    %164 = vector.broadcast %163 : vector<1x256xf32> to vector<2x256xf32>
    %165 = arith.addf %162, %164 : vector<2x256xf32>
    %cst_163 = arith.constant 0.000000e+00 : f32
    %166 = vector.broadcast %cst_163 : f32 to vector<2x256xf32>
    %167 = arith.maximumf %165, %166 : vector<2x256xf32>
    %168 = arith.truncf %167 : vector<2x256xf32> to vector<2x256xbf16>
    %c0_164 = arith.constant 0 : index
    %c0_165 = arith.constant 0 : index
    %169 = vector.load %arg10[%c0_164, %c0_165] : memref<256x288xbf16, #tpu.memory_space<vmem>>, vector<256x288xbf16>
    %cst_166 = arith.constant dense<0.000000e+00> : vector<2x288xf32>
    %170 = tpu.matmul %168, %169, %cst_166 {dimension_numbers = #tpu.dot_dimension_numbers<[1], [0], [0], [1], [0, 0, 1, 1], [], []>} : vector<2x256xbf16>, vector<256x288xbf16>, vector<2x288xf32> -> vector<2x288xf32>
    %c0_167 = arith.constant 0 : index
    %c0_168 = arith.constant 0 : index
    %171 = vector.load %arg11[%c0_167, %c0_168] : memref<1x288xf32, #tpu.memory_space<vmem>>, vector<1x288xf32>
    %172 = vector.broadcast %171 : vector<1x288xf32> to vector<2x288xf32>
    %173 = arith.addf %170, %172 : vector<2x288xf32>
    %174 = vector.extract_strided_slice %173 {offsets = [0, 0], sizes = [2, 256], strides = [1, 1]} : vector<2x288xf32> to vector<2x256xf32>
    %cst_169 = arith.constant dense<0xFF800000> : vector<2xf32>
    %175 = vector.multi_reduction <maximumf>, %174, %cst_169 [1] : vector<2x256xf32> to vector<2xf32>
    %176 = vector.shape_cast %175 : vector<2xf32> to vector<2x1xf32>
    %177 = vector.broadcast %176 : vector<2x1xf32> to vector<2x256xf32>
    %178 = arith.subf %174, %177 : vector<2x256xf32>
    %179 = math.exp %178 : vector<2x256xf32>
    %cst_170 = arith.constant dense<0.000000e+00> : vector<2xf32>
    %180 = vector.multi_reduction <add>, %179, %cst_170 [1] : vector<2x256xf32> to vector<2xf32>
    %181 = vector.shape_cast %180 : vector<2xf32> to vector<2x1xf32>
    %182 = vector.broadcast %181 : vector<2x1xf32> to vector<2x256xf32>
    %183 = arith.divf %179, %182 : vector<2x256xf32>
    %c0_171 = arith.constant 0 : index
    %c0_172 = arith.constant 0 : index
    %184 = vector.load %arg13[%c0_171, %c0_172] : memref<2x256xf32, #tpu.memory_space<vmem>>, vector<2x256xf32>
    tpu.vector_store %arg13[%c0_171, %c0_172], %183 {strides = array<i32>} : memref<2x256xf32, #tpu.memory_space<vmem>>, vector<2x256xf32>,
    %185 = vector.extract_strided_slice %173 {offsets = [0, 256], sizes = [2, 32], strides = [1, 1]} : vector<2x288xf32> to vector<2x32xf32>
    %186 = math.tanh %185 : vector<2x32xf32>
    %c0_173 = arith.constant 0 : index
    %c0_174 = arith.constant 0 : index
    %187 = vector.load %arg12[%c0_173, %c0_174] : memref<2x32xf32, #tpu.memory_space<vmem>>, vector<2x32xf32>
    tpu.vector_store %arg12[%c0_173, %c0_174], %186 {strides = array<i32>} : memref<2x32xf32, #tpu.memory_space<vmem>>, vector<2x32xf32>,
    return
  }
  func.func @transform_0(%arg0: i32) -> (i32, i32, i32, i32) {
    %c0_i32 = arith.constant 0 : i32
    %c0_i32_0 = arith.constant 0 : i32
    %c0_i32_1 = arith.constant 0 : i32
    %c0_i32_2 = arith.constant 0 : i32
    %c0_i32_3 = arith.constant 0 : i32
    return %c0_i32, %c0_i32_0, %c0_i32_1, %c0_i32_2 : i32, i32, i32, i32
  }
  func.func @transform_1(%arg0: i32) -> (i32, i32) {
    %c0_i32 = arith.constant 0 : i32
    %c0_i32_0 = arith.constant 0 : i32
    %c0_i32_1 = arith.constant 0 : i32
    return %c0_i32, %c0_i32_0 : i32, i32
  }
  func.func @transform_2(%arg0: i32) -> (i32, i32) {
    %c0_i32 = arith.constant 0 : i32
    %c0_i32_0 = arith.constant 0 : i32
    %c0_i32_1 = arith.constant 0 : i32
    return %c0_i32, %c0_i32_0 : i32, i32
  }
  func.func @transform_3(%arg0: i32) -> (i32, i32) {
    %c0_i32 = arith.constant 0 : i32
    %c0_i32_0 = arith.constant 0 : i32
    %c0_i32_1 = arith.constant 0 : i32
    return %c0_i32, %c0_i32_0 : i32, i32
  }
  func.func @transform_4(%arg0: i32) -> (i32, i32) {
    %c0_i32 = arith.constant 0 : i32
    %c0_i32_0 = arith.constant 0 : i32
    %c0_i32_1 = arith.constant 0 : i32
    return %c0_i32, %c0_i32_0 : i32, i32
  }
  func.func @transform_5(%arg0: i32) -> (i32, i32) {
    %c0_i32 = arith.constant 0 : i32
    %c0_i32_0 = arith.constant 0 : i32
    %c0_i32_1 = arith.constant 0 : i32
    return %c0_i32, %c0_i32_0 : i32, i32
  }
  func.func @transform_6(%arg0: i32) -> (i32, i32) {
    %c0_i32 = arith.constant 0 : i32
    %c0_i32_0 = arith.constant 0 : i32
    %c0_i32_1 = arith.constant 0 : i32
    return %c0_i32, %c0_i32_0 : i32, i32
  }
  func.func @transform_7(%arg0: i32) -> (i32, i32) {
    %c0_i32 = arith.constant 0 : i32
    %c0_i32_0 = arith.constant 0 : i32
    %c0_i32_1 = arith.constant 0 : i32
    return %c0_i32, %c0_i32_0 : i32, i32
  }
  func.func @transform_8(%arg0: i32) -> (i32, i32) {
    %c0_i32 = arith.constant 0 : i32
    %c0_i32_0 = arith.constant 0 : i32
    %c0_i32_1 = arith.constant 0 : i32
    return %c0_i32, %c0_i32_0 : i32, i32
  }
  func.func @transform_9(%arg0: i32) -> (i32, i32) {
    %c0_i32 = arith.constant 0 : i32
    %c0_i32_0 = arith.constant 0 : i32
    %c0_i32_1 = arith.constant 0 : i32
    return %c0_i32, %c0_i32_0 : i32, i32
  }
  func.func @transform_10(%arg0: i32) -> (i32, i32) {
    %c0_i32 = arith.constant 0 : i32
    %c0_i32_0 = arith.constant 0 : i32
    %c0_i32_1 = arith.constant 0 : i32
    return %c0_i32, %c0_i32_0 : i32, i32
  }
  func.func @transform_11(%arg0: i32) -> (i32, i32) {
    %c0_i32 = arith.constant 0 : i32
    %c0_i32_0 = arith.constant 0 : i32
    %c0_i32_1 = arith.constant 0 : i32
    return %c0_i32, %c0_i32_0 : i32, i32
  }
  func.func @transform_12(%arg0: i32) -> (i32, i32) {
    %c0_i32 = arith.constant 0 : i32
    %c0_i32_0 = arith.constant 0 : i32
    %c0_i32_1 = arith.constant 0 : i32
    return %c0_i32, %c0_i32_0 : i32, i32
  }
}

</mosaic_0001>

<bundles_post_ra>
// kernel: imgnet_forward.1
= control target key start
LH: loop header
LB: loop body
LE: loop exit
PB: predicated region body
PF: predicated region fallthrough
CT: control target
= control target key end

     0   :  { %18 = vsyncpa [#allocation8], 0  ;;  %vm43_vm0 = vcmask 31744   ;;  %v12290_v0 = vmov 0.0   ;;  %s12277_s0 = inlined_call_operand.vmem [shape: f32[2,16,16,4], index: 0, kind: input, shape index: {}]   ;;  %s12278_s1 = inlined_call_operand.vmem [shape: bf16[36,8], index: 1, kind: input, shape index: {}]   ;;  %s12279_s2 = inlined_call_operand.vmem [shape: f32[1,8], index: 2, kind: input, shape index: {}]   ;;  %s12280_s3 = inlined_call_operand.vmem [shape: bf16[72,16], index: 3, kind: input, shape index: {}]   ;;  %s12281_s4 = inlined_call_operand.vmem [shape: f32[1,16], index: 4, kind: input, shape index: {}]   ;;  %s12282_s5 = inlined_call_operand.vmem [shape: bf16[256,256], index: 5, kind: input, shape index: {}]   ;;  %s12283_s6 = inlined_call_operand.vmem [shape: f32[1,256], index: 6, kind: input, shape index: {}]   ;;  %s12284_s7 = inlined_call_operand.vmem [shape: bf16[256,256], index: 7, kind: input, shape index: {}]   ;;  %s12285_s8 = inlined_call_operand.vmem [shape: f32[1,256], index: 8, kind: input, shape index: {}]   ;;  %s12286_s9 = inlined_call_operand.vmem [shape: bf16[256,288], index: 9, kind: input, shape index: {}]   ;;  %s12287_s10 = inlined_call_operand.vmem [shape: f32[1,288], index: 10, kind: input, shape index: {}]   ;;  %s12288_s11 = inlined_call_operand.hbm [shape: f32[2,32], index: 11, kind: output, shape index: {0}]   ;;  %s12289_s12 = inlined_call_operand.hbm [shape: f32[2,256], index: 12, kind: output, shape index: {1}]  }
   0x1   :  { %44 = vst.msk [vmem:[#allocation2] sm:$0xff] %vm43_vm0, %v12290_v0 }
   0x2   :  { %19 = vsyncpa [#allocation10], 0  ;;  %45 = vst.msk [vmem:[#allocation2 + $0x8] sm:$0xff] %vm43_vm0, %v12290_v0  ;;  %s8410_s21 = smov 4   ;;  %v197_v2 = vld [vmem:[%s12277_s0 + $0x10] sm:$0xff]  ;;  %v195_v3 = vld [vmem:[%s12277_s0] sm:$0xff] }
   0x3   :  { %48 = vst.msk [vmem:[#allocation2 + $0x18] sm:$0xff] %vm43_vm0, %v12290_v0  ;;  %vm46_vm1 = vcmask 25600   ;;  %v198_v7 = vld [vmem:[%s12277_s0 + $0x18] sm:$0xff]  ;;  %v196_v8 = vld [vmem:[%s12277_s0 + $0x8] sm:$0xff]  ;;  %v199_v9 = vld [vmem:[%s12277_s0 + $0x20] sm:$0xff]  ;;  %vm772_vm2 = vcmask 64544  }
   0x4   :  { %49 = vst.msk [vmem:[#allocation2 + $0x20] sm:$0xff] %vm43_vm0, %v12290_v0  ;;  %v201_v10 = vld [vmem:[%s12277_s0 + $0x30] sm:$0xff]  ;;  %v200_v11 = vld [vmem:[%s12277_s0 + $0x28] sm:$0xff]  ;;  %v202_v12 = vld [vmem:[%s12277_s0 + $0x38] sm:$0xff]  ;;  %vm1157_vm3 = vcmask 97344   ;;  %s8412_s23 = smov 12  }
   0x5   :  { %51 = vst.msk [vmem:[#allocation2 + $0x30] sm:$0xff] %vm43_vm0, %v12290_v0  ;;  %v204_v13 = vld [vmem:[%s12277_s0 + $0x48] sm:$0xff]  ;;  %v203_v14 = vld [vmem:[%s12277_s0 + $0x40] sm:$0xff]  ;;  %v205_v15 = vld [vmem:[%s12277_s0 + $0x50] sm:$0xff]  ;;  %vm1542_vm4 = vcmask 130144   ;;  %s8414_s14 = smov 20  }
   0x6   :  { %52 = vst.msk [vmem:[#allocation2 + $0x38] sm:$0xff] %vm43_vm0, %v12290_v0  ;;  %v207_v16 = vld [vmem:[%s12277_s0 + $0x60] sm:$0xff]  ;;  %v206_v18 = vld [vmem:[%s12277_s0 + $0x58] sm:$0xff]  ;;  %v208_v20 = vld [vmem:[%s12277_s0 + $0x68] sm:$0xff]  ;;  %s8415_s15 = smov 24   ;;  %vm1927_vm5 = vcmask 162944  }
   0x7   :  { %54 = vst.msk [vmem:[#allocation2 + $0x48] sm:$0xff] %vm43_vm0, %v12290_v0  ;;  %v210_v22 = vld [vmem:[%s12277_s0 + $0x78] sm:$0xff]  ;;  %v209_v23 = vld [vmem:[%s12277_s0 + $0x70] sm:$0xff]  ;;  %v211_v24 = vld [vmem:[%s12277_s0 + $0x80] sm:$0xff]  ;;  %s8416_s16 = smov 28   ;;  %s8417_s17 = smov 32  }
   0x8   :  { %55 = vst.msk [vmem:[#allocation2 + $0x50] sm:$0xff] %vm43_vm0, %v12290_v0  ;;  %v213_v25 = vld [vmem:[%s12277_s0 + $0x90] sm:$0xff]  ;;  %v212_v27 = vld [vmem:[%s12277_s0 + $0x88] sm:$0xff]  ;;  %v214_v30 = vld [vmem:[%s12277_s0 + $0x98] sm:$0xff]  ;;  %vm2312_vm6 = vcmask 195744   ;;  %vm12292_vm7 = vcmask 1041408  }
   0x9   :  { %v452_v1 = vld [vmem:[#allocation2 + $0x1] sm:$0xff]  ;;  %57 = vst.msk [vmem:[#allocation2 + $0x60] sm:$0xff] %vm43_vm0, %v12290_v0  ;;  %v215_v32 = vld [vmem:[%s12277_s0 + $0xa0] sm:$0xff]  ;;  %v218_v38 = vld [vmem:[%s12277_s0 + $0xb8] sm:$0xff]  ;;  %vm2698_vm8 = vcmask 228544   ;;  %vm3083_vm9 = vcmask 261344  }
   0xa   :  { %580 = vrot.lane.b32.xlu0 %v452_v1, %s8410_s21  ;;  %58 = vst.msk [vmem:[#allocation2 + $0x68] sm:$0xff] %vm43_vm0, %v12290_v0  ;;  %v216_v31 = vld [vmem:[%s12277_s0 + $0xa8] sm:$0xff]  ;;  %v217_v36 = vld [vmem:[%s12277_s0 + $0xb0] sm:$0xff]  ;;  %v219_v37 = vld [vmem:[%s12277_s0 + $0xc0] sm:$0xff]  ;;  %vm3468_vm10 = vcmask 294144   ;;  %vm3653_vm11 = vcmask 293888  }
   0xb   :  { %60 = vst.msk [vmem:[#allocation2 + $0x78] sm:$0xff] %vm43_vm0, %v12290_v0  ;;  %v220_v42 = vld [vmem:[%s12277_s0 + $0xc8] sm:$0xff]  ;;  %v222_v43 = vld [vmem:[%s12277_s0 + $0xd8] sm:$0xff]  ;;  %v221_v44 = vld [vmem:[%s12277_s0 + $0xd0] sm:$0xff]  ;;  %vm153_vm12 = vcmask 64512   ;;  %vm155_vm13 = vcmask 58368  }
   0xc   :  { %61 = vst.msk [vmem:[#allocation2 + $0x80] sm:$0xff] %vm43_vm0, %v12290_v0  ;;  %v223_v48 = vld [vmem:[%s12277_s0 + $0xe0] sm:$0xff]  ;;  %v224_v49 = vld [vmem:[%s12277_s0 + $0xe8] sm:$0xff]  ;;  %v229_v58 = vld [vmem:[%s12277_s0 + $0x110] sm:$0xff]  ;;  %vm5011_vm14 = vcmask 1041409   ;;  %vm5013_vm15 = vcmask 1042434  }
   0xd   :  { %63 = vst.msk [vmem:[#allocation2 + $0x90] sm:$0xff] %vm43_vm0, %v12290_v0  ;;  %v228_v53 = vld [vmem:[%s12277_s0 + $0x108] sm:$0xff]  ;;  %v227_v54 = vld [vmem:[%s12277_s0 + $0x100] sm:$0xff]  ;;  %v230_v60 = vld [vmem:[%s12277_s0 + $0x118] sm:$0xff]  ;;  %s8418_s30 = smov 40   ;;  %s8419_s13 = smov 48  }
   0xe   :  { %64 = vst.msk [vmem:[#allocation2 + $0x98] sm:$0xff] %vm43_vm0, %v12290_v0  ;;  %v231_v59 = vld [vmem:[%s12277_s0 + $0x120] sm:$0xff]  ;;  %s8425_s24 = smov [#allocation7]  }
   0xf   :  { %66 = vst.msk [vmem:[#allocation2 + $0xa8] sm:$0xff] %vm43_vm0, %v12290_v0 }
  0x10   :  { %67 = vst.msk [vmem:[#allocation2 + $0xb0] sm:$0xff] %vm43_vm0, %v12290_v0 }
  0x11   :  { %69 = vst.msk [vmem:[#allocation2 + $0xc0] sm:$0xff] %vm43_vm0, %v12290_v0 }
  0x12   :  { %70 = vst.msk [vmem:[#allocation2 + $0xc8] sm:$0xff] %vm43_vm0, %v12290_v0 }
  0x13   :  { %72 = vst.msk [vmem:[#allocation2 + $0xd8] sm:$0xff] %vm43_vm0, %v12290_v0 }
  0x14   :  { %73 = vst.msk [vmem:[#allocation2 + $0xe0] sm:$0xff] %vm43_vm0, %v12290_v0 }
  0x15   :  { %75 = vst.msk [vmem:[#allocation2 + $0xf0] sm:$0xff] %vm43_vm0, %v12290_v0 }
  0x16   :  { %76 = vst.msk [vmem:[#allocation2 + $0xf8] sm:$0xff] %vm43_vm0, %v12290_v0 }
  0x17   :  { %78 = vst.msk [vmem:[#allocation2 + $0x108] sm:$0xff] %vm43_vm0, %v12290_v0 }
  0x18   :  { %79 = vst.msk [vmem:[#allocation2 + $0x110] sm:$0xff] %vm43_vm0, %v12290_v0 }
  0x19   :  { %81 = vst.msk [vmem:[#allocation2 + $0x120] sm:$0xff] %vm43_vm0, %v12290_v0 }
  0x1a   :  { %82 = vst.msk [vmem:[#allocation2 + $0x128] sm:$0xff] %vm43_vm0, %v12290_v0 }
  0x1b   :  { %84 = vst.msk [vmem:[#allocation2 + $0x138] sm:$0xff] %vm43_vm0, %v12290_v0 }
  0x1c   :  { %85 = vst.msk [vmem:[#allocation2 + $0x140] sm:$0xff] %vm43_vm0, %v12290_v0 }
  0x1d   :  { %87 = vst.msk [vmem:[#allocation2 + $0x150] sm:$0xff] %vm43_vm0, %v12290_v0 }
  0x1e   :  { %88 = vst.msk [vmem:[#allocation2 + $0x158] sm:$0xff] %vm43_vm0, %v12290_v0 }
  0x1f   :  { %90 = vst.msk [vmem:[#allocation2 + $0x168] sm:$0xff] %vm43_vm0, %v12290_v0 }
  0x20   :  { %91 = vst.msk [vmem:[#allocation2 + $0x170] sm:$0xff] %vm43_vm0, %v12290_v0 }
  0x21   :  { %93 = vst.msk [vmem:[#allocation2 + $0x180] sm:$0xff] %vm43_vm0, %v12290_v0 }
  0x22   :  { %94 = vst.msk [vmem:[#allocation2 + $0x188] sm:$0xff] %vm43_vm0, %v12290_v0 }
  0x23   :  { %96 = vst.msk [vmem:[#allocation2 + $0x198] sm:$0xff] %vm43_vm0, %v12290_v0 }
  0x24   :  { %97 = vst.msk [vmem:[#allocation2 + $0x1a0] sm:$0xff] %vm43_vm0, %v12290_v0 }
  0x25   :  { %99 = vst.msk [vmem:[#allocation2 + $0x1b0] sm:$0xff] %vm43_vm0, %v12290_v0 }
  0x26   :  { %100 = vst.msk [vmem:[#allocation2 + $0x1b8] sm:$0xff] %vm43_vm0, %v12290_v0 }
  0x27   :  { %102 = vst.msk [vmem:[#allocation2 + $0x1c8] sm:$0xff] %vm43_vm0, %v12290_v0 }
  0x28   :  { %103 = vst.msk [vmem:[#allocation2 + $0x1d0] sm:$0xff] %vm43_vm0, %v12290_v0 }
  0x29   :  { %105 = vst.msk [vmem:[#allocation2 + $0x1e0] sm:$0xff] %vm43_vm0, %v12290_v0 }
  0x2a   :  { %106 = vst.msk [vmem:[#allocation2 + $0x1e8] sm:$0xff] %vm43_vm0, %v12290_v0 }
  0x2b   :  { %108 = vst.msk [vmem:[#allocation2 + $0x1f8] sm:$0xff] %vm43_vm0, %v12290_v0 }
  0x2c   :  { %109 = vst.msk [vmem:[#allocation2 + $0x200] sm:$0xff] %vm43_vm0, %v12290_v0 }
  0x2d   :  { %111 = vst.msk [vmem:[#allocation2 + $0x210] sm:$0xff] %vm43_vm0, %v12290_v0 }
  0x2e   :  { %112 = vst.msk [vmem:[#allocation2 + $0x218] sm:$0xff] %vm43_vm0, %v12290_v0 }
  0x2f   :  { %114 = vst.msk [vmem:[#allocation2 + $0x228] sm:$0xff] %vm43_vm0, %v12290_v0 }
  0x30   :  { %115 = vst.msk [vmem:[#allocation2 + $0x230] sm:$0xff] %vm43_vm0, %v12290_v0 }
  0x31   :  { %117 = vst.msk [vmem:[#allocation2 + $0x240] sm:$0xff] %vm43_vm0, %v12290_v0 }
  0x32   :  { %118 = vst.msk [vmem:[#allocation2 + $0x248] sm:$0xff] %vm43_vm0, %v12290_v0 }
  0x33   :  { %120 = vst.msk [vmem:[#allocation2 + $0x258] sm:$0xff] %vm43_vm0, %v12290_v0 }
  0x34   :  { %121 = vst.msk [vmem:[#allocation2 + $0x260] sm:$0xff] %vm43_vm0, %v12290_v0 }
  0x35   :  { %123 = vst.msk [vmem:[#allocation2 + $0x270] sm:$0xff] %vm43_vm0, %v12290_v0 }
  0x36   :  { %124 = vst.msk [vmem:[#allocation2 + $0x278] sm:$0xff] %vm43_vm0, %v12290_v0 }
  0x37   :  { %126 = vst.msk [vmem:[#allocation2 + $0x288] sm:$0xff] %vm43_vm0, %v12290_v0 }
  0x38   :  { %127 = vst.msk [vmem:[#allocation2 + $0x290] sm:$0xff] %vm43_vm0, %v12290_v0 }
  0x39   :  { %129 = vst.msk [vmem:[#allocation2 + $0x2a0] sm:$0xff] %vm43_vm0, %v12290_v0 }
  0x3a   :  { %130 = vst.msk [vmem:[#allocation2 + $0x2a8] sm:$0xff] %vm43_vm0, %v12290_v0 }
  0x3b   :  { %132 = vst.msk [vmem:[#allocation2 + $0x2b8] sm:$0xff] %vm43_vm0, %v12290_v0 }
  0x3c   :  { %133 = vst.msk [vmem:[#allocation2 + $0x2c0] sm:$0xff] %vm43_vm0, %v12290_v0 }
  0x3d   :  { %135 = vst.msk [vmem:[#allocation2 + $0x2d0] sm:$0xff] %vm43_vm0, %v12290_v0 }
  0x3e   :  { %136 = vst.msk [vmem:[#allocation2 + $0x2d8] sm:$0xff] %vm43_vm0, %v12290_v0 }
  0x3f   :  { %138 = vst.msk [vmem:[#allocation2 + $0x2e8] sm:$0xff] %vm43_vm0, %v12290_v0 }
  0x40   :  { %139 = vst.msk [vmem:[#allocation2 + $0x2f0] sm:$0xff] %vm43_vm0, %v12290_v0 }
  0x41   :  { %141 = vst.msk [vmem:[#allocation2 + $0x300] sm:$0xff] %vm43_vm0, %v12290_v0 }
  0x42   :  { %142 = vst.msk [vmem:[#allocation2 + $0x308] sm:$0xff] %vm43_vm0, %v12290_v0 }
  0x43   :  { %144 = vst.msk [vmem:[#allocation2 + $0x318] sm:$0xff] %vm43_vm0, %v12290_v0 }
  0x44   :  { %145 = vst.msk [vmem:[#allocation2 + $0x320] sm:$0xff] %vm43_vm0, %v12290_v0 }
  0x45   :  { %147 = vst.msk [vmem:[#allocation2 + $0x330] sm:$0xff] %vm43_vm0, %v12290_v0 }
  0x46   :  { %148 = vst.msk [vmem:[#allocation2 + $0x338] sm:$0xff] %vm43_vm0, %v12290_v0 }
  0x47   :  { %150 = vst.msk [vmem:[#allocation2 + $0x348] sm:$0xff] %vm43_vm0, %v12290_v0 }
  0x48   :  { %151 = vst.msk [vmem:[#allocation2 + $0x350] sm:$0xff] %vm43_vm0, %v12290_v0 }
  0x49   :  { %262 = vst.msk [vmem:[#allocation2 + $0x31] sm:$0xff] %vm43_vm0, %v197_v2 }
  0x4a   :  { %260 = vst.msk [vmem:[#allocation2 + $0x19] sm:$0xff] %vm43_vm0, %v195_v3  ;;  %v232_v3 = vld [vmem:[%s12277_s0 + $0x128] sm:$0xff] }
  0x4b   :  { %47 = vst.msk [vmem:[#allocation2 + $0x10] sm:$0x3] %vm46_vm1, %v12290_v0 }
  0x4c   :  { %50 = vst.msk [vmem:[#allocation2 + $0x28] sm:$0x3] %vm46_vm1, %v12290_v0 }
  0x4d   :  { %53 = vst.msk [vmem:[#allocation2 + $0x40] sm:$0x3] %vm46_vm1, %v12290_v0 }
  0x4e   :  { %56 = vst.msk [vmem:[#allocation2 + $0x58] sm:$0x3] %vm46_vm1, %v12290_v0 }
  0x4f   :  { %59 = vst.msk [vmem:[#allocation2 + $0x70] sm:$0x3] %vm46_vm1, %v12290_v0 }
  0x50   :  { %v456_v4 = vld [vmem:[#allocation2 + $0x31] sm:$0xff]  ;;  %62 = vst.msk [vmem:[#allocation2 + $0x88] sm:$0x3] %vm46_vm1, %v12290_v0 }
  0x51   :  { %588 = vrot.lane.b32.xlu2 %v456_v4, %s8410_s21  ;;  %v454_v5 = vld [vmem:[#allocation2 + $0x19] sm:$0xff]  ;;  %65 = vst.msk [vmem:[#allocation2 + $0xa0] sm:$0x3] %vm46_vm1, %v12290_v0  ;;  %v328_v61 = vld [vmem:[#allocation2 + $0x30] sm:$0xff] }
  0x52   :  { %584 = vrot.lane.b32.xlu1 %v454_v5, %s8410_s21  ;;  %v453_v6 = vld [vmem:[#allocation2 + $0x9] sm:$0xff]  ;;  %68 = vst.msk [vmem:[#allocation2 + $0xb8] sm:$0x3] %vm46_vm1, %v12290_v0 }
  0x53   :  { %582 = vrot.lane.b32.xlu0 %v453_v6, %s8410_s21  ;;  %71 = vst.msk [vmem:[#allocation2 + $0xd0] sm:$0x3] %vm46_vm1, %v12290_v0  ;;  %v234_v4 = vld [vmem:[%s12277_s0 + $0x138] sm:$0xff]  ;;  %v233_v5 = vld [vmem:[%s12277_s0 + $0x130] sm:$0xff] }
  0x54   :  { %74 = vst.msk [vmem:[#allocation2 + $0xe8] sm:$0x3] %vm46_vm1, %v12290_v0 }
  0x55   :  { %77 = vst.msk [vmem:[#allocation2 + $0x100] sm:$0x3] %vm46_vm1, %v12290_v0 }
  0x56   :  { %80 = vst.msk [vmem:[#allocation2 + $0x118] sm:$0x3] %vm46_vm1, %v12290_v0 }
  0x57   :  { %83 = vst.msk [vmem:[#allocation2 + $0x130] sm:$0x3] %vm46_vm1, %v12290_v0 }
  0x58   :  { %86 = vst.msk [vmem:[#allocation2 + $0x148] sm:$0x3] %vm46_vm1, %v12290_v0 }
  0x59   :  { %89 = vst.msk [vmem:[#allocation2 + $0x160] sm:$0x3] %vm46_vm1, %v12290_v0 }
  0x5a   :  { %92 = vst.msk [vmem:[#allocation2 + $0x178] sm:$0x3] %vm46_vm1, %v12290_v0 }
  0x5b   :  { %95 = vst.msk [vmem:[#allocation2 + $0x190] sm:$0x3] %vm46_vm1, %v12290_v0 }
  0x5c   :  { %98 = vst.msk [vmem:[#allocation2 + $0x1a8] sm:$0x3] %vm46_vm1, %v12290_v0 }
  0x5d   :  { %101 = vst.msk [vmem:[#allocation2 + $0x1c0] sm:$0x3] %vm46_vm1, %v12290_v0 }
  0x5e   :  { %104 = vst.msk [vmem:[#allocation2 + $0x1d8] sm:$0x3] %vm46_vm1, %v12290_v0 }
  0x5f   :  { %107 = vst.msk [vmem:[#allocation2 + $0x1f0] sm:$0x3] %vm46_vm1, %v12290_v0 }
  0x60   :  { %110 = vst.msk [vmem:[#allocation2 + $0x208] sm:$0x3] %vm46_vm1, %v12290_v0 }
  0x61   :  { %113 = vst.msk [vmem:[#allocation2 + $0x220] sm:$0x3] %vm46_vm1, %v12290_v0 }
  0x62   :  { %116 = vst.msk [vmem:[#allocation2 + $0x238] sm:$0x3] %vm46_vm1, %v12290_v0 }
  0x63   :  { %119 = vst.msk [vmem:[#allocation2 + $0x250] sm:$0x3] %vm46_vm1, %v12290_v0 }
  0x64   :  { %122 = vst.msk [vmem:[#allocation2 + $0x268] sm:$0x3] %vm46_vm1, %v12290_v0 }
  0x65   :  { %125 = vst.msk [vmem:[#allocation2 + $0x280] sm:$0x3] %vm46_vm1, %v12290_v0 }
  0x66   :  { %128 = vst.msk [vmem:[#allocation2 + $0x298] sm:$0x3] %vm46_vm1, %v12290_v0 }
  0x67   :  { %131 = vst.msk [vmem:[#allocation2 + $0x2b0] sm:$0x3] %vm46_vm1, %v12290_v0 }
  0x68   :  { %134 = vst.msk [vmem:[#allocation2 + $0x2c8] sm:$0x3] %vm46_vm1, %v12290_v0 }
  0x69   :  { %137 = vst.msk [vmem:[#allocation2 + $0x2e0] sm:$0x3] %vm46_vm1, %v12290_v0 }
  0x6a   :  { %140 = vst.msk [vmem:[#allocation2 + $0x2f8] sm:$0x3] %vm46_vm1, %v12290_v0 }
  0x6b   :  { %143 = vst.msk [vmem:[#allocation2 + $0x310] sm:$0x3] %vm46_vm1, %v12290_v0 }
  0x6c   :  { %146 = vst.msk [vmem:[#allocation2 + $0x328] sm:$0x3] %vm46_vm1, %v12290_v0 }
  0x6d   :  { %149 = vst.msk [vmem:[#allocation2 + $0x340] sm:$0x3] %vm46_vm1, %v12290_v0 }
  0x6e   :  { %152 = vst.msk [vmem:[#allocation2 + $0x358] sm:$0x3] %vm46_vm1, %v12290_v0  ;;  %vm5017_vm1 = vcmask 1044484  }
  0x6f   :  { %263 = vst.msk [vmem:[#allocation2 + $0x39] sm:$0xff] %vm43_vm0, %v198_v7 }
  0x70   :  { %261 = vst.msk [vmem:[#allocation2 + $0x21] sm:$0xff] %vm43_vm0, %v196_v8 }
  0x71   :  { %264 = vst.msk [vmem:[#allocation2 + $0x49] sm:$0xff] %vm43_vm0, %v199_v9 }
  0x72   :  { %266 = vst.msk [vmem:[#allocation2 + $0x61] sm:$0xff] %vm43_vm0, %v201_v10  ;;  %v235_v10 = vld [vmem:[%s12277_s0 + $0x140] sm:$0xff] }
  0x73   :  { %265 = vst.msk [vmem:[#allocation2 + $0x51] sm:$0xff] %vm43_vm0, %v200_v11  ;;  %v237_v11 = vld [vmem:[%s12277_s0 + $0x150] sm:$0xff] }
  0x74   :  { %267 = vst.msk [vmem:[#allocation2 + $0x69] sm:$0xff] %vm43_vm0, %v202_v12  ;;  %v236_v12 = vld [vmem:[%s12277_s0 + $0x148] sm:$0xff] }
  0x75   :  { %269 = vst.msk [vmem:[#allocation2 + $0x81] sm:$0xff] %vm43_vm0, %v204_v13 }
  0x76   :  { %v457_v17 = vld [vmem:[#allocation2 + $0x39] sm:$0xff]  ;;  %268 = vst.msk [vmem:[#allocation2 + $0x79] sm:$0xff] %vm43_vm0, %v203_v14  ;;  %v484_v14 = vld [vmem:[#allocation2 + $0x1b1] sm:$0xff] }
  0x77   :  { %590 = vrot.lane.b32.xlu2 %v457_v17, %s8410_s21  ;;  %v455_v19 = vld [vmem:[#allocation2 + $0x21] sm:$0xff]  ;;  %270 = vst.msk [vmem:[#allocation2 + $0x91] sm:$0xff] %vm43_vm0, %v205_v15  ;;  %v329_v6 = vld [vmem:[#allocation2 + $0x38] sm:$0xff]  ;;  %v238_v17 = vld [vmem:[%s12277_s0 + $0x158] sm:$0xff] }
  0x78   :  { %586 = vrot.lane.b32.xlu1 %v455_v19, %s8410_s21  ;;  %v458_v21 = vld [vmem:[#allocation2 + $0x49] sm:$0xff]  ;;  %272 = vst.msk [vmem:[#allocation2 + $0xa9] sm:$0xff] %vm43_vm0, %v207_v16  ;;  %v485_v16 = vld [vmem:[#allocation2 + $0x1b9] sm:$0xff] }
  0x79   :  { %592 = vrot.lane.b32.xlu0 %v458_v21, %s8410_s21  ;;  %271 = vst.msk [vmem:[#allocation2 + $0x99] sm:$0xff] %vm43_vm0, %v206_v18  ;;  %v460_v26 = vld [vmem:[#allocation2 + $0x61] sm:$0xff] }
  0x7a   :  { %273 = vst.msk [vmem:[#allocation2 + $0xb1] sm:$0xff] %vm43_vm0, %v208_v20  ;;  %v459_v28 = vld [vmem:[#allocation2 + $0x51] sm:$0xff]  ;;  %v332_v13 = vld [vmem:[#allocation2 + $0x60] sm:$0xff] }
  0x7b   :  { %275 = vst.msk [vmem:[#allocation2 + $0xc9] sm:$0xff] %vm43_vm0, %v210_v22  ;;  %v461_v29 = vld [vmem:[#allocation2 + $0x69] sm:$0xff]  ;;  %v240_v18 = vld [vmem:[%s12277_s0 + $0x168] sm:$0xff]  ;;  %v8919_v22 = vld [vmem:[#allocation2 + $0x18] sm:$0xff] }
  0x7c   :  { %274 = vst.msk [vmem:[#allocation2 + $0xc1] sm:$0xff] %vm43_vm0, %v209_v23  ;;  %v463_v33 = vld [vmem:[#allocation2 + $0x81] sm:$0xff]  ;;  %v581_v19 = vpop.permute.xlu0 %580  ;;  %v239_v23 = vld [vmem:[%s12277_s0 + $0x160] sm:$0xff] }
  0x7d   :  { %276 = vst.msk [vmem:[#allocation2 + $0xd9] sm:$0xff] %vm43_vm0, %v211_v24  ;;  %v462_v34 = vld [vmem:[#allocation2 + $0x79] sm:$0xff] }
  0x7e   :  { %278 = vst.msk [vmem:[#allocation2 + $0xf1] sm:$0xff] %vm43_vm0, %v213_v25  ;;  %v464_v35 = vld [vmem:[#allocation2 + $0x91] sm:$0xff]  ;;  %v324_v20 = vld [vmem:[#allocation2] sm:$0xff] }
  0x7f   :  { %596 = vrot.lane.b32.xlu2 %v460_v26, %s8410_s21  ;;  %277 = vst.msk [vmem:[#allocation2 + $0xe1] sm:$0xff] %vm43_vm0, %v212_v27  ;;  %v466_v39 = vld [vmem:[#allocation2 + $0xa9] sm:$0xff]  ;;  %v335_v21 = vld [vmem:[#allocation2 + $0x80] sm:$0xff] }
  0x80   :  { %594 = vrot.lane.b32.xlu1 %v459_v28, %s8410_s21  ;;  %279 = vst.msk [vmem:[#allocation2 + $0xf9] sm:$0xff] %vm43_vm0, %v214_v30  ;;  %v465_v40 = vld [vmem:[#allocation2 + $0x99] sm:$0xff]  ;;  %v241_v28 = vld [vmem:[%s12277_s0 + $0x170] sm:$0xff] }
  0x81   :  { %598 = vrot.lane.b32.xlu0 %v461_v29, %s8410_s21  ;;  %281 = vst.msk [vmem:[#allocation2 + $0x111] sm:$0xff] %vm43_vm0, %v216_v31  ;;  %v467_v41 = vld [vmem:[#allocation2 + $0xb1] sm:$0xff]  ;;  %v325_v30 = vld [vmem:[#allocation2 + $0x8] sm:$0xff] }
  0x82   :  { %280 = vst.msk [vmem:[#allocation2 + $0x109] sm:$0xff] %vm43_vm0, %v215_v32  ;;  %v469_v45 = vld [vmem:[#allocation2 + $0xc9] sm:$0xff]  ;;  %v243_v29 = vld [vmem:[%s12277_s0 + $0x180] sm:$0xff] }
  0x83   :  { %282 = vst.msk [vmem:[#allocation2 + $0x121] sm:$0xff] %vm43_vm0, %v217_v36  ;;  %v468_v46 = vld [vmem:[#allocation2 + $0xc1] sm:$0xff] }
  0x84   :  { %284 = vst.msk [vmem:[#allocation2 + $0x139] sm:$0xff] %vm43_vm0, %v219_v37  ;;  %v470_v47 = vld [vmem:[#allocation2 + $0xd9] sm:$0xff]  ;;  %v338_v32 = vld [vmem:[#allocation2 + $0xa8] sm:$0xff] }
  0x85   :  { %283 = vst.msk [vmem:[#allocation2 + $0x129] sm:$0xff] %vm43_vm0, %v218_v38  ;;  %v472_v50 = vld [vmem:[#allocation2 + $0xf1] sm:$0xff]  ;;  %v244_v38 = vld [vmem:[%s12277_s0 + $0x188] sm:$0xff] }
  0x86   :  { %285 = vst.msk [vmem:[#allocation2 + $0x141] sm:$0xff] %vm43_vm0, %v220_v42  ;;  %v471_v51 = vld [vmem:[#allocation2 + $0xe1] sm:$0xff] }
  0x87   :  { %602 = vrot.lane.b32.xlu2 %v463_v33, %s8410_s21  ;;  %287 = vst.msk [vmem:[#allocation2 + $0x159] sm:$0xff] %vm43_vm0, %v222_v43  ;;  %v473_v52 = vld [vmem:[#allocation2 + $0xf9] sm:$0xff]  ;;  %v8969_v43 = vld [vmem:[#allocation2 + $0x50] sm:$0xff] }
  0x88   :  { %600 = vrot.lane.b32.xlu1 %v462_v34, %s8410_s21  ;;  %286 = vst.msk [vmem:[#allocation2 + $0x151] sm:$0xff] %vm43_vm0, %v221_v44  ;;  %v475_v55 = vld [vmem:[#allocation2 + $0x111] sm:$0xff]  ;;  %v8942_v33 = vld [vmem:[#allocation2 + $0x20] sm:$0xff]  ;;  %v245_v44 = vld [vmem:[%s12277_s0 + $0x190] sm:$0xff] }
  0x89   :  { %604 = vrot.lane.b32.xlu0 %v464_v35, %s8410_s21  ;;  %288 = vst.msk [vmem:[#allocation2 + $0x169] sm:$0xff] %vm43_vm0, %v223_v48  ;;  %v474_v56 = vld [vmem:[#allocation2 + $0x109] sm:$0xff]  ;;  %v247_v48 = vld [vmem:[%s12277_s0 + $0x1a0] sm:$0xff] }
  0x8a   :  { %289 = vst.msk [vmem:[#allocation2 + $0x171] sm:$0xff] %vm43_vm0, %v224_v49  ;;  %v476_v57 = vld [vmem:[#allocation2 + $0x121] sm:$0xff]  ;;  %v242_v34 = vld [vmem:[%s12277_s0 + $0x178] sm:$0xff] }
  0x8b   :  { %293 = vst.msk [vmem:[#allocation2 + $0x1d1] sm:$0xff] %vm43_vm0, %v228_v53  ;;  %v478_v63 = vld [vmem:[#allocation2 + $0x139] sm:$0xff]  ;;  %v249_v49 = vld [vmem:[%s12277_s0 + $0x1b0] sm:$0xff] }
  0x8c   :  { %292 = vst.msk [vmem:[#allocation2 + $0x1c9] sm:$0xff] %vm43_vm0, %v227_v54  ;;  %v477_v1 = vld [vmem:[#allocation2 + $0x129] sm:$0xff]  ;;  %v8997_v53 = vld [vmem:[#allocation2 + $0x78] sm:$0xff]  ;;  %v248_v54 = vld [vmem:[%s12277_s0 + $0x1a8] sm:$0xff] }
  0x8d   :  { %294 = vst.msk [vmem:[#allocation2 + $0x1e1] sm:$0xff] %vm43_vm0, %v229_v58  ;;  %v479_v2 = vld [vmem:[#allocation2 + $0x141] sm:$0xff]  ;;  %v250_v58 = vld [vmem:[%s12277_s0 + $0x1b8] sm:$0xff] }
  0x8e   :  { %296 = vst.msk [vmem:[#allocation2 + $0x1f9] sm:$0xff] %vm43_vm0, %v231_v59  ;;  %v481_v7 = vld [vmem:[#allocation2 + $0x159] sm:$0xff] }
  0x8f   :  { %608 = vrot.lane.b32.xlu2 %v466_v39, %s8410_s21  ;;  %392 = vst.msk [vmem:[#allocation4 + $0x20] sm:$0xff] %vm43_vm0, %v328_v61  ;;  %v480_v8 = vld [vmem:[#allocation2 + $0x151] sm:$0xff]  ;;  %v252_v59 = vld [vmem:[%s12277_s0 + $0x1c8] sm:$0xff] }
  0x90   :  { %606 = vrot.lane.b32.xlu1 %v465_v40, %s8410_s21  ;;  %295 = vst.msk [vmem:[#allocation2 + $0x1e9] sm:$0xff] %vm43_vm0, %v230_v60  ;;  %v482_v9 = vld [vmem:[#allocation2 + $0x169] sm:$0xff] }
  0x91   :  { %610 = vrot.lane.b32.xlu0 %v467_v41, %s8410_s21  ;;  %297 = vst.msk [vmem:[#allocation2 + $0x201] sm:$0xff] %vm43_vm0, %v232_v3  ;;  %v483_v15 = vld [vmem:[#allocation2 + $0x171] sm:$0xff]  ;;  %v8961_v40 = vld [vmem:[#allocation2 + $0x48] sm:$0xff] }
  0x92   :  { %299 = vst.msk [vmem:[#allocation2 + $0x219] sm:$0xff] %vm43_vm0, %v234_v4  ;;  %v487_v24 = vld [vmem:[#allocation2 + $0x1d1] sm:$0xff]  ;;  %v8963_v41 = vld [vmem:[#allocation2 + $0xc8] sm:$0xff] }
  0x93   :  { %298 = vst.msk [vmem:[#allocation2 + $0x211] sm:$0xff] %vm43_vm0, %v233_v5  ;;  %v486_v26 = vld [vmem:[#allocation2 + $0x1c9] sm:$0xff] }
  0x94   :  { %393 = vst.msk [vmem:[#allocation4 + $0x28] sm:$0xff] %vm43_vm0, %v329_v6  ;;  %v488_v27 = vld [vmem:[#allocation2 + $0x1e1] sm:$0xff]  ;;  %v246_v39 = vld [vmem:[%s12277_s0 + $0x198] sm:$0xff]  ;;  %v255_v6 = vld [vmem:[%s12277_s0 + $0x1e0] sm:$0xff] }
  0x95   :  { %300 = vst.msk [vmem:[#allocation2 + $0x229] sm:$0xff] %vm43_vm0, %v235_v10  ;;  %v490_v35 = vld [vmem:[#allocation2 + $0x1f9] sm:$0xff]  ;;  %v9017_v60 = vld [vmem:[#allocation2 + $0x90] sm:$0xff]  ;;  %v253_v5 = vld [vmem:[%s12277_s0 + $0x1d0] sm:$0xff] }
  0x96   :  { %302 = vst.msk [vmem:[#allocation2 + $0x241] sm:$0xff] %vm43_vm0, %v237_v11  ;;  %v9019_v61 = vld [vmem:[#allocation2 + $0x110] sm:$0xff]  ;;  %v9052_v10 = vld [vmem:[#allocation2 + $0x138] sm:$0xff] }
  0x97   :  { %614 = vrot.lane.b32.xlu2 %v469_v45, %s8410_s21  ;;  %396 = vst.msk [vmem:[#allocation4 + $0x40] sm:$0xff] %vm43_vm0, %v332_v13  ;;  %v489_v36 = vld [vmem:[#allocation2 + $0x1e9] sm:$0xff] }
  0x98   :  { %612 = vrot.lane.b32.xlu1 %v468_v46, %s8410_s21  ;;  %301 = vst.msk [vmem:[#allocation2 + $0x231] sm:$0xff] %vm43_vm0, %v236_v12  ;;  %v491_v37 = vld [vmem:[#allocation2 + $0x201] sm:$0xff] }
  0x99   :  { %616 = vrot.lane.b32.xlu0 %v470_v47, %s8410_s21  ;;  %303 = vst.msk [vmem:[#allocation2 + $0x249] sm:$0xff] %vm43_vm0, %v238_v17  ;;  %v493_v45 = vld [vmem:[#allocation2 + $0x219] sm:$0xff] }
  0x9a   :  { %305 = vst.msk [vmem:[#allocation2 + $0x261] sm:$0xff] %vm43_vm0, %v240_v18  ;;  %v492_v46 = vld [vmem:[#allocation2 + $0x211] sm:$0xff]  ;;  %v9055_v12 = vld [vmem:[#allocation2 + $0xc0] sm:$0xff] }
  0x9b   :  { %388 = vst.msk [vmem:[#allocation4] sm:$0xff] %vm43_vm0, %v324_v20  ;;  %v256_v17 = vld [vmem:[%s12277_s0 + $0x1e8] sm:$0xff]  ;;  %v9071_v18 = vld [vmem:[#allocation2 + $0xd8] sm:$0xff] }
  0x9c   :  { %773 = vst.msk [vmem:[#allocation4] sm:$0xff] %vm772_vm2, %v581_v19  ;;  %v494_v47 = vld [vmem:[#allocation2 + $0x229] sm:$0xff]  ;;  %v875_v0 = vld [vmem:[#allocation2 + $0x1fa] sm:$0xff] }
  0x9d   :  { %399 = vst.msk [vmem:[#allocation4 + $0x58] sm:$0xff] %vm43_vm0, %v335_v21  ;;  %v9078_v21 = vld [vmem:[#allocation2 + $0x158] sm:$0xff] }
  0x9e   :  { %390 = vst.msk [vmem:[#allocation4 + $0x10] sm:$0xff] %vm43_vm0, %v8919_v22 }
  0x9f   :  { %620 = vrot.lane.b32.xlu2 %v472_v50, %s8410_s21  ;;  %304 = vst.msk [vmem:[#allocation2 + $0x259] sm:$0xff] %vm43_vm0, %v239_v23  ;;  %v8989_v50 = vld [vmem:[#allocation2 + $0x68] sm:$0xff] }
  0xa0   :  { %618 = vrot.lane.b32.xlu1 %v471_v51, %s8410_s21  ;;  %306 = vst.msk [vmem:[#allocation2 + $0x271] sm:$0xff] %vm43_vm0, %v241_v28  ;;  %v8991_v51 = vld [vmem:[#allocation2 + $0xf0] sm:$0xff]  ;;  %v9090_v28 = vld [vmem:[#allocation2 + $0xf8] sm:$0xff] }
  0xa1   :  { %622 = vrot.lane.b32.xlu0 %v473_v52, %s8410_s21  ;;  %308 = vst.msk [vmem:[#allocation2 + $0x289] sm:$0xff] %vm43_vm0, %v243_v29 }
  0xa2   :  { %389 = vst.msk [vmem:[#allocation4 + $0x8] sm:$0xff] %vm43_vm0, %v325_v30 }
  0xa3   :  { %402 = vst.msk [vmem:[#allocation4 + $0x70] sm:$0xff] %vm43_vm0, %v338_v32 }
  0xa4   :  { %391 = vst.msk [vmem:[#allocation4 + $0x18] sm:$0xff] %vm43_vm0, %v8942_v33 }
  0xa5   :  { %307 = vst.msk [vmem:[#allocation2 + $0x279] sm:$0xff] %vm43_vm0, %v242_v34  ;;  %v9097_v34 = vld [vmem:[#allocation2 + $0x108] sm:$0xff] }
  0xa6   :  { %309 = vst.msk [vmem:[#allocation2 + $0x291] sm:$0xff] %vm43_vm0, %v244_v38  ;;  %v498_v3 = vld [vmem:[#allocation2 + $0x259] sm:$0xff] }
  0xa7   :  { %626 = vrot.lane.b32.xlu2 %v475_v55, %s8410_s21  ;;  %311 = vst.msk [vmem:[#allocation2 + $0x2a9] sm:$0xff] %vm43_vm0, %v246_v39  ;;  %v496_v55 = vld [vmem:[#allocation2 + $0x241] sm:$0xff]  ;;  %v500_v4 = vld [vmem:[#allocation2 + $0x271] sm:$0xff] }
  0xa8   :  { %624 = vrot.lane.b32.xlu1 %v474_v56, %s8410_s21  ;;  %394 = vst.msk [vmem:[#allocation4 + $0x30] sm:$0xff] %vm43_vm0, %v8961_v40  ;;  %v495_v56 = vld [vmem:[#allocation2 + $0x231] sm:$0xff]  ;;  %v502_v13 = vld [vmem:[#allocation2 + $0x289] sm:$0xff]  ;;  %v9105_v38 = vld [vmem:[#allocation2 + $0x120] sm:$0xff] }
  0xa9   :  { %628 = vrot.lane.b32.xlu0 %v476_v57, %s8410_s21  ;;  %405 = vst.msk [vmem:[#allocation4 + $0x88] sm:$0xff] %vm43_vm0, %v8963_v41  ;;  %v497_v57 = vld [vmem:[#allocation2 + $0x249] sm:$0xff] }
  0xaa   :  { %395 = vst.msk [vmem:[#allocation4 + $0x38] sm:$0xff] %vm43_vm0, %v8969_v43 }
  0xab   :  { %v589_v62 = vpop.permute.xlu2 %588  ;;  %310 = vst.msk [vmem:[#allocation2 + $0x2a1] sm:$0xff] %vm43_vm0, %v245_v44  ;;  %v9111_v44 = vld [vmem:[#allocation2 + $0x1d0] sm:$0xff] }
  0xac   :  { %777 = vst.msk [vmem:[#allocation4 + $0x20] sm:$0xff] %vm772_vm2, %v589_v62 }
  0xad   :  { %312 = vst.msk [vmem:[#allocation2 + $0x2b9] sm:$0xff] %vm43_vm0, %v247_v48 }
  0xae   :  { %314 = vst.msk [vmem:[#allocation2 + $0x2d1] sm:$0xff] %vm43_vm0, %v249_v49 }
  0xaf   :  { %632 = vrot.lane.b32.xlu2 %v478_v63, %s8410_s21  ;;  %397 = vst.msk [vmem:[#allocation4 + $0x48] sm:$0xff] %vm43_vm0, %v8989_v50  ;;  %v9025_v63 = vld [vmem:[#allocation2 + $0x98] sm:$0xff] }
  0xb0   :  { %630 = vrot.lane.b32.xlu1 %v477_v1, %s8410_s21  ;;  %408 = vst.msk [vmem:[#allocation4 + $0xa0] sm:$0xff] %vm43_vm0, %v8991_v51  ;;  %v251_v1 = vld [vmem:[%s12277_s0 + $0x1c0] sm:$0xff] }
  0xb1   :  { %634 = vrot.lane.b32.xlu0 %v479_v2, %s8410_s21  ;;  %398 = vst.msk [vmem:[#allocation4 + $0x50] sm:$0xff] %vm43_vm0, %v8997_v53  ;;  %v499_v2 = vld [vmem:[#allocation2 + $0x261] sm:$0xff] }
  0xb2   :  { %313 = vst.msk [vmem:[#allocation2 + $0x2c1] sm:$0xff] %vm43_vm0, %v248_v54 }
  0xb3   :  { %315 = vst.msk [vmem:[#allocation2 + $0x2d9] sm:$0xff] %vm43_vm0, %v250_v58  ;;  %v9132_v58 = vld [vmem:[#allocation2 + $0x150] sm:$0xff] }
  0xb4   :  { %317 = vst.msk [vmem:[#allocation2 + $0x2f1] sm:$0xff] %vm43_vm0, %v252_v59 }
  0xb5   :  { %400 = vst.msk [vmem:[#allocation4 + $0x60] sm:$0xff] %vm43_vm0, %v9017_v60 }
  0xb6   :  { %411 = vst.msk [vmem:[#allocation4 + $0xb8] sm:$0xff] %vm43_vm0, %v9019_v61 }
  0xb7   :  { %638 = vrot.lane.b32.xlu2 %v481_v7, %s8410_s21  ;;  %401 = vst.msk [vmem:[#allocation4 + $0x68] sm:$0xff] %vm43_vm0, %v9025_v63  ;;  %v9045_v7 = vld [vmem:[#allocation2 + $0xb0] sm:$0xff] }
  0xb8   :  { %636 = vrot.lane.b32.xlu1 %v480_v8, %s8410_s21  ;;  %316 = vst.msk [vmem:[#allocation2 + $0x2e9] sm:$0xff] %vm43_vm0, %v251_v1 }
  0xb9   :  { %640 = vrot.lane.b32.xlu0 %v482_v9, %s8410_s21  ;;  %318 = vst.msk [vmem:[#allocation2 + $0x301] sm:$0xff] %vm43_vm0, %v253_v5  ;;  %v9147_v5 = vld [vmem:[#allocation2 + $0x218] sm:$0xff] }
  0xba   :  { %320 = vst.msk [vmem:[#allocation2 + $0x319] sm:$0xff] %vm43_vm0, %v255_v6 }
  0xbb   :  { %403 = vst.msk [vmem:[#allocation4 + $0x78] sm:$0xff] %vm43_vm0, %v9045_v7 }
  0xbc   :  { %414 = vst.msk [vmem:[#allocation4 + $0xd0] sm:$0xff] %vm43_vm0, %v9052_v10 }
  0xbd   :  { %404 = vst.msk [vmem:[#allocation4 + $0x80] sm:$0xff] %vm43_vm0, %v9055_v12 }
  0xbe   :  { %321 = vst.msk [vmem:[#allocation2 + $0x321] sm:$0xff] %vm43_vm0, %v256_v17  ;;  %v9162_v17 = vld [vmem:[#allocation2 + $0x240] sm:$0xff] }
  0xbf   :  { %644 = vrot.lane.b32.xlu2 %v484_v14, %s8410_s21  ;;  %v254_v14 = vld [vmem:[%s12277_s0 + $0x1d8] sm:$0xff]  ;;  %406 = vst.msk [vmem:[#allocation4 + $0x90] sm:$0xff] %vm43_vm0, %v9071_v18 }
  0xc0   :  { %642 = vrot.lane.b32.xlu1 %v483_v15, %s8410_s21  ;;  %v501_v15 = vld [vmem:[#allocation2 + $0x279] sm:$0xff]  ;;  %319 = vst.msk [vmem:[#allocation2 + $0x309] sm:$0xff] %vm43_vm0, %v254_v14  ;;  %v510_v48 = vld [vmem:[#allocation2 + $0x2e9] sm:$0xff]  ;;  %v512_v49 = vld [vmem:[#allocation2 + $0x301] sm:$0xff] }
  0xc1   :  { %646 = vrot.lane.b32.xlu0 %v485_v16, %s8410_s21  ;;  %v503_v16 = vld [vmem:[#allocation2 + $0x291] sm:$0xff]  ;;  %417 = vst.msk [vmem:[#allocation4 + $0xe8] sm:$0xff] %vm43_vm0, %v9078_v21  ;;  %v514_v59 = vld [vmem:[#allocation2 + $0x319] sm:$0xff] }
  0xc2   :  { %409 = vst.msk [vmem:[#allocation4 + $0xa8] sm:$0xff] %vm43_vm0, %v9090_v28  ;;  %v357_v14 = vld [vmem:[#allocation2 + $0x1b8] sm:$0xff] }
  0xc3   :  { %410 = vst.msk [vmem:[#allocation4 + $0xb0] sm:$0xff] %vm43_vm0, %v9097_v34 }
  0xc4   :  { %v585_v25 = vpop.permute.xlu1 %584  ;;  %412 = vst.msk [vmem:[#allocation4 + $0xc0] sm:$0xff] %vm43_vm0, %v9105_v38 }
  0xc5   :  { %775 = vst.msk [vmem:[#allocation4 + $0x10] sm:$0xff] %vm772_vm2, %v585_v25  ;;  %v583_v31 = vpop.permute.xlu0 %582  ;;  %v505_v25 = vld [vmem:[#allocation2 + $0x2a9] sm:$0xff]  ;;  %v515_v1 = vld [vmem:[#allocation2 + $0x321] sm:$0xff] }
  0xc6   :  { %774 = vst.msk [vmem:[#allocation4 + $0x8] sm:$0xff] %vm772_vm2, %v583_v31  ;;  %v356_v31 = vld [vmem:[#allocation2 + $0x1b0] sm:$0xff] }
  0xc7   :  { %650 = vrot.lane.b32.xlu2 %v487_v24, %s8410_s21  ;;  %v9081_v24 = vld [vmem:[#allocation2 + $0xe0] sm:$0xff]  ;;  %420 = vst.msk [vmem:[#allocation4 + $0x100] sm:$0xff] %vm43_vm0, %v356_v31 }
  0xc8   :  { %648 = vrot.lane.b32.xlu1 %v486_v26, %s8410_s21  ;;  %v504_v26 = vld [vmem:[#allocation2 + $0x2a1] sm:$0xff]  ;;  %407 = vst.msk [vmem:[#allocation4 + $0x98] sm:$0xff] %vm43_vm0, %v9081_v24 }
  0xc9   :  { %652 = vrot.lane.b32.xlu0 %v488_v27, %s8410_s21  ;;  %v506_v27 = vld [vmem:[#allocation2 + $0x2b9] sm:$0xff]  ;;  %423 = vst.msk [vmem:[#allocation4 + $0x118] sm:$0xff] %vm43_vm0, %v9111_v44 }
  0xca   :  { %416 = vst.msk [vmem:[#allocation4 + $0xe0] sm:$0xff] %vm43_vm0, %v9132_v58  ;;  %v9180_v31 = vld [vmem:[#allocation2 + $0x260] sm:$0xff] }
  0xcb   :  { %429 = vst.msk [vmem:[#allocation4 + $0x148] sm:$0xff] %vm43_vm0, %v9147_v5 }
  0xcc   :  { %421 = vst.msk [vmem:[#allocation4 + $0x108] sm:$0xff] %vm43_vm0, %v357_v14  ;;  %v851_v14 = vld [vmem:[#allocation2 + $0xaa] sm:$0xff] }
  0xcd   :  { %432 = vst.msk [vmem:[#allocation4 + $0x160] sm:$0xff] %vm43_vm0, %v9162_v17 }
  0xce   :  { %435 = vst.msk [vmem:[#allocation4 + $0x178] sm:$0xff] %vm43_vm0, %v9180_v31 }
  0xcf   :  { %656 = vrot.lane.b32.xlu2 %v490_v35, %s8410_s21  ;;  %v508_v35 = vld [vmem:[#allocation2 + $0x2d1] sm:$0xff] }
  0xd0   :  { %654 = vrot.lane.b32.xlu1 %v489_v36, %s8410_s21  ;;  %v507_v36 = vld [vmem:[#allocation2 + $0x2c1] sm:$0xff] }
  0xd1   :  { %v591_v42 = vpop.permute.xlu2 %590  ;;  %658 = vrot.lane.b32.xlu0 %v491_v37, %s8410_s21  ;;  %v509_v37 = vld [vmem:[#allocation2 + $0x2d9] sm:$0xff] }
  0xd2   :  { %778 = vst.msk [vmem:[#allocation4 + $0x28] sm:$0xff] %vm772_vm2, %v591_v42 }
  0xd7   :  { %662 = vrot.lane.b32.xlu2 %v493_v45, %s8410_s21 }
  0xd8   :  { %660 = vrot.lane.b32.xlu1 %v492_v46, %s8410_s21  ;;  %v9114_v46 = vld [vmem:[#allocation2 + $0x128] sm:$0xff] }
  0xd9   :  { %v597_v52 = vpop.permute.xlu2 %596  ;;  %664 = vrot.lane.b32.xlu0 %v494_v47, %s8410_s21  ;;  %v511_v47 = vld [vmem:[#allocation2 + $0x2f1] sm:$0xff]  ;;  %413 = vst.msk [vmem:[#allocation4 + $0xc8] sm:$0xff] %vm43_vm0, %v9114_v46 }
  0xda   :  { %781 = vst.msk [vmem:[#allocation4 + $0x40] sm:$0xff] %vm772_vm2, %v597_v52  ;;  %v9123_v52 = vld [vmem:[#allocation2 + $0x140] sm:$0xff] }
  0xdb   :  { %415 = vst.msk [vmem:[#allocation4 + $0xd8] sm:$0xff] %vm43_vm0, %v9123_v52 }
  0xdf   :  { %668 = vrot.lane.b32.xlu2 %v496_v55, %s8410_s21 }
  0xe0   :  { %666 = vrot.lane.b32.xlu1 %v495_v56, %s8410_s21  ;;  %v9129_v56 = vld [vmem:[#allocation2 + $0x1f8] sm:$0xff] }
  0xe1   :  { %v603_v62 = vpop.permute.xlu2 %602  ;;  %670 = vrot.lane.b32.xlu0 %v497_v57, %s8410_s21  ;;  %426 = vst.msk [vmem:[#allocation4 + $0x130] sm:$0xff] %vm43_vm0, %v9129_v56 }
  0xe2   :  { %784 = vst.msk [vmem:[#allocation4 + $0x58] sm:$0xff] %vm772_vm2, %v603_v62  ;;  %v513_v62 = vld [vmem:[#allocation2 + $0x309] sm:$0xff] }
  0xe7   :  { %674 = vrot.lane.b32.xlu2 %v499_v2, %s8410_s21  ;;  %v9141_v2 = vld [vmem:[#allocation2 + $0x168] sm:$0xff] }
  0xe8   :  { %672 = vrot.lane.b32.xlu1 %v498_v3, %s8410_s21  ;;  %418 = vst.msk [vmem:[#allocation4 + $0xf0] sm:$0xff] %vm43_vm0, %v9141_v2 }
  0xe9   :  { %v609_v8 = vpop.permute.xlu2 %608  ;;  %676 = vrot.lane.b32.xlu0 %v500_v4, %s8410_s21 }
  0xea   :  { %787 = vst.msk [vmem:[#allocation4 + $0x70] sm:$0xff] %vm772_vm2, %v609_v8  ;;  %v587_v9 = vpop.permute.xlu1 %586  ;;  %v9150_v8 = vld [vmem:[#allocation2 + $0x170] sm:$0xff] }
  0xeb   :  { %776 = vst.msk [vmem:[#allocation4 + $0x18] sm:$0xff] %vm772_vm2, %v587_v9  ;;  %v593_v11 = vpop.permute.xlu0 %592  ;;  %v838_v9 = vld [vmem:[#allocation2 + $0xa] sm:$0xff] }
  0xec   :  { %779 = vst.msk [vmem:[#allocation4 + $0x30] sm:$0xff] %vm772_vm2, %v593_v11  ;;  %v837_v11 = vld [vmem:[#allocation2 + $0x2] sm:$0xff] }
  0xed   :  { %419 = vst.msk [vmem:[#allocation4 + $0xf8] sm:$0xff] %vm43_vm0, %v9150_v8 }
  0xef   :  { %680 = vrot.lane.b32.xlu2 %v502_v13, %s8410_s21  ;;  %v839_v13 = vld [vmem:[#allocation2 + $0x1a] sm:$0xff] }
  0xf0   :  { %678 = vrot.lane.b32.xlu1 %v501_v15, %s8410_s21 }
  0xf1   :  { %v615_v19 = vpop.permute.xlu2 %614  ;;  %682 = vrot.lane.b32.xlu0 %v503_v16, %s8410_s21 }
  0xf2   :  { %790 = vst.msk [vmem:[#allocation4 + $0x88] sm:$0xff] %vm772_vm2, %v615_v19  ;;  %v595_v20 = vpop.permute.xlu1 %594 }
  0xf3   :  { %780 = vst.msk [vmem:[#allocation4 + $0x38] sm:$0xff] %vm772_vm2, %v595_v20  ;;  %v599_v23 = vpop.permute.xlu0 %598  ;;  %v9165_v20 = vld [vmem:[#allocation2 + $0x1c8] sm:$0xff] }
  0xf4   :  { %782 = vst.msk [vmem:[#allocation4 + $0x48] sm:$0xff] %vm772_vm2, %v599_v23  ;;  %v841_v23 = vld [vmem:[#allocation2 + $0x32] sm:$0xff] }
  0xf5   :  { %422 = vst.msk [vmem:[#allocation4 + $0x110] sm:$0xff] %vm43_vm0, %v9165_v20 }
  0xf7   :  { %686 = vrot.lane.b32.xlu2 %v505_v25, %s8410_s21  ;;  %v840_v25 = vld [vmem:[#allocation2 + $0x22] sm:$0xff] }
  0xf8   :  { %684 = vrot.lane.b32.xlu1 %v504_v26, %s8410_s21  ;;  %v842_v26 = vld [vmem:[#allocation2 + $0x3a] sm:$0xff] }
  0xf9   :  { %v621_v29 = vpop.permute.xlu2 %620  ;;  %688 = vrot.lane.b32.xlu0 %v506_v27, %s8410_s21  ;;  %v9174_v27 = vld [vmem:[#allocation2 + $0x1e0] sm:$0xff] }
  0xfa   :  { %793 = vst.msk [vmem:[#allocation4 + $0xa0] sm:$0xff] %vm772_vm2, %v621_v29  ;;  %v601_v30 = vpop.permute.xlu1 %600 }
  0xfb   :  { %783 = vst.msk [vmem:[#allocation4 + $0x50] sm:$0xff] %vm772_vm2, %v601_v30  ;;  %v605_v32 = vpop.permute.xlu0 %604 }
  0xfc   :  { %785 = vst.msk [vmem:[#allocation4 + $0x60] sm:$0xff] %vm772_vm2, %v605_v32 }
  0xfd   :  { %424 = vst.msk [vmem:[#allocation4 + $0x120] sm:$0xff] %vm43_vm0, %v9174_v27 }
  0xff   :  { %692 = vrot.lane.b32.xlu2 %v508_v35, %s8410_s21  ;;  %v9183_v35 = vld [vmem:[#allocation2 + $0x1e8] sm:$0xff] }
 0x100   :  { %690 = vrot.lane.b32.xlu1 %v507_v36, %s8410_s21  ;;  %v844_v36 = vld [vmem:[#allocation2 + $0x52] sm:$0xff]  ;;  %425 = vst.msk [vmem:[#allocation4 + $0x128] sm:$0xff] %vm43_vm0, %v9183_v35 }
 0x101   :  { %v627_v39 = vpop.permute.xlu2 %626  ;;  %694 = vrot.lane.b32.xlu0 %v509_v37, %s8410_s21  ;;  %v843_v37 = vld [vmem:[#allocation2 + $0x4a] sm:$0xff] }
 0x102   :  { %796 = vst.msk [vmem:[#allocation4 + $0xb8] sm:$0xff] %vm772_vm2, %v627_v39  ;;  %v607_v42 = vpop.permute.xlu1 %606  ;;  %v845_v39 = vld [vmem:[#allocation2 + $0x62] sm:$0xff] }
 0x103   :  { %786 = vst.msk [vmem:[#allocation4 + $0x68] sm:$0xff] %vm772_vm2, %v607_v42  ;;  %v611_v45 = vpop.permute.xlu0 %610  ;;  %v9192_v42 = vld [vmem:[#allocation2 + $0x200] sm:$0xff] }
 0x104   :  { %788 = vst.msk [vmem:[#allocation4 + $0x78] sm:$0xff] %vm772_vm2, %v611_v45 }
 0x105   :  { %427 = vst.msk [vmem:[#allocation4 + $0x138] sm:$0xff] %vm43_vm0, %v9192_v42 }
 0x107   :  { %698 = vrot.lane.b32.xlu2 %v511_v47, %s8410_s21 }
 0x108   :  { %696 = vrot.lane.b32.xlu1 %v510_v48, %s8410_s21  ;;  %v9198_v48 = vld [vmem:[#allocation2 + $0x288] sm:$0xff] }
 0x109   :  { %v633_v54 = vpop.permute.xlu2 %632  ;;  %700 = vrot.lane.b32.xlu0 %v512_v49, %s8410_s21  ;;  %438 = vst.msk [vmem:[#allocation4 + $0x190] sm:$0xff] %vm43_vm0, %v9198_v48 }
 0x10a   :  { %799 = vst.msk [vmem:[#allocation4 + $0xd0] sm:$0xff] %vm772_vm2, %v633_v54  ;;  %v613_v55 = vpop.permute.xlu1 %612  ;;  %v9201_v54 = vld [vmem:[#allocation2 + $0x210] sm:$0xff] }
 0x10b   :  { %789 = vst.msk [vmem:[#allocation4 + $0x80] sm:$0xff] %vm772_vm2, %v613_v55  ;;  %v617_v57 = vpop.permute.xlu0 %616  ;;  %v847_v55 = vld [vmem:[#allocation2 + $0x7a] sm:$0xff] }
 0x10c   :  { %791 = vst.msk [vmem:[#allocation4 + $0x90] sm:$0xff] %vm772_vm2, %v617_v57  ;;  %v846_v57 = vld [vmem:[#allocation2 + $0x6a] sm:$0xff] }
 0x10d   :  { %428 = vst.msk [vmem:[#allocation4 + $0x140] sm:$0xff] %vm43_vm0, %v9201_v54 }
 0x10f   :  { %704 = vrot.lane.b32.xlu2 %v514_v59, %s8410_s21  ;;  %v848_v59 = vld [vmem:[#allocation2 + $0x82] sm:$0xff] }
 0x110   :  { %702 = vrot.lane.b32.xlu1 %v513_v62, %s8410_s21  ;;  %v9210_v62 = vld [vmem:[#allocation2 + $0x228] sm:$0xff] }
 0x111   :  { %v639_v3 = vpop.permute.xlu2 %638  ;;  %706 = vrot.lane.b32.xlu0 %v515_v1, %s8410_s21  ;;  %s8411_s21 = smov 8   ;;  %430 = vst.msk [vmem:[#allocation4 + $0x150] sm:$0xff] %vm43_vm0, %v9210_v62 }
 0x112   :  { %802 = vst.msk [vmem:[#allocation4 + $0xe8] sm:$0xff] %vm772_vm2, %v639_v3  ;;  %v619_v4 = vpop.permute.xlu1 %618 }
 0x113   :  { %792 = vst.msk [vmem:[#allocation4 + $0x98] sm:$0xff] %vm772_vm2, %v619_v4  ;;  %v623_v6 = vpop.permute.xlu0 %622  ;;  %v9216_v4 = vld [vmem:[#allocation2 + $0x2a8] sm:$0xff] }
 0x114   :  { %794 = vst.msk [vmem:[#allocation4 + $0xa8] sm:$0xff] %vm772_vm2, %v623_v6 }
 0x115   :  { %441 = vst.msk [vmem:[#allocation4 + $0x1a8] sm:$0xff] %vm43_vm0, %v9216_v4 }
 0x117   :  { %967 = vrot.lane.b32.xlu2 %v838_v9, %s8411_s21  ;;  %v9219_v9 = vld [vmem:[#allocation2 + $0x230] sm:$0xff] }
 0x118   :  { %965 = vrot.lane.b32.xlu1 %v837_v11, %s8411_s21  ;;  %v850_v11 = vld [vmem:[#allocation2 + $0x9a] sm:$0xff]  ;;  %431 = vst.msk [vmem:[#allocation4 + $0x158] sm:$0xff] %vm43_vm0, %v9219_v9 }
 0x119   :  { %v645_v15 = vpop.permute.xlu2 %644  ;;  %969 = vrot.lane.b32.xlu0 %v839_v13, %s8411_s21  ;;  %v849_v13 = vld [vmem:[#allocation2 + $0x92] sm:$0xff] }
 0x11a   :  { %805 = vst.msk [vmem:[#allocation4 + $0x100] sm:$0xff] %vm772_vm2, %v645_v15  ;;  %v625_v16 = vpop.permute.xlu1 %624  ;;  %v9228_v15 = vld [vmem:[#allocation2 + $0x248] sm:$0xff] }
 0x11b   :  { %795 = vst.msk [vmem:[#allocation4 + $0xb0] sm:$0xff] %vm772_vm2, %v625_v16  ;;  %v629_v19 = vpop.permute.xlu0 %628 }
 0x11c   :  { %797 = vst.msk [vmem:[#allocation4 + $0xc0] sm:$0xff] %vm772_vm2, %v629_v19 }
 0x11d   :  { %433 = vst.msk [vmem:[#allocation4 + $0x168] sm:$0xff] %vm43_vm0, %v9228_v15 }
 0x11f   :  { %973 = vrot.lane.b32.xlu2 %v841_v23, %s8411_s21  ;;  %v9234_v23 = vld [vmem:[#allocation2 + $0x2d0] sm:$0xff] }
 0x120   :  { %971 = vrot.lane.b32.xlu1 %v840_v25, %s8411_s21  ;;  %444 = vst.msk [vmem:[#allocation4 + $0x1c0] sm:$0xff] %vm43_vm0, %v9234_v23 }
 0x121   :  { %v651_v29 = vpop.permute.xlu2 %650  ;;  %975 = vrot.lane.b32.xlu0 %v842_v26, %s8411_s21  ;;  %v9237_v26 = vld [vmem:[#allocation2 + $0x258] sm:$0xff] }
 0x122   :  { %808 = vst.msk [vmem:[#allocation4 + $0x118] sm:$0xff] %vm772_vm2, %v651_v29  ;;  %v631_v30 = vpop.permute.xlu1 %630  ;;  %v853_v29 = vld [vmem:[#allocation2 + $0xc2] sm:$0xff] }
 0x123   :  { %798 = vst.msk [vmem:[#allocation4 + $0xc8] sm:$0xff] %vm772_vm2, %v631_v30  ;;  %v635_v32 = vpop.permute.xlu0 %634  ;;  %v852_v30 = vld [vmem:[#allocation2 + $0xb2] sm:$0xff] }
 0x124   :  { %800 = vst.msk [vmem:[#allocation4 + $0xd8] sm:$0xff] %vm772_vm2, %v635_v32  ;;  %v854_v32 = vld [vmem:[#allocation2 + $0xca] sm:$0xff] }
 0x125   :  { %434 = vst.msk [vmem:[#allocation4 + $0x170] sm:$0xff] %vm43_vm0, %v9237_v26 }
 0x127   :  { %979 = vrot.lane.b32.xlu2 %v844_v36, %s8411_s21  ;;  %v9246_v36 = vld [vmem:[#allocation2 + $0x270] sm:$0xff] }
 0x128   :  { %977 = vrot.lane.b32.xlu1 %v843_v37, %s8411_s21  ;;  %436 = vst.msk [vmem:[#allocation4 + $0x180] sm:$0xff] %vm43_vm0, %v9246_v36 }
 0x129   :  { %v657_v45 = vpop.permute.xlu2 %656  ;;  %981 = vrot.lane.b32.xlu0 %v845_v39, %s8411_s21 }
 0x12a   :  { %811 = vst.msk [vmem:[#allocation4 + $0x130] sm:$0xff] %vm772_vm2, %v657_v45  ;;  %v637_v47 = vpop.permute.xlu1 %636  ;;  %v9252_v45 = vld [vmem:[#allocation2 + $0x2f0] sm:$0xff] }
 0x12b   :  { %801 = vst.msk [vmem:[#allocation4 + $0xe0] sm:$0xff] %vm772_vm2, %v637_v47  ;;  %v641_v49 = vpop.permute.xlu0 %640 }
 0x12c   :  { %803 = vst.msk [vmem:[#allocation4 + $0xf0] sm:$0xff] %vm772_vm2, %v641_v49  ;;  %v9255_v49 = vld [vmem:[#allocation2 + $0x278] sm:$0xff] }
 0x12d   :  { %447 = vst.msk [vmem:[#allocation4 + $0x1d8] sm:$0xff] %vm43_vm0, %v9252_v45 }
 0x12e   :  { %437 = vst.msk [vmem:[#allocation4 + $0x188] sm:$0xff] %vm43_vm0, %v9255_v49 }
 0x12f   :  { %985 = vrot.lane.b32.xlu2 %v847_v55, %s8411_s21  ;;  %v856_v55 = vld [vmem:[#allocation2 + $0xe2] sm:$0xff] }
 0x130   :  { %983 = vrot.lane.b32.xlu1 %v846_v57, %s8411_s21  ;;  %v855_v57 = vld [vmem:[#allocation2 + $0xda] sm:$0xff] }
 0x131   :  { %v663_v1 = vpop.permute.xlu2 %662  ;;  %987 = vrot.lane.b32.xlu0 %v848_v59, %s8411_s21  ;;  %v857_v59 = vld [vmem:[#allocation2 + $0xf2] sm:$0xff] }
 0x132   :  { %814 = vst.msk [vmem:[#allocation4 + $0x148] sm:$0xff] %vm772_vm2, %v663_v1  ;;  %v643_v3 = vpop.permute.xlu1 %642  ;;  %v9264_v1 = vld [vmem:[#allocation2 + $0x290] sm:$0xff] }
 0x133   :  { %804 = vst.msk [vmem:[#allocation4 + $0xf8] sm:$0xff] %vm772_vm2, %v643_v3  ;;  %v647_v6 = vpop.permute.xlu0 %646 }
 0x134   :  { %806 = vst.msk [vmem:[#allocation4 + $0x108] sm:$0xff] %vm772_vm2, %v647_v6 }
 0x135   :  { %439 = vst.msk [vmem:[#allocation4 + $0x198] sm:$0xff] %vm43_vm0, %v9264_v1 }
 0x137   :  { %991 = vrot.lane.b32.xlu2 %v850_v11, %s8411_s21  ;;  %v9270_v11 = vld [vmem:[#allocation2 + $0x318] sm:$0xff] }
 0x138   :  { %989 = vrot.lane.b32.xlu1 %v849_v13, %s8411_s21  ;;  %450 = vst.msk [vmem:[#allocation4 + $0x1f0] sm:$0xff] %vm43_vm0, %v9270_v11 }
 0x139   :  { %v669_v16 = vpop.permute.xlu2 %668  ;;  %993 = vrot.lane.b32.xlu0 %v851_v14, %s8411_s21  ;;  %v9273_v14 = vld [vmem:[#allocation2 + $0x2a0] sm:$0xff] }
 0x13a   :  { %817 = vst.msk [vmem:[#allocation4 + $0x160] sm:$0xff] %vm772_vm2, %v669_v16  ;;  %v649_v19 = vpop.permute.xlu1 %648  ;;  %v859_v16 = vld [vmem:[#allocation2 + $0x10a] sm:$0xff] }
 0x13b   :  { %807 = vst.msk [vmem:[#allocation4 + $0x110] sm:$0xff] %vm772_vm2, %v649_v19  ;;  %v653_v25 = vpop.permute.xlu0 %652  ;;  %v858_v19 = vld [vmem:[#allocation2 + $0xfa] sm:$0xff] }
 0x13c   :  { %809 = vst.msk [vmem:[#allocation4 + $0x120] sm:$0xff] %vm772_vm2, %v653_v25  ;;  %v860_v25 = vld [vmem:[#allocation2 + $0x112] sm:$0xff] }
 0x13d   :  { %440 = vst.msk [vmem:[#allocation4 + $0x1a0] sm:$0xff] %vm43_vm0, %v9273_v14 }
 0x13f   :  { %997 = vrot.lane.b32.xlu2 %v853_v29, %s8411_s21  ;;  %v9282_v29 = vld [vmem:[#allocation2 + $0x2b8] sm:$0xff] }
 0x140   :  { %995 = vrot.lane.b32.xlu1 %v852_v30, %s8411_s21  ;;  %442 = vst.msk [vmem:[#allocation4 + $0x1b0] sm:$0xff] %vm43_vm0, %v9282_v29 }
 0x141   :  { %v675_v37 = vpop.permute.xlu2 %674  ;;  %999 = vrot.lane.b32.xlu0 %v854_v32, %s8411_s21 }
 0x142   :  { %820 = vst.msk [vmem:[#allocation4 + $0x178] sm:$0xff] %vm772_vm2, %v675_v37  ;;  %v655_v39 = vpop.permute.xlu1 %654  ;;  %v9288_v37 = vld [vmem:[#allocation2 + $0x2c0] sm:$0xff] }
 0x143   :  { %810 = vst.msk [vmem:[#allocation4 + $0x128] sm:$0xff] %vm772_vm2, %v655_v39  ;;  %v659_v47 = vpop.permute.xlu0 %658 }
 0x144   :  { %812 = vst.msk [vmem:[#allocation4 + $0x138] sm:$0xff] %vm772_vm2, %v659_v47  ;;  %v862_v47 = vld [vmem:[#allocation2 + $0x12a] sm:$0xff] }
 0x145   :  { %443 = vst.msk [vmem:[#allocation4 + $0x1b8] sm:$0xff] %vm43_vm0, %v9288_v37 }
 0x147   :  { %1003 = vrot.lane.b32.xlu2 %v856_v55, %s8411_s21  ;;  %v861_v55 = vld [vmem:[#allocation2 + $0x122] sm:$0xff] }
 0x148   :  { %1001 = vrot.lane.b32.xlu1 %v855_v57, %s8411_s21  ;;  %v863_v57 = vld [vmem:[#allocation2 + $0x13a] sm:$0xff] }
 0x149   :  { %v681_v3 = vpop.permute.xlu2 %680  ;;  %1005 = vrot.lane.b32.xlu0 %v857_v59, %s8411_s21  ;;  %v9296_v59 = vld [vmem:[#allocation2 + $0x2d8] sm:$0xff] }
 0x14a   :  { %823 = vst.msk [vmem:[#allocation4 + $0x190] sm:$0xff] %vm772_vm2, %v681_v3  ;;  %v661_v6 = vpop.permute.xlu1 %660 }
 0x14b   :  { %813 = vst.msk [vmem:[#allocation4 + $0x140] sm:$0xff] %vm772_vm2, %v661_v6  ;;  %v665_v13 = vpop.permute.xlu0 %664 }
 0x14c   :  { %815 = vst.msk [vmem:[#allocation4 + $0x150] sm:$0xff] %vm772_vm2, %v665_v13  ;;  %v9302_v13 = vld [vmem:[#allocation2 + $0x2e8] sm:$0xff] }
 0x14d   :  { %445 = vst.msk [vmem:[#allocation4 + $0x1c8] sm:$0xff] %vm43_vm0, %v9296_v59 }
 0x14e   :  { %446 = vst.msk [vmem:[#allocation4 + $0x1d0] sm:$0xff] %vm43_vm0, %v9302_v13 }
 0x14f   :  { %1009 = vrot.lane.b32.xlu2 %v859_v16, %s8411_s21 }
 0x150   :  { %1007 = vrot.lane.b32.xlu1 %v858_v19, %s8411_s21  ;;  %v865_v19 = vld [vmem:[#allocation2 + $0x152] sm:$0xff] }
 0x151   :  { %v687_v30 = vpop.permute.xlu2 %686  ;;  %1011 = vrot.lane.b32.xlu0 %v860_v25, %s8411_s21  ;;  %v864_v25 = vld [vmem:[#allocation2 + $0x142] sm:$0xff] }
 0x152   :  { %826 = vst.msk [vmem:[#allocation4 + $0x1a8] sm:$0xff] %vm772_vm2, %v687_v30  ;;  %v667_v32 = vpop.permute.xlu1 %666  ;;  %v866_v30 = vld [vmem:[#allocation2 + $0x15a] sm:$0xff] }
 0x153   :  { %816 = vst.msk [vmem:[#allocation4 + $0x158] sm:$0xff] %vm772_vm2, %v667_v32  ;;  %v671_v39 = vpop.permute.xlu0 %670  ;;  %v9310_v32 = vld [vmem:[#allocation2 + $0x300] sm:$0xff] }
 0x154   :  { %818 = vst.msk [vmem:[#allocation4 + $0x168] sm:$0xff] %vm772_vm2, %v671_v39 }
 0x155   :  { %448 = vst.msk [vmem:[#allocation4 + $0x1e0] sm:$0xff] %vm43_vm0, %v9310_v32 }
 0x157   :  { %1015 = vrot.lane.b32.xlu2 %v862_v47, %s8411_s21 }
 0x158   :  { %1013 = vrot.lane.b32.xlu1 %v861_v55, %s8411_s21  ;;  %v9316_v55 = vld [vmem:[#allocation2 + $0x308] sm:$0xff] }
 0x159   :  { %v693_v3 = vpop.permute.xlu2 %692  ;;  %1017 = vrot.lane.b32.xlu0 %v863_v57, %s8411_s21  ;;  %449 = vst.msk [vmem:[#allocation4 + $0x1e8] sm:$0xff] %vm43_vm0, %v9316_v55 }
 0x15a   :  { %829 = vst.msk [vmem:[#allocation4 + $0x1c0] sm:$0xff] %vm772_vm2, %v693_v3  ;;  %v673_v6 = vpop.permute.xlu1 %672  ;;  %v868_v3 = vld [vmem:[#allocation2 + $0x172] sm:$0xff] }
 0x15b   :  { %819 = vst.msk [vmem:[#allocation4 + $0x170] sm:$0xff] %vm772_vm2, %v673_v6  ;;  %v677_v16 = vpop.permute.xlu0 %676  ;;  %v867_v6 = vld [vmem:[#allocation2 + $0x16a] sm:$0xff] }
 0x15c   :  { %821 = vst.msk [vmem:[#allocation4 + $0x180] sm:$0xff] %vm772_vm2, %v677_v16  ;;  %v869_v16 = vld [vmem:[#allocation2 + $0x1b2] sm:$0xff] }
 0x15f   :  { %1021 = vrot.lane.b32.xlu2 %v865_v19, %s8411_s21  ;;  %v9324_v19 = vld [vmem:[#allocation2 + $0x320] sm:$0xff] }
 0x160   :  { %1019 = vrot.lane.b32.xlu1 %v864_v25, %s8411_s21  ;;  %451 = vst.msk [vmem:[#allocation4 + $0x1f8] sm:$0xff] %vm43_vm0, %v9324_v19 }
 0x161   :  { %v699_v39 = vpop.permute.xlu2 %698  ;;  %1023 = vrot.lane.b32.xlu0 %v866_v30, %s8411_s21 }
 0x162   :  { %832 = vst.msk [vmem:[#allocation4 + $0x1d8] sm:$0xff] %vm772_vm2, %v699_v39  ;;  %v679_v47 = vpop.permute.xlu1 %678 }
 0x163   :  { %822 = vst.msk [vmem:[#allocation4 + $0x188] sm:$0xff] %vm772_vm2, %v679_v47  ;;  %v683_v57 = vpop.permute.xlu0 %682  ;;  %v871_v47 = vld [vmem:[#allocation2 + $0x1ca] sm:$0xff] }
 0x164   :  { %824 = vst.msk [vmem:[#allocation4 + $0x198] sm:$0xff] %vm772_vm2, %v683_v57  ;;  %v870_v57 = vld [vmem:[#allocation2 + $0x1ba] sm:$0xff] }
 0x167   :  { %1027 = vrot.lane.b32.xlu2 %v868_v3, %s8411_s21  ;;  %v872_v3 = vld [vmem:[#allocation2 + $0x1d2] sm:$0xff] }
 0x168   :  { %1025 = vrot.lane.b32.xlu1 %v867_v6, %s8411_s21 }
 0x169   :  { %v705_v25 = vpop.permute.xlu2 %704  ;;  %1029 = vrot.lane.b32.xlu0 %v869_v16, %s8411_s21 }
 0x16a   :  { %835 = vst.msk [vmem:[#allocation4 + $0x1f0] sm:$0xff] %vm772_vm2, %v705_v25  ;;  %v685_v30 = vpop.permute.xlu1 %684 }
 0x16b   :  { %825 = vst.msk [vmem:[#allocation4 + $0x1a0] sm:$0xff] %vm772_vm2, %v685_v30  ;;  %v689_v39 = vpop.permute.xlu0 %688  ;;  %v874_v30 = vld [vmem:[#allocation2 + $0x1ea] sm:$0xff] }
 0x16c   :  { %827 = vst.msk [vmem:[#allocation4 + $0x1b0] sm:$0xff] %vm772_vm2, %v689_v39  ;;  %v873_v39 = vld [vmem:[#allocation2 + $0x1e2] sm:$0xff] }
 0x16f   :  { %1033 = vrot.lane.b32.xlu2 %v871_v47, %s8411_s21 }
 0x170   :  { %1031 = vrot.lane.b32.xlu1 %v870_v57, %s8411_s21 }
 0x171   :  { %v968_v6 = vpop.permute.xlu2 %967  ;;  %1035 = vrot.lane.b32.xlu0 %v872_v3, %s8411_s21 }
 0x172   :  { %v691_v16 = vpop.permute.xlu1 %690  ;;  %1159 = vst.msk [vmem:[#allocation4 + $0x8] sm:$0xff] %vm1157_vm3, %v968_v6  ;;  %v877_v6 = vld [vmem:[#allocation2 + $0x212] sm:$0xff] }
 0x173   :  { %828 = vst.msk [vmem:[#allocation4 + $0x1b8] sm:$0xff] %vm772_vm2, %v691_v16  ;;  %v695_v25 = vpop.permute.xlu0 %694  ;;  %v876_v16 = vld [vmem:[#allocation2 + $0x202] sm:$0xff] }
 0x174   :  { %830 = vst.msk [vmem:[#allocation4 + $0x1c8] sm:$0xff] %vm772_vm2, %v695_v25  ;;  %v878_v25 = vld [vmem:[#allocation2 + $0x21a] sm:$0xff] }
 0x177   :  { %1039 = vrot.lane.b32.xlu2 %v874_v30, %s8411_s21 }
 0x178   :  { %1037 = vrot.lane.b32.xlu1 %v873_v39, %s8411_s21 }
 0x179   :  { %v974_v47 = vpop.permute.xlu2 %973  ;;  %1041 = vrot.lane.b32.xlu0 %v875_v0, %s8411_s21 }
 0x17a   :  { %v697_v57 = vpop.permute.xlu1 %696  ;;  %1162 = vst.msk [vmem:[#allocation4 + $0x20] sm:$0xff] %vm1157_vm3, %v974_v47  ;;  %v880_v47 = vld [vmem:[#allocation2 + $0x232] sm:$0xff] }
 0x17b   :  { %831 = vst.msk [vmem:[#allocation4 + $0x1d0] sm:$0xff] %vm772_vm2, %v697_v57  ;;  %v701_v3 = vpop.permute.xlu0 %700  ;;  %v879_v57 = vld [vmem:[#allocation2 + $0x22a] sm:$0xff] }
 0x17c   :  { %833 = vst.msk [vmem:[#allocation4 + $0x1e0] sm:$0xff] %vm772_vm2, %v701_v3  ;;  %v881_v3 = vld [vmem:[#allocation2 + $0x242] sm:$0xff] }
 0x17f   :  { %1045 = vrot.lane.b32.xlu2 %v877_v6, %s8411_s21 }
 0x180   :  { %1043 = vrot.lane.b32.xlu1 %v876_v16, %s8411_s21 }
 0x181   :  { %v980_v30 = vpop.permute.xlu2 %979  ;;  %1047 = vrot.lane.b32.xlu0 %v878_v25, %s8411_s21 }
 0x182   :  { %v703_v39 = vpop.permute.xlu1 %702  ;;  %1165 = vst.msk [vmem:[#allocation4 + $0x38] sm:$0xff] %vm1157_vm3, %v980_v30  ;;  %v883_v30 = vld [vmem:[#allocation2 + $0x25a] sm:$0xff] }
 0x183   :  { %834 = vst.msk [vmem:[#allocation4 + $0x1e8] sm:$0xff] %vm772_vm2, %v703_v39  ;;  %v707_v0 = vpop.permute.xlu0 %706  ;;  %v882_v39 = vld [vmem:[#allocation2 + $0x24a] sm:$0xff] }
 0x184   :  { %836 = vst.msk [vmem:[#allocation4 + $0x1f8] sm:$0xff] %vm772_vm2, %v707_v0  ;;  %v884_v0 = vld [vmem:[#allocation2 + $0x262] sm:$0xff]  ;;  %vm5019_vm2 = vcmask 1045509  }
 0x187   :  { %1051 = vrot.lane.b32.xlu2 %v880_v47, %s8411_s21 }
 0x188   :  { %1049 = vrot.lane.b32.xlu1 %v879_v57, %s8411_s21 }
 0x189   :  { %v986_v6 = vpop.permute.xlu2 %985  ;;  %1053 = vrot.lane.b32.xlu0 %v881_v3, %s8411_s21 }
 0x18a   :  { %1168 = vst.msk [vmem:[#allocation4 + $0x50] sm:$0xff] %vm1157_vm3, %v986_v6  ;;  %v966_v16 = vpop.permute.xlu1 %965  ;;  %v886_v6 = vld [vmem:[#allocation2 + $0x27a] sm:$0xff] }
 0x18b   :  { %1158 = vst.msk [vmem:[#allocation4] sm:$0xff] %vm1157_vm3, %v966_v16  ;;  %v970_v25 = vpop.permute.xlu0 %969  ;;  %v885_v16 = vld [vmem:[#allocation2 + $0x272] sm:$0xff] }
 0x18c   :  { %1160 = vst.msk [vmem:[#allocation4 + $0x10] sm:$0xff] %vm1157_vm3, %v970_v25  ;;  %v887_v25 = vld [vmem:[#allocation2 + $0x28a] sm:$0xff] }
 0x18f   :  { %1057 = vrot.lane.b32.xlu2 %v883_v30, %s8411_s21 }
 0x190   :  { %1055 = vrot.lane.b32.xlu1 %v882_v39, %s8411_s21 }
 0x191   :  { %v992_v47 = vpop.permute.xlu2 %991  ;;  %1059 = vrot.lane.b32.xlu0 %v884_v0, %s8411_s21 }
 0x192   :  { %1171 = vst.msk [vmem:[#allocation4 + $0x68] sm:$0xff] %vm1157_vm3, %v992_v47  ;;  %v972_v57 = vpop.permute.xlu1 %971  ;;  %v889_v47 = vld [vmem:[#allocation2 + $0x2a2] sm:$0xff] }
 0x193   :  { %1161 = vst.msk [vmem:[#allocation4 + $0x18] sm:$0xff] %vm1157_vm3, %v972_v57  ;;  %v976_v3 = vpop.permute.xlu0 %975  ;;  %v888_v57 = vld [vmem:[#allocation2 + $0x292] sm:$0xff] }
 0x194   :  { %1163 = vst.msk [vmem:[#allocation4 + $0x28] sm:$0xff] %vm1157_vm3, %v976_v3  ;;  %v890_v3 = vld [vmem:[#allocation2 + $0x2aa] sm:$0xff] }
 0x197   :  { %1063 = vrot.lane.b32.xlu2 %v886_v6, %s8411_s21 }
 0x198   :  { %1061 = vrot.lane.b32.xlu1 %v885_v16, %s8411_s21 }
 0x199   :  { %v998_v30 = vpop.permute.xlu2 %997  ;;  %1065 = vrot.lane.b32.xlu0 %v887_v25, %s8411_s21 }
 0x19a   :  { %1174 = vst.msk [vmem:[#allocation4 + $0x80] sm:$0xff] %vm1157_vm3, %v998_v30  ;;  %v978_v39 = vpop.permute.xlu1 %977  ;;  %v892_v30 = vld [vmem:[#allocation2 + $0x2c2] sm:$0xff] }
 0x19b   :  { %1164 = vst.msk [vmem:[#allocation4 + $0x30] sm:$0xff] %vm1157_vm3, %v978_v39  ;;  %v982_v0 = vpop.permute.xlu0 %981  ;;  %v891_v39 = vld [vmem:[#allocation2 + $0x2ba] sm:$0xff] }
 0x19c   :  { %1166 = vst.msk [vmem:[#allocation4 + $0x40] sm:$0xff] %vm1157_vm3, %v982_v0  ;;  %v893_v0 = vld [vmem:[#allocation2 + $0x2d2] sm:$0xff] }
 0x19f   :  { %1069 = vrot.lane.b32.xlu2 %v889_v47, %s8411_s21 }
 0x1a0   :  { %1067 = vrot.lane.b32.xlu1 %v888_v57, %s8411_s21 }
 0x1a1   :  { %v1004_v6 = vpop.permute.xlu2 %1003  ;;  %1071 = vrot.lane.b32.xlu0 %v890_v3, %s8411_s21 }
 0x1a2   :  { %1177 = vst.msk [vmem:[#allocation4 + $0x98] sm:$0xff] %vm1157_vm3, %v1004_v6  ;;  %v984_v16 = vpop.permute.xlu1 %983  ;;  %v895_v6 = vld [vmem:[#allocation2 + $0x2ea] sm:$0xff] }
 0x1a3   :  { %1167 = vst.msk [vmem:[#allocation4 + $0x48] sm:$0xff] %vm1157_vm3, %v984_v16  ;;  %v988_v25 = vpop.permute.xlu0 %987  ;;  %v894_v16 = vld [vmem:[#allocation2 + $0x2da] sm:$0xff] }
 0x1a4   :  { %1169 = vst.msk [vmem:[#allocation4 + $0x58] sm:$0xff] %vm1157_vm3, %v988_v25  ;;  %v896_v25 = vld [vmem:[#allocation2 + $0x2f2] sm:$0xff] }
 0x1a7   :  { %1075 = vrot.lane.b32.xlu2 %v892_v30, %s8411_s21 }
 0x1a8   :  { %1073 = vrot.lane.b32.xlu1 %v891_v39, %s8411_s21 }
 0x1a9   :  { %v1010_v47 = vpop.permute.xlu2 %1009  ;;  %1077 = vrot.lane.b32.xlu0 %v893_v0, %s8411_s21 }
 0x1aa   :  { %1180 = vst.msk [vmem:[#allocation4 + $0xb0] sm:$0xff] %vm1157_vm3, %v1010_v47  ;;  %v990_v57 = vpop.permute.xlu1 %989  ;;  %v898_v47 = vld [vmem:[#allocation2 + $0x30a] sm:$0xff] }
 0x1ab   :  { %1170 = vst.msk [vmem:[#allocation4 + $0x60] sm:$0xff] %vm1157_vm3, %v990_v57  ;;  %v994_v3 = vpop.permute.xlu0 %993  ;;  %v897_v57 = vld [vmem:[#allocation2 + $0x302] sm:$0xff] }
 0x1ac   :  { %1172 = vst.msk [vmem:[#allocation4 + $0x70] sm:$0xff] %vm1157_vm3, %v994_v3  ;;  %v899_v3 = vld [vmem:[#allocation2 + $0x31a] sm:$0xff] }
 0x1af   :  { %1081 = vrot.lane.b32.xlu2 %v895_v6, %s8411_s21 }
 0x1b0   :  { %1079 = vrot.lane.b32.xlu1 %v894_v16, %s8411_s21 }
 0x1b1   :  { %v1016_v30 = vpop.permute.xlu2 %1015  ;;  %1083 = vrot.lane.b32.xlu0 %v896_v25, %s8411_s21 }
 0x1b2   :  { %1183 = vst.msk [vmem:[#allocation4 + $0xc8] sm:$0xff] %vm1157_vm3, %v1016_v30  ;;  %v996_v39 = vpop.permute.xlu1 %995  ;;  %v900_v30 = vld [vmem:[#allocation2 + $0x322] sm:$0xff] }
 0x1b3   :  { %1173 = vst.msk [vmem:[#allocation4 + $0x78] sm:$0xff] %vm1157_vm3, %v996_v39  ;;  %v1000_v0 = vpop.permute.xlu0 %999 }
 0x1b4   :  { %1175 = vst.msk [vmem:[#allocation4 + $0x88] sm:$0xff] %vm1157_vm3, %v1000_v0 }
 0x1b7   :  { %1087 = vrot.lane.b32.xlu2 %v898_v47, %s8411_s21 }
 0x1b8   :  { %1085 = vrot.lane.b32.xlu1 %v897_v57, %s8411_s21  ;;  %v9399_v57 = vld [vmem:[#allocation2 + $0x38] sm:$0xff] }
 0x1b9   :  { %v1022_v6 = vpop.permute.xlu2 %1021  ;;  %1089 = vrot.lane.b32.xlu0 %v899_v3, %s8411_s21  ;;  %v9402_v3 = vld [vmem:[#allocation2 + $0x30] sm:$0xff] }
 0x1ba   :  { %1186 = vst.msk [vmem:[#allocation4 + $0xe0] sm:$0xff] %vm1157_vm3, %v1022_v6  ;;  %v1002_v16 = vpop.permute.xlu1 %1001 }
 0x1bb   :  { %1176 = vst.msk [vmem:[#allocation4 + $0x90] sm:$0xff] %vm1157_vm3, %v1002_v16  ;;  %v1006_v25 = vpop.permute.xlu0 %1005  ;;  %v9412_v16 = vld [vmem:[#allocation2 + $0x60] sm:$0xff] }
 0x1bc   :  { %1178 = vst.msk [vmem:[#allocation4 + $0xa0] sm:$0xff] %vm1157_vm3, %v1006_v25 }
 0x1bf   :  { %1350 = vrot.lane.b32.xlu2 %v8919_v22, %s8412_s23 }
 0x1c0   :  { %1091 = vrot.lane.b32.xlu1 %v900_v30, %s8411_s21 }
 0x1c1   :  { %v1028_v39 = vpop.permute.xlu2 %1027  ;;  %1352 = vrot.lane.b32.xlu0 %v8942_v33, %s8412_s23 }
 0x1c2   :  { %1189 = vst.msk [vmem:[#allocation4 + $0xf8] sm:$0xff] %vm1157_vm3, %v1028_v39  ;;  %v1008_v0 = vpop.permute.xlu1 %1007  ;;  %v1231_v39 = vld [vmem:[#allocation2 + $0x80] sm:$0xff] }
 0x1c3   :  { %1179 = vst.msk [vmem:[#allocation4 + $0xa8] sm:$0xff] %vm1157_vm3, %v1008_v0  ;;  %v1012_v47 = vpop.permute.xlu0 %1011 }
 0x1c4   :  { %1181 = vst.msk [vmem:[#allocation4 + $0xb8] sm:$0xff] %vm1157_vm3, %v1012_v47  ;;  %v1234_v47 = vld [vmem:[#allocation2 + $0xa8] sm:$0xff] }
 0x1c7   :  { %1356 = vrot.lane.b32.xlu2 %v9399_v57, %s8412_s23 }
 0x1c8   :  { %1354 = vrot.lane.b32.xlu1 %v9402_v3, %s8412_s23 }
 0x1c9   :  { %v1034_v22 = vpop.permute.xlu2 %1033  ;;  %1358 = vrot.lane.b32.xlu0 %v8961_v40, %s8412_s23 }
 0x1ca   :  { %1192 = vst.msk [vmem:[#allocation4 + $0x110] sm:$0xff] %vm1157_vm3, %v1034_v22  ;;  %v1014_v33 = vpop.permute.xlu1 %1013 }
 0x1cb   :  { %1182 = vst.msk [vmem:[#allocation4 + $0xc0] sm:$0xff] %vm1157_vm3, %v1014_v33  ;;  %v1018_v6 = vpop.permute.xlu0 %1017  ;;  %v225_v33 = vld [vmem:[%s12277_s0 + $0xf0] sm:$0xff] }
 0x1cc   :  { %1184 = vst.msk [vmem:[#allocation4 + $0xd0] sm:$0xff] %vm1157_vm3, %v1018_v6 }
 0x1cd   :  { %290 = vst.msk [vmem:[#allocation2 + $0x181] sm:$0xff] %vm43_vm0, %v225_v33  ;;  %v1608_v33 = vld [vmem:[#allocation2 + $0x21] sm:$0xff] }
 0x1cf   :  { %1362 = vrot.lane.b32.xlu2 %v9412_v16, %s8412_s23 }
 0x1d0   :  { %1360 = vrot.lane.b32.xlu1 %v8969_v43, %s8412_s23 }
 0x1d1   :  { %v1040_v25 = vpop.permute.xlu2 %1039  ;;  %1364 = vrot.lane.b32.xlu0 %v8989_v50, %s8412_s23 }
 0x1d2   :  { %1195 = vst.msk [vmem:[#allocation4 + $0x128] sm:$0xff] %vm1157_vm3, %v1040_v25  ;;  %v1020_v40 = vpop.permute.xlu1 %1019 }
 0x1d3   :  { %1185 = vst.msk [vmem:[#allocation4 + $0xd8] sm:$0xff] %vm1157_vm3, %v1020_v40  ;;  %v1024_v30 = vpop.permute.xlu0 %1023 }
 0x1d4   :  { %1187 = vst.msk [vmem:[#allocation4 + $0xe8] sm:$0xff] %vm1157_vm3, %v1024_v30  ;;  %v1252_v40 = vld [vmem:[#allocation2 + $0x180] sm:$0xff] }
 0x1d7   :  { %1368 = vrot.lane.b32.xlu2 %v1231_v39, %s8412_s23 }
 0x1d8   :  { %1366 = vrot.lane.b32.xlu1 %v8997_v53, %s8412_s23 }
 0x1d9   :  { %v1046_v0 = vpop.permute.xlu2 %1045  ;;  %1370 = vrot.lane.b32.xlu0 %v9017_v60, %s8412_s23 }
 0x1da   :  { %1198 = vst.msk [vmem:[#allocation4 + $0x140] sm:$0xff] %vm1157_vm3, %v1046_v0  ;;  %v1026_v43 = vpop.permute.xlu1 %1025 }
 0x1db   :  { %1188 = vst.msk [vmem:[#allocation4 + $0xf0] sm:$0xff] %vm1157_vm3, %v1026_v43  ;;  %v1030_v50 = vpop.permute.xlu0 %1029 }
 0x1dc   :  { %1190 = vst.msk [vmem:[#allocation4 + $0x100] sm:$0xff] %vm1157_vm3, %v1030_v50 }
 0x1df   :  { %1374 = vrot.lane.b32.xlu2 %v1234_v47, %s8412_s23 }
 0x1e0   :  { %1372 = vrot.lane.b32.xlu1 %v9025_v63, %s8412_s23 }
 0x1e1   :  { %v1052_v22 = vpop.permute.xlu2 %1051  ;;  %1376 = vrot.lane.b32.xlu0 %v9045_v7, %s8412_s23 }
 0x1e2   :  { %1201 = vst.msk [vmem:[#allocation4 + $0x158] sm:$0xff] %vm1157_vm3, %v1052_v22  ;;  %v1032_v53 = vpop.permute.xlu1 %1031 }
 0x1e3   :  { %1191 = vst.msk [vmem:[#allocation4 + $0x108] sm:$0xff] %vm1157_vm3, %v1032_v53  ;;  %v1036_v60 = vpop.permute.xlu0 %1035  ;;  %v1607_v53 = vld [vmem:[#allocation2 + $0x19] sm:$0xff] }
 0x1e4   :  { %1193 = vst.msk [vmem:[#allocation4 + $0x118] sm:$0xff] %vm1157_vm3, %v1036_v60  ;;  %v9603_v60 = vld [vmem:[#allocation2 + $0x31] sm:$0xff] }
 0x1e7   :  { %1380 = vrot.lane.b32.xlu2 %v8963_v41, %s8412_s23  ;;  %v226_v41 = vld [vmem:[%s12277_s0 + $0xf8] sm:$0xff] }
 0x1e8   :  { %1378 = vrot.lane.b32.xlu1 %v9055_v12, %s8412_s23  ;;  %291 = vst.msk [vmem:[#allocation2 + $0x189] sm:$0xff] %vm43_vm0, %v226_v41 }
 0x1e9   :  { %v1058_v63 = vpop.permute.xlu2 %1057  ;;  %1382 = vrot.lane.b32.xlu0 %v9071_v18, %s8412_s23 }
 0x1ea   :  { %1204 = vst.msk [vmem:[#allocation4 + $0x170] sm:$0xff] %vm1157_vm3, %v1058_v63  ;;  %v1038_v7 = vpop.permute.xlu1 %1037  ;;  %v9606_v63 = vld [vmem:[#allocation2 + $0x39] sm:$0xff] }
 0x1eb   :  { %1194 = vst.msk [vmem:[#allocation4 + $0x120] sm:$0xff] %vm1157_vm3, %v1038_v7  ;;  %v1042_v6 = vpop.permute.xlu0 %1041 }
 0x1ec   :  { %1196 = vst.msk [vmem:[#allocation4 + $0x130] sm:$0xff] %vm1157_vm3, %v1042_v6 }
 0x1ef   :  { %1386 = vrot.lane.b32.xlu2 %v8991_v51, %s8412_s23  ;;  %v1253_v30 = vld [vmem:[#allocation2 + $0x188] sm:$0xff] }
 0x1f0   :  { %1384 = vrot.lane.b32.xlu1 %v9081_v24, %s8412_s23 }
 0x1f1   :  { %v1064_v12 = vpop.permute.xlu2 %1063  ;;  %1388 = vrot.lane.b32.xlu0 %v9090_v28, %s8412_s23 }
 0x1f2   :  { %1207 = vst.msk [vmem:[#allocation4 + $0x188] sm:$0xff] %vm1157_vm3, %v1064_v12  ;;  %v1044_v18 = vpop.permute.xlu1 %1043  ;;  %v9615_v12 = vld [vmem:[#allocation2 + $0x51] sm:$0xff] }
 0x1f3   :  { %1197 = vst.msk [vmem:[#allocation4 + $0x138] sm:$0xff] %vm1157_vm3, %v1044_v18  ;;  %v1048_v25 = vpop.permute.xlu0 %1047  ;;  %v9618_v18 = vld [vmem:[#allocation2 + $0x49] sm:$0xff] }
 0x1f4   :  { %1199 = vst.msk [vmem:[#allocation4 + $0x148] sm:$0xff] %vm1157_vm3, %v1048_v25  ;;  %v9620_v25 = vld [vmem:[#allocation2 + $0x61] sm:$0xff] }
 0x1f7   :  { %1392 = vrot.lane.b32.xlu2 %v9019_v61, %s8412_s23 }
 0x1f8   :  { %1390 = vrot.lane.b32.xlu1 %v9097_v34, %s8412_s23 }
 0x1f9   :  { %v1070_v51 = vpop.permute.xlu2 %1069  ;;  %1394 = vrot.lane.b32.xlu0 %v9105_v38, %s8412_s23 }
 0x1fa   :  { %1210 = vst.msk [vmem:[#allocation4 + $0x1a0] sm:$0xff] %vm1157_vm3, %v1070_v51  ;;  %v1050_v24 = vpop.permute.xlu1 %1049 }
 0x1fb   :  { %1200 = vst.msk [vmem:[#allocation4 + $0x150] sm:$0xff] %vm1157_vm3, %v1050_v24  ;;  %v1054_v28 = vpop.permute.xlu0 %1053 }
 0x1fc   :  { %1202 = vst.msk [vmem:[#allocation4 + $0x160] sm:$0xff] %vm1157_vm3, %v1054_v28 }
 0x1ff   :  { %1398 = vrot.lane.b32.xlu2 %v9052_v10, %s8412_s23 }
 0x200   :  { %1396 = vrot.lane.b32.xlu1 %v9114_v46, %s8412_s23 }
 0x201   :  { %v1076_v61 = vpop.permute.xlu2 %1075  ;;  %1400 = vrot.lane.b32.xlu0 %v9123_v52, %s8412_s23 }
 0x202   :  { %1213 = vst.msk [vmem:[#allocation4 + $0x1b8] sm:$0xff] %vm1157_vm3, %v1076_v61  ;;  %v1056_v34 = vpop.permute.xlu1 %1055  ;;  %v9630_v61 = vld [vmem:[#allocation2 + $0x79] sm:$0xff] }
 0x203   :  { %1203 = vst.msk [vmem:[#allocation4 + $0x168] sm:$0xff] %vm1157_vm3, %v1056_v34  ;;  %v1060_v38 = vpop.permute.xlu0 %1059  ;;  %v9633_v34 = vld [vmem:[#allocation2 + $0x69] sm:$0xff] }
 0x204   :  { %1205 = vst.msk [vmem:[#allocation4 + $0x178] sm:$0xff] %vm1157_vm3, %v1060_v38  ;;  %v9635_v38 = vld [vmem:[#allocation2 + $0x81] sm:$0xff] }
 0x207   :  { %1404 = vrot.lane.b32.xlu2 %v9078_v21, %s8412_s23 }
 0x208   :  { %1402 = vrot.lane.b32.xlu1 %v9132_v58, %s8412_s23 }
 0x209   :  { %v1082_v10 = vpop.permute.xlu2 %1081  ;;  %1406 = vrot.lane.b32.xlu0 %v9141_v2, %s8412_s23 }
 0x20a   :  { %1216 = vst.msk [vmem:[#allocation4 + $0x1d0] sm:$0xff] %vm1157_vm3, %v1082_v10  ;;  %v1062_v46 = vpop.permute.xlu1 %1061 }
 0x20b   :  { %1206 = vst.msk [vmem:[#allocation4 + $0x180] sm:$0xff] %vm1157_vm3, %v1062_v46  ;;  %v1066_v52 = vpop.permute.xlu0 %1065 }
 0x20c   :  { %1208 = vst.msk [vmem:[#allocation4 + $0x190] sm:$0xff] %vm1157_vm3, %v1066_v52 }
 0x20f   :  { %1410 = vrot.lane.b32.xlu2 %v1252_v40, %s8412_s23  ;;  %v9645_v40 = vld [vmem:[#allocation2 + $0x99] sm:$0xff] }
 0x210   :  { %1408 = vrot.lane.b32.xlu1 %v9150_v8, %s8412_s23 }
 0x211   :  { %v1088_v21 = vpop.permute.xlu2 %1087  ;;  %1412 = vrot.lane.b32.xlu0 %v1253_v30, %s8412_s23  ;;  %v9648_v30 = vld [vmem:[#allocation2 + $0x91] sm:$0xff] }
 0x212   :  { %1219 = vst.msk [vmem:[#allocation4 + $0x1e8] sm:$0xff] %vm1157_vm3, %v1088_v21  ;;  %v1068_v58 = vpop.permute.xlu1 %1067  ;;  %v9650_v21 = vld [vmem:[#allocation2 + $0xa9] sm:$0xff] }
 0x213   :  { %1209 = vst.msk [vmem:[#allocation4 + $0x198] sm:$0xff] %vm1157_vm3, %v1068_v58  ;;  %v1072_v2 = vpop.permute.xlu0 %1071 }
 0x214   :  { %1211 = vst.msk [vmem:[#allocation4 + $0x1a8] sm:$0xff] %vm1157_vm3, %v1072_v2 }
 0x217   :  { %1416 = vrot.lane.b32.xlu2 %v9111_v44, %s8412_s23 }
 0x218   :  { %1414 = vrot.lane.b32.xlu1 %v9165_v20, %s8412_s23 }
 0x219   :  { %v1351_v39 = vpop.permute.xlu2 %1350  ;;  %1418 = vrot.lane.b32.xlu0 %v9174_v27, %s8412_s23 }
 0x21a   :  { %1543 = vst.msk [vmem:[#allocation4] sm:$0xff] %vm1542_vm4, %v1351_v39  ;;  %v1074_v8 = vpop.permute.xlu1 %1073 }
 0x21b   :  { %1212 = vst.msk [vmem:[#allocation4 + $0x1b0] sm:$0xff] %vm1157_vm3, %v1074_v8  ;;  %v1078_v0 = vpop.permute.xlu0 %1077  ;;  %v9660_v8 = vld [vmem:[#allocation2 + $0xc1] sm:$0xff] }
 0x21c   :  { %1214 = vst.msk [vmem:[#allocation4 + $0x1c0] sm:$0xff] %vm1157_vm3, %v1078_v0  ;;  %v9663_v0 = vld [vmem:[#allocation2 + $0xb1] sm:$0xff] }
 0x21f   :  { %1422 = vrot.lane.b32.xlu2 %v9129_v56, %s8412_s23 }
 0x220   :  { %1420 = vrot.lane.b32.xlu1 %v9183_v35, %s8412_s23 }
 0x221   :  { %v1357_v44 = vpop.permute.xlu2 %1356  ;;  %1424 = vrot.lane.b32.xlu0 %v9192_v42, %s8412_s23 }
 0x222   :  { %1546 = vst.msk [vmem:[#allocation4 + $0x18] sm:$0xff] %vm1542_vm4, %v1357_v44  ;;  %v1080_v20 = vpop.permute.xlu1 %1079  ;;  %v9665_v44 = vld [vmem:[#allocation2 + $0xc9] sm:$0xff] }
 0x223   :  { %1215 = vst.msk [vmem:[#allocation4 + $0x1c8] sm:$0xff] %vm1157_vm3, %v1080_v20  ;;  %v1084_v27 = vpop.permute.xlu0 %1083 }
 0x224   :  { %1217 = vst.msk [vmem:[#allocation4 + $0x1d8] sm:$0xff] %vm1157_vm3, %v1084_v27 }
 0x227   :  { %1428 = vrot.lane.b32.xlu2 %v9147_v5, %s8412_s23 }
 0x228   :  { %1426 = vrot.lane.b32.xlu1 %v9201_v54, %s8412_s23 }
 0x229   :  { %v1363_v56 = vpop.permute.xlu2 %1362  ;;  %1430 = vrot.lane.b32.xlu0 %v9210_v62, %s8412_s23 }
 0x22a   :  { %1549 = vst.msk [vmem:[#allocation4 + $0x30] sm:$0xff] %vm1542_vm4, %v1363_v56  ;;  %v1086_v35 = vpop.permute.xlu1 %1085 }
 0x22b   :  { %1218 = vst.msk [vmem:[#allocation4 + $0x1e0] sm:$0xff] %vm1157_vm3, %v1086_v35  ;;  %v1090_v42 = vpop.permute.xlu0 %1089  ;;  %v1624_v35 = vld [vmem:[#allocation2 + $0xe1] sm:$0xff] }
 0x22c   :  { %1220 = vst.msk [vmem:[#allocation4 + $0x1f0] sm:$0xff] %vm1157_vm3, %v1090_v42  ;;  %v1623_v42 = vld [vmem:[#allocation2 + $0xd9] sm:$0xff] }
 0x22f   :  { %1434 = vrot.lane.b32.xlu2 %v9162_v17, %s8412_s23 }
 0x230   :  { %1432 = vrot.lane.b32.xlu1 %v9219_v9, %s8412_s23 }
 0x231   :  { %v1369_v5 = vpop.permute.xlu2 %1368  ;;  %1436 = vrot.lane.b32.xlu0 %v9228_v15, %s8412_s23 }
 0x232   :  { %1552 = vst.msk [vmem:[#allocation4 + $0x48] sm:$0xff] %vm1542_vm4, %v1369_v5  ;;  %v1092_v54 = vpop.permute.xlu1 %1091  ;;  %v1625_v5 = vld [vmem:[#allocation2 + $0xf1] sm:$0xff] }
 0x233   :  { %1221 = vst.msk [vmem:[#allocation4 + $0x1f8] sm:$0xff] %vm1157_vm3, %v1092_v54  ;;  %v1353_v62 = vpop.permute.xlu0 %1352  ;;  %vm5021_vm3 = vcmask 1046534  }
 0x234   :  { %1544 = vst.msk [vmem:[#allocation4 + $0x8] sm:$0xff] %vm1542_vm4, %v1353_v62 }
 0x237   :  { %1440 = vrot.lane.b32.xlu2 %v9180_v31, %s8412_s23  ;;  %v257_v31 = vld [vmem:[%s12277_s0 + $0x1f0] sm:$0xff] }
 0x238   :  { %1438 = vrot.lane.b32.xlu1 %v9237_v26, %s8412_s23  ;;  %v258_v26 = vld [vmem:[%s12277_s0 + $0x1f8] sm:$0xff]  ;;  %322 = vst.msk [vmem:[#allocation2 + $0x331] sm:$0xff] %vm43_vm0, %v257_v31  ;;  %s8413_s0 = smov 16  }
 0x239   :  { %v1375_v17 = vpop.permute.xlu2 %1374  ;;  %1442 = vrot.lane.b32.xlu0 %v9246_v36, %s8412_s23  ;;  %323 = vst.msk [vmem:[#allocation2 + $0x339] sm:$0xff] %vm43_vm0, %v258_v26  ;;  %v1628_v31 = vld [vmem:[#allocation2 + $0x111] sm:$0xff]  ;;  %vm5015_vm0 = vcmask 1043459  }
 0x23a   :  { %1555 = vst.msk [vmem:[#allocation4 + $0x60] sm:$0xff] %vm1542_vm4, %v1375_v17  ;;  %v1355_v9 = vpop.permute.xlu1 %1354 }
 0x23b   :  { %1545 = vst.msk [vmem:[#allocation4 + $0x10] sm:$0xff] %vm1542_vm4, %v1355_v9  ;;  %v1359_v15 = vpop.permute.xlu0 %1358  ;;  %v1627_v9 = vld [vmem:[#allocation2 + $0x109] sm:$0xff] }
 0x23c   :  { %1547 = vst.msk [vmem:[#allocation4 + $0x20] sm:$0xff] %vm1542_vm4, %v1359_v15  ;;  %v1626_v15 = vld [vmem:[#allocation2 + $0xf9] sm:$0xff] }
 0x23f   :  { %1446 = vrot.lane.b32.xlu2 %v9198_v48, %s8412_s23  ;;  %v1284_v22 = vld [vmem:[#allocation2 + $0x330] sm:$0xff] }
 0x240   :  { %1444 = vrot.lane.b32.xlu1 %v9255_v49, %s8412_s23  ;;  %v1285_v47 = vld [vmem:[#allocation2 + $0x338] sm:$0xff] }
 0x241   :  { %v1381_v36 = vpop.permute.xlu2 %1380  ;;  %1448 = vrot.lane.b32.xlu0 %v9264_v1, %s8412_s23 }
 0x242   :  { %1558 = vst.msk [vmem:[#allocation4 + $0x78] sm:$0xff] %vm1542_vm4, %v1381_v36  ;;  %v1361_v48 = vpop.permute.xlu1 %1360 }
 0x243   :  { %1548 = vst.msk [vmem:[#allocation4 + $0x28] sm:$0xff] %vm1542_vm4, %v1361_v48  ;;  %v1365_v43 = vpop.permute.xlu0 %1364 }
 0x244   :  { %1550 = vst.msk [vmem:[#allocation4 + $0x38] sm:$0xff] %vm1542_vm4, %v1365_v43  ;;  %v1630_v43 = vld [vmem:[#allocation2 + $0x129] sm:$0xff] }
 0x247   :  { %1452 = vrot.lane.b32.xlu2 %v9216_v4, %s8412_s23 }
 0x248   :  { %1450 = vrot.lane.b32.xlu1 %v9273_v14, %s8412_s23 }
 0x249   :  { %v1387_v49 = vpop.permute.xlu2 %1386  ;;  %1454 = vrot.lane.b32.xlu0 %v9282_v29, %s8412_s23 }
 0x24a   :  { %1561 = vst.msk [vmem:[#allocation4 + $0x90] sm:$0xff] %vm1542_vm4, %v1387_v49  ;;  %v1367_v1 = vpop.permute.xlu1 %1366  ;;  %v1629_v49 = vld [vmem:[#allocation2 + $0x121] sm:$0xff] }
 0x24b   :  { %1551 = vst.msk [vmem:[#allocation4 + $0x40] sm:$0xff] %vm1542_vm4, %v1367_v1  ;;  %v1371_v50 = vpop.permute.xlu0 %1370  ;;  %v1631_v1 = vld [vmem:[#allocation2 + $0x139] sm:$0xff] }
 0x24c   :  { %1553 = vst.msk [vmem:[#allocation4 + $0x50] sm:$0xff] %vm1542_vm4, %v1371_v50 }
 0x24f   :  { %1458 = vrot.lane.b32.xlu2 %v9234_v23, %s8412_s23 }
 0x250   :  { %1456 = vrot.lane.b32.xlu1 %v9288_v37, %s8412_s23 }
 0x251   :  { %v1393_v4 = vpop.permute.xlu2 %1392  ;;  %1460 = vrot.lane.b32.xlu0 %v9296_v59, %s8412_s23 }
 0x252   :  { %1564 = vst.msk [vmem:[#allocation4 + $0xa8] sm:$0xff] %vm1542_vm4, %v1393_v4  ;;  %v1373_v14 = vpop.permute.xlu1 %1372 }
 0x253   :  { %1554 = vst.msk [vmem:[#allocation4 + $0x58] sm:$0xff] %vm1542_vm4, %v1373_v14  ;;  %v1377_v29 = vpop.permute.xlu0 %1376 }
 0x254   :  { %1556 = vst.msk [vmem:[#allocation4 + $0x68] sm:$0xff] %vm1542_vm4, %v1377_v29  ;;  %v1633_v29 = vld [vmem:[#allocation2 + $0x151] sm:$0xff] }
 0x257   :  { %1464 = vrot.lane.b32.xlu2 %v9252_v45, %s8412_s23 }
 0x258   :  { %1462 = vrot.lane.b32.xlu1 %v9302_v13, %s8412_s23 }
 0x259   :  { %v1399_v23 = vpop.permute.xlu2 %1398  ;;  %1466 = vrot.lane.b32.xlu0 %v9310_v32, %s8412_s23 }
 0x25a   :  { %1567 = vst.msk [vmem:[#allocation4 + $0xc0] sm:$0xff] %vm1542_vm4, %v1399_v23  ;;  %v1379_v37 = vpop.permute.xlu1 %1378  ;;  %v1632_v23 = vld [vmem:[#allocation2 + $0x141] sm:$0xff] }
 0x25b   :  { %1557 = vst.msk [vmem:[#allocation4 + $0x70] sm:$0xff] %vm1542_vm4, %v1379_v37  ;;  %v1383_v59 = vpop.permute.xlu0 %1382  ;;  %v1634_v37 = vld [vmem:[#allocation2 + $0x159] sm:$0xff] }
 0x25c   :  { %1559 = vst.msk [vmem:[#allocation4 + $0x80] sm:$0xff] %vm1542_vm4, %v1383_v59 }
 0x25f   :  { %1470 = vrot.lane.b32.xlu2 %v9270_v11, %s8412_s23 }
 0x260   :  { %1468 = vrot.lane.b32.xlu1 %v9316_v55, %s8412_s23 }
 0x261   :  { %v1405_v45 = vpop.permute.xlu2 %1404  ;;  %1472 = vrot.lane.b32.xlu0 %v9324_v19, %s8412_s23 }
 0x262   :  { %1570 = vst.msk [vmem:[#allocation4 + $0xd8] sm:$0xff] %vm1542_vm4, %v1405_v45  ;;  %v1385_v13 = vpop.permute.xlu1 %1384 }
 0x263   :  { %1560 = vst.msk [vmem:[#allocation4 + $0x88] sm:$0xff] %vm1542_vm4, %v1385_v13  ;;  %v1389_v32 = vpop.permute.xlu0 %1388 }
 0x264   :  { %1562 = vst.msk [vmem:[#allocation4 + $0x98] sm:$0xff] %vm1542_vm4, %v1389_v32  ;;  %v1636_v32 = vld [vmem:[#allocation2 + $0x171] sm:$0xff] }
 0x267   :  { %1476 = vrot.lane.b32.xlu2 %v1285_v47, %s8412_s23  ;;  %v1635_v47 = vld [vmem:[#allocation2 + $0x169] sm:$0xff] }
 0x268   :  { %1474 = vrot.lane.b32.xlu1 %v1284_v22, %s8412_s23  ;;  %v1637_v22 = vld [vmem:[#allocation2 + $0x181] sm:$0xff]  ;;  %s7503_s23 = sshll.u32 %s12288_s11, 4  ;;  %s8426_s11 = smov [#allocation9]   ;;  %s7504_s23 = int_to_ptr.hbm [resolvable:$true] %s7503_s23 }
 0x269   :  { %v1411_v11 = vpop.permute.xlu2 %1410  ;;  %1735 = vrot.lane.b32.xlu0 %v1607_v53, %s8413_s0  ;;  %s7512_s25 = sshll.u32 %s8426_s11, 4  ;;  %s7513_s25 = int_to_ptr.vmem [resolvable:$true] %s7512_s25 }
 0x26a   :  { %1573 = vst.msk [vmem:[#allocation4 + $0xf0] sm:$0xff] %vm1542_vm4, %v1411_v11  ;;  %v1391_v55 = vpop.permute.xlu1 %1390 }
 0x26b   :  { %1563 = vst.msk [vmem:[#allocation4 + $0xa0] sm:$0xff] %vm1542_vm4, %v1391_v55  ;;  %v1395_v19 = vpop.permute.xlu0 %1394 }
 0x26c   :  { %1565 = vst.msk [vmem:[#allocation4 + $0xb0] sm:$0xff] %vm1542_vm4, %v1395_v19  ;;  %v1992_v19 = vld [vmem:[#allocation2 + $0x1a] sm:$0xff] }
 0x26f   :  { %1739 = vrot.lane.b32.xlu2 %v9603_v60, %s8413_s0 }
 0x270   :  { %1737 = vrot.lane.b32.xlu1 %v1608_v33, %s8413_s0  ;;  %v1638_v33 = vld [vmem:[#allocation2 + $0x189] sm:$0xff] }
 0x271   :  { %v1417_v7 = vpop.permute.xlu2 %1416  ;;  %1741 = vrot.lane.b32.xlu0 %v9606_v63, %s8413_s0 }
 0x272   :  { %1576 = vst.msk [vmem:[#allocation4 + $0x108] sm:$0xff] %vm1542_vm4, %v1417_v7  ;;  %v1397_v6 = vpop.permute.xlu1 %1396  ;;  %v1993_v7 = vld [vmem:[#allocation2 + $0x22] sm:$0xff] }
 0x273   :  { %1566 = vst.msk [vmem:[#allocation4 + $0xb8] sm:$0xff] %vm1542_vm4, %v1397_v6  ;;  %v1401_v41 = vpop.permute.xlu0 %1400 }
 0x274   :  { %1568 = vst.msk [vmem:[#allocation4 + $0xc8] sm:$0xff] %vm1542_vm4, %v1401_v41 }
 0x277   :  { %1745 = vrot.lane.b32.xlu2 %v9615_v12, %s8413_s0 }
 0x278   :  { %1743 = vrot.lane.b32.xlu1 %v9618_v18, %s8413_s0 }
 0x279   :  { %v1423_v51 = vpop.permute.xlu2 %1422  ;;  %1747 = vrot.lane.b32.xlu0 %v9620_v25, %s8413_s0 }
 0x27a   :  { %1579 = vst.msk [vmem:[#allocation4 + $0x120] sm:$0xff] %vm1542_vm4, %v1423_v51  ;;  %v1403_v24 = vpop.permute.xlu1 %1402 }
 0x27b   :  { %1569 = vst.msk [vmem:[#allocation4 + $0xd0] sm:$0xff] %vm1542_vm4, %v1403_v24  ;;  %v1407_v28 = vpop.permute.xlu0 %1406 }
 0x27c   :  { %1571 = vst.msk [vmem:[#allocation4 + $0xe0] sm:$0xff] %vm1542_vm4, %v1407_v28 }
 0x27f   :  { %1751 = vrot.lane.b32.xlu2 %v9630_v61, %s8413_s0 }
 0x280   :  { %1749 = vrot.lane.b32.xlu1 %v9633_v34, %s8413_s0 }
 0x281   :  { %v1429_v10 = vpop.permute.xlu2 %1428  ;;  %1753 = vrot.lane.b32.xlu0 %v9635_v38, %s8413_s0 }
 0x282   :  { %1582 = vst.msk [vmem:[#allocation4 + $0x138] sm:$0xff] %vm1542_vm4, %v1429_v10  ;;  %v1409_v46 = vpop.permute.xlu1 %1408 }
 0x283   :  { %1572 = vst.msk [vmem:[#allocation4 + $0xe8] sm:$0xff] %vm1542_vm4, %v1409_v46  ;;  %v1413_v52 = vpop.permute.xlu0 %1412  ;;  %v3148_v46 = vld [vmem:[#allocation2 + $0x32] sm:$0xff] }
 0x284   :  { %1574 = vst.msk [vmem:[#allocation4 + $0xf8] sm:$0xff] %vm1542_vm4, %v1413_v52  ;;  %v3149_v52 = vld [vmem:[#allocation2 + $0x3a] sm:$0xff] }
 0x287   :  { %1757 = vrot.lane.b32.xlu2 %v9645_v40, %s8413_s0 }
 0x288   :  { %1755 = vrot.lane.b32.xlu1 %v9648_v30, %s8413_s0 }
 0x289   :  { %v1435_v58 = vpop.permute.xlu2 %1434  ;;  %1759 = vrot.lane.b32.xlu0 %v9650_v21, %s8413_s0 }
 0x28a   :  { %1585 = vst.msk [vmem:[#allocation4 + $0x150] sm:$0xff] %vm1542_vm4, %v1435_v58  ;;  %v1415_v2 = vpop.permute.xlu1 %1414  ;;  %v2380_v58 = vld [vmem:[#allocation2 + $0x48] sm:$0xff] }
 0x28b   :  { %1575 = vst.msk [vmem:[#allocation4 + $0x100] sm:$0xff] %vm1542_vm4, %v1415_v2  ;;  %v1419_v39 = vpop.permute.xlu0 %1418 }
 0x28c   :  { %1577 = vst.msk [vmem:[#allocation4 + $0x110] sm:$0xff] %vm1542_vm4, %v1419_v39 }
 0x28f   :  { %1763 = vrot.lane.b32.xlu2 %v9660_v8, %s8413_s0 }
 0x290   :  { %1761 = vrot.lane.b32.xlu1 %v9663_v0, %s8413_s0 }
 0x291   :  { %v1441_v20 = vpop.permute.xlu2 %1440  ;;  %1765 = vrot.lane.b32.xlu0 %v9665_v44, %s8413_s0 }
 0x292   :  { %1588 = vst.msk [vmem:[#allocation4 + $0x168] sm:$0xff] %vm1542_vm4, %v1441_v20  ;;  %v1421_v27 = vpop.permute.xlu1 %1420  ;;  %v2381_v20 = vld [vmem:[#allocation2 + $0x50] sm:$0xff] }
 0x293   :  { %1578 = vst.msk [vmem:[#allocation4 + $0x118] sm:$0xff] %vm1542_vm4, %v1421_v27  ;;  %v1425_v56 = vpop.permute.xlu0 %1424 }
 0x294   :  { %1580 = vst.msk [vmem:[#allocation4 + $0x128] sm:$0xff] %vm1542_vm4, %v1425_v56 }
 0x297   :  { %1769 = vrot.lane.b32.xlu2 %v1624_v35, %s8413_s0 }
 0x298   :  { %1767 = vrot.lane.b32.xlu1 %v1623_v42, %s8413_s0  ;;  %v3151_v42 = vld [vmem:[#allocation2 + $0x52] sm:$0xff] }
 0x299   :  { %v1447_v54 = vpop.permute.xlu2 %1446  ;;  %1771 = vrot.lane.b32.xlu0 %v1625_v5, %s8413_s0  ;;  %v3150_v5 = vld [vmem:[#allocation2 + $0x4a] sm:$0xff] }
 0x29a   :  { %1591 = vst.msk [vmem:[#allocation4 + $0x180] sm:$0xff] %vm1542_vm4, %v1447_v54  ;;  %v1427_v62 = vpop.permute.xlu1 %1426 }
 0x29b   :  { %1581 = vst.msk [vmem:[#allocation4 + $0x130] sm:$0xff] %vm1542_vm4, %v1427_v62  ;;  %v1431_v17 = vpop.permute.xlu0 %1430  ;;  %v2383_v62 = vld [vmem:[#allocation2 + $0x68] sm:$0xff] }
 0x29c   :  { %1583 = vst.msk [vmem:[#allocation4 + $0x140] sm:$0xff] %vm1542_vm4, %v1431_v17 }
 0x29f   :  { %1775 = vrot.lane.b32.xlu2 %v1627_v9, %s8413_s0 }
 0x2a0   :  { %1773 = vrot.lane.b32.xlu1 %v1626_v15, %s8413_s0 }
 0x2a1   :  { %v1453_v26 = vpop.permute.xlu2 %1452  ;;  %1777 = vrot.lane.b32.xlu0 %v1628_v31, %s8413_s0  ;;  %v3152_v31 = vld [vmem:[#allocation2 + $0x62] sm:$0xff] }
 0x2a2   :  { %1594 = vst.msk [vmem:[#allocation4 + $0x198] sm:$0xff] %vm1542_vm4, %v1453_v26  ;;  %v1433_v36 = vpop.permute.xlu1 %1432 }
 0x2a3   :  { %1584 = vst.msk [vmem:[#allocation4 + $0x148] sm:$0xff] %vm1542_vm4, %v1433_v36  ;;  %v1437_v48 = vpop.permute.xlu0 %1436 }
 0x2a4   :  { %1586 = vst.msk [vmem:[#allocation4 + $0x158] sm:$0xff] %vm1542_vm4, %v1437_v48  ;;  %v1641_v48 = vld [vmem:[#allocation2 + $0x1e1] sm:$0xff] }
 0x2a7   :  { %1781 = vrot.lane.b32.xlu2 %v1630_v43, %s8413_s0  ;;  %v3153_v43 = vld [vmem:[#allocation2 + $0x6a] sm:$0xff] }
 0x2a8   :  { %1779 = vrot.lane.b32.xlu1 %v1629_v49, %s8413_s0  ;;  %v1642_v49 = vld [vmem:[#allocation2 + $0x1e9] sm:$0xff] }
 0x2a9   :  { %v1459_v50 = vpop.permute.xlu2 %1458  ;;  %1783 = vrot.lane.b32.xlu0 %v1631_v1, %s8413_s0 }
 0x2aa   :  { %1597 = vst.msk [vmem:[#allocation4 + $0x1b0] sm:$0xff] %vm1542_vm4, %v1459_v50  ;;  %v1439_v4 = vpop.permute.xlu1 %1438  ;;  %v2027_v50 = vld [vmem:[#allocation2 + $0x1ea] sm:$0xff] }
 0x2ab   :  { %1587 = vst.msk [vmem:[#allocation4 + $0x160] sm:$0xff] %vm1542_vm4, %v1439_v4  ;;  %v1443_v14 = vpop.permute.xlu0 %1442  ;;  %v2026_v4 = vld [vmem:[#allocation2 + $0x1e2] sm:$0xff] }
 0x2ac   :  { %1589 = vst.msk [vmem:[#allocation4 + $0x170] sm:$0xff] %vm1542_vm4, %v1443_v14  ;;  %v2412_v14 = vld [vmem:[#allocation2 + $0x1f8] sm:$0xff] }
 0x2af   :  { %1787 = vrot.lane.b32.xlu2 %v1633_v29, %s8413_s0 }
 0x2b0   :  { %1785 = vrot.lane.b32.xlu1 %v1632_v23, %s8413_s0 }
 0x2b1   :  { %v1465_v59 = vpop.permute.xlu2 %1464  ;;  %1789 = vrot.lane.b32.xlu0 %v1634_v37, %s8413_s0 }
 0x2b2   :  { %1600 = vst.msk [vmem:[#allocation4 + $0x1c8] sm:$0xff] %vm1542_vm4, %v1465_v59  ;;  %v1445_v45 = vpop.permute.xlu1 %1444  ;;  %v2797_v59 = vld [vmem:[#allocation2 + $0x1f9] sm:$0xff] }
 0x2b3   :  { %1590 = vst.msk [vmem:[#allocation4 + $0x178] sm:$0xff] %vm1542_vm4, %v1445_v45  ;;  %v1449_v13 = vpop.permute.xlu0 %1448  ;;  %v2413_v45 = vld [vmem:[#allocation2 + $0x200] sm:$0xff] }
 0x2b4   :  { %1592 = vst.msk [vmem:[#allocation4 + $0x188] sm:$0xff] %vm1542_vm4, %v1449_v13  ;;  %v2798_v13 = vld [vmem:[#allocation2 + $0x201] sm:$0xff] }
 0x2b7   :  { %1793 = vrot.lane.b32.xlu2 %v1636_v32, %s8413_s0 }
 0x2b8   :  { %1791 = vrot.lane.b32.xlu1 %v1635_v47, %s8413_s0 }
 0x2b9   :  { %v1471_v53 = vpop.permute.xlu2 %1470  ;;  %1795 = vrot.lane.b32.xlu0 %v1637_v22, %s8413_s0 }
 0x2ba   :  { %1603 = vst.msk [vmem:[#allocation4 + $0x1e0] sm:$0xff] %vm1542_vm4, %v1471_v53  ;;  %v1451_v11 = vpop.permute.xlu1 %1450  ;;  %v3183_v53 = vld [vmem:[#allocation2 + $0x202] sm:$0xff] }
 0x2bb   :  { %1593 = vst.msk [vmem:[#allocation4 + $0x190] sm:$0xff] %vm1542_vm4, %v1451_v11  ;;  %v1455_v55 = vpop.permute.xlu0 %1454  ;;  %v3182_v11 = vld [vmem:[#allocation2 + $0x1fa] sm:$0xff] }
 0x2bc   :  { %1595 = vst.msk [vmem:[#allocation4 + $0x1a0] sm:$0xff] %vm1542_vm4, %v1455_v55 }
 0x2bf   :  { %2120 = vrot.lane.b32.xlu2 %v1992_v19, %s8414_s14 }
 0x2c0   :  { %1797 = vrot.lane.b32.xlu1 %v1638_v33, %s8413_s0 }
 0x2c1   :  { %v1477_v6 = vpop.permute.xlu2 %1476  ;;  %2122 = vrot.lane.b32.xlu0 %v1993_v7, %s8414_s14  ;;  %v2384_v7 = vld [vmem:[#allocation2 + $0x78] sm:$0xff] }
 0x2c2   :  { %1606 = vst.msk [vmem:[#allocation4 + $0x1f8] sm:$0xff] %vm1542_vm4, %v1477_v6  ;;  %v1457_v41 = vpop.permute.xlu1 %1456  ;;  %v2385_v6 = vld [vmem:[#allocation2 + $0x80] sm:$0xff] }
 0x2c3   :  { %1596 = vst.msk [vmem:[#allocation4 + $0x1a8] sm:$0xff] %vm1542_vm4, %v1457_v41  ;;  %v1461_v51 = vpop.permute.xlu0 %1460 }
 0x2c4   :  { %1598 = vst.msk [vmem:[#allocation4 + $0x1b8] sm:$0xff] %vm1542_vm4, %v1461_v51 }
 0x2c7   :  { %2508 = vrot.lane.b32.xlu2 %v9399_v57, %s8415_s15 }
 0x2c8   :  { %2506 = vrot.lane.b32.xlu1 %v9402_v3, %s8415_s15 }
 0x2c9   :  { %v1740_v24 = vpop.permute.xlu2 %1739  ;;  %2891 = vrot.lane.b32.xlu0 %v9603_v60, %s8416_s16 }
 0x2ca   :  { %1930 = vst.msk [vmem:[#allocation4 + $0x10] sm:$0xff] %vm1927_vm5, %v1740_v24  ;;  %v1463_v28 = vpop.permute.xlu1 %1462 }
 0x2cb   :  { %1599 = vst.msk [vmem:[#allocation4 + $0x1c0] sm:$0xff] %vm1542_vm4, %v1463_v28  ;;  %v1467_v10 = vpop.permute.xlu0 %1466  ;;  %v3633_v28 = vld [vmem:[%s12278_s1 + $0x10] sm:$0x3] }
 0x2cc   :  { %1601 = vst.msk [vmem:[#allocation4 + $0x1d0] sm:$0xff] %vm1542_vm4, %v1467_v10  ;;  %v3647_v10 = vunpack.c.l.b16 %v3633_v28 }
 0x2cf   :  { %3276 = vrot.lane.b32.xlu2 %v3148_v46, %s8417_s17 }
 0x2d0   :  { %2893 = vrot.lane.b32.xlu1 %v9606_v63, %s8416_s16 }
 0x2d1   :  { %v1746_v57 = vpop.permute.xlu2 %1745  ;;  %3278 = vrot.lane.b32.xlu0 %v3149_v52, %s8417_s17 }
 0x2d2   :  { %1933 = vst.msk [vmem:[#allocation4 + $0x28] sm:$0xff] %vm1927_vm5, %v1746_v57  ;;  %v1469_v3 = vpop.permute.xlu1 %1468 }
 0x2d3   :  { %1602 = vst.msk [vmem:[#allocation4 + $0x1d8] sm:$0xff] %vm1542_vm4, %v1469_v3  ;;  %v1473_v60 = vpop.permute.xlu0 %1472 }
 0x2d4   :  { %1604 = vst.msk [vmem:[#allocation4 + $0x1e8] sm:$0xff] %vm1542_vm4, %v1473_v60 }
 0x2d7   :  { %2126 = vrot.lane.b32.xlu2 %v3149_v52, %s8414_s14  ;;  %v3650_v52 = vpack.c.b16 %v3647_v10, %v3647_v10 }
 0x2d8   :  { %2124 = vrot.lane.b32.xlu1 %v3148_v46, %s8414_s14  ;;  %v3154_v46 = vld [vmem:[#allocation2 + $0x7a] sm:$0xff] }
 0x2d9   :  { %v1752_v2 = vpop.permute.xlu2 %1751  ;;  %2510 = vrot.lane.b32.xlu0 %v2380_v58, %s8415_s15  ;;  %v3752_v57 = vsel %vm12292_vm7, %v3650_v52, 0  ;;  %vm5858_vm7 = vcmask 523712  }
 0x2da   :  { %1936 = vst.msk [vmem:[#allocation4 + $0x40] sm:$0xff] %vm1927_vm5, %v1752_v2  ;;  %v1475_v63 = vpop.permute.xlu1 %1474  ;;  %3759 = vmatpush.bf16.msra.mxu0 %v3752_v57  ;;  %8318 = vmatpush.bf16.msra.mxu1 %v3752_v57  ;;  %v8201_v2 = vld [vmem:[%s12278_s1 + $0x8] sm:$0xff] }
 0x2db   :  { %1605 = vst.msk [vmem:[#allocation4 + $0x1f0] sm:$0xff] %vm1542_vm4, %v1475_v63  ;;  %v1736_v39 = vpop.permute.xlu0 %1735  ;;  %vm5023_vm4 = vcmask 1047559  }
 0x2dc   :  { %1928 = vst.msk [vmem:[#allocation4] sm:$0xff] %vm1927_vm5, %v1736_v39 }
 0x2de   :  { %3760 = vmatpush.bf16.msra.mxu0 %v8201_v2  ;;  %8319 = vmatpush.bf16.msra.mxu1 %v8201_v2 }
 0x2df   :  { %2895 = vrot.lane.b32.xlu2 %v9618_v18, %s8416_s16 }
 0x2e0   :  { %2512 = vrot.lane.b32.xlu1 %v2381_v20, %s8415_s15 }
 0x2e1   :  { %v1758_v27 = vpop.permute.xlu2 %1757  ;;  %2897 = vrot.lane.b32.xlu0 %v9615_v12, %s8416_s16 }
 0x2e2   :  { %1939 = vst.msk [vmem:[#allocation4 + $0x58] sm:$0xff] %vm1927_vm5, %v1758_v27  ;;  %v1738_v56 = vpop.permute.xlu1 %1737  ;;  %v2414_v27 = vld [vmem:[#allocation2 + $0x210] sm:$0xff] }
 0x2e3   :  { %1929 = vst.msk [vmem:[#allocation4 + $0x8] sm:$0xff] %vm1927_vm5, %v1738_v56  ;;  %v1742_v35 = vpop.permute.xlu0 %1741 }
 0x2e4   :  { %1931 = vst.msk [vmem:[#allocation4 + $0x18] sm:$0xff] %vm1927_vm5, %v1742_v35 }
 0x2e7   :  { %3282 = vrot.lane.b32.xlu2 %v3151_v42, %s8417_s17 }
 0x2e8   :  { %3280 = vrot.lane.b32.xlu1 %v3150_v5, %s8417_s17 }
 0x2e9   :  { %v1764_v18 = vpop.permute.xlu2 %1763  ;;  %2128 = vrot.lane.b32.xlu0 %v3150_v5, %s8414_s14  ;;  %v2799_v5 = vld [vmem:[#allocation2 + $0x211] sm:$0xff] }
 0x2ea   :  { %1942 = vst.msk [vmem:[#allocation4 + $0x70] sm:$0xff] %vm1927_vm5, %v1764_v18  ;;  %v1744_v12 = vpop.permute.xlu1 %1743  ;;  %v2415_v18 = vld [vmem:[#allocation2 + $0x218] sm:$0xff] }
 0x2eb   :  { %1932 = vst.msk [vmem:[#allocation4 + $0x20] sm:$0xff] %vm1927_vm5, %v1744_v12  ;;  %v1748_v54 = vpop.permute.xlu0 %1747  ;;  %v2800_v12 = vld [vmem:[#allocation2 + $0x219] sm:$0xff] }
 0x2ec   :  { %1934 = vst.msk [vmem:[#allocation4 + $0x30] sm:$0xff] %vm1927_vm5, %v1748_v54 }
 0x2ef   :  { %2514 = vrot.lane.b32.xlu2 %v9412_v16, %s8415_s15 }
 0x2f0   :  { %2130 = vrot.lane.b32.xlu1 %v3151_v42, %s8414_s14 }
 0x2f1   :  { %v1770_v17 = vpop.permute.xlu2 %1769  ;;  %2516 = vrot.lane.b32.xlu0 %v2383_v62, %s8415_s15 }
 0x2f2   :  { %1945 = vst.msk [vmem:[#allocation4 + $0x88] sm:$0xff] %vm1927_vm5, %v1770_v17  ;;  %v1750_v9 = vpop.permute.xlu1 %1749 }
 0x2f3   :  { %1935 = vst.msk [vmem:[#allocation4 + $0x38] sm:$0xff] %vm1927_vm5, %v1750_v9  ;;  %v1754_v15 = vpop.permute.xlu0 %1753  ;;  %v3185_v9 = vld [vmem:[#allocation2 + $0x21a] sm:$0xff] }
 0x2f4   :  { %1937 = vst.msk [vmem:[#allocation4 + $0x48] sm:$0xff] %vm1927_vm5, %v1754_v15  ;;  %v3184_v15 = vld [vmem:[#allocation2 + $0x212] sm:$0xff] }
 0x2f7   :  { %2901 = vrot.lane.b32.xlu2 %v9633_v34, %s8416_s16 }
 0x2f8   :  { %2899 = vrot.lane.b32.xlu1 %v9620_v25, %s8416_s16 }
 0x2f9   :  { %v1776_v16 = vpop.permute.xlu2 %1775  ;;  %3284 = vrot.lane.b32.xlu0 %v3152_v31, %s8417_s17 }
 0x2fa   :  { %1948 = vst.msk [vmem:[#allocation4 + $0xa0] sm:$0xff] %vm1927_vm5, %v1776_v16  ;;  %v1756_v26 = vpop.permute.xlu1 %1755 }
 0x2fb   :  { %1938 = vst.msk [vmem:[#allocation4 + $0x50] sm:$0xff] %vm1927_vm5, %v1756_v26  ;;  %v1760_v36 = vpop.permute.xlu0 %1759 }
 0x2fc   :  { %1940 = vst.msk [vmem:[#allocation4 + $0x60] sm:$0xff] %vm1927_vm5, %v1760_v36 }
 0x2ff   :  { %1803 = vrot.lane.b32.xlu2 %v1641_v48, %s8413_s0 }
 0x300   :  { %3286 = vrot.lane.b32.xlu1 %v3153_v43, %s8417_s17 }
 0x301   :  { %v1782_v34 = vpop.permute.xlu2 %1781  ;;  %1805 = vrot.lane.b32.xlu0 %v1642_v49, %s8413_s0 }
 0x302   :  { %1951 = vst.msk [vmem:[#allocation4 + $0xb8] sm:$0xff] %vm1927_vm5, %v1782_v34  ;;  %v1762_v25 = vpop.permute.xlu1 %1761  ;;  %v2387_v34 = vld [vmem:[#allocation2 + $0x98] sm:$0xff] }
 0x303   :  { %1941 = vst.msk [vmem:[#allocation4 + $0x68] sm:$0xff] %vm1927_vm5, %v1762_v25  ;;  %v1766_v1 = vpop.permute.xlu0 %1765 }
 0x304   :  { %1943 = vst.msk [vmem:[#allocation4 + $0x78] sm:$0xff] %vm1927_vm5, %v1766_v1 }
 0x307   :  { %2190 = vrot.lane.b32.xlu2 %v2027_v50, %s8414_s14 }
 0x308   :  { %2188 = vrot.lane.b32.xlu1 %v2026_v4, %s8414_s14  ;;  %v3156_v4 = vld [vmem:[#allocation2 + $0x92] sm:$0xff] }
 0x309   :  { %v1788_v29 = vpop.permute.xlu2 %1787  ;;  %2574 = vrot.lane.b32.xlu0 %v2412_v14, %s8415_s15 }
 0x30a   :  { %1954 = vst.msk [vmem:[#allocation4 + $0xd0] sm:$0xff] %vm1927_vm5, %v1788_v29  ;;  %v1768_v23 = vpop.permute.xlu1 %1767 }
 0x30b   :  { %1944 = vst.msk [vmem:[#allocation4 + $0x80] sm:$0xff] %vm1927_vm5, %v1768_v23  ;;  %v1772_v37 = vpop.permute.xlu0 %1771 }
 0x30c   :  { %1946 = vst.msk [vmem:[#allocation4 + $0x90] sm:$0xff] %vm1927_vm5, %v1772_v37  ;;  %v3157_v37 = vld [vmem:[#allocation2 + $0x9a] sm:$0xff] }
 0x30f   :  { %2959 = vrot.lane.b32.xlu2 %v2797_v59, %s8416_s16 }
 0x310   :  { %2576 = vrot.lane.b32.xlu1 %v2413_v45, %s8415_s15 }
 0x311   :  { %v1794_v32 = vpop.permute.xlu2 %1793  ;;  %2961 = vrot.lane.b32.xlu0 %v2798_v13, %s8416_s16 }
 0x312   :  { %1957 = vst.msk [vmem:[#allocation4 + $0xe8] sm:$0xff] %vm1927_vm5, %v1794_v32  ;;  %v1774_v47 = vpop.permute.xlu1 %1773 }
 0x313   :  { %1947 = vst.msk [vmem:[#allocation4 + $0x98] sm:$0xff] %vm1927_vm5, %v1774_v47  ;;  %v1778_v22 = vpop.permute.xlu0 %1777  ;;  %v2416_v47 = vld [vmem:[#allocation2 + $0x228] sm:$0xff] }
 0x314   :  { %1949 = vst.msk [vmem:[#allocation4 + $0xa8] sm:$0xff] %vm1927_vm5, %v1778_v22 }
 0x317   :  { %3346 = vrot.lane.b32.xlu2 %v3183_v53, %s8417_s17 }
 0x318   :  { %3344 = vrot.lane.b32.xlu1 %v3182_v11, %s8417_s17 }
 0x319   :  { %v2121_v55 = vpop.permute.xlu2 %2120  ;;  %2132 = vrot.lane.b32.xlu0 %v3152_v31, %s8414_s14 }
 0x31a   :  { %2313 = vst.msk [vmem:[#allocation4] sm:$0xff] %vm2312_vm6, %v2121_v55  ;;  %v1780_v19 = vpop.permute.xlu1 %1779  ;;  %v2801_v55 = vld [vmem:[#allocation2 + $0x229] sm:$0xff] }
 0x31b   :  { %1950 = vst.msk [vmem:[#allocation4 + $0xb0] sm:$0xff] %vm1927_vm5, %v1780_v19  ;;  %v1784_v33 = vpop.permute.xlu0 %1783  ;;  %v2417_v19 = vld [vmem:[#allocation2 + $0x230] sm:$0xff] }
 0x31c   :  { %1952 = vst.msk [vmem:[#allocation4 + $0xc0] sm:$0xff] %vm1927_vm5, %v1784_v33  ;;  %v2802_v33 = vld [vmem:[#allocation2 + $0x231] sm:$0xff] }
 0x31f   :  { %2518 = vrot.lane.b32.xlu2 %v2384_v7, %s8415_s15 }
 0x320   :  { %2134 = vrot.lane.b32.xlu1 %v3153_v43, %s8414_s14  ;;  %v2386_v43 = vld [vmem:[#allocation2 + $0x90] sm:$0xff] }
 0x321   :  { %v2509_v41 = vpop.permute.xlu2 %2508  ;;  %2520 = vrot.lane.b32.xlu0 %v2385_v6, %s8415_s15 }
 0x322   :  { %v1786_v51 = vpop.permute.xlu1 %1785 }
 0x323   :  { %1953 = vst.msk [vmem:[#allocation4 + $0xc8] sm:$0xff] %vm1927_vm5, %v1786_v51  ;;  %v1790_v24 = vpop.permute.xlu0 %1789  ;;  %v3187_v51 = vld [vmem:[#allocation2 + $0x232] sm:$0xff] }
 0x324   :  { %1955 = vst.msk [vmem:[#allocation4 + $0xd8] sm:$0xff] %vm1927_vm5, %v1790_v24  ;;  %v3186_v24 = vld [vmem:[#allocation2 + $0x22a] sm:$0xff] }
 0x327   :  { %2905 = vrot.lane.b32.xlu2 %v9635_v38, %s8416_s16  ;;  %v3155_v38 = vld [vmem:[#allocation2 + $0x82] sm:$0xff] }
 0x328   :  { %2903 = vrot.lane.b32.xlu1 %v9630_v61, %s8416_s16  ;;  %v8200_v61 = vld [vmem:[%s12278_s1] sm:$0xff]  ;;  %s7501_s1 = sshll.u32 %s8425_s24, 4  ;;  %s7502_s1 = int_to_ptr.vmem [resolvable:$true] %s7501_s1 }
 0x329   :  { %v3277_v3 = vpop.permute.xlu2 %3276  ;;  %3288 = vrot.lane.b32.xlu0 %v3154_v46, %s8417_s17  ;;  %3761 = vmatpush.bf16.msra.mxu0 %v8200_v61 }
 0x32a   :  { %v1792_v60 = vpop.permute.xlu1 %1791  ;;  %8320 = vmatpush.bf16.msra.mxu1 %v8200_v61 }
 0x32b   :  { %1956 = vst.msk [vmem:[#allocation4 + $0xe0] sm:$0xff] %vm1927_vm5, %v1792_v60  ;;  %v1796_v58 = vpop.permute.xlu0 %1795  ;;  %v2388_v60 = vld [vmem:[#allocation2 + $0xa8] sm:$0xff] }
 0x32c   :  { %1958 = vst.msk [vmem:[#allocation4 + $0xf0] sm:$0xff] %vm1927_vm5, %v1796_v58  ;;  %v2389_v58 = vld [vmem:[#allocation2 + $0xb0] sm:$0xff] }
 0x32f   :  { %1807 = vrot.lane.b32.xlu2 %v2797_v59, %s8413_s0 }
 0x330   :  { %3290 = vrot.lane.b32.xlu1 %v3155_v38, %s8417_s17 }
 0x331   :  { %v2127_v63 = vpop.permute.xlu2 %2126  ;;  %1809 = vrot.lane.b32.xlu0 %v2798_v13, %s8413_s0 }
 0x332   :  { %2316 = vst.msk [vmem:[#allocation4 + $0x18] sm:$0xff] %vm2312_vm6, %v2127_v63  ;;  %v1798_v39 = vpop.permute.xlu1 %1797  ;;  %v3158_v63 = vld [vmem:[#allocation2 + $0xaa] sm:$0xff] }
 0x333   :  { %1959 = vst.msk [vmem:[#allocation4 + $0xf8] sm:$0xff] %vm1927_vm5, %v1798_v39  ;;  %v2123_v20 = vpop.permute.xlu0 %2122 }
 0x334   :  { %2314 = vst.msk [vmem:[#allocation4 + $0x8] sm:$0xff] %vm2312_vm6, %v2123_v20 }
 0x335   :  { %2700 = vst.msk [vmem:[#allocation4 + $0x8] sm:$0xff] %vm2698_vm8, %v2509_v41 }
 0x337   :  { %2194 = vrot.lane.b32.xlu2 %v3183_v53, %s8414_s14 }
 0x338   :  { %2192 = vrot.lane.b32.xlu1 %v3182_v11, %s8414_s14 }
 0x339   :  { %v2896_v56 = vpop.permute.xlu2 %2895  ;;  %2578 = vrot.lane.b32.xlu0 %v2414_v27, %s8415_s15 }
 0x33a   :  { %v2507_v35 = vpop.permute.xlu1 %2506 }
 0x33b   :  { %2699 = vst.msk [vmem:[#allocation4] sm:$0xff] %vm2698_vm8, %v2507_v35  ;;  %v2892_v42 = vpop.permute.xlu0 %2891 }
 0x33c   :  { %3084 = vst.msk [vmem:[#allocation4] sm:$0xff] %vm3083_vm9, %v2892_v42 }
 0x33d   :  { %3469 = vst.msk [vmem:[#allocation4] sm:$0xff] %vm3468_vm10, %v3277_v3 }
 0x33f   :  { %2963 = vrot.lane.b32.xlu2 %v2799_v5, %s8416_s16 }
 0x340   :  { %2580 = vrot.lane.b32.xlu1 %v2415_v18, %s8415_s15 }
 0x341   :  { %v3283_v54 = vpop.permute.xlu2 %3282  ;;  %2965 = vrot.lane.b32.xlu0 %v2800_v12, %s8416_s16 }
 0x342   :  { %v2894_v62 = vpop.permute.xlu1 %2893 }
 0x343   :  { %3085 = vst.msk [vmem:[#allocation4 + $0x8] sm:$0xff] %vm3083_vm9, %v2894_v62  ;;  %v3279_v17 = vpop.permute.xlu0 %3278 }
 0x344   :  { %3470 = vst.msk [vmem:[#allocation4 + $0x8] sm:$0xff] %vm3468_vm10, %v3279_v17  ;;  %v3533_v16 = vld [vmem:[#allocation4] sm:$0xff] }
 0x347   :  { %3350 = vrot.lane.b32.xlu2 %v3185_v9, %s8417_s17 }
 0x348   :  { %3348 = vrot.lane.b32.xlu1 %v3184_v15, %s8417_s17 }
 0x349   :  { %v2515_v31 = vpop.permute.xlu2 %2514  ;;  %2136 = vrot.lane.b32.xlu0 %v3154_v46, %s8414_s14 }
 0x34a   :  { %v2125_v26 = vpop.permute.xlu1 %2124 }
 0x34b   :  { %2315 = vst.msk [vmem:[#allocation4 + $0x10] sm:$0xff] %vm2312_vm6, %v2125_v26  ;;  %v2511_v36 = vpop.permute.xlu0 %2510  ;;  %v3534_v48 = vld [vmem:[#allocation4 + $0x8] sm:$0xff] }
 0x34c   :  { %2701 = vst.msk [vmem:[#allocation4 + $0x10] sm:$0xff] %vm2698_vm8, %v2511_v36  ;;  %v3597_v49 = vpack.c.bf16 %v3534_v48, %v3533_v16  ;;  %v3189_v48 = vld [vmem:[#allocation2 + $0x24a] sm:$0xff] }
 0x34d   :  { %3086 = vst.msk [vmem:[#allocation4 + $0x10] sm:$0xff] %vm3083_vm9, %v2896_v56  ;;  %v3159_v56 = vld [vmem:[#allocation2 + $0xb2] sm:$0xff] }
 0x34e   :  { %7536 = vmatmul.msk.bf16.vlgmr.msra.gmra.mxu0 %vm3653_vm11, %v3597_v49 }
 0x34f   :  { %2522 = vrot.lane.b32.xlu2 %v2386_v43, %s8415_s15  ;;  %v3188_v43 = vld [vmem:[#allocation2 + $0x242] sm:$0xff] }
 0x350   :  { %2138 = vrot.lane.b32.xlu1 %v3155_v38, %s8414_s14 }
 0x351   :  { %v2902_v25 = vpop.permute.xlu2 %2901  ;;  %2524 = vrot.lane.b32.xlu0 %v2387_v34, %s8415_s15 }
 0x352   :  { %v2513_v1 = vpop.permute.xlu1 %2512 }
 0x353   :  { %2702 = vst.msk [vmem:[#allocation4 + $0x18] sm:$0xff] %vm2698_vm8, %v2513_v1  ;;  %v2898_v50 = vpop.permute.xlu0 %2897 }
 0x354   :  { %3087 = vst.msk [vmem:[#allocation4 + $0x18] sm:$0xff] %vm3083_vm9, %v2898_v50 }
 0x355   :  { %3472 = vst.msk [vmem:[#allocation4 + $0x18] sm:$0xff] %vm3468_vm10, %v3283_v54 }
 0x357   :  { %2909 = vrot.lane.b32.xlu2 %v9645_v40, %s8416_s16 }
 0x358   :  { %2907 = vrot.lane.b32.xlu1 %v9648_v30, %s8416_s16 }
 0x359   :  { %v1804_v14 = vpop.permute.xlu2 %1803  ;;  %3292 = vrot.lane.b32.xlu0 %v3156_v4, %s8417_s17 }
 0x35a   :  { %1962 = vst.msk [vmem:[#allocation4 + $0x110] sm:$0xff] %vm1927_vm5, %v1804_v14  ;;  %v3281_v29 = vpop.permute.xlu1 %3280  ;;  %v2390_v14 = vld [vmem:[#allocation2 + $0xc0] sm:$0xff] }
 0x35b   :  { %3471 = vst.msk [vmem:[#allocation4 + $0x10] sm:$0xff] %vm3468_vm10, %v3281_v29  ;;  %v2129_v23 = vpop.permute.xlu0 %2128  ;;  %v2391_v29 = vld [vmem:[#allocation2 + $0xc8] sm:$0xff] }
 0x35c   :  { %2317 = vst.msk [vmem:[#allocation4 + $0x20] sm:$0xff] %vm2312_vm6, %v2129_v23  ;;  %v3536_v40 = vld [vmem:[#allocation4 + $0x18] sm:$0xff] }
 0x35d   :  { %2703 = vst.msk [vmem:[#allocation4 + $0x20] sm:$0xff] %vm2698_vm8, %v2515_v31  ;;  %v2804_v31 = vld [vmem:[#allocation2 + $0x249] sm:$0xff] }
 0x35f   :  { %1811 = vrot.lane.b32.xlu2 %v2799_v5, %s8413_s0 }
 0x360   :  { %3294 = vrot.lane.b32.xlu1 %v3157_v37, %s8417_s17 }
 0x361   :  { %v2191_v30 = vpop.permute.xlu2 %2190  ;;  %1813 = vrot.lane.b32.xlu0 %v2800_v12, %s8413_s0  ;;  %v2418_v12 = vld [vmem:[#allocation2 + $0x240] sm:$0xff] }
 0x362   :  { %v2131_v59 = vpop.permute.xlu1 %2130  ;;  %v3535_v45 = vld [vmem:[#allocation4 + $0x10] sm:$0xff] }
 0x363   :  { %2318 = vst.msk [vmem:[#allocation4 + $0x28] sm:$0xff] %vm2312_vm6, %v2131_v59  ;;  %v3598_v13 = vpack.c.bf16 %v3536_v40, %v3535_v45  ;;  %v2517_v32 = vpop.permute.xlu0 %2516 }
 0x364   :  { %2704 = vst.msk [vmem:[#allocation4 + $0x28] sm:$0xff] %vm2698_vm8, %v2517_v32  ;;  %v9928_v32 = vld [vmem:[#allocation2 + $0xca] sm:$0xff] }
 0x365   :  { %7537 = vmatmul.msk.bf16.gmra.mxu0 %vm3653_vm11, %v3598_v13  ;;  %3089 = vst.msk [vmem:[#allocation4 + $0x28] sm:$0xff] %vm3083_vm9, %v2902_v25 }
 0x367   :  { %2198 = vrot.lane.b32.xlu2 %v3185_v9, %s8414_s14  ;;  %v2803_v9 = vld [vmem:[#allocation2 + $0x241] sm:$0xff] }
 0x368   :  { %2196 = vrot.lane.b32.xlu1 %v3184_v15, %s8414_s14  ;;  %v2419_v15 = vld [vmem:[#allocation2 + $0x248] sm:$0xff] }
 0x369   :  { %v2960_v22 = vpop.permute.xlu2 %2959  ;;  %2582 = vrot.lane.b32.xlu0 %v2416_v47, %s8415_s15 }
 0x36a   :  { %v2900_v53 = vpop.permute.xlu1 %2899 }
 0x36b   :  { %3088 = vst.msk [vmem:[#allocation4 + $0x20] sm:$0xff] %vm3083_vm9, %v2900_v53  ;;  %v3285_v11 = vpop.permute.xlu0 %3284 }
 0x36c   :  { %3473 = vst.msk [vmem:[#allocation4 + $0x20] sm:$0xff] %vm3468_vm10, %v3285_v11 }
 0x36f   :  { %2967 = vrot.lane.b32.xlu2 %v2801_v55, %s8416_s16 }
 0x370   :  { %2584 = vrot.lane.b32.xlu1 %v2417_v19, %s8415_s15 }
 0x371   :  { %v3347_v7 = vpop.permute.xlu2 %3346  ;;  %2969 = vrot.lane.b32.xlu0 %v2802_v33, %s8416_s16 }
 0x372   :  { %v3287_v6 = vpop.permute.xlu1 %3286 }
 0x373   :  { %3474 = vst.msk [vmem:[#allocation4 + $0x28] sm:$0xff] %vm3468_vm10, %v3287_v6  ;;  %v1806_v41 = vpop.permute.xlu0 %1805  ;;  %v3537_v28 = vld [vmem:[#allocation4 + $0x20] sm:$0xff] }
 0x374   :  { %1963 = vst.msk [vmem:[#allocation4 + $0x118] sm:$0xff] %vm1927_vm5, %v1806_v41  ;;  %v9943_v6 = vld [vmem:[#allocation2 + $0x259] sm:$0xff] }
 0x375   :  { %2348 = vst.msk [vmem:[#allocation4 + $0x118] sm:$0xff] %vm2312_vm6, %v2191_v30  ;;  %v3160_v30 = vld [vmem:[#allocation2 + $0xc2] sm:$0xff] }
 0x376   :  { %v2421_v41 = vld [vmem:[#allocation2 + $0x260] sm:$0xff] }
 0x377   :  { %3354 = vrot.lane.b32.xlu2 %v3187_v51, %s8417_s17 }
 0x378   :  { %3352 = vrot.lane.b32.xlu1 %v3186_v24, %s8417_s17 }
 0x379   :  { %v2519_v10 = vpop.permute.xlu2 %2518  ;;  %2140 = vrot.lane.b32.xlu0 %v3156_v4, %s8414_s14 }
 0x37a   :  { %v2189_v46 = vpop.permute.xlu1 %2188  ;;  %v3538_v52 = vld [vmem:[#allocation4 + $0x28] sm:$0xff] }
 0x37b   :  { %2347 = vst.msk [vmem:[#allocation4 + $0x110] sm:$0xff] %vm2312_vm6, %v2189_v46  ;;  %v3599_v57 = vpack.c.bf16 %v3538_v52, %v3537_v28  ;;  %v2575_v3 = vpop.permute.xlu0 %2574  ;;  %v9954_v52 = vld [vmem:[#allocation2 + $0x262] sm:$0xff] }
 0x37c   :  { %2733 = vst.msk [vmem:[#allocation4 + $0x110] sm:$0xff] %vm2698_vm8, %v2575_v3  ;;  %v12296_v3 = vmov 0.0  }
 0x37d   :  { %7538 = vmatmul.msk.bf16.gmra.mxu0 %vm3653_vm11, %v3599_v57  ;;  %3118 = vst.msk [vmem:[#allocation4 + $0x110] sm:$0xff] %vm3083_vm9, %v2960_v22  ;;  %v9957_v57 = vld [vmem:[#allocation2 + $0x25a] sm:$0xff] }
 0x37e   :  { %157 = vst.msk [vmem:[#allocation3 + $0x10] sm:$0xff] %vm153_vm12, %v12296_v3 }
 0x37f   :  { %2526 = vrot.lane.b32.xlu2 %v2388_v60, %s8415_s15  ;;  %158 = vst.msk [vmem:[#allocation3 + $0x18] sm:$0x3] %vm155_vm13, %v12296_v3 }
 0x380   :  { %2142 = vrot.lane.b32.xlu1 %v3157_v37, %s8414_s14  ;;  %154 = vst.msk [vmem:[#allocation3] sm:$0xff] %vm153_vm12, %v12296_v3 }
 0x381   :  { %v2906_v2 = vpop.permute.xlu2 %2905  ;;  %2528 = vrot.lane.b32.xlu0 %v2389_v58, %s8415_s15  ;;  %156 = vst.msk [vmem:[#allocation3 + $0x8] sm:$0x3] %vm155_vm13, %v12296_v3 }
 0x382   :  { %v2577_v38 = vpop.permute.xlu1 %2576  ;;  %159 = vst.msk [vmem:[#allocation3 + $0x20] sm:$0xff] %vm153_vm12, %v12296_v3 }
 0x383   :  { %2734 = vst.msk [vmem:[#allocation4 + $0x118] sm:$0xff] %vm2698_vm8, %v2577_v38  ;;  %v2962_v61 = vpop.permute.xlu0 %2961 }
 0x384   :  { %3119 = vst.msk [vmem:[#allocation4 + $0x118] sm:$0xff] %vm3083_vm9, %v2962_v61 }
 0x385   :  { %3504 = vst.msk [vmem:[#allocation4 + $0x118] sm:$0xff] %vm3468_vm10, %v3347_v7 }
 0x386   :  { %160 = vst.msk [vmem:[#allocation3 + $0x28] sm:$0x3] %vm155_vm13, %v12296_v3 }
 0x387   :  { %2913 = vrot.lane.b32.xlu2 %v9663_v0, %s8416_s16  ;;  %161 = vst.msk [vmem:[#allocation3 + $0x30] sm:$0xff] %vm153_vm12, %v12296_v3 }
 0x388   :  { %2911 = vrot.lane.b32.xlu1 %v9650_v21, %s8416_s16  ;;  %162 = vst.msk [vmem:[#allocation3 + $0x38] sm:$0x3] %vm155_vm13, %v12296_v3 }
 0x389   :  { %v1808_v39 = vpop.permute.xlu2 %1807  ;;  %3296 = vrot.lane.b32.xlu0 %v3158_v63, %s8417_s17  ;;  %163 = vst.msk [vmem:[#allocation3 + $0x40] sm:$0xff] %vm153_vm12, %v12296_v3 }
 0x38a   :  { %1964 = vst.msk [vmem:[#allocation4 + $0x120] sm:$0xff] %vm1927_vm5, %v1808_v39  ;;  %v3345_v20 = vpop.permute.xlu1 %3344 }
 0x38b   :  { %3503 = vst.msk [vmem:[#allocation4 + $0x110] sm:$0xff] %vm3468_vm10, %v3345_v20  ;;  %v2133_v27 = vpop.permute.xlu0 %2132  ;;  %v2392_v20 = vld [vmem:[#allocation2 + $0xd8] sm:$0xff] }
 0x38c   :  { %2319 = vst.msk [vmem:[#allocation4 + $0x30] sm:$0xff] %vm2312_vm6, %v2133_v27  ;;  %v3568_v0 = vld [vmem:[#allocation4 + $0x118] sm:$0xff] }
 0x38d   :  { %2705 = vst.msk [vmem:[#allocation4 + $0x30] sm:$0xff] %vm2698_vm8, %v2519_v10  ;;  %v9982_v27 = vld [vmem:[%s12279_s2] ss:$0 sm:$0xff] }
 0x38e   :  { %164 = vst.msk [vmem:[#allocation3 + $0x48] sm:$0x3] %vm155_vm13, %v12296_v3 }
 0x38f   :  { %1815 = vrot.lane.b32.xlu2 %v2801_v55, %s8413_s0  ;;  %v2420_v55 = vld [vmem:[#allocation2 + $0x258] sm:$0xff]  ;;  %165 = vst.msk [vmem:[#allocation3 + $0x50] sm:$0xff] %vm153_vm12, %v12296_v3 }
 0x390   :  { %3298 = vrot.lane.b32.xlu1 %v3159_v56, %s8417_s17  ;;  %166 = vst.msk [vmem:[#allocation3 + $0x58] sm:$0x3] %vm155_vm13, %v12296_v3 }
 0x391   :  { %v2195_v21 = vpop.permute.xlu2 %2194  ;;  %1817 = vrot.lane.b32.xlu0 %v2802_v33, %s8413_s0  ;;  %167 = vst.msk [vmem:[#allocation3 + $0x60] sm:$0xff] %vm153_vm12, %v12296_v3 }
 0x392   :  { %v2135_v35 = vpop.permute.xlu1 %2134  ;;  %v3567_v42 = vld [vmem:[#allocation4 + $0x110] sm:$0xff]  ;;  %168 = vst.msk [vmem:[#allocation3 + $0x68] sm:$0x3] %vm155_vm13, %v12296_v3 }
 0x393   :  { %2320 = vst.msk [vmem:[#allocation4 + $0x38] sm:$0xff] %vm2312_vm6, %v2135_v35  ;;  %v3614_v5 = vpack.c.bf16 %v3568_v0, %v3567_v42  ;;  %v2521_v18 = vpop.permute.xlu0 %2520 }
 0x394   :  { %2706 = vst.msk [vmem:[#allocation4 + $0x38] sm:$0xff] %vm2698_vm8, %v2521_v18 }
 0x395   :  { %7553 = vmatmul.msk.bf16.vlgmr.msra.gmra.mxu1 %vm3653_vm11, %v3614_v5  ;;  %3091 = vst.msk [vmem:[#allocation4 + $0x38] sm:$0xff] %vm3083_vm9, %v2906_v2 }
 0x396   :  { %169 = vst.msk [vmem:[#allocation3 + $0x70] sm:$0xff] %vm153_vm12, %v12296_v3 }
 0x397   :  { %2202 = vrot.lane.b32.xlu2 %v3187_v51, %s8414_s14  ;;  %170 = vst.msk [vmem:[#allocation3 + $0x78] sm:$0x3] %vm155_vm13, %v12296_v3 }
 0x398   :  { %2200 = vrot.lane.b32.xlu1 %v3186_v24, %s8414_s14  ;;  %v9946_v24 = vld [vmem:[#allocation2 + $0x261] sm:$0xff]  ;;  %171 = vst.msk [vmem:[#allocation3 + $0x80] sm:$0xff] %vm153_vm12, %v12296_v3 }
 0x399   :  { %v2964_v54 = vpop.permute.xlu2 %2963  ;;  %2586 = vrot.lane.b32.xlu0 %v2418_v12, %s8415_s15  ;;  %v2778_v12 = vld [vmem:[#allocation2 + $0xe1] sm:$0xff]  ;;  %172 = vst.msk [vmem:[#allocation3 + $0x88] sm:$0x3] %vm155_vm13, %v12296_v3 }
 0x39a   :  { %v2904_v62 = vpop.permute.xlu1 %2903  ;;  %173 = vst.msk [vmem:[#allocation3 + $0x90] sm:$0xff] %vm153_vm12, %v12296_v3 }
 0x39b   :  { %3090 = vst.msk [vmem:[#allocation4 + $0x30] sm:$0xff] %vm3083_vm9, %v2904_v62  ;;  %v3289_v17 = vpop.permute.xlu0 %3288 }
 0x39c   :  { %3475 = vst.msk [vmem:[#allocation4 + $0x30] sm:$0xff] %vm3468_vm10, %v3289_v17  ;;  %v2777_v17 = vld [vmem:[#allocation2 + $0xd9] sm:$0xff] }
 0x39d   :  { %174 = vst.msk [vmem:[#allocation3 + $0x98] sm:$0x3] %vm155_vm13, %v12296_v3 }
 0x39e   :  { %175 = vst.msk [vmem:[#allocation3 + $0xa0] sm:$0xff] %vm153_vm12, %v12296_v3 }
 0x39f   :  { %2971 = vrot.lane.b32.xlu2 %v2803_v9, %s8416_s16  ;;  %176 = vst.msk [vmem:[#allocation3 + $0xa8] sm:$0x3] %vm155_vm13, %v12296_v3 }
 0x3a0   :  { %2588 = vrot.lane.b32.xlu1 %v2419_v15, %s8415_s15  ;;  %177 = vst.msk [vmem:[#allocation3 + $0xb0] sm:$0xff] %vm153_vm12, %v12296_v3 }
 0x3a1   :  { %v3351_v16 = vpop.permute.xlu2 %3350  ;;  %2973 = vrot.lane.b32.xlu0 %v2804_v31, %s8416_s16  ;;  %178 = vst.msk [vmem:[#allocation3 + $0xb8] sm:$0x3] %vm155_vm13, %v12296_v3 }
 0x3a2   :  { %v3291_v26 = vpop.permute.xlu1 %3290  ;;  %179 = vst.msk [vmem:[#allocation3 + $0xc0] sm:$0xff] %vm153_vm12, %v12296_v3 }
 0x3a3   :  { %3476 = vst.msk [vmem:[#allocation4 + $0x38] sm:$0xff] %vm3468_vm10, %v3291_v26  ;;  %v1810_v36 = vpop.permute.xlu0 %1809  ;;  %v3539_v49 = vld [vmem:[#allocation4 + $0x30] sm:$0xff] }
 0x3a4   :  { %1965 = vst.msk [vmem:[#allocation4 + $0x128] sm:$0xff] %vm1927_vm5, %v1810_v36 }
 0x3a5   :  { %2350 = vst.msk [vmem:[#allocation4 + $0x128] sm:$0xff] %vm2312_vm6, %v2195_v21 }
 0x3a6   :  { %180 = vst.msk [vmem:[#allocation3 + $0xc8] sm:$0x3] %vm155_vm13, %v12296_v3 }
 0x3a7   :  { %3358 = vrot.lane.b32.xlu2 %v3189_v48, %s8417_s17  ;;  %181 = vst.msk [vmem:[#allocation3 + $0xd0] sm:$0xff] %vm153_vm12, %v12296_v3 }
 0x3a8   :  { %3356 = vrot.lane.b32.xlu1 %v3188_v43, %s8417_s17  ;;  %182 = vst.msk [vmem:[#allocation3 + $0xd8] sm:$0x3] %vm155_vm13, %v12296_v3 }
 0x3a9   :  { %v2523_v34 = vpop.permute.xlu2 %2522  ;;  %2144 = vrot.lane.b32.xlu0 %v3158_v63, %s8414_s14  ;;  %183 = vst.msk [vmem:[#allocation3 + $0xe0] sm:$0xff] %vm153_vm12, %v12296_v3 }
 0x3aa   :  { %v2193_v25 = vpop.permute.xlu1 %2192  ;;  %v3540_v1 = vld [vmem:[#allocation4 + $0x38] sm:$0xff]  ;;  %184 = vst.msk [vmem:[#allocation3 + $0xe8] sm:$0x3] %vm155_vm13, %v12296_v3 }
 0x3ab   :  { %2349 = vst.msk [vmem:[#allocation4 + $0x120] sm:$0xff] %vm2312_vm6, %v2193_v25  ;;  %v3600_v50 = vpack.c.bf16 %v3540_v1, %v3539_v49  ;;  %v2579_v4 = vpop.permute.xlu0 %2578 }
 0x3ac   :  { %2735 = vst.msk [vmem:[#allocation4 + $0x120] sm:$0xff] %vm2698_vm8, %v2579_v4 }
 0x3ad   :  { %7539 = vmatmul.msk.bf16.gmra.mxu0 %vm3653_vm11, %v3600_v50  ;;  %3120 = vst.msk [vmem:[#allocation4 + $0x120] sm:$0xff] %vm3083_vm9, %v2964_v54 }
 0x3ae   :  { %185 = vst.msk [vmem:[#allocation3 + $0xf0] sm:$0xff] %vm153_vm12, %v12296_v3 }
 0x3af   :  { %2530 = vrot.lane.b32.xlu2 %v2390_v14, %s8415_s15  ;;  %186 = vst.msk [vmem:[#allocation3 + $0xf8] sm:$0x3] %vm155_vm13, %v12296_v3 }
 0x3b0   :  { %2146 = vrot.lane.b32.xlu1 %v3159_v56, %s8414_s14  ;;  %v2393_v56 = vld [vmem:[#allocation2 + $0xe0] sm:$0xff]  ;;  %187 = vst.msk [vmem:[#allocation3 + $0x100] sm:$0xff] %vm153_vm12, %v12296_v3 }
 0x3b1   :  { %v2910_v23 = vpop.permute.xlu2 %2909  ;;  %2532 = vrot.lane.b32.xlu0 %v2391_v29, %s8415_s15  ;;  %188 = vst.msk [vmem:[#allocation3 + $0x108] sm:$0x3] %vm155_vm13, %v12296_v3 }
 0x3b2   :  { %v2581_v37 = vpop.permute.xlu1 %2580  ;;  %189 = vst.msk [vmem:[#allocation3 + $0x110] sm:$0xff] %vm153_vm12, %v12296_v3 }
 0x3b3   :  { %2736 = vst.msk [vmem:[#allocation4 + $0x128] sm:$0xff] %vm2698_vm8, %v2581_v37  ;;  %v2966_v40 = vpop.permute.xlu0 %2965 }
 0x3b4   :  { %3121 = vst.msk [vmem:[#allocation4 + $0x128] sm:$0xff] %vm3083_vm9, %v2966_v40  ;;  %v10031_v40 = vld [vmem:[#allocation2 + $0xe2] sm:$0xff] }
 0x3b5   :  { %3506 = vst.msk [vmem:[#allocation4 + $0x128] sm:$0xff] %vm3468_vm10, %v3351_v16 }
 0x3b6   :  { %190 = vst.msk [vmem:[#allocation3 + $0x118] sm:$0x3] %vm155_vm13, %v12296_v3 }
 0x3b7   :  { %2917 = vrot.lane.b32.xlu2 %v9665_v44, %s8416_s16  ;;  %191 = vst.msk [vmem:[#allocation3 + $0x120] sm:$0xff] %vm153_vm12, %v12296_v3 }
 0x3b8   :  { %2915 = vrot.lane.b32.xlu1 %v9660_v8, %s8416_s16  ;;  %192 = vst.msk [vmem:[#allocation3 + $0x128] sm:$0x3] %vm155_vm13, %v12296_v3 }
 0x3b9   :  { %v1812_v59 = vpop.permute.xlu2 %1811  ;;  %3300 = vrot.lane.b32.xlu0 %v3160_v30, %s8417_s17  ;;  %193 = vst.msk [vmem:[#allocation3 + $0x130] sm:$0xff] %vm153_vm12, %v12296_v3 }
 0x3ba   :  { %1966 = vst.msk [vmem:[#allocation4 + $0x130] sm:$0xff] %vm1927_vm5, %v1812_v59  ;;  %v3349_v45 = vpop.permute.xlu1 %3348 }
 0x3bb   :  { %3505 = vst.msk [vmem:[#allocation4 + $0x120] sm:$0xff] %vm3468_vm10, %v3349_v45  ;;  %v2137_v13 = vpop.permute.xlu0 %2136 }
 0x3bc   :  { %2321 = vst.msk [vmem:[#allocation4 + $0x40] sm:$0xff] %vm2312_vm6, %v2137_v13  ;;  %v3570_v8 = vld [vmem:[#allocation4 + $0x128] sm:$0xff] }
 0x3bd   :  { %2707 = vst.msk [vmem:[#allocation4 + $0x40] sm:$0xff] %vm2698_vm8, %v2523_v34 }
 0x3be   :  { %194 = vst.msk [vmem:[#allocation3 + $0x138] sm:$0x3] %vm155_vm13, %v12296_v3  ;;  %vm5275_vm13 = vcmask 130112  }
 0x3bf   :  { %1819 = vrot.lane.b32.xlu2 %v2803_v9, %s8413_s0  ;;  %v10009_v9 = vld [vmem:[#allocation2 + $0xda] sm:$0xff] }
 0x3c0   :  { %3302 = vrot.lane.b32.xlu1 %v9928_v32, %s8417_s17 }
 0x3c1   :  { %v2199_v44 = vpop.permute.xlu2 %2198  ;;  %1821 = vrot.lane.b32.xlu0 %v2804_v31, %s8413_s0 }
 0x3c2   :  { %v2139_v47 = vpop.permute.xlu1 %2138  ;;  %v3569_v22 = vld [vmem:[#allocation4 + $0x120] sm:$0xff] }
 0x3c3   :  { %2322 = vst.msk [vmem:[#allocation4 + $0x48] sm:$0xff] %vm2312_vm6, %v2139_v47  ;;  %v3615_v53 = vpack.c.bf16 %v3570_v8, %v3569_v22  ;;  %v2525_v11 = vpop.permute.xlu0 %2524 }
 0x3c4   :  { %2708 = vst.msk [vmem:[#allocation4 + $0x48] sm:$0xff] %vm2698_vm8, %v2525_v11 }
 0x3c5   :  { %7554 = vmatmul.msk.bf16.gmra.mxu1 %vm3653_vm11, %v3615_v53  ;;  %3093 = vst.msk [vmem:[#allocation4 + $0x48] sm:$0xff] %vm3083_vm9, %v2910_v23 }
 0x3c7   :  { %2206 = vrot.lane.b32.xlu2 %v3189_v48, %s8414_s14 }
 0x3c8   :  { %2204 = vrot.lane.b32.xlu1 %v3188_v43, %s8414_s14 }
 0x3c9   :  { %v2968_v19 = vpop.permute.xlu2 %2967  ;;  %2590 = vrot.lane.b32.xlu0 %v2420_v55, %s8415_s15 }
 0x3ca   :  { %v2908_v33 = vpop.permute.xlu1 %2907 }
 0x3cb   :  { %3092 = vst.msk [vmem:[#allocation4 + $0x40] sm:$0xff] %vm3083_vm9, %v2908_v33  ;;  %v3293_v7 = vpop.permute.xlu0 %3292  ;;  %v3763_v51 = vpop.f32.mrf.mxu0 }
 0x3cc   :  { %3477 = vst.msk [vmem:[#allocation4 + $0x40] sm:$0xff] %vm3468_vm10, %v3293_v7  ;;  %v3764_v0 = vadd.f32 %v9982_v27, %v3763_v51 }
 0x3ce   :  { %v3923_v54 = vmax.f32 %v3764_v0, 0.0 }
 0x3cf   :  { %2975 = vrot.lane.b32.xlu2 %v9943_v6, %s8416_s16 }
 0x3d0   :  { %2592 = vrot.lane.b32.xlu1 %v2421_v41, %s8415_s15 }
 0x3d1   :  { %v3355_v28 = vpop.permute.xlu2 %3354  ;;  %2977 = vrot.lane.b32.xlu0 %v9946_v24, %s8416_s16 }
 0x3d2   :  { %v3295_v10 = vpop.permute.xlu1 %3294 }
 0x3d3   :  { %3478 = vst.msk [vmem:[#allocation4 + $0x48] sm:$0xff] %vm3468_vm10, %v3295_v10  ;;  %v1814_v46 = vpop.permute.xlu0 %1813  ;;  %v3765_v60 = vpop.f32.mrf.mxu0  ;;  %v3541_v58 = vld [vmem:[#allocation4 + $0x40] sm:$0xff] }
 0x3d4   :  { %1967 = vst.msk [vmem:[#allocation4 + $0x138] sm:$0xff] %vm1927_vm5, %v1814_v46  ;;  %v3766_v43 = vadd.f32 %v9982_v27, %v3765_v60 }
 0x3d5   :  { %2352 = vst.msk [vmem:[#allocation4 + $0x138] sm:$0xff] %vm2312_vm6, %v2199_v44 }
 0x3d7   :  { %3362 = vrot.lane.b32.xlu2 %v9954_v52, %s8417_s17 }
 0x3d8   :  { %3360 = vrot.lane.b32.xlu1 %v9957_v57, %s8417_s17 }
 0x3d9   :  { %v9970_v2 = vpop.permute.xlu2 %2526  ;;  %2148 = vrot.lane.b32.xlu0 %v3160_v30, %s8414_s14  ;;  %v3924_v30 = vmax.f32 %v3766_v43, 0.0  ;;  %v10116_v43 = vld [vmem:[#allocation2 + $0x272] sm:$0xff] }
 0x3da   :  { %v2197_v38 = vpop.permute.xlu1 %2196  ;;  %v3542_v61 = vld [vmem:[#allocation4 + $0x48] sm:$0xff] }
 0x3db   :  { %2351 = vst.msk [vmem:[#allocation4 + $0x130] sm:$0xff] %vm2312_vm6, %v2197_v38  ;;  %v3601_v63 = vpack.c.bf16 %v3542_v61, %v3541_v58  ;;  %v2583_v39 = vpop.permute.xlu0 %2582 }
 0x3dc   :  { %2737 = vst.msk [vmem:[#allocation4 + $0x130] sm:$0xff] %vm2698_vm8, %v2583_v39  ;;  %v2422_v39 = vld [vmem:[#allocation2 + $0x270] sm:$0xff] }
 0x3dd   :  { %7540 = vmatmul.msk.bf16.gmra.mxu0 %vm3653_vm11, %v3601_v63  ;;  %3122 = vst.msk [vmem:[#allocation4 + $0x130] sm:$0xff] %vm3083_vm9, %v2968_v19 }
 0x3df   :  { %2534 = vrot.lane.b32.xlu2 %v2392_v20, %s8415_s15 }
 0x3e0   :  { %2150 = vrot.lane.b32.xlu1 %v9928_v32, %s8414_s14 }
 0x3e1   :  { %v9996_v21 = vpop.permute.xlu2 %2913  ;;  %2536 = vrot.lane.b32.xlu0 %v2393_v56, %s8415_s15 }
 0x3e2   :  { %v2585_v35 = vpop.permute.xlu1 %2584  ;;  %v3768_v42 = vpop.f32.mrf.mxu0 }
 0x3e3   :  { %2738 = vst.msk [vmem:[#allocation4 + $0x138] sm:$0xff] %vm2698_vm8, %v2585_v35  ;;  %v3769_v5 = vadd.f32 %v9982_v27, %v3768_v42  ;;  %v2970_v18 = vpop.permute.xlu0 %2969 }
 0x3e4   :  { %3123 = vst.msk [vmem:[#allocation4 + $0x138] sm:$0xff] %vm3083_vm9, %v2970_v18 }
 0x3e5   :  { %v3925_v62 = vmax.f32 %v3769_v5, 0.0  ;;  %3508 = vst.msk [vmem:[#allocation4 + $0x138] sm:$0xff] %vm3468_vm10, %v3355_v28 }
 0x3e7   :  { %v3987_v15 = vmax.f32 %v3923_v54, %v3925_v62  ;;  %2921 = vrot.lane.b32.xlu2 %v2778_v12, %s8416_s16 }
 0x3e8   :  { %2919 = vrot.lane.b32.xlu1 %v2777_v17, %s8416_s16  ;;  %v10088_v17 = vld [vmem:[#allocation2 + $0x271] sm:$0xff] }
 0x3e9   :  { %v4051_v31 = vrot.slane %v3987_v15, 2  ;;  %v4052_v16 = vrot.slane %v3987_v15, 4  ;;  %v4053_v26 = vrot.slane %v3987_v15, 6  ;;  %v7568_v36 = vrot.slane %v3987_v15, 9  ;;  %v1816_v48 = vpop.permute.xlu2 %1815  ;;  %3304 = vrot.lane.b32.xlu0 %v10009_v9, %s8417_s17 }
 0x3ea   :  { %1968 = vst.msk [vmem:[#allocation4 + $0x140] sm:$0xff] %vm1927_vm5, %v1816_v48  ;;  %v3353_v49 = vpop.permute.xlu1 %3352  ;;  %v3770_v34 = vpop.f32.mrf.mxu0  ;;  %v10112_v48 = vld [vmem:[#allocation2 + $0x27a] sm:$0xff] }
 0x3eb   :  { %v7569_v25 = vrot.slane %v4051_v31, 9  ;;  %v7570_v1 = vrot.slane %v4052_v16, 9  ;;  %3507 = vst.msk [vmem:[#allocation4 + $0x130] sm:$0xff] %vm3468_vm10, %v3353_v49  ;;  %v10024_v50 = vpop.permute.xlu0 %2140  ;;  %v4627_v4 = vmax.f32 %v3987_v15, %v7568_v36  ;;  %v3771_v14 = vadd.f32 %v9982_v27, %v3770_v34  ;;  %v2423_v15 = vld [vmem:[#allocation2 + $0x278] sm:$0xff] }
 0x3ec   :  { %v7571_v29 = vrot.slane %v4053_v26, 9  ;;  %v3572_v8 = vld [vmem:[#allocation4 + $0x138] sm:$0xff]  ;;  %2323 = vst.msk [vmem:[#allocation4 + $0x50] sm:$0xff] %vm2312_vm6, %v10024_v50 }
 0x3ed   :  { %v4628_v23 = vmax.f32 %v4051_v31, %v7569_v25  ;;  %v4629_v37 = vmax.f32 %v4052_v16, %v7570_v1  ;;  %v3926_v59 = vmax.f32 %v3771_v14, 0.0  ;;  %v4883_v13 = vperm.slane %v4627_v4, 0  ;;  %v10093_v31 = vld [vmem:[#allocation2 + $0x279] sm:$0xff]  ;;  %2709 = vst.msk [vmem:[#allocation4 + $0x50] sm:$0xff] %vm2698_vm8, %v9970_v2  ;;  %v2394_v2 = vld [vmem:[#allocation2 + $0xf0] sm:$0xff] }
 0x3ee   :  { %v4630_v44 = vmax.f32 %v4053_v26, %v7571_v29  ;;  %v2395_v25 = vld [vmem:[#allocation2 + $0xf8] sm:$0xff] }
 0x3ef   :  { %v4884_v45 = vperm.slane %v4628_v23, 0  ;;  %1823 = vrot.lane.b32.xlu2 %v9943_v6, %s8413_s0  ;;  %v3988_v32 = vmax.f32 %v3924_v30, %v3926_v59  ;;  %v4885_v47 = vperm.slane %v4629_v37, 0  ;;  %v2780_v4 = vld [vmem:[#allocation2 + $0xf9] sm:$0xff]  ;;  %v2779_v23 = vld [vmem:[#allocation2 + $0xf1] sm:$0xff] }
 0x3f0   :  { %3306 = vrot.lane.b32.xlu1 %v10031_v40, %s8417_s17  ;;  %v4886_v58 = vperm.slane %v4630_v44, 0 }
 0x3f1   :  { %v10045_v22 = vpop.permute.xlu2 %2202  ;;  %1825 = vrot.lane.b32.xlu0 %v9946_v24, %s8413_s0  ;;  %v5012_v53 = vsel %vm5011_vm14, %v4884_v45, %v4883_v13  ;;  %v4054_v11 = vrot.slane %v3988_v32, 2  ;;  %v4055_v55 = vrot.slane %v3988_v32, 4  ;;  %v4056_v19 = vrot.slane %v3988_v32, 6 }
 0x3f2   :  { %v10052_v33 = vpop.permute.xlu1 %2142  ;;  %v3571_v7 = vld [vmem:[#allocation4 + $0x130] sm:$0xff]  ;;  %v7572_v6 = vrot.slane %v3988_v32, 9  ;;  %v5014_v46 = vsel %vm5013_vm15, %v4885_v47, %v5012_v53 }
 0x3f3   :  { %v3616_v41 = vpack.c.bf16 %v3572_v8, %v3571_v7  ;;  %v10056_v51 = vpop.permute.xlu0 %2528  ;;  %v7573_v28 = vrot.slane %v4054_v11, 9  ;;  %v7574_v24 = vrot.slane %v4055_v55, 9  ;;  %v7575_v10 = vrot.slane %v4056_v19, 9  ;;  %2324 = vst.msk [vmem:[#allocation4 + $0x58] sm:$0xff] %vm2312_vm6, %v10052_v33 }
 0x3f4   :  { %v4631_v60 = vmax.f32 %v3988_v32, %v7572_v6  ;;  %v5016_v56 = vsel %vm5015_vm0, %v4886_v58, %v5014_v46  ;;  %2710 = vst.msk [vmem:[#allocation4 + $0x58] sm:$0xff] %vm2698_vm8, %v10056_v51  ;;  %v10166_v32 = vld [vmem:[#allocation2 + $0xfa] sm:$0xff]  ;;  %v10192_v58 = vld [vmem:[#allocation2 + $0x291] sm:$0xff] }
 0x3f5   :  { %7555 = vmatmul.msk.bf16.gmra.mxu1 %vm3653_vm11, %v3616_v41  ;;  %v4632_v38 = vmax.f32 %v4054_v11, %v7573_v28  ;;  %v4633_v61 = vmax.f32 %v4055_v55, %v7574_v24  ;;  %v4634_v63 = vmax.f32 %v4056_v19, %v7575_v10  ;;  %3095 = vst.msk [vmem:[#allocation4 + $0x58] sm:$0xff] %vm3083_vm9, %v9996_v21  ;;  %v2424_v19 = vld [vmem:[#allocation2 + $0x288] sm:$0xff] }
 0x3f6   :  { %v4887_v20 = vperm.slane %v4631_v60, 0  ;;  %v10189_v24 = vld [vmem:[#allocation2 + $0x289] sm:$0xff] }
 0x3f7   :  { %2210 = vrot.lane.b32.xlu2 %v9954_v52, %s8414_s14  ;;  %v4888_v0 = vperm.slane %v4632_v38, 0  ;;  %v4889_v35 = vperm.slane %v4633_v61, 0  ;;  %v4890_v52 = vperm.slane %v4634_v63, 0  ;;  %v2425_v60 = vld [vmem:[#allocation2 + $0x290] sm:$0xff] }
 0x3f8   :  { %2208 = vrot.lane.b32.xlu1 %v9957_v57, %s8414_s14  ;;  %v5018_v42 = vsel %vm5017_vm1, %v4887_v20, %v5016_v56 }
 0x3f9   :  { %v2972_v5 = vpop.permute.xlu2 %2971  ;;  %2594 = vrot.lane.b32.xlu0 %v2422_v39, %s8415_s15  ;;  %v5020_v18 = vsel %vm5019_vm2, %v4888_v0, %v5018_v42 }
 0x3fa   :  { %v2912_v12 = vpop.permute.xlu1 %2911  ;;  %v5022_v54 = vsel %vm5021_vm3, %v4889_v35, %v5020_v18  ;;  %v3773_v30 = vpop.f32.mrf.mxu0 }
 0x3fb   :  { %v3297_v57 = vpop.permute.xlu0 %3296  ;;  %v5024_v62 = vsel %vm5023_vm4, %v4890_v52, %v5022_v54  ;;  %3094 = vst.msk [vmem:[#allocation4 + $0x50] sm:$0xff] %vm3083_vm9, %v2912_v12  ;;  %v3774_v33 = vadd.f32 %v9982_v27, %v3773_v30 }
 0x3fc   :  { %5147 = vst.msk [vmem:[#allocation3 + $0x11] sm:$0xff] %vm153_vm12, %v5024_v62 }
 0x3fd   :  { %3479 = vst.msk [vmem:[#allocation4 + $0x50] sm:$0xff] %vm3468_vm10, %v3297_v57  ;;  %v3927_v10 = vmax.f32 %v3774_v33, 0.0  ;;  %v10204_v57 = vld [vmem:[#allocation2 + $0x292] sm:$0xff] }
 0x3ff   :  { %2979 = vrot.lane.b32.xlu2 %v10088_v17, %s8416_s16 }
 0x400   :  { %2596 = vrot.lane.b32.xlu1 %v2423_v15, %s8415_s15 }
 0x401   :  { %v3359_v16 = vpop.permute.xlu2 %3358  ;;  %2981 = vrot.lane.b32.xlu0 %v10093_v31, %s8416_s16 }
 0x402   :  { %v3299_v26 = vpop.permute.xlu1 %3298  ;;  %v3775_v47 = vpop.f32.mrf.mxu0 }
 0x403   :  { %v1818_v36 = vpop.permute.xlu0 %1817  ;;  %3480 = vst.msk [vmem:[#allocation4 + $0x58] sm:$0xff] %vm3468_vm10, %v3299_v26  ;;  %v10150_v14 = vld [vmem:[#allocation3 + $0x10] sm:$0xff]  ;;  %v3776_v0 = vadd.f32 %v9982_v27, %v3775_v47 }
 0x404   :  { %1969 = vst.msk [vmem:[#allocation4 + $0x148] sm:$0xff] %vm1927_vm5, %v1818_v36  ;;  %v3543_v50 = vld [vmem:[#allocation4 + $0x50] sm:$0xff] }
 0x405   :  { %2354 = vst.msk [vmem:[#allocation4 + $0x148] sm:$0xff] %vm2312_vm6, %v10045_v22 }
 0x406   :  { %5180 = vst.msk [vmem:[#allocation5 + $0x8] sm:$0xff] %vm153_vm12, %v10150_v14 }
 0x407   :  { %3366 = vrot.lane.b32.xlu2 %v10112_v48, %s8417_s17 }
 0x408   :  { %3364 = vrot.lane.b32.xlu1 %v10116_v43, %s8417_s17 }
 0x409   :  { %v2531_v49 = vpop.permute.xlu2 %2530  ;;  %2152 = vrot.lane.b32.xlu0 %v10009_v9, %s8414_s14 }
 0x40a   :  { %v2201_v3 = vpop.permute.xlu1 %2200  ;;  %v3544_v29 = vld [vmem:[#allocation4 + $0x58] sm:$0xff] }
 0x40b   :  { %v2587_v34 = vpop.permute.xlu0 %2586  ;;  %2353 = vst.msk [vmem:[#allocation4 + $0x140] sm:$0xff] %vm2312_vm6, %v2201_v3  ;;  %v3602_v37 = vpack.c.bf16 %v3544_v29, %v3543_v50 }
 0x40c   :  { %2739 = vst.msk [vmem:[#allocation4 + $0x140] sm:$0xff] %vm2698_vm8, %v2587_v34 }
 0x40d   :  { %3124 = vst.msk [vmem:[#allocation4 + $0x140] sm:$0xff] %vm3083_vm9, %v2972_v5  ;;  %7541 = vmatmul.msk.bf16.gmra.mxu0 %vm3653_vm11, %v3602_v37 }
 0x40f   :  { %2538 = vrot.lane.b32.xlu2 %v2394_v2, %s8415_s15 }
 0x410   :  { %2154 = vrot.lane.b32.xlu1 %v10031_v40, %s8414_s14  ;;  %v10154_v40 = vld [vmem:[#allocation2 + $0xf2] sm:$0xff] }
 0x411   :  { %v2918_v21 = vpop.permute.xlu2 %2917  ;;  %2540 = vrot.lane.b32.xlu0 %v2395_v25, %s8415_s15 }
 0x412   :  { %v2589_v9 = vpop.permute.xlu1 %2588 }
 0x413   :  { %v2974_v1 = vpop.permute.xlu0 %2973  ;;  %2740 = vst.msk [vmem:[#allocation4 + $0x148] sm:$0xff] %vm2698_vm8, %v2589_v9 }
 0x414   :  { %3125 = vst.msk [vmem:[#allocation4 + $0x148] sm:$0xff] %vm3083_vm9, %v2974_v1 }
 0x415   :  { %3510 = vst.msk [vmem:[#allocation4 + $0x148] sm:$0xff] %vm3468_vm10, %v3359_v16  ;;  %v3928_v16 = vmax.f32 %v3776_v0, 0.0 }
 0x417   :  { %2925 = vrot.lane.b32.xlu2 %v2780_v4, %s8416_s16 }
 0x418   :  { %2923 = vrot.lane.b32.xlu1 %v2779_v23, %s8416_s16 }
 0x419   :  { %v1820_v59 = vpop.permute.xlu2 %1819  ;;  %3308 = vrot.lane.b32.xlu0 %v10154_v40, %s8417_s17 }
 0x41a   :  { %1970 = vst.msk [vmem:[#allocation4 + $0x150] sm:$0xff] %vm1927_vm5, %v1820_v59  ;;  %v3357_v45 = vpop.permute.xlu1 %3356 }
 0x41b   :  { %3509 = vst.msk [vmem:[#allocation4 + $0x140] sm:$0xff] %vm3468_vm10, %v3357_v45  ;;  %v2145_v13 = vpop.permute.xlu0 %2144 }
 0x41c   :  { %2325 = vst.msk [vmem:[#allocation4 + $0x60] sm:$0xff] %vm2312_vm6, %v2145_v13  ;;  %v3574_v8 = vld [vmem:[#allocation4 + $0x148] sm:$0xff] }
 0x41d   :  { %2711 = vst.msk [vmem:[#allocation4 + $0x60] sm:$0xff] %vm2698_vm8, %v2531_v49  ;;  %v2396_v13 = vld [vmem:[#allocation2 + $0x108] sm:$0xff] }
 0x41f   :  { %1827 = vrot.lane.b32.xlu2 %v10088_v17, %s8413_s0 }
 0x420   :  { %3310 = vrot.lane.b32.xlu1 %v10166_v32, %s8417_s17 }
 0x421   :  { %v2207_v44 = vpop.permute.xlu2 %2206  ;;  %1829 = vrot.lane.b32.xlu0 %v10093_v31, %s8413_s0  ;;  %v10207_v31 = vld [vmem:[#allocation2 + $0x28a] sm:$0xff] }
 0x422   :  { %v2147_v22 = vpop.permute.xlu1 %2146  ;;  %v3573_v53 = vld [vmem:[#allocation4 + $0x140] sm:$0xff] }
 0x423   :  { %2326 = vst.msk [vmem:[#allocation4 + $0x68] sm:$0xff] %vm2312_vm6, %v2147_v22  ;;  %v3617_v11 = vpack.c.bf16 %v3574_v8, %v3573_v53  ;;  %v2533_v55 = vpop.permute.xlu0 %2532 }
 0x424   :  { %2712 = vst.msk [vmem:[#allocation4 + $0x68] sm:$0xff] %vm2698_vm8, %v2533_v55 }
 0x425   :  { %7556 = vmatmul.msk.bf16.gmra.mxu1 %vm3653_vm11, %v3617_v11  ;;  %3097 = vst.msk [vmem:[#allocation4 + $0x68] sm:$0xff] %vm3083_vm9, %v2918_v21  ;;  %v2397_v11 = vld [vmem:[#allocation2 + $0x110] sm:$0xff] }
 0x427   :  { %2214 = vrot.lane.b32.xlu2 %v10112_v48, %s8414_s14 }
 0x428   :  { %2212 = vrot.lane.b32.xlu1 %v10116_v43, %s8414_s14 }
 0x429   :  { %v10184_v7 = vpop.permute.xlu2 %2975  ;;  %2598 = vrot.lane.b32.xlu0 %v2424_v19, %s8415_s15 }
 0x42a   :  { %v2916_v6 = vpop.permute.xlu1 %2915  ;;  %v3778_v41 = vpop.f32.mrf.mxu0 }
 0x42b   :  { %3096 = vst.msk [vmem:[#allocation4 + $0x60] sm:$0xff] %vm3083_vm9, %v2916_v6  ;;  %v3779_v51 = vadd.f32 %v9982_v27, %v3778_v41  ;;  %v3301_v28 = vpop.permute.xlu0 %3300 }
 0x42c   :  { %3481 = vst.msk [vmem:[#allocation4 + $0x60] sm:$0xff] %vm3468_vm10, %v3301_v28 }
 0x42d   :  { %v3929_v46 = vmax.f32 %v3779_v51, 0.0 }
 0x42f   :  { %v3989_v38 = vmax.f32 %v3927_v10, %v3929_v46  ;;  %2983 = vrot.lane.b32.xlu2 %v10189_v24, %s8416_s16 }
 0x430   :  { %2600 = vrot.lane.b32.xlu1 %v2425_v60, %s8415_s15 }
 0x431   :  { %v4057_v61 = vrot.slane %v3989_v38, 2  ;;  %v4058_v63 = vrot.slane %v3989_v38, 4  ;;  %v4059_v39 = vrot.slane %v3989_v38, 6  ;;  %v7576_v20 = vrot.slane %v3989_v38, 9  ;;  %v10197_v56 = vpop.permute.xlu2 %3362  ;;  %2985 = vrot.lane.b32.xlu0 %v10192_v58, %s8416_s16 }
 0x432   :  { %v3303_v35 = vpop.permute.xlu1 %3302  ;;  %v3780_v42 = vpop.f32.mrf.mxu0 }
 0x433   :  { %v7577_v5 = vrot.slane %v4057_v61, 9  ;;  %v7578_v52 = vrot.slane %v4058_v63, 9  ;;  %3482 = vst.msk [vmem:[#allocation4 + $0x68] sm:$0xff] %vm3468_vm10, %v3303_v35  ;;  %v1822_v18 = vpop.permute.xlu0 %1821  ;;  %v4635_v12 = vmax.f32 %v3989_v38, %v7576_v20  ;;  %v3781_v54 = vadd.f32 %v9982_v27, %v3780_v42  ;;  %v3545_v49 = vld [vmem:[#allocation4 + $0x60] sm:$0xff]  ;;  %v3167_v42 = vld [vmem:[#allocation2 + $0x112] sm:$0xff] }
 0x434   :  { %1971 = vst.msk [vmem:[#allocation4 + $0x158] sm:$0xff] %vm1927_vm5, %v1822_v18  ;;  %v7579_v62 = vrot.slane %v4059_v39, 9 }
 0x435   :  { %v4636_v17 = vmax.f32 %v4057_v61, %v7577_v5  ;;  %v4637_v15 = vmax.f32 %v4058_v63, %v7578_v52  ;;  %2356 = vst.msk [vmem:[#allocation4 + $0x158] sm:$0xff] %vm2312_vm6, %v2207_v44  ;;  %v3930_v26 = vmax.f32 %v3781_v54, 0.0  ;;  %v4891_v48 = vperm.slane %v4635_v12, 0  ;;  %v2782_v61 = vld [vmem:[#allocation2 + $0x111] sm:$0xff] }
 0x436   :  { %v4638_v3 = vmax.f32 %v4059_v39, %v7579_v62  ;;  %v3166_v63 = vld [vmem:[#allocation2 + $0x10a] sm:$0xff] }
 0x437   :  { %v4892_v36 = vperm.slane %v4636_v17, 0  ;;  %3370 = vrot.lane.b32.xlu2 %v10204_v57, %s8417_s17  ;;  %v3990_v43 = vmax.f32 %v3928_v16, %v3930_v26  ;;  %v4893_v34 = vperm.slane %v4637_v15, 0  ;;  %v10267_v26 = vld [vmem:[#allocation2 + $0x2a1] sm:$0xff] }
 0x438   :  { %3368 = vrot.lane.b32.xlu1 %v10207_v31, %s8417_s17  ;;  %v4894_v44 = vperm.slane %v4638_v3, 0  ;;  %v10278_v3 = vld [vmem:[#allocation2 + $0x2aa] sm:$0xff] }
 0x439   :  { %v2535_v2 = vpop.permute.xlu2 %2534  ;;  %2156 = vrot.lane.b32.xlu0 %v10154_v40, %s8414_s14  ;;  %v5025_v25 = vsel %vm5011_vm14, %v4892_v36, %v4891_v48  ;;  %v4060_v21 = vrot.slane %v3990_v43, 2  ;;  %v4061_v9 = vrot.slane %v3990_v43, 4  ;;  %v4062_v1 = vrot.slane %v3990_v43, 6  ;;  %v2427_v36 = vld [vmem:[#allocation2 + $0x2a8] sm:$0xff] }
 0x43a   :  { %v2205_v50 = vpop.permute.xlu1 %2204  ;;  %v3546_v4 = vld [vmem:[#allocation4 + $0x68] sm:$0xff]  ;;  %v7580_v29 = vrot.slane %v3990_v43, 9  ;;  %v5026_v40 = vsel %vm5013_vm15, %v4893_v34, %v5025_v25 }
 0x43b   :  { %2355 = vst.msk [vmem:[#allocation4 + $0x150] sm:$0xff] %vm2312_vm6, %v2205_v50  ;;  %v3603_v23 = vpack.c.bf16 %v3546_v4, %v3545_v49  ;;  %v2591_v37 = vpop.permute.xlu0 %2590  ;;  %v7581_v30 = vrot.slane %v4060_v21, 9  ;;  %v7582_v59 = vrot.slane %v4061_v9, 9  ;;  %v7583_v45 = vrot.slane %v4062_v1, 9  ;;  %v10270_v48 = vld [vmem:[#allocation2 + $0x2a9] sm:$0xff] }
 0x43c   :  { %2741 = vst.msk [vmem:[#allocation4 + $0x150] sm:$0xff] %vm2698_vm8, %v2591_v37  ;;  %v4639_v8 = vmax.f32 %v3990_v43, %v7580_v29  ;;  %v5027_v19 = vsel %vm5015_vm0, %v4894_v44, %v5026_v40  ;;  %v10281_v34 = vld [vmem:[#allocation2 + $0x2a2] sm:$0xff] }
 0x43d   :  { %7542 = vmatmul.msk.bf16.gmra.mxu0 %vm3653_vm11, %v3603_v23  ;;  %3126 = vst.msk [vmem:[#allocation4 + $0x150] sm:$0xff] %vm3083_vm9, %v10184_v7  ;;  %v4640_v47 = vmax.f32 %v4060_v21, %v7581_v30  ;;  %v4641_v22 = vmax.f32 %v4061_v9, %v7582_v59  ;;  %v4642_v53 = vmax.f32 %v4062_v1, %v7583_v45  ;;  %v2398_v29 = vld [vmem:[#allocation2 + $0x120] sm:$0xff]  ;;  %v2399_v23 = vld [vmem:[#allocation2 + $0x128] sm:$0xff] }
 0x43e   :  { %v4895_v55 = vperm.slane %v4639_v8, 0  ;;  %v2784_v8 = vld [vmem:[#allocation2 + $0x129] sm:$0xff] }
 0x43f   :  { %2542 = vrot.lane.b32.xlu2 %v2396_v13, %s8415_s15  ;;  %v4896_v33 = vperm.slane %v4640_v47, 0  ;;  %v4897_v6 = vperm.slane %v4641_v22, 0  ;;  %v4898_v7 = vperm.slane %v4642_v53, 0  ;;  %v2783_v22 = vld [vmem:[#allocation2 + $0x121] sm:$0xff] }
 0x440   :  { %2158 = vrot.lane.b32.xlu1 %v10166_v32, %s8414_s14  ;;  %v5028_v41 = vsel %vm5017_vm1, %v4895_v55, %v5027_v19  ;;  %v2781_v32 = vld [vmem:[#allocation2 + $0x109] sm:$0xff] }
 0x441   :  { %v2922_v51 = vpop.permute.xlu2 %2921  ;;  %2544 = vrot.lane.b32.xlu0 %v2397_v11, %s8415_s15  ;;  %v5029_v28 = vsel %vm5019_vm2, %v4896_v33, %v5028_v41  ;;  %v10303_v53 = vld [vmem:[#allocation2 + $0x122] sm:$0xff] }
 0x442   :  { %v2593_v10 = vpop.permute.xlu1 %2592  ;;  %v5030_v46 = vsel %vm5021_vm3, %v4897_v6, %v5029_v28 }
 0x443   :  { %2742 = vst.msk [vmem:[#allocation4 + $0x158] sm:$0xff] %vm2698_vm8, %v2593_v10  ;;  %v2978_v60 = vpop.permute.xlu0 %2977  ;;  %v5031_v38 = vsel %vm5023_vm4, %v4898_v7, %v5030_v46 }
 0x444   :  { %3127 = vst.msk [vmem:[#allocation4 + $0x158] sm:$0xff] %vm3083_vm9, %v2978_v60 }
 0x445   :  { %5148 = vst.msk [vmem:[#allocation3 + $0x21] sm:$0xff] %vm153_vm12, %v5031_v38 }
 0x446   :  { %3512 = vst.msk [vmem:[#allocation4 + $0x158] sm:$0xff] %vm3468_vm10, %v10197_v56  ;;  %v10246_v56 = vpop.f32.mrf.mxu1 }
 0x447   :  { %2929 = vrot.lane.b32.xlu2 %v2782_v61, %s8416_s16 }
 0x448   :  { %2927 = vrot.lane.b32.xlu1 %v2781_v32, %s8416_s16 }
 0x449   :  { %v1824_v39 = vpop.permute.xlu2 %1823  ;;  %3312 = vrot.lane.b32.xlu0 %v3166_v63, %s8417_s17 }
 0x44a   :  { %1972 = vst.msk [vmem:[#allocation4 + $0x160] sm:$0xff] %vm1927_vm5, %v1824_v39  ;;  %v3361_v20 = vpop.permute.xlu1 %3360 }
 0x44b   :  { %3511 = vst.msk [vmem:[#allocation4 + $0x150] sm:$0xff] %vm3468_vm10, %v3361_v20  ;;  %v2149_v0 = vpop.permute.xlu0 %2148  ;;  %v10314_v20 = vld [vmem:[#allocation2 + $0x12a] sm:$0xff] }
 0x44c   :  { %2327 = vst.msk [vmem:[#allocation4 + $0x70] sm:$0xff] %vm2312_vm6, %v2149_v0  ;;  %v10243_v35 = vld [vmem:[#allocation3 + $0x20] sm:$0xff] }
 0x44d   :  { %2713 = vst.msk [vmem:[#allocation4 + $0x70] sm:$0xff] %vm2698_vm8, %v2535_v2  ;;  %v3576_v5 = vld [vmem:[#allocation4 + $0x158] sm:$0xff] }
 0x44e   :  { %5181 = vst.msk [vmem:[#allocation5 + $0x10] sm:$0xff] %vm153_vm12, %v10243_v35  ;;  %v10261_v17 = vpop.f32.mrf.mxu1 }
 0x44f   :  { %1831 = vrot.lane.b32.xlu2 %v10189_v24, %s8413_s0  ;;  %v2426_v24 = vld [vmem:[#allocation2 + $0x2a0] sm:$0xff] }
 0x450   :  { %3314 = vrot.lane.b32.xlu1 %v3167_v42, %s8417_s17 }
 0x451   :  { %v2211_v52 = vpop.permute.xlu2 %2210  ;;  %1833 = vrot.lane.b32.xlu0 %v10192_v58, %s8413_s0 }
 0x452   :  { %v2151_v18 = vpop.permute.xlu1 %2150  ;;  %v3575_v12 = vld [vmem:[#allocation4 + $0x150] sm:$0xff] }
 0x453   :  { %2328 = vst.msk [vmem:[#allocation4 + $0x78] sm:$0xff] %vm2312_vm6, %v2151_v18  ;;  %v3618_v54 = vpack.c.bf16 %v3576_v5, %v3575_v12  ;;  %v2537_v62 = vpop.permute.xlu0 %2536 }
 0x454   :  { %2714 = vst.msk [vmem:[#allocation4 + $0x78] sm:$0xff] %vm2698_vm8, %v2537_v62 }
 0x455   :  { %7557 = vmatmul.msk.bf16.gmra.mxu1 %vm3653_vm11, %v3618_v54  ;;  %3099 = vst.msk [vmem:[#allocation4 + $0x78] sm:$0xff] %vm3083_vm9, %v2922_v51 }
 0x457   :  { %2218 = vrot.lane.b32.xlu2 %v10204_v57, %s8414_s14  ;;  %v3853_v57 = vpop.f32.mrf.mxu1 }
 0x458   :  { %2216 = vrot.lane.b32.xlu1 %v10207_v31, %s8414_s14  ;;  %v3854_v37 = vadd.f32 %v9982_v27, %v3853_v57 }
 0x459   :  { %v2980_v58 = vpop.permute.xlu2 %2979  ;;  %2602 = vrot.lane.b32.xlu0 %v2426_v24, %s8415_s15 }
 0x45a   :  { %v2920_v15 = vpop.permute.xlu1 %2919  ;;  %v3959_v44 = vmax.f32 %v3854_v37, 0.0  ;;  %v2428_v37 = vld [vmem:[#allocation2 + $0x2b8] sm:$0xff] }
 0x45b   :  { %3098 = vst.msk [vmem:[#allocation4 + $0x70] sm:$0xff] %vm3083_vm9, %v2920_v15  ;;  %v3305_v16 = vpop.permute.xlu0 %3304 }
 0x45c   :  { %3483 = vst.msk [vmem:[#allocation4 + $0x70] sm:$0xff] %vm3468_vm10, %v3305_v16 }
 0x45f   :  { %2987 = vrot.lane.b32.xlu2 %v10267_v26, %s8416_s16  ;;  %v3855_v21 = vpop.f32.mrf.mxu1 }
 0x460   :  { %2604 = vrot.lane.b32.xlu1 %v2427_v36, %s8415_s15  ;;  %v3856_v51 = vadd.f32 %v9982_v27, %v3855_v21 }
 0x461   :  { %v3367_v31 = vpop.permute.xlu2 %3366  ;;  %2989 = vrot.lane.b32.xlu0 %v10270_v48, %s8416_s16 }
 0x462   :  { %v3307_v43 = vpop.permute.xlu1 %3306  ;;  %v3960_v0 = vmax.f32 %v3856_v51, 0.0 }
 0x463   :  { %3484 = vst.msk [vmem:[#allocation4 + $0x78] sm:$0xff] %vm3468_vm10, %v3307_v43  ;;  %v1826_v49 = vpop.permute.xlu0 %1825  ;;  %v3547_v2 = vld [vmem:[#allocation4 + $0x70] sm:$0xff] }
 0x464   :  { %1973 = vst.msk [vmem:[#allocation4 + $0x168] sm:$0xff] %vm1927_vm5, %v1826_v49 }
 0x465   :  { %2358 = vst.msk [vmem:[#allocation4 + $0x168] sm:$0xff] %vm2312_vm6, %v2211_v52 }
 0x467   :  { %3374 = vrot.lane.b32.xlu2 %v10278_v3, %s8417_s17 }
 0x468   :  { %3372 = vrot.lane.b32.xlu1 %v10281_v34, %s8417_s17 }
 0x469   :  { %v2539_v25 = vpop.permute.xlu2 %2538  ;;  %2160 = vrot.lane.b32.xlu0 %v3166_v63, %s8414_s14 }
 0x46a   :  { %v2209_v9 = vpop.permute.xlu1 %2208  ;;  %v3548_v1 = vld [vmem:[#allocation4 + $0x78] sm:$0xff] }
 0x46b   :  { %2357 = vst.msk [vmem:[#allocation4 + $0x160] sm:$0xff] %vm2312_vm6, %v2209_v9  ;;  %v3604_v50 = vpack.c.bf16 %v3548_v1, %v3547_v2  ;;  %v2595_v4 = vpop.permute.xlu0 %2594 }
 0x46c   :  { %2743 = vst.msk [vmem:[#allocation4 + $0x160] sm:$0xff] %vm2698_vm8, %v2595_v4 }
 0x46d   :  { %7543 = vmatmul.msk.bf16.gmra.mxu0 %vm3653_vm11, %v3604_v50  ;;  %3128 = vst.msk [vmem:[#allocation4 + $0x160] sm:$0xff] %vm3083_vm9, %v2980_v58 }
 0x46f   :  { %2546 = vrot.lane.b32.xlu2 %v2398_v29, %s8415_s15 }
 0x470   :  { %2162 = vrot.lane.b32.xlu1 %v3167_v42, %s8414_s14 }
 0x471   :  { %v10296_v30 = vpop.permute.xlu2 %2925  ;;  %2548 = vrot.lane.b32.xlu0 %v2399_v23, %s8415_s15 }
 0x472   :  { %v2597_v59 = vpop.permute.xlu1 %2596  ;;  %v3858_v45 = vpop.f32.mrf.mxu1 }
 0x473   :  { %2744 = vst.msk [vmem:[#allocation4 + $0x168] sm:$0xff] %vm2698_vm8, %v2597_v59  ;;  %v3859_v13 = vadd.f32 %v9982_v27, %v3858_v45  ;;  %v2982_v40 = vpop.permute.xlu0 %2981 }
 0x474   :  { %3129 = vst.msk [vmem:[#allocation4 + $0x168] sm:$0xff] %vm3083_vm9, %v2982_v40 }
 0x475   :  { %v3961_v47 = vmax.f32 %v3859_v13, 0.0  ;;  %3514 = vst.msk [vmem:[#allocation4 + $0x168] sm:$0xff] %vm3468_vm10, %v3367_v31 }
 0x477   :  { %v4005_v11 = vmax.f32 %v3959_v44, %v3961_v47  ;;  %2933 = vrot.lane.b32.xlu2 %v2784_v8, %s8416_s16 }
 0x478   :  { %2931 = vrot.lane.b32.xlu1 %v2783_v22, %s8416_s16 }
 0x479   :  { %v4105_v55 = vrot.slane %v4005_v11, 2  ;;  %v4106_v19 = vrot.slane %v4005_v11, 4  ;;  %v4107_v33 = vrot.slane %v4005_v11, 6  ;;  %v7640_v6 = vrot.slane %v4005_v11, 9  ;;  %v1828_v41 = vpop.permute.xlu2 %1827  ;;  %3316 = vrot.lane.b32.xlu0 %v10303_v53, %s8417_s17 }
 0x47a   :  { %1974 = vst.msk [vmem:[#allocation4 + $0x170] sm:$0xff] %vm1927_vm5, %v1828_v41  ;;  %v3365_v7 = vpop.permute.xlu1 %3364  ;;  %v3860_v28 = vpop.f32.mrf.mxu1 }
 0x47b   :  { %v7641_v10 = vrot.slane %v4105_v55, 9  ;;  %v7642_v46 = vrot.slane %v4106_v19, 9  ;;  %3513 = vst.msk [vmem:[#allocation4 + $0x160] sm:$0xff] %vm3468_vm10, %v3365_v7  ;;  %v2153_v60 = vpop.permute.xlu0 %2152  ;;  %v4699_v38 = vmax.f32 %v4005_v11, %v7640_v6  ;;  %v3861_v61 = vadd.f32 %v9982_v27, %v3860_v28  ;;  %v10345_v6 = vld [vmem:[#allocation2 + $0x2c1] sm:$0xff] }
 0x47c   :  { %2329 = vst.msk [vmem:[#allocation4 + $0x80] sm:$0xff] %vm2312_vm6, %v2153_v60  ;;  %v7643_v32 = vrot.slane %v4107_v33, 9  ;;  %v3578_v12 = vld [vmem:[#allocation4 + $0x168] sm:$0xff] }
 0x47d   :  { %v4700_v63 = vmax.f32 %v4105_v55, %v7641_v10  ;;  %v4701_v39 = vmax.f32 %v4106_v19, %v7642_v46  ;;  %2715 = vst.msk [vmem:[#allocation4 + $0x80] sm:$0xff] %vm2698_vm8, %v2539_v25  ;;  %v3962_v42 = vmax.f32 %v3861_v61, 0.0  ;;  %v4955_v52 = vperm.slane %v4699_v38, 0  ;;  %v10341_v19 = vld [vmem:[#allocation2 + $0x2b9] sm:$0xff]  ;;  %v10356_v10 = vld [vmem:[#allocation2 + $0x2c2] sm:$0xff] }
 0x47e   :  { %v4702_v54 = vmax.f32 %v4107_v33, %v7643_v32  ;;  %v2429_v33 = vld [vmem:[#allocation2 + $0x2c0] sm:$0xff] }
 0x47f   :  { %v4956_v5 = vperm.slane %v4700_v63, 0  ;;  %1835 = vrot.lane.b32.xlu2 %v10267_v26, %s8413_s0  ;;  %v4006_v18 = vmax.f32 %v3960_v0, %v3962_v42  ;;  %v4957_v62 = vperm.slane %v4701_v39, 0  ;;  %v3783_v26 = vpop.f32.mrf.mxu0  ;;  %v10361_v38 = vld [vmem:[#allocation2 + $0x2ba] sm:$0xff] }
 0x480   :  { %3318 = vrot.lane.b32.xlu1 %v10314_v20, %s8417_s17  ;;  %v4958_v50 = vperm.slane %v4702_v54, 0  ;;  %v3784_v28 = vadd.f32 %v9982_v27, %v3783_v26 }
 0x481   :  { %v2215_v24 = vpop.permute.xlu2 %2214  ;;  %1837 = vrot.lane.b32.xlu0 %v10270_v48, %s8413_s0  ;;  %v5081_v58 = vsel %vm5011_vm14, %v4956_v5, %v4955_v52  ;;  %v4108_v15 = vrot.slane %v4006_v18, 2  ;;  %v4109_v16 = vrot.slane %v4006_v18, 4  ;;  %v4110_v36 = vrot.slane %v4006_v18, 6 }
 0x482   :  { %v2155_v57 = vpop.permute.xlu1 %2154  ;;  %v3577_v31 = vld [vmem:[#allocation4 + $0x160] sm:$0xff]  ;;  %v7644_v43 = vrot.slane %v4006_v18, 9  ;;  %v5082_v48 = vsel %vm5013_vm15, %v4957_v62, %v5081_v58  ;;  %v3931_v32 = vmax.f32 %v3784_v28, 0.0  ;;  %v2400_v58 = vld [vmem:[#allocation2 + $0x138] sm:$0xff] }
 0x483   :  { %2330 = vst.msk [vmem:[#allocation4 + $0x88] sm:$0xff] %vm2312_vm6, %v2155_v57  ;;  %v3619_v49 = vpack.c.bf16 %v3578_v12, %v3577_v31  ;;  %v2541_v2 = vpop.permute.xlu0 %2540  ;;  %v7645_v25 = vrot.slane %v4108_v15, 9  ;;  %v7646_v21 = vrot.slane %v4109_v16, 9  ;;  %v7647_v9 = vrot.slane %v4110_v36, 9  ;;  %v2401_v31 = vld [vmem:[#allocation2 + $0x140] sm:$0xff] }
 0x484   :  { %2716 = vst.msk [vmem:[#allocation4 + $0x88] sm:$0xff] %vm2698_vm8, %v2541_v2  ;;  %v4703_v1 = vmax.f32 %v4006_v18, %v7644_v43  ;;  %v5083_v45 = vsel %vm5015_vm0, %v4958_v50, %v5082_v48 }
 0x485   :  { %7558 = vmatmul.msk.bf16.gmra.mxu1 %vm3653_vm11, %v3619_v49  ;;  %3101 = vst.msk [vmem:[#allocation4 + $0x88] sm:$0xff] %vm3083_vm9, %v10296_v30  ;;  %v4704_v4 = vmax.f32 %v4108_v15, %v7645_v25  ;;  %v4705_v29 = vmax.f32 %v4109_v16, %v7646_v21  ;;  %v4706_v23 = vmax.f32 %v4110_v36, %v7647_v9  ;;  %v10380_v15 = vld [vmem:[%s12279_s2] ss:$0 sm:$0xff] }
 0x486   :  { %v4959_v59 = vperm.slane %v4703_v1, 0 }
 0x487   :  { %2222 = vrot.lane.b32.xlu2 %v10278_v3, %s8414_s14  ;;  %v4960_v13 = vperm.slane %v4704_v4, 0  ;;  %v4961_v40 = vperm.slane %v4705_v29, 0  ;;  %v4962_v30 = vperm.slane %v4706_v23, 0 }
 0x488   :  { %2220 = vrot.lane.b32.xlu1 %v10281_v34, %s8414_s14  ;;  %v5084_v8 = vsel %vm5017_vm1, %v4959_v59, %v5083_v45  ;;  %v3785_v34 = vpop.f32.mrf.mxu0  ;;  %v2786_v45 = vld [vmem:[#allocation2 + $0x141] sm:$0xff] }
 0x489   :  { %v2984_v44 = vpop.permute.xlu2 %2983  ;;  %2606 = vrot.lane.b32.xlu0 %v2428_v37, %s8415_s15  ;;  %v5085_v47 = vsel %vm5019_vm2, %v4960_v13, %v5084_v8 }
 0x48a   :  { %v2924_v22 = vpop.permute.xlu1 %2923  ;;  %v5086_v11 = vsel %vm5021_vm3, %v4961_v40, %v5085_v47  ;;  %v10395_v47 = vld [vmem:[#allocation2 + $0x13a] sm:$0xff] }
 0x48b   :  { %3100 = vst.msk [vmem:[#allocation4 + $0x80] sm:$0xff] %vm3083_vm9, %v2924_v22  ;;  %v3309_v3 = vpop.permute.xlu0 %3308  ;;  %v5087_v55 = vsel %vm5023_vm4, %v4962_v30, %v5086_v11 }
 0x48c   :  { %3485 = vst.msk [vmem:[#allocation4 + $0x80] sm:$0xff] %vm3468_vm10, %v3309_v3 }
 0x48d   :  { %5156 = vst.msk [vmem:[#allocation3 + $0xc1] sm:$0xff] %vm153_vm12, %v5087_v55 }
 0x48f   :  { %2991 = vrot.lane.b32.xlu2 %v10341_v19, %s8416_s16 }
 0x490   :  { %2608 = vrot.lane.b32.xlu1 %v2429_v33, %s8415_s15  ;;  %v3788_v60 = vpop.f32.mrf.mxu0 }
 0x491   :  { %v10350_v41 = vpop.permute.xlu2 %3370  ;;  %2993 = vrot.lane.b32.xlu0 %v10345_v6, %s8416_s16  ;;  %v3789_v61 = vadd.f32 %v9982_v27, %v3788_v60 }
 0x492   :  { %v3311_v51 = vpop.permute.xlu1 %3310 }
 0x493   :  { %3486 = vst.msk [vmem:[#allocation4 + $0x88] sm:$0xff] %vm3468_vm10, %v3311_v51  ;;  %v1830_v7 = vpop.permute.xlu0 %1829  ;;  %v3933_v63 = vmax.f32 %v3789_v61, 0.0  ;;  %v3549_v39 = vld [vmem:[#allocation4 + $0x80] sm:$0xff] }
 0x494   :  { %1975 = vst.msk [vmem:[#allocation4 + $0x178] sm:$0xff] %vm1927_vm5, %v1830_v7  ;;  %v10359_v46 = vld [vmem:[#allocation3 + $0xc0] sm:$0xff] }
 0x495   :  { %2360 = vst.msk [vmem:[#allocation4 + $0x178] sm:$0xff] %vm2312_vm6, %v2215_v24  ;;  %v3991_v42 = vmax.f32 %v3931_v32, %v3933_v63 }
 0x496   :  { %5189 = vst.msk [vmem:[#allocation5 + $0x50] sm:$0xff] %vm153_vm12, %v10359_v46 }
 0x497   :  { %3378 = vrot.lane.b32.xlu2 %v10356_v10, %s8417_s17  ;;  %v4063_v12 = vrot.slane %v3991_v42, 2  ;;  %v4064_v54 = vrot.slane %v3991_v42, 4  ;;  %v4065_v62 = vrot.slane %v3991_v42, 6  ;;  %v7584_v24 = vrot.slane %v3991_v42, 9 }
 0x498   :  { %3376 = vrot.lane.b32.xlu1 %v10361_v38, %s8417_s17  ;;  %v3790_v16 = vpop.f32.mrf.mxu0 }
 0x499   :  { %v10371_v0 = vpop.permute.xlu2 %2542  ;;  %2164 = vrot.lane.b32.xlu0 %v10303_v53, %s8414_s14  ;;  %v3786_v53 = vadd.f32 %v10380_v15, %v3785_v34  ;;  %v7585_v36 = vrot.slane %v4063_v12, 9  ;;  %v7586_v57 = vrot.slane %v4064_v54, 9  ;;  %v4643_v26 = vmax.f32 %v3991_v42, %v7584_v24 }
 0x49a   :  { %v2213_v5 = vpop.permute.xlu1 %2212  ;;  %v3550_v27 = vld [vmem:[#allocation4 + $0x88] sm:$0xff]  ;;  %v3791_v43 = vadd.f32 %v10380_v15, %v3790_v16  ;;  %v7587_v49 = vrot.slane %v4065_v62, 9 }
 0x49b   :  { %2359 = vst.msk [vmem:[#allocation4 + $0x170] sm:$0xff] %vm2312_vm6, %v2213_v5  ;;  %v3605_v52 = vpack.c.bf16 %v3550_v27, %v3549_v39  ;;  %v2599_v18 = vpop.permute.xlu0 %2598  ;;  %v4644_v2 = vmax.f32 %v4063_v12, %v7585_v36  ;;  %v4645_v25 = vmax.f32 %v4064_v54, %v7586_v57  ;;  %v3932_v21 = vmax.f32 %v3786_v53, 0.0 }
 0x49c   :  { %2745 = vst.msk [vmem:[#allocation4 + $0x170] sm:$0xff] %vm2698_vm8, %v2599_v18  ;;  %v3934_v9 = vmax.f32 %v3791_v43, 0.0  ;;  %v4899_v4 = vperm.slane %v4643_v26, 0  ;;  %v4646_v37 = vmax.f32 %v4065_v62, %v7587_v49  ;;  %v3171_v18 = vld [vmem:[#allocation2 + $0x142] sm:$0xff]  ;;  %v10432_v26 = vld [vmem:[#allocation2 + $0x2d1] sm:$0xff]  ;;  %v10435_v43 = vld [vmem:[#allocation2 + $0x2d9] sm:$0xff] }
 0x49d   :  { %7544 = vmatmul.msk.bf16.gmra.mxu0 %vm3653_vm11, %v3605_v52  ;;  %3130 = vst.msk [vmem:[#allocation4 + $0x170] sm:$0xff] %vm3083_vm9, %v2984_v44  ;;  %v4900_v1 = vperm.slane %v4644_v2, 0  ;;  %v4901_v59 = vperm.slane %v4645_v25, 0  ;;  %v2785_v44 = vld [vmem:[#allocation2 + $0x139] sm:$0xff] }
 0x49e   :  { %v3992_v29 = vmax.f32 %v3932_v21, %v3934_v9  ;;  %v4902_v33 = vperm.slane %v4646_v37, 0  ;;  %v10443_v21 = vld [vmem:[#allocation2 + $0x2da] sm:$0xff]  ;;  %v10446_v9 = vld [vmem:[#allocation2 + $0x2d2] sm:$0xff] }
 0x49f   :  { %2550 = vrot.lane.b32.xlu2 %v2400_v58, %s8415_s15  ;;  %v5032_v13 = vsel %vm5011_vm14, %v4900_v1, %v4899_v4 }
 0x4a0   :  { %2166 = vrot.lane.b32.xlu1 %v10314_v20, %s8414_s14  ;;  %v4066_v20 = vrot.slane %v3992_v29, 2  ;;  %v4067_v40 = vrot.slane %v3992_v29, 4  ;;  %v4068_v8 = vrot.slane %v3992_v29, 6  ;;  %v7588_v30 = vrot.slane %v3992_v29, 9 }
 0x4a1   :  { %v2930_v48 = vpop.permute.xlu2 %2929  ;;  %2552 = vrot.lane.b32.xlu0 %v2401_v31, %s8415_s15  ;;  %v5033_v55 = vsel %vm5013_vm15, %v4901_v59, %v5032_v13  ;;  %v2402_v59 = vld [vmem:[#allocation2 + $0x150] sm:$0xff] }
 0x4a2   :  { %v2601_v50 = vpop.permute.xlu1 %2600  ;;  %v7589_v22 = vrot.slane %v4066_v20, 9  ;;  %v7590_v11 = vrot.slane %v4067_v40, 9  ;;  %v7591_v3 = vrot.slane %v4068_v8, 9  ;;  %v4647_v34 = vmax.f32 %v3992_v29, %v7588_v30 }
 0x4a3   :  { %2746 = vst.msk [vmem:[#allocation4 + $0x178] sm:$0xff] %vm2698_vm8, %v2601_v50  ;;  %v2986_v23 = vpop.permute.xlu0 %2985  ;;  %v5034_v32 = vsel %vm5015_vm0, %v4902_v33, %v5033_v55  ;;  %v10469_v55 = vld [vmem:[#allocation2 + $0x152] sm:$0xff] }
 0x4a4   :  { %3131 = vst.msk [vmem:[#allocation4 + $0x178] sm:$0xff] %vm3083_vm9, %v2986_v23  ;;  %v4648_v51 = vmax.f32 %v4066_v20, %v7589_v22  ;;  %v4649_v7 = vmax.f32 %v4067_v40, %v7590_v11  ;;  %v4650_v28 = vmax.f32 %v4068_v8, %v7591_v3  ;;  %v2787_v3 = vld [vmem:[#allocation2 + $0x151] sm:$0xff] }
 0x4a5   :  { %3516 = vst.msk [vmem:[#allocation4 + $0x178] sm:$0xff] %vm3468_vm10, %v10350_v41  ;;  %v4903_v41 = vperm.slane %v4647_v34, 0 }
 0x4a6   :  { %v4904_v63 = vperm.slane %v4648_v51, 0  ;;  %v4905_v39 = vperm.slane %v4649_v7, 0  ;;  %v4906_v27 = vperm.slane %v4650_v28, 0 }
 0x4a7   :  { %2937 = vrot.lane.b32.xlu2 %v2786_v45, %s8416_s16  ;;  %v5035_v5 = vsel %vm5017_vm1, %v4903_v41, %v5034_v32  ;;  %v2403_v45 = vld [vmem:[#allocation2 + $0x158] sm:$0xff] }
 0x4a8   :  { %2935 = vrot.lane.b32.xlu1 %v2785_v44, %s8416_s16  ;;  %v5036_v52 = vsel %vm5019_vm2, %v4904_v63, %v5035_v5 }
 0x4a9   :  { %v1832_v60 = vpop.permute.xlu2 %1831  ;;  %3320 = vrot.lane.b32.xlu0 %v10395_v47, %s8417_s17  ;;  %v5037_v12 = vsel %vm5021_vm3, %v4905_v39, %v5036_v52 }
 0x4aa   :  { %1976 = vst.msk [vmem:[#allocation4 + $0x180] sm:$0xff] %vm1927_vm5, %v1832_v60  ;;  %v3369_v61 = vpop.permute.xlu1 %3368  ;;  %v5038_v54 = vsel %vm5023_vm4, %v4906_v27, %v5037_v12 }
 0x4ab   :  { %3515 = vst.msk [vmem:[#allocation4 + $0x170] sm:$0xff] %vm3468_vm10, %v3369_v61  ;;  %v2157_v42 = vpop.permute.xlu0 %2156 }
 0x4ac   :  { %2331 = vst.msk [vmem:[#allocation4 + $0x90] sm:$0xff] %vm2312_vm6, %v2157_v42  ;;  %v3580_v62 = vld [vmem:[#allocation4 + $0x178] sm:$0xff] }
 0x4ad   :  { %2717 = vst.msk [vmem:[#allocation4 + $0x90] sm:$0xff] %vm2698_vm8, %v10371_v0 }
 0x4ae   :  { %5149 = vst.msk [vmem:[#allocation3 + $0x31] sm:$0xff] %vm153_vm12, %v5038_v54 }
 0x4af   :  { %1839 = vrot.lane.b32.xlu2 %v10341_v19, %s8413_s0  ;;  %v2430_v19 = vld [vmem:[#allocation2 + $0x2d0] sm:$0xff] }
 0x4b0   :  { %3322 = vrot.lane.b32.xlu1 %v3171_v18, %s8417_s17 }
 0x4b1   :  { %v2219_v24 = vpop.permute.xlu2 %2218  ;;  %1841 = vrot.lane.b32.xlu0 %v10345_v6, %s8413_s0 }
 0x4b2   :  { %v2159_v58 = vpop.permute.xlu1 %2158  ;;  %v3579_v53 = vld [vmem:[#allocation4 + $0x170] sm:$0xff] }
 0x4b3   :  { %2332 = vst.msk [vmem:[#allocation4 + $0x98] sm:$0xff] %vm2312_vm6, %v2159_v58  ;;  %v3620_v0 = vpack.c.bf16 %v3580_v62, %v3579_v53  ;;  %v2545_v16 = vpop.permute.xlu0 %2544  ;;  %v10482_v62 = vld [vmem:[#allocation2 + $0x15a] sm:$0xff] }
 0x4b4   :  { %2718 = vst.msk [vmem:[#allocation4 + $0x98] sm:$0xff] %vm2698_vm8, %v2545_v16 }
 0x4b5   :  { %7559 = vmatmul.msk.bf16.gmra.mxu1 %vm3653_vm11, %v3620_v0  ;;  %3103 = vst.msk [vmem:[#allocation4 + $0x98] sm:$0xff] %vm3083_vm9, %v2930_v48  ;;  %v10424_v36 = vld [vmem:[#allocation3 + $0x30] sm:$0xff] }
 0x4b6   :  { %5182 = vst.msk [vmem:[#allocation5 + $0x18] sm:$0xff] %vm153_vm12, %v10424_v36 }
 0x4b7   :  { %2226 = vrot.lane.b32.xlu2 %v10356_v10, %s8414_s14  ;;  %v2431_v10 = vld [vmem:[#allocation2 + $0x2d8] sm:$0xff] }
 0x4b8   :  { %2224 = vrot.lane.b32.xlu1 %v10361_v38, %s8414_s14  ;;  %v3863_v38 = vpop.f32.mrf.mxu1 }
 0x4b9   :  { %v2988_v6 = vpop.permute.xlu2 %2987  ;;  %2610 = vrot.lane.b32.xlu0 %v2430_v19, %s8415_s15  ;;  %v3864_v13 = vadd.f32 %v10380_v15, %v3863_v38 }
 0x4ba   :  { %v2928_v57 = vpop.permute.xlu1 %2927  ;;  %v10472_v33 = vpop.f32.mrf.mxu0 }
 0x4bb   :  { %3102 = vst.msk [vmem:[#allocation4 + $0x90] sm:$0xff] %vm3083_vm9, %v2928_v57  ;;  %v3313_v31 = vpop.permute.xlu0 %3312  ;;  %v3963_v22 = vmax.f32 %v3864_v13, 0.0 }
 0x4bc   :  { %3487 = vst.msk [vmem:[#allocation4 + $0x90] sm:$0xff] %vm3468_vm10, %v3313_v31 }
 0x4bf   :  { %2995 = vrot.lane.b32.xlu2 %v10432_v26, %s8416_s16 }
 0x4c0   :  { %2612 = vrot.lane.b32.xlu1 %v2431_v10, %s8415_s15  ;;  %v3865_v50 = vpop.f32.mrf.mxu1 }
 0x4c1   :  { %v3375_v49 = vpop.permute.xlu2 %3374  ;;  %2997 = vrot.lane.b32.xlu0 %v10435_v43, %s8416_s16  ;;  %v3866_v61 = vadd.f32 %v10380_v15, %v3865_v50 }
 0x4c2   :  { %v3315_v2 = vpop.permute.xlu1 %3314  ;;  %v3795_v10 = vpop.f32.mrf.mxu0 }
 0x4c3   :  { %3488 = vst.msk [vmem:[#allocation4 + $0x98] sm:$0xff] %vm3468_vm10, %v3315_v2  ;;  %v1834_v25 = vpop.permute.xlu0 %1833  ;;  %v3551_v48 = vld [vmem:[#allocation4 + $0x90] sm:$0xff] }
 0x4c4   :  { %1977 = vst.msk [vmem:[#allocation4 + $0x188] sm:$0xff] %vm1927_vm5, %v1834_v25 }
 0x4c5   :  { %2362 = vst.msk [vmem:[#allocation4 + $0x188] sm:$0xff] %vm2312_vm6, %v2219_v24  ;;  %v3964_v24 = vmax.f32 %v3866_v61, 0.0  ;;  %v10516_v61 = vld [vmem:[#allocation2 + $0x2e9] sm:$0xff] }
 0x4c7   :  { %3382 = vrot.lane.b32.xlu2 %v10443_v21, %s8417_s17 }
 0x4c8   :  { %3380 = vrot.lane.b32.xlu1 %v10446_v9, %s8417_s17 }
 0x4c9   :  { %v2547_v1 = vpop.permute.xlu2 %2546  ;;  %2168 = vrot.lane.b32.xlu0 %v10395_v47, %s8414_s14  ;;  %v2788_v47 = vld [vmem:[#allocation2 + $0x159] sm:$0xff] }
 0x4ca   :  { %v2217_v4 = vpop.permute.xlu1 %2216  ;;  %v3552_v29 = vld [vmem:[#allocation4 + $0x98] sm:$0xff] }
 0x4cb   :  { %2361 = vst.msk [vmem:[#allocation4 + $0x180] sm:$0xff] %vm2312_vm6, %v2217_v4  ;;  %v3606_v23 = vpack.c.bf16 %v3552_v29, %v3551_v48  ;;  %v2603_v37 = vpop.permute.xlu0 %2602 }
 0x4cc   :  { %2747 = vst.msk [vmem:[#allocation4 + $0x180] sm:$0xff] %vm2698_vm8, %v2603_v37 }
 0x4cd   :  { %7545 = vmatmul.msk.bf16.gmra.mxu0 %vm3653_vm11, %v3606_v23  ;;  %3132 = vst.msk [vmem:[#allocation4 + $0x180] sm:$0xff] %vm3083_vm9, %v2988_v6 }
 0x4cf   :  { %2554 = vrot.lane.b32.xlu2 %v2402_v59, %s8415_s15 }
 0x4d0   :  { %2170 = vrot.lane.b32.xlu1 %v3171_v18, %s8414_s14 }
 0x4d1   :  { %v10462_v20 = vpop.permute.xlu2 %2933  ;;  %2556 = vrot.lane.b32.xlu0 %v2403_v45, %s8415_s15 }
 0x4d2   :  { %v2605_v40 = vpop.permute.xlu1 %2604  ;;  %v3868_v8 = vpop.f32.mrf.mxu1 }
 0x4d3   :  { %2748 = vst.msk [vmem:[#allocation4 + $0x188] sm:$0xff] %vm2698_vm8, %v2605_v40  ;;  %v3869_v44 = vadd.f32 %v10380_v15, %v3868_v8  ;;  %v2990_v30 = vpop.permute.xlu0 %2989 }
 0x4d4   :  { %3133 = vst.msk [vmem:[#allocation4 + $0x188] sm:$0xff] %vm3083_vm9, %v2990_v30 }
 0x4d5   :  { %v3965_v11 = vmax.f32 %v3869_v44, 0.0  ;;  %3518 = vst.msk [vmem:[#allocation4 + $0x188] sm:$0xff] %vm3468_vm10, %v3375_v49  ;;  %v2432_v44 = vld [vmem:[#allocation2 + $0x2e8] sm:$0xff] }
 0x4d7   :  { %v4007_v34 = vmax.f32 %v3963_v22, %v3965_v11  ;;  %2941 = vrot.lane.b32.xlu2 %v2788_v47, %s8416_s16 }
 0x4d8   :  { %2939 = vrot.lane.b32.xlu1 %v2787_v3, %s8416_s16  ;;  %v3794_v3 = vadd.f32 %v10380_v15, %v10472_v33 }
 0x4d9   :  { %v4111_v51 = vrot.slane %v4007_v34, 2  ;;  %v4112_v7 = vrot.slane %v4007_v34, 4  ;;  %v4113_v28 = vrot.slane %v4007_v34, 6  ;;  %v7648_v60 = vrot.slane %v4007_v34, 9  ;;  %v1836_v41 = vpop.permute.xlu2 %1835  ;;  %3324 = vrot.lane.b32.xlu0 %v10469_v55, %s8417_s17 }
 0x4da   :  { %1978 = vst.msk [vmem:[#allocation4 + $0x190] sm:$0xff] %vm1927_vm5, %v1836_v41  ;;  %v3373_v32 = vpop.permute.xlu1 %3372  ;;  %v3870_v63 = vpop.f32.mrf.mxu1 }
 0x4db   :  { %v7649_v39 = vrot.slane %v4111_v51, 9  ;;  %v7650_v42 = vrot.slane %v4112_v7, 9  ;;  %3517 = vst.msk [vmem:[#allocation4 + $0x180] sm:$0xff] %vm3468_vm10, %v3373_v32  ;;  %v2161_v5 = vpop.permute.xlu0 %2160  ;;  %v4707_v27 = vmax.f32 %v4007_v34, %v7648_v60  ;;  %v3871_v52 = vadd.f32 %v10380_v15, %v3870_v63 }
 0x4dc   :  { %2333 = vst.msk [vmem:[#allocation4 + $0xa0] sm:$0xff] %vm2312_vm6, %v2161_v5  ;;  %v7651_v18 = vrot.slane %v4113_v28, 9  ;;  %v3582_v19 = vld [vmem:[#allocation4 + $0x188] sm:$0xff]  ;;  %v3935_v32 = vmax.f32 %v3794_v3, 0.0 }
 0x4dd   :  { %v4708_v12 = vmax.f32 %v4111_v51, %v7649_v39  ;;  %v4709_v54 = vmax.f32 %v4112_v7, %v7650_v42  ;;  %2719 = vst.msk [vmem:[#allocation4 + $0xa0] sm:$0xff] %vm2698_vm8, %v2547_v1  ;;  %v3966_v58 = vmax.f32 %v3871_v52, 0.0  ;;  %v4963_v0 = vperm.slane %v4707_v27, 0  ;;  %v2433_v39 = vld [vmem:[#allocation2 + $0x2f0] sm:$0xff] }
 0x4de   :  { %v4710_v6 = vmax.f32 %v4113_v28, %v7651_v18  ;;  %v10520_v42 = vld [vmem:[#allocation2 + $0x2f1] sm:$0xff] }
 0x4df   :  { %v4964_v53 = vperm.slane %v4708_v12, 0  ;;  %1843 = vrot.lane.b32.xlu2 %v10432_v26, %s8413_s0  ;;  %v4008_v16 = vmax.f32 %v3964_v24, %v3966_v58  ;;  %v4965_v57 = vperm.slane %v4709_v54, 0  ;;  %v3796_v24 = vadd.f32 %v10380_v15, %v3795_v10  ;;  %v10537_v10 = vld [vmem:[#allocation2 + $0x2ea] sm:$0xff] }
 0x4e0   :  { %3326 = vrot.lane.b32.xlu1 %v10482_v62, %s8417_s17  ;;  %v4966_v45 = vperm.slane %v4710_v6, 0 }
 0x4e1   :  { %v10489_v31 = vpop.permute.xlu2 %2222  ;;  %1845 = vrot.lane.b32.xlu0 %v10435_v43, %s8413_s0  ;;  %v5088_v38 = vsel %vm5011_vm14, %v4964_v53, %v4963_v0  ;;  %v4114_v49 = vrot.slane %v4008_v16, 2  ;;  %v4115_v2 = vrot.slane %v4008_v16, 4  ;;  %v4116_v25 = vrot.slane %v4008_v16, 6 }
 0x4e2   :  { %v2163_v26 = vpop.permute.xlu1 %2162  ;;  %v3581_v48 = vld [vmem:[#allocation4 + $0x180] sm:$0xff]  ;;  %v7652_v1 = vrot.slane %v4008_v16, 9  ;;  %v5089_v43 = vsel %vm5013_vm15, %v4965_v57, %v5088_v38  ;;  %v10532_v38 = vld [vmem:[#allocation2 + $0x2f2] sm:$0xff] }
 0x4e3   :  { %2334 = vst.msk [vmem:[#allocation4 + $0xa8] sm:$0xff] %vm2312_vm6, %v2163_v26  ;;  %v3621_v50 = vpack.c.bf16 %v3582_v19, %v3581_v48  ;;  %v2549_v4 = vpop.permute.xlu0 %2548  ;;  %v7653_v29 = vrot.slane %v4114_v49, 9  ;;  %v7654_v23 = vrot.slane %v4115_v2, 9  ;;  %v7655_v37 = vrot.slane %v4116_v25, 9 }
 0x4e4   :  { %2720 = vst.msk [vmem:[#allocation4 + $0xa8] sm:$0xff] %vm2698_vm8, %v2549_v4  ;;  %v4711_v59 = vmax.f32 %v4008_v16, %v7652_v1  ;;  %v5090_v47 = vsel %vm5015_vm0, %v4966_v45, %v5089_v43  ;;  %v3936_v48 = vmax.f32 %v3796_v24, 0.0 }
 0x4e5   :  { %7560 = vmatmul.msk.bf16.gmra.mxu1 %vm3653_vm11, %v3621_v50  ;;  %3105 = vst.msk [vmem:[#allocation4 + $0xa8] sm:$0xff] %vm3083_vm9, %v10462_v20  ;;  %v4712_v13 = vmax.f32 %v4114_v49, %v7653_v29  ;;  %v4713_v40 = vmax.f32 %v4115_v2, %v7654_v23  ;;  %v4714_v8 = vmax.f32 %v4116_v25, %v7655_v37 }
 0x4e6   :  { %v4967_v30 = vperm.slane %v4711_v59, 0 }
 0x4e7   :  { %2230 = vrot.lane.b32.xlu2 %v10443_v21, %s8414_s14  ;;  %v4968_v22 = vperm.slane %v4712_v13, 0  ;;  %v4969_v11 = vperm.slane %v4713_v40, 0  ;;  %v4970_v51 = vperm.slane %v4714_v8, 0 }
 0x4e8   :  { %2228 = vrot.lane.b32.xlu1 %v10446_v9, %s8414_s14  ;;  %v5091_v20 = vsel %vm5017_vm1, %v4967_v30, %v5090_v47 }
 0x4e9   :  { %v10508_v34 = vpop.permute.xlu2 %2991  ;;  %2614 = vrot.lane.b32.xlu0 %v2432_v44, %s8415_s15  ;;  %v5092_v7 = vsel %vm5019_vm2, %v4968_v22, %v5091_v20 }
 0x4ea   :  { %v2932_v21 = vpop.permute.xlu1 %2931  ;;  %v3798_v28 = vpop.f32.mrf.mxu0  ;;  %v5093_v60 = vsel %vm5021_vm3, %v4969_v11, %v5092_v7 }
 0x4eb   :  { %3104 = vst.msk [vmem:[#allocation4 + $0xa0] sm:$0xff] %vm3083_vm9, %v2932_v21  ;;  %v3799_v9 = vadd.f32 %v10380_v15, %v3798_v28  ;;  %v3317_v41 = vpop.permute.xlu0 %3316  ;;  %v5094_v33 = vsel %vm5023_vm4, %v4970_v51, %v5093_v60  ;;  %v2404_v51 = vld [vmem:[#allocation2 + $0x168] sm:$0xff] }
 0x4ec   :  { %3489 = vst.msk [vmem:[#allocation4 + $0xa0] sm:$0xff] %vm3468_vm10, %v3317_v41  ;;  %v2405_v41 = vld [vmem:[#allocation2 + $0x170] sm:$0xff] }
 0x4ed   :  { %5157 = vst.msk [vmem:[#allocation3 + $0xd1] sm:$0xff] %vm153_vm12, %v5094_v33  ;;  %v3937_v63 = vmax.f32 %v3799_v9, 0.0 }
 0x4ef   :  { %v3993_v5 = vmax.f32 %v3935_v32, %v3937_v63  ;;  %2999 = vrot.lane.b32.xlu2 %v10516_v61, %s8416_s16 }
 0x4f0   :  { %2616 = vrot.lane.b32.xlu1 %v2433_v39, %s8415_s15 }
 0x4f1   :  { %v4069_v27 = vrot.slane %v3993_v5, 2  ;;  %v4070_v52 = vrot.slane %v3993_v5, 4  ;;  %v4071_v18 = vrot.slane %v3993_v5, 6  ;;  %v7592_v12 = vrot.slane %v3993_v5, 9  ;;  %v10525_v54 = vpop.permute.xlu2 %3378  ;;  %3001 = vrot.lane.b32.xlu0 %v10520_v42, %s8416_s16 }
 0x4f2   :  { %v3319_v58 = vpop.permute.xlu1 %3318  ;;  %v3800_v53 = vpop.f32.mrf.mxu0 }
 0x4f3   :  { %v7593_v0 = vrot.slane %v4069_v27, 9  ;;  %v7594_v16 = vrot.slane %v4070_v52, 9  ;;  %3490 = vst.msk [vmem:[#allocation4 + $0xa8] sm:$0xff] %vm3468_vm10, %v3319_v58  ;;  %v1838_v19 = vpop.permute.xlu0 %1837  ;;  %v4651_v6 = vmax.f32 %v3993_v5, %v7592_v12  ;;  %v3801_v57 = vadd.f32 %v10380_v15, %v3800_v53  ;;  %v3553_v23 = vld [vmem:[#allocation4 + $0xa0] sm:$0xff]  ;;  %v2790_v53 = vld [vmem:[#allocation2 + $0x171] sm:$0xff] }
 0x4f4   :  { %1979 = vst.msk [vmem:[#allocation4 + $0x198] sm:$0xff] %vm1927_vm5, %v1838_v19  ;;  %v10535_v49 = vld [vmem:[#allocation3 + $0xd0] sm:$0xff]  ;;  %v7595_v2 = vrot.slane %v4071_v18, 9 }
 0x4f5   :  { %v4652_v25 = vmax.f32 %v4069_v27, %v7593_v0  ;;  %v4653_v26 = vmax.f32 %v4070_v52, %v7594_v16  ;;  %2364 = vst.msk [vmem:[#allocation4 + $0x198] sm:$0xff] %vm2312_vm6, %v10489_v31  ;;  %v3938_v1 = vmax.f32 %v3801_v57, 0.0  ;;  %v4907_v4 = vperm.slane %v4651_v6, 0  ;;  %v3174_v0 = vld [vmem:[#allocation2 + $0x16a] sm:$0xff] }
 0x4f6   :  { %5190 = vst.msk [vmem:[#allocation5 + $0x58] sm:$0xff] %vm153_vm12, %v10535_v49  ;;  %v4654_v37 = vmax.f32 %v4071_v18, %v7595_v2  ;;  %v3175_v2 = vld [vmem:[#allocation2 + $0x172] sm:$0xff] }
 0x4f7   :  { %v4908_v50 = vperm.slane %v4652_v25, 0  ;;  %3386 = vrot.lane.b32.xlu2 %v10532_v38, %s8417_s17  ;;  %v3994_v29 = vmax.f32 %v3936_v48, %v3938_v1  ;;  %v4909_v43 = vperm.slane %v4653_v26, 0 }
 0x4f8   :  { %3384 = vrot.lane.b32.xlu1 %v10537_v10, %s8417_s17  ;;  %v4910_v21 = vperm.slane %v4654_v37, 0  ;;  %v2435_v37 = vld [vmem:[#allocation2 + $0x308] sm:$0xff] }
 0x4f9   :  { %v2551_v59 = vpop.permute.xlu2 %2550  ;;  %2172 = vrot.lane.b32.xlu0 %v10469_v55, %s8414_s14  ;;  %v5039_v31 = vsel %vm5011_vm14, %v4908_v50, %v4907_v4  ;;  %v4072_v45 = vrot.slane %v3994_v29, 2  ;;  %v4073_v13 = vrot.slane %v3994_v29, 4  ;;  %v4074_v40 = vrot.slane %v3994_v29, 6 }
 0x4fa   :  { %v2221_v8 = vpop.permute.xlu1 %2220  ;;  %v3554_v44 = vld [vmem:[#allocation4 + $0xa8] sm:$0xff]  ;;  %v7596_v30 = vrot.slane %v3994_v29, 9  ;;  %v5040_v55 = vsel %vm5013_vm15, %v4909_v43, %v5039_v31 }
 0x4fb   :  { %2363 = vst.msk [vmem:[#allocation4 + $0x190] sm:$0xff] %vm2312_vm6, %v2221_v8  ;;  %v3607_v47 = vpack.c.bf16 %v3554_v44, %v3553_v23  ;;  %v2607_v22 = vpop.permute.xlu0 %2606  ;;  %v7597_v11 = vrot.slane %v4072_v45, 9  ;;  %v7598_v3 = vrot.slane %v4073_v13, 9  ;;  %v7599_v20 = vrot.slane %v4074_v40, 9  ;;  %v10596_v23 = vld [vmem:[#allocation2 + $0x301] sm:$0xff]  ;;  %v10599_v43 = vld [vmem:[#allocation2 + $0x309] sm:$0xff] }
 0x4fc   :  { %2749 = vst.msk [vmem:[#allocation4 + $0x190] sm:$0xff] %vm2698_vm8, %v2607_v22  ;;  %v4655_v7 = vmax.f32 %v3994_v29, %v7596_v30  ;;  %v5041_v32 = vsel %vm5015_vm0, %v4910_v21, %v5040_v55 }
 0x4fd   :  { %7546 = vmatmul.msk.bf16.gmra.mxu0 %vm3653_vm11, %v3607_v47  ;;  %3134 = vst.msk [vmem:[#allocation4 + $0x190] sm:$0xff] %vm3083_vm9, %v10508_v34  ;;  %v4656_v28 = vmax.f32 %v4072_v45, %v7597_v11  ;;  %v4657_v60 = vmax.f32 %v4073_v13, %v7598_v3  ;;  %v4658_v9 = vmax.f32 %v4074_v40, %v7599_v20  ;;  %v10607_v45 = vld [vmem:[#allocation2 + $0x30a] sm:$0xff]  ;;  %v10610_v13 = vld [vmem:[#allocation2 + $0x302] sm:$0xff] }
 0x4fe   :  { %v4911_v33 = vperm.slane %v4655_v7, 0  ;;  %v2406_v3 = vld [vmem:[#allocation2 + $0x180] sm:$0xff]  ;;  %v2407_v20 = vld [vmem:[#allocation2 + $0x188] sm:$0xff] }
 0x4ff   :  { %2558 = vrot.lane.b32.xlu2 %v2404_v51, %s8415_s15  ;;  %v4912_v63 = vperm.slane %v4656_v28, 0  ;;  %v4913_v39 = vperm.slane %v4657_v60, 0  ;;  %v4914_v34 = vperm.slane %v4658_v9, 0  ;;  %v2792_v9 = vld [vmem:[#allocation2 + $0x189] sm:$0xff] }
 0x500   :  { %2174 = vrot.lane.b32.xlu1 %v10482_v62, %s8414_s14  ;;  %v5042_v5 = vsel %vm5017_vm1, %v4911_v33, %v5041_v32  ;;  %v2789_v62 = vld [vmem:[#allocation2 + $0x169] sm:$0xff]  ;;  %v2791_v32 = vld [vmem:[#allocation2 + $0x181] sm:$0xff] }
 0x501   :  { %v2938_v27 = vpop.permute.xlu2 %2937  ;;  %2560 = vrot.lane.b32.xlu0 %v2405_v41, %s8415_s15  ;;  %v5043_v52 = vsel %vm5019_vm2, %v4912_v63, %v5042_v5  ;;  %v10632_v63 = vld [vmem:[#allocation2 + $0x182] sm:$0xff] }
 0x502   :  { %v2609_v18 = vpop.permute.xlu1 %2608  ;;  %v5044_v12 = vsel %vm5021_vm3, %v4913_v39, %v5043_v52 }
 0x503   :  { %2750 = vst.msk [vmem:[#allocation4 + $0x198] sm:$0xff] %vm2698_vm8, %v2609_v18  ;;  %v2994_v24 = vpop.permute.xlu0 %2993  ;;  %v5045_v58 = vsel %vm5023_vm4, %v4914_v34, %v5044_v12 }
 0x504   :  { %3135 = vst.msk [vmem:[#allocation4 + $0x198] sm:$0xff] %vm3083_vm9, %v2994_v24 }
 0x505   :  { %5150 = vst.msk [vmem:[#allocation3 + $0x41] sm:$0xff] %vm153_vm12, %v5045_v58 }
 0x506   :  { %3520 = vst.msk [vmem:[#allocation4 + $0x198] sm:$0xff] %vm3468_vm10, %v10525_v54 }
 0x507   :  { %2945 = vrot.lane.b32.xlu2 %v2790_v53, %s8416_s16 }
 0x508   :  { %2943 = vrot.lane.b32.xlu1 %v2789_v62, %s8416_s16 }
 0x509   :  { %v1840_v16 = vpop.permute.xlu2 %1839  ;;  %3328 = vrot.lane.b32.xlu0 %v3174_v0, %s8417_s17 }
 0x50a   :  { %1980 = vst.msk [vmem:[#allocation4 + $0x1a0] sm:$0xff] %vm1927_vm5, %v1840_v16  ;;  %v3377_v19 = vpop.permute.xlu1 %3376 }
 0x50b   :  { %3519 = vst.msk [vmem:[#allocation4 + $0x190] sm:$0xff] %vm3468_vm10, %v3377_v19  ;;  %v2165_v6 = vpop.permute.xlu0 %2164 }
 0x50c   :  { %2335 = vst.msk [vmem:[#allocation4 + $0xb0] sm:$0xff] %vm2312_vm6, %v2165_v6  ;;  %v10576_v57 = vld [vmem:[#allocation3 + $0x40] sm:$0xff] }
 0x50d   :  { %2721 = vst.msk [vmem:[#allocation4 + $0xb0] sm:$0xff] %vm2698_vm8, %v2551_v59  ;;  %v3584_v54 = vld [vmem:[#allocation4 + $0x198] sm:$0xff] }
 0x50e   :  { %5183 = vst.msk [vmem:[#allocation5 + $0x20] sm:$0xff] %vm153_vm12, %v10576_v57 }
 0x50f   :  { %1847 = vrot.lane.b32.xlu2 %v10516_v61, %s8413_s0  ;;  %v2434_v61 = vld [vmem:[#allocation2 + $0x300] sm:$0xff] }
 0x510   :  { %3330 = vrot.lane.b32.xlu1 %v3175_v2, %s8417_s17 }
 0x511   :  { %v2227_v25 = vpop.permute.xlu2 %2226  ;;  %1849 = vrot.lane.b32.xlu0 %v10520_v42, %s8413_s0 }
 0x512   :  { %v2167_v26 = vpop.permute.xlu1 %2166  ;;  %v3583_v48 = vld [vmem:[#allocation4 + $0x190] sm:$0xff] }
 0x513   :  { %2336 = vst.msk [vmem:[#allocation4 + $0xb8] sm:$0xff] %vm2312_vm6, %v2167_v26  ;;  %v3622_v1 = vpack.c.bf16 %v3584_v54, %v3583_v48  ;;  %v2553_v50 = vpop.permute.xlu0 %2552  ;;  %v10645_v26 = vld [vmem:[#allocation2 + $0x18a] sm:$0xff] }
 0x514   :  { %2722 = vst.msk [vmem:[#allocation4 + $0xb8] sm:$0xff] %vm2698_vm8, %v2553_v50 }
 0x515   :  { %7561 = vmatmul.msk.bf16.gmra.mxu1 %vm3653_vm11, %v3622_v1  ;;  %3107 = vst.msk [vmem:[#allocation4 + $0xb8] sm:$0xff] %vm3083_vm9, %v2938_v27 }
 0x517   :  { %2234 = vrot.lane.b32.xlu2 %v10532_v38, %s8414_s14  ;;  %v3873_v38 = vpop.f32.mrf.mxu1 }
 0x518   :  { %2232 = vrot.lane.b32.xlu1 %v10537_v10, %s8414_s14  ;;  %v3874_v51 = vadd.f32 %v10380_v15, %v3873_v38 }
 0x519   :  { %v2996_v42 = vpop.permute.xlu2 %2995  ;;  %2618 = vrot.lane.b32.xlu0 %v2434_v61, %s8415_s15 }
 0x51a   :  { %v2936_v4 = vpop.permute.xlu1 %2935  ;;  %v3967_v41 = vmax.f32 %v3874_v51, 0.0  ;;  %v10635_v5 = vpop.f32.mrf.mxu0 }
 0x51b   :  { %3106 = vst.msk [vmem:[#allocation4 + $0xb0] sm:$0xff] %vm3083_vm9, %v2936_v4  ;;  %v3321_v29 = vpop.permute.xlu0 %3320 }
 0x51c   :  { %3491 = vst.msk [vmem:[#allocation4 + $0xb0] sm:$0xff] %vm3468_vm10, %v3321_v29 }
 0x51f   :  { %3003 = vrot.lane.b32.xlu2 %v10596_v23, %s8416_s16  ;;  %v3875_v44 = vpop.f32.mrf.mxu1 }
 0x520   :  { %2620 = vrot.lane.b32.xlu1 %v2435_v37, %s8415_s15  ;;  %v3876_v24 = vadd.f32 %v10380_v15, %v3875_v44 }
 0x521   :  { %v3383_v10 = vpop.permute.xlu2 %3382  ;;  %3005 = vrot.lane.b32.xlu0 %v10599_v43, %s8416_s16 }
 0x522   :  { %v3323_v59 = vpop.permute.xlu1 %3322  ;;  %v3968_v48 = vmax.f32 %v3876_v24, 0.0 }
 0x523   :  { %3492 = vst.msk [vmem:[#allocation4 + $0xb8] sm:$0xff] %vm3468_vm10, %v3323_v59  ;;  %v1842_v31 = vpop.permute.xlu0 %1841  ;;  %v3555_v40 = vld [vmem:[#allocation4 + $0xb0] sm:$0xff] }
 0x524   :  { %1981 = vst.msk [vmem:[#allocation4 + $0x1a8] sm:$0xff] %vm1927_vm5, %v1842_v31 }
 0x525   :  { %2366 = vst.msk [vmem:[#allocation4 + $0x1a8] sm:$0xff] %vm2312_vm6, %v2227_v25 }
 0x527   :  { %3390 = vrot.lane.b32.xlu2 %v10607_v45, %s8417_s17 }
 0x528   :  { %3388 = vrot.lane.b32.xlu1 %v10610_v13, %s8417_s17 }
 0x529   :  { %v2555_v8 = vpop.permute.xlu2 %2554  ;;  %2176 = vrot.lane.b32.xlu0 %v3174_v0, %s8414_s14 }
 0x52a   :  { %v2225_v30 = vpop.permute.xlu1 %2224  ;;  %v3556_v47 = vld [vmem:[#allocation4 + $0xb8] sm:$0xff] }
 0x52b   :  { %2365 = vst.msk [vmem:[#allocation4 + $0x1a0] sm:$0xff] %vm2312_vm6, %v2225_v30  ;;  %v3608_v22 = vpack.c.bf16 %v3556_v47, %v3555_v40  ;;  %v2611_v11 = vpop.permute.xlu0 %2610 }
 0x52c   :  { %2751 = vst.msk [vmem:[#allocation4 + $0x1a0] sm:$0xff] %vm2698_vm8, %v2611_v11 }
 0x52d   :  { %7547 = vmatmul.msk.bf16.gmra.mxu0 %vm3653_vm11, %v3608_v22  ;;  %3136 = vst.msk [vmem:[#allocation4 + $0x1a0] sm:$0xff] %vm3083_vm9, %v2996_v42 }
 0x52f   :  { %2562 = vrot.lane.b32.xlu2 %v2406_v3, %s8415_s15 }
 0x530   :  { %2178 = vrot.lane.b32.xlu1 %v3175_v2, %s8414_s14 }
 0x531   :  { %v10625_v55 = vpop.permute.xlu2 %2941  ;;  %2564 = vrot.lane.b32.xlu0 %v2407_v20, %s8415_s15 }
 0x532   :  { %v2613_v7 = vpop.permute.xlu1 %2612  ;;  %v3878_v21 = vpop.f32.mrf.mxu1 }
 0x533   :  { %2752 = vst.msk [vmem:[#allocation4 + $0x1a8] sm:$0xff] %vm2698_vm8, %v2613_v7  ;;  %v3879_v28 = vadd.f32 %v10380_v15, %v3878_v21  ;;  %v2998_v60 = vpop.permute.xlu0 %2997 }
 0x534   :  { %3137 = vst.msk [vmem:[#allocation4 + $0x1a8] sm:$0xff] %vm3083_vm9, %v2998_v60 }
 0x535   :  { %v3969_v33 = vmax.f32 %v3879_v28, 0.0  ;;  %3522 = vst.msk [vmem:[#allocation4 + $0x1a8] sm:$0xff] %vm3468_vm10, %v3383_v10  ;;  %v3805_v10 = vpop.f32.mrf.mxu0 }
 0x537   :  { %v4009_v39 = vmax.f32 %v3967_v41, %v3969_v33  ;;  %2949 = vrot.lane.b32.xlu2 %v2792_v9, %s8416_s16  ;;  %v2436_v9 = vld [vmem:[#allocation2 + $0x318] sm:$0xff] }
 0x538   :  { %2947 = vrot.lane.b32.xlu1 %v2791_v32, %s8416_s16 }
 0x539   :  { %v4117_v27 = vrot.slane %v4009_v39, 2  ;;  %v4118_v34 = vrot.slane %v4009_v39, 4  ;;  %v4119_v52 = vrot.slane %v4009_v39, 6  ;;  %v7656_v18 = vrot.slane %v4009_v39, 9  ;;  %v1844_v12 = vpop.permute.xlu2 %1843  ;;  %3332 = vrot.lane.b32.xlu0 %v10632_v63, %s8417_s17 }
 0x53a   :  { %1982 = vst.msk [vmem:[#allocation4 + $0x1b0] sm:$0xff] %vm1927_vm5, %v1844_v12  ;;  %v3381_v58 = vpop.permute.xlu1 %3380  ;;  %v3880_v53 = vpop.f32.mrf.mxu1 }
 0x53b   :  { %v7657_v62 = vrot.slane %v4117_v27, 9  ;;  %v7658_v0 = vrot.slane %v4118_v34, 9  ;;  %3521 = vst.msk [vmem:[#allocation4 + $0x1a0] sm:$0xff] %vm3468_vm10, %v3381_v58  ;;  %v2169_v16 = vpop.permute.xlu0 %2168  ;;  %v4715_v19 = vmax.f32 %v4009_v39, %v7656_v18  ;;  %v3881_v6 = vadd.f32 %v10380_v15, %v3880_v53  ;;  %v10679_v53 = vld [vmem:[#allocation2 + $0x319] sm:$0xff] }
 0x53c   :  { %2337 = vst.msk [vmem:[#allocation4 + $0xc0] sm:$0xff] %vm2312_vm6, %v2169_v16  ;;  %v7659_v2 = vrot.slane %v4119_v52, 9  ;;  %v3586_v4 = vld [vmem:[#allocation4 + $0x1a8] sm:$0xff]  ;;  %v2437_v16 = vld [vmem:[#allocation2 + $0x320] sm:$0xff] }
 0x53d   :  { %v4716_v54 = vmax.f32 %v4117_v27, %v7657_v62  ;;  %v4717_v25 = vmax.f32 %v4118_v34, %v7658_v0  ;;  %2723 = vst.msk [vmem:[#allocation4 + $0xc0] sm:$0xff] %vm2698_vm8, %v2555_v8  ;;  %v3970_v1 = vmax.f32 %v3881_v6, 0.0  ;;  %v4971_v61 = vperm.slane %v4715_v19, 0  ;;  %v10683_v19 = vld [vmem:[#allocation2 + $0x321] sm:$0xff] }
 0x53e   :  { %v4718_v29 = vmax.f32 %v4119_v52, %v7659_v2  ;;  %v3804_v27 = vadd.f32 %v10380_v15, %v10635_v5 }
 0x53f   :  { %v4972_v50 = vperm.slane %v4716_v54, 0  ;;  %1851 = vrot.lane.b32.xlu2 %v10596_v23, %s8413_s0  ;;  %v4010_v42 = vmax.f32 %v3968_v48, %v3970_v1  ;;  %v4973_v37 = vperm.slane %v4717_v25, 0 }
 0x540   :  { %3334 = vrot.lane.b32.xlu1 %v10645_v26, %s8417_s17  ;;  %v4974_v7 = vperm.slane %v4718_v29, 0  ;;  %v3939_v62 = vmax.f32 %v3804_v27, 0.0 }
 0x541   :  { %v10652_v38 = vpop.permute.xlu2 %2230  ;;  %1853 = vrot.lane.b32.xlu0 %v10599_v43, %s8413_s0  ;;  %v5095_v59 = vsel %vm5011_vm14, %v4972_v50, %v4971_v61  ;;  %v4120_v31 = vrot.slane %v4010_v42, 2  ;;  %v4121_v40 = vrot.slane %v4010_v42, 4  ;;  %v4122_v8 = vrot.slane %v4010_v42, 6 }
 0x542   :  { %v2171_v23 = vpop.permute.xlu1 %2170  ;;  %v3585_v44 = vld [vmem:[#allocation4 + $0x1a0] sm:$0xff]  ;;  %v7660_v30 = vrot.slane %v4010_v42, 9  ;;  %v5096_v43 = vsel %vm5013_vm15, %v4973_v37, %v5095_v59  ;;  %v3806_v50 = vadd.f32 %v10380_v15, %v3805_v10 }
 0x543   :  { %2338 = vst.msk [vmem:[#allocation4 + $0xc8] sm:$0xff] %vm2312_vm6, %v2171_v23  ;;  %v3623_v47 = vpack.c.bf16 %v3586_v4, %v3585_v44  ;;  %v2557_v22 = vpop.permute.xlu0 %2556  ;;  %v7661_v11 = vrot.slane %v4120_v31, 9  ;;  %v7662_v3 = vrot.slane %v4121_v40, 9  ;;  %v7663_v20 = vrot.slane %v4122_v8, 9  ;;  %v10700_v10 = vld [vmem:[#allocation2 + $0x31a] sm:$0xff] }
 0x544   :  { %2724 = vst.msk [vmem:[#allocation4 + $0xc8] sm:$0xff] %vm2698_vm8, %v2557_v22  ;;  %v4719_v51 = vmax.f32 %v4010_v42, %v7660_v30  ;;  %v5097_v33 = vsel %vm5015_vm0, %v4974_v7, %v5096_v43 }
 0x545   :  { %7562 = vmatmul.msk.bf16.gmra.mxu1 %vm3653_vm11, %v3623_v47  ;;  %3109 = vst.msk [vmem:[#allocation4 + $0xc8] sm:$0xff] %vm3083_vm9, %v10625_v55  ;;  %v4720_v21 = vmax.f32 %v4120_v31, %v7661_v11  ;;  %v4721_v28 = vmax.f32 %v4121_v40, %v7662_v3  ;;  %v4722_v60 = vmax.f32 %v4122_v8, %v7663_v20  ;;  %v10695_v40 = vld [vmem:[#allocation2 + $0x322] sm:$0xff]  ;;  %v3940_v47 = vmax.f32 %v3806_v50, 0.0 }
 0x546   :  { %v4975_v41 = vperm.slane %v4719_v51, 0 }
 0x547   :  { %2238 = vrot.lane.b32.xlu2 %v10607_v45, %s8414_s14  ;;  %v4976_v32 = vperm.slane %v4720_v21, 0  ;;  %v4977_v39 = vperm.slane %v4721_v28, 0  ;;  %v4978_v52 = vperm.slane %v4722_v60, 0 }
 0x548   :  { %2236 = vrot.lane.b32.xlu1 %v10610_v13, %s8414_s14  ;;  %v5098_v55 = vsel %vm5017_vm1, %v4975_v41, %v5097_v33 }
 0x549   :  { %v10671_v34 = vpop.permute.xlu2 %2999  ;;  %2622 = vrot.lane.b32.xlu0 %v2436_v9, %s8415_s15  ;;  %v5099_v18 = vsel %vm5019_vm2, %v4976_v32, %v5098_v55 }
 0x54a   :  { %v2940_v45 = vpop.permute.xlu1 %2939  ;;  %v3808_v12 = vpop.f32.mrf.mxu0  ;;  %v5100_v24 = vsel %vm5021_vm3, %v4977_v39, %v5099_v18  ;;  %v2408_v18 = vld [vmem:[#allocation2 + $0x198] sm:$0xff] }
 0x54b   :  { %3108 = vst.msk [vmem:[#allocation4 + $0xc0] sm:$0xff] %vm3083_vm9, %v2940_v45  ;;  %v3809_v13 = vadd.f32 %v10380_v15, %v3808_v12  ;;  %v3325_v58 = vpop.permute.xlu0 %3324  ;;  %v5101_v5 = vsel %vm5023_vm4, %v4978_v52, %v5100_v24 }
 0x54c   :  { %3493 = vst.msk [vmem:[#allocation4 + $0xc0] sm:$0xff] %vm3468_vm10, %v3325_v58 }
 0x54d   :  { %5158 = vst.msk [vmem:[#allocation3 + $0xe1] sm:$0xff] %vm153_vm12, %v5101_v5  ;;  %v3941_v0 = vmax.f32 %v3809_v13, 0.0  ;;  %v2409_v5 = vld [vmem:[#allocation2 + $0x1a0] sm:$0xff] }
 0x54f   :  { %v3995_v6 = vmax.f32 %v3939_v62, %v3941_v0  ;;  %3007 = vrot.lane.b32.xlu2 %v10679_v53, %s8416_s16 }
 0x550   :  { %2624 = vrot.lane.b32.xlu1 %v2437_v16, %s8415_s15 }
 0x551   :  { %v4075_v2 = vrot.slane %v3995_v6, 2  ;;  %v4076_v54 = vrot.slane %v3995_v6, 4  ;;  %v4077_v25 = vrot.slane %v3995_v6, 6  ;;  %v7600_v48 = vrot.slane %v3995_v6, 9  ;;  %v10688_v1 = vpop.permute.xlu2 %3386  ;;  %3009 = vrot.lane.b32.xlu0 %v10683_v19, %s8416_s16 }
 0x552   :  { %v3327_v61 = vpop.permute.xlu1 %3326  ;;  %v3810_v42 = vpop.f32.mrf.mxu0 }
 0x553   :  { %v7601_v4 = vrot.slane %v4075_v2, 9  ;;  %v7602_v29 = vrot.slane %v4076_v54, 9  ;;  %3494 = vst.msk [vmem:[#allocation4 + $0xc8] sm:$0xff] %vm3468_vm10, %v3327_v61  ;;  %v1846_v37 = vpop.permute.xlu0 %1845  ;;  %v4659_v59 = vmax.f32 %v3995_v6, %v7600_v48  ;;  %v3811_v31 = vadd.f32 %v10380_v15, %v3810_v42  ;;  %v3557_v20 = vld [vmem:[#allocation4 + $0xc0] sm:$0xff] }
 0x554   :  { %1983 = vst.msk [vmem:[#allocation4 + $0x1b8] sm:$0xff] %vm1927_vm5, %v1846_v37  ;;  %v10698_v8 = vld [vmem:[#allocation3 + $0xe0] sm:$0xff]  ;;  %v7603_v23 = vrot.slane %v4077_v25, 9 }
 0x555   :  { %v4660_v44 = vmax.f32 %v4075_v2, %v7601_v4  ;;  %v4661_v30 = vmax.f32 %v4076_v54, %v7602_v29  ;;  %2368 = vst.msk [vmem:[#allocation4 + $0x1b8] sm:$0xff] %vm2312_vm6, %v10652_v38  ;;  %v3942_v22 = vmax.f32 %v3811_v31, 0.0  ;;  %v4915_v11 = vperm.slane %v4659_v59, 0  ;;  %v2794_v4 = vld [vmem:[#allocation2 + $0x1a1] sm:$0xff] }
 0x556   :  { %5191 = vst.msk [vmem:[#allocation5 + $0x60] sm:$0xff] %vm153_vm12, %v10698_v8  ;;  %v4662_v43 = vmax.f32 %v4077_v25, %v7603_v23  ;;  %v3178_v29 = vld [vmem:[#allocation2 + $0x19a] sm:$0xff] }
 0x557   :  { %v4916_v15 = vperm.slane %v4660_v44, 0  ;;  %3394 = vrot.lane.b32.xlu2 %v10695_v40, %s8417_s17  ;;  %v3996_v3 = vmax.f32 %v3940_v47, %v3942_v22  ;;  %v4917_v51 = vperm.slane %v4661_v30, 0  ;;  %v3179_v44 = vld [vmem:[#allocation2 + $0x1a2] sm:$0xff] }
 0x558   :  { %3392 = vrot.lane.b32.xlu1 %v10700_v10, %s8417_s17  ;;  %v4918_v12 = vperm.slane %v4662_v43, 0  ;;  %v10759_v43 = vld [vmem:[#allocation2 + $0x331] sm:$0xff] }
 0x559   :  { %v2559_v7 = vpop.permute.xlu2 %2558  ;;  %2180 = vrot.lane.b32.xlu0 %v10632_v63, %s8414_s14  ;;  %v5046_v38 = vsel %vm5011_vm14, %v4916_v15, %v4915_v11  ;;  %v4078_v21 = vrot.slane %v3996_v3, 2  ;;  %v4079_v28 = vrot.slane %v3996_v3, 4  ;;  %v4080_v60 = vrot.slane %v3996_v3, 6 }
 0x55a   :  { %v2229_v9 = vpop.permute.xlu1 %2228  ;;  %v3558_v41 = vld [vmem:[#allocation4 + $0xc8] sm:$0xff]  ;;  %v7604_v33 = vrot.slane %v3996_v3, 9  ;;  %v5047_v63 = vsel %vm5013_vm15, %v4917_v51, %v5046_v38  ;;  %v2439_v51 = vld [vmem:[#allocation2 + $0x338] sm:$0xff] }
 0x55b   :  { %2367 = vst.msk [vmem:[#allocation4 + $0x1b0] sm:$0xff] %vm2312_vm6, %v2229_v9  ;;  %v3609_v32 = vpack.c.bf16 %v3558_v41, %v3557_v20  ;;  %v2615_v39 = vpop.permute.xlu0 %2614  ;;  %v7605_v27 = vrot.slane %v4078_v21, 9  ;;  %v7606_v55 = vrot.slane %v4079_v28, 9  ;;  %v7607_v52 = vrot.slane %v4080_v60, 9  ;;  %v1639_v9 = vld [vmem:[#allocation2 + $0x1c9] sm:$0xff] }
 0x55c   :  { %2753 = vst.msk [vmem:[#allocation4 + $0x1b0] sm:$0xff] %vm2698_vm8, %v2615_v39  ;;  %v4663_v45 = vmax.f32 %v3996_v3, %v7604_v33  ;;  %v5048_v0 = vsel %vm5015_vm0, %v4918_v12, %v5047_v63  ;;  %v1640_v63 = vld [vmem:[#allocation2 + $0x1d1] sm:$0xff] }
 0x55d   :  { %7548 = vmatmul.msk.bf16.gmra.mxu0 %vm3653_vm11, %v3609_v32  ;;  %3138 = vst.msk [vmem:[#allocation4 + $0x1b0] sm:$0xff] %vm3083_vm9, %v10671_v34  ;;  %v4664_v24 = vmax.f32 %v4078_v21, %v7605_v27  ;;  %v4665_v13 = vmax.f32 %v4079_v28, %v7606_v55  ;;  %v4666_v58 = vmax.f32 %v4080_v60, %v7607_v52  ;;  %v10770_v28 = vld [vmem:[#allocation2 + $0x33a] sm:$0xff]  ;;  %v10773_v60 = vld [vmem:[#allocation2 + $0x332] sm:$0xff] }
 0x55e   :  { %v4919_v62 = vperm.slane %v4663_v45, 0  ;;  %v2025_v45 = vld [vmem:[#allocation2 + $0x1d2] sm:$0xff] }
 0x55f   :  { %2566 = vrot.lane.b32.xlu2 %v2408_v18, %s8415_s15  ;;  %v4920_v16 = vperm.slane %v4664_v24, 0  ;;  %v4921_v6 = vperm.slane %v4665_v13, 0  ;;  %v4922_v34 = vperm.slane %v4666_v58, 0  ;;  %v2024_v18 = vld [vmem:[#allocation2 + $0x1ca] sm:$0xff]  ;;  %v10790_v12 = vld [vmem:[%s12279_s2] ss:$0 sm:$0xff] }
 0x560   :  { %2182 = vrot.lane.b32.xlu1 %v10645_v26, %s8414_s14  ;;  %v5049_v2 = vsel %vm5017_vm1, %v4919_v62, %v5048_v0  ;;  %v2793_v26 = vld [vmem:[#allocation2 + $0x199] sm:$0xff] }
 0x561   :  { %v2946_v54 = vpop.permute.xlu2 %2945  ;;  %2568 = vrot.lane.b32.xlu0 %v2409_v5, %s8415_s15  ;;  %v5050_v25 = vsel %vm5019_vm2, %v4920_v16, %v5049_v2  ;;  %v2411_v16 = vld [vmem:[#allocation2 + $0x1e8] sm:$0xff] }
 0x562   :  { %v2617_v48 = vpop.permute.xlu1 %2616  ;;  %v5051_v50 = vsel %vm5021_vm3, %v4921_v6, %v5050_v25 }
 0x563   :  { %2754 = vst.msk [vmem:[#allocation4 + $0x1b8] sm:$0xff] %vm2698_vm8, %v2617_v48  ;;  %v3002_v61 = vpop.permute.xlu0 %3001  ;;  %v5052_v42 = vsel %vm5023_vm4, %v4922_v34, %v5051_v50  ;;  %v2795_v34 = vld [vmem:[#allocation2 + $0x1e1] sm:$0xff] }
 0x564   :  { %3139 = vst.msk [vmem:[#allocation4 + $0x1b8] sm:$0xff] %vm3083_vm9, %v3002_v61 }
 0x565   :  { %5151 = vst.msk [vmem:[#allocation3 + $0x51] sm:$0xff] %vm153_vm12, %v5052_v42 }
 0x566   :  { %3524 = vst.msk [vmem:[#allocation4 + $0x1b8] sm:$0xff] %vm3468_vm10, %v10688_v1 }
 0x567   :  { %2953 = vrot.lane.b32.xlu2 %v2794_v4, %s8416_s16 }
 0x568   :  { %2951 = vrot.lane.b32.xlu1 %v2793_v26, %s8416_s16 }
 0x569   :  { %v1848_v37 = vpop.permute.xlu2 %1847  ;;  %3336 = vrot.lane.b32.xlu0 %v3178_v29, %s8417_s17 }
 0x56a   :  { %1984 = vst.msk [vmem:[#allocation4 + $0x1c0] sm:$0xff] %vm1927_vm5, %v1848_v37  ;;  %v3385_v59 = vpop.permute.xlu1 %3384 }
 0x56b   :  { %3523 = vst.msk [vmem:[#allocation4 + $0x1b0] sm:$0xff] %vm3468_vm10, %v3385_v59  ;;  %v2173_v31 = vpop.permute.xlu0 %2172 }
 0x56c   :  { %2339 = vst.msk [vmem:[#allocation4 + $0xd0] sm:$0xff] %vm2312_vm6, %v2173_v31  ;;  %v10739_v23 = vld [vmem:[#allocation3 + $0x50] sm:$0xff] }
 0x56d   :  { %2725 = vst.msk [vmem:[#allocation4 + $0xd0] sm:$0xff] %vm2698_vm8, %v2559_v7  ;;  %v3588_v1 = vld [vmem:[#allocation4 + $0x1b8] sm:$0xff] }
 0x56e   :  { %5184 = vst.msk [vmem:[#allocation5 + $0x28] sm:$0xff] %vm153_vm12, %v10739_v23  ;;  %v10762_v7 = vld [vmem:[#allocation2 + $0x339] sm:$0xff] }
 0x56f   :  { %1855 = vrot.lane.b32.xlu2 %v10679_v53, %s8413_s0  ;;  %v2438_v53 = vld [vmem:[#allocation2 + $0x330] sm:$0xff] }
 0x570   :  { %3338 = vrot.lane.b32.xlu1 %v3179_v44, %s8417_s17 }
 0x571   :  { %v2235_v30 = vpop.permute.xlu2 %2234  ;;  %1857 = vrot.lane.b32.xlu0 %v10683_v19, %s8413_s0 }
 0x572   :  { %v2175_v47 = vpop.permute.xlu1 %2174  ;;  %v3587_v22 = vld [vmem:[#allocation4 + $0x1b0] sm:$0xff] }
 0x573   :  { %2340 = vst.msk [vmem:[#allocation4 + $0xd8] sm:$0xff] %vm2312_vm6, %v2175_v47  ;;  %v3624_v15 = vpack.c.bf16 %v3588_v1, %v3587_v22  ;;  %v2561_v11 = vpop.permute.xlu0 %2560  ;;  %v3180_v22 = vld [vmem:[#allocation2 + $0x1e2] sm:$0xff] }
 0x574   :  { %2726 = vst.msk [vmem:[#allocation4 + $0xd8] sm:$0xff] %vm2698_vm8, %v2561_v11 }
 0x575   :  { %7563 = vmatmul.msk.bf16.gmra.mxu1 %vm3653_vm11, %v3624_v15  ;;  %3111 = vst.msk [vmem:[#allocation4 + $0xd8] sm:$0xff] %vm3083_vm9, %v2946_v54  ;;  %v2410_v54 = vld [vmem:[#allocation2 + $0x1e0] sm:$0xff] }
 0x577   :  { %2242 = vrot.lane.b32.xlu2 %v10695_v40, %s8414_s14  ;;  %v3883_v40 = vpop.f32.mrf.mxu1 }
 0x578   :  { %2240 = vrot.lane.b32.xlu1 %v10700_v10, %s8414_s14  ;;  %v3884_v24 = vadd.f32 %v10790_v12, %v3883_v40 }
 0x579   :  { %v3004_v19 = vpop.permute.xlu2 %3003  ;;  %2626 = vrot.lane.b32.xlu0 %v2438_v53, %s8415_s15 }
 0x57a   :  { %v2944_v3 = vpop.permute.xlu1 %2943  ;;  %v3971_v6 = vmax.f32 %v3884_v24, 0.0  ;;  %v10801_v48 = vpop.f32.mrf.mxu0 }
 0x57b   :  { %3110 = vst.msk [vmem:[#allocation4 + $0xd0] sm:$0xff] %vm3083_vm9, %v2944_v3  ;;  %v3329_v20 = vpop.permute.xlu0 %3328 }
 0x57c   :  { %3495 = vst.msk [vmem:[#allocation4 + $0xd0] sm:$0xff] %vm3468_vm10, %v3329_v20 }
 0x57f   :  { %3011 = vrot.lane.b32.xlu2 %v10759_v43, %s8416_s16  ;;  %v3885_v32 = vpop.f32.mrf.mxu1 }
 0x580   :  { %2628 = vrot.lane.b32.xlu1 %v2439_v51, %s8415_s15  ;;  %v3886_v29 = vadd.f32 %v10790_v12, %v3885_v32  ;;  %v3181_v51 = vld [vmem:[#allocation2 + $0x1ea] sm:$0xff] }
 0x581   :  { %v3391_v10 = vpop.permute.xlu2 %3390  ;;  %3013 = vrot.lane.b32.xlu0 %v10762_v7, %s8416_s16 }
 0x582   :  { %v3331_v38 = vpop.permute.xlu1 %3330  ;;  %v3972_v3 = vmax.f32 %v3886_v29, 0.0 }
 0x583   :  { %3496 = vst.msk [vmem:[#allocation4 + $0xd8] sm:$0xff] %vm3468_vm10, %v3331_v38  ;;  %v1850_v21 = vpop.permute.xlu0 %1849  ;;  %v3559_v41 = vld [vmem:[#allocation4 + $0xd0] sm:$0xff] }
 0x584   :  { %1985 = vst.msk [vmem:[#allocation4 + $0x1c8] sm:$0xff] %vm1927_vm5, %v1850_v21 }
 0x585   :  { %2370 = vst.msk [vmem:[#allocation4 + $0x1c8] sm:$0xff] %vm2312_vm6, %v2235_v30 }
 0x587   :  { %3398 = vrot.lane.b32.xlu2 %v10770_v28, %s8417_s17 }
 0x588   :  { %3396 = vrot.lane.b32.xlu1 %v10773_v60, %s8417_s17 }
 0x589   :  { %v2563_v33 = vpop.permute.xlu2 %2562  ;;  %1799 = vrot.lane.b32.xlu0 %v1639_v9, %s8413_s0 }
 0x58a   :  { %v2233_v39 = vpop.permute.xlu1 %2232  ;;  %v3560_v27 = vld [vmem:[#allocation4 + $0xd8] sm:$0xff] }
 0x58b   :  { %2369 = vst.msk [vmem:[#allocation4 + $0x1c0] sm:$0xff] %vm2312_vm6, %v2233_v39  ;;  %v3610_v55 = vpack.c.bf16 %v3560_v27, %v3559_v41  ;;  %v2619_v52 = vpop.permute.xlu0 %2618  ;;  %v3815_v39 = vpop.f32.mrf.mxu0 }
 0x58c   :  { %2755 = vst.msk [vmem:[#allocation4 + $0x1c0] sm:$0xff] %vm2698_vm8, %v2619_v52 }
 0x58d   :  { %7549 = vmatmul.msk.bf16.gmra.mxu0 %vm3653_vm11, %v3610_v55  ;;  %3140 = vst.msk [vmem:[#allocation4 + $0x1c0] sm:$0xff] %vm3083_vm9, %v3004_v19  ;;  %v2796_v19 = vld [vmem:[#allocation2 + $0x1e9] sm:$0xff] }
 0x58f   :  { %2184 = vrot.lane.b32.xlu2 %v2024_v18, %s8414_s14 }
 0x590   :  { %1801 = vrot.lane.b32.xlu1 %v1640_v63, %s8413_s0 }
 0x591   :  { %v10793_v13 = vpop.permute.xlu2 %2949  ;;  %2186 = vrot.lane.b32.xlu0 %v2025_v45, %s8414_s14 }
 0x592   :  { %v2621_v58 = vpop.permute.xlu1 %2620  ;;  %v3888_v5 = vpop.f32.mrf.mxu1 }
 0x593   :  { %2756 = vst.msk [vmem:[#allocation4 + $0x1c8] sm:$0xff] %vm2698_vm8, %v2621_v58  ;;  %v3889_v62 = vadd.f32 %v10790_v12, %v3888_v5  ;;  %v3006_v0 = vpop.permute.xlu0 %3005 }
 0x594   :  { %3141 = vst.msk [vmem:[#allocation4 + $0x1c8] sm:$0xff] %vm3083_vm9, %v3006_v0 }
 0x595   :  { %v3973_v2 = vmax.f32 %v3889_v62, 0.0  ;;  %3526 = vst.msk [vmem:[#allocation4 + $0x1c8] sm:$0xff] %vm3468_vm10, %v3391_v10 }
 0x597   :  { %v4011_v25 = vmax.f32 %v3971_v6, %v3973_v2  ;;  %2572 = vrot.lane.b32.xlu2 %v2411_v16, %s8415_s15 }
 0x598   :  { %2570 = vrot.lane.b32.xlu1 %v2410_v54, %s8415_s15 }
 0x599   :  { %v4123_v50 = vrot.slane %v4011_v25, 2  ;;  %v4124_v61 = vrot.slane %v4011_v25, 4  ;;  %v4125_v42 = vrot.slane %v4011_v25, 6  ;;  %v7664_v4 = vrot.slane %v4011_v25, 9  ;;  %v1852_v26 = vpop.permute.xlu2 %1851  ;;  %2955 = vrot.lane.b32.xlu0 %v2795_v34, %s8416_s16 }
 0x59a   :  { %1986 = vst.msk [vmem:[#allocation4 + $0x1d0] sm:$0xff] %vm1927_vm5, %v1852_v26  ;;  %v3389_v37 = vpop.permute.xlu1 %3388  ;;  %v3890_v59 = vpop.f32.mrf.mxu1  ;;  %v3814_v26 = vadd.f32 %v10790_v12, %v10801_v48 }
 0x59b   :  { %v7665_v31 = vrot.slane %v4123_v50, 9  ;;  %v7666_v44 = vrot.slane %v4124_v61, 9  ;;  %3525 = vst.msk [vmem:[#allocation4 + $0x1c0] sm:$0xff] %vm3468_vm10, %v3389_v37  ;;  %v2177_v1 = vpop.permute.xlu0 %2176  ;;  %v4723_v30 = vmax.f32 %v4011_v25, %v7664_v4  ;;  %v3891_v47 = vadd.f32 %v10790_v12, %v3890_v59 }
 0x59c   :  { %2341 = vst.msk [vmem:[#allocation4 + $0xe0] sm:$0xff] %vm2312_vm6, %v2177_v1  ;;  %v7667_v15 = vrot.slane %v4125_v42, 9  ;;  %v3590_v21 = vld [vmem:[#allocation4 + $0x1c8] sm:$0xff] }
 0x59d   :  { %v4724_v11 = vmax.f32 %v4123_v50, %v7665_v31  ;;  %v4725_v53 = vmax.f32 %v4124_v61, %v7666_v44  ;;  %2727 = vst.msk [vmem:[#allocation4 + $0xe0] sm:$0xff] %vm2698_vm8, %v2563_v33  ;;  %v3974_v20 = vmax.f32 %v3891_v47, 0.0  ;;  %v4979_v10 = vperm.slane %v4723_v30, 0  ;;  %v2440_v30 = vld [vmem:[#allocation2 + $0x348] sm:$0xff] }
 0x59e   :  { %v4726_v9 = vmax.f32 %v4125_v42, %v7667_v15  ;;  %v3943_v47 = vmax.f32 %v3814_v26, 0.0 }
 0x59f   :  { %v4980_v40 = vperm.slane %v4724_v11, 0  ;;  %3340 = vrot.lane.b32.xlu2 %v3180_v22, %s8417_s17  ;;  %v4012_v38 = vmax.f32 %v3972_v3, %v3974_v20  ;;  %v4981_v41 = vperm.slane %v4725_v53, 0  ;;  %v2441_v22 = vld [vmem:[#allocation2 + $0x350] sm:$0xff] }
 0x5a0   :  { %2957 = vrot.lane.b32.xlu1 %v2796_v19, %s8416_s16  ;;  %v4982_v2 = vperm.slane %v4726_v9, 0 }
 0x5a1   :  { %v10813_v32 = vpop.permute.xlu2 %2238  ;;  %3342 = vrot.lane.b32.xlu0 %v3181_v51, %s8417_s17  ;;  %v5102_v33 = vsel %vm5011_vm14, %v4980_v40, %v4979_v10  ;;  %v4126_v27 = vrot.slane %v4012_v38, 2  ;;  %v4127_v55 = vrot.slane %v4012_v38, 4  ;;  %v4128_v52 = vrot.slane %v4012_v38, 6 }
 0x5a2   :  { %v2179_v18 = vpop.permute.xlu1 %2178  ;;  %v3589_v63 = vld [vmem:[#allocation4 + $0x1c0] sm:$0xff]  ;;  %v7668_v45 = vrot.slane %v4012_v38, 9  ;;  %v5103_v16 = vsel %vm5013_vm15, %v4981_v41, %v5102_v33  ;;  %v3816_v51 = vadd.f32 %v10790_v12, %v3815_v39  ;;  %v2826_v33 = vld [vmem:[#allocation2 + $0x351] sm:$0xff] }
 0x5a3   :  { %2342 = vst.msk [vmem:[#allocation4 + $0xe8] sm:$0xff] %vm2312_vm6, %v2179_v18  ;;  %v3625_v24 = vpack.c.bf16 %v3590_v21, %v3589_v63  ;;  %v2565_v58 = vpop.permute.xlu0 %2564  ;;  %v7669_v5 = vrot.slane %v4126_v27, 9  ;;  %v7670_v62 = vrot.slane %v4127_v55, 9  ;;  %v7671_v0 = vrot.slane %v4128_v52, 9  ;;  %v2825_v63 = vld [vmem:[#allocation2 + $0x349] sm:$0xff] }
 0x5a4   :  { %2728 = vst.msk [vmem:[#allocation4 + $0xe8] sm:$0xff] %vm2698_vm8, %v2565_v58  ;;  %v4727_v6 = vmax.f32 %v4012_v38, %v7668_v45  ;;  %v5104_v61 = vsel %vm5015_vm0, %v4982_v2, %v5103_v16  ;;  %v3944_v39 = vmax.f32 %v3816_v51, 0.0 }
 0x5a5   :  { %7564 = vmatmul.msk.bf16.gmra.mxu1 %vm3653_vm11, %v3625_v24  ;;  %3113 = vst.msk [vmem:[#allocation4 + $0xe8] sm:$0xff] %vm3083_vm9, %v10793_v13  ;;  %v4728_v54 = vmax.f32 %v4126_v27, %v7669_v5  ;;  %v4729_v34 = vmax.f32 %v4127_v55, %v7670_v62  ;;  %v4730_v25 = vmax.f32 %v4128_v52, %v7671_v0  ;;  %v3210_v24 = vld [vmem:[#allocation2 + $0x34a] sm:$0xff] }
 0x5a6   :  { %v4983_v50 = vperm.slane %v4727_v6, 0 }
 0x5a7   :  { %1861 = vrot.lane.b32.xlu2 %v10762_v7, %s8413_s0  ;;  %v4984_v42 = vperm.slane %v4728_v54, 0  ;;  %v4985_v4 = vperm.slane %v4729_v34, 0  ;;  %v4986_v37 = vperm.slane %v4730_v25, 0 }
 0x5a8   :  { %1859 = vrot.lane.b32.xlu1 %v10759_v43, %s8413_s0  ;;  %v5105_v13 = vsel %vm5017_vm1, %v4983_v50, %v5104_v61 }
 0x5a9   :  { %v10831_v29 = vpop.permute.xlu2 %3007  ;;  %2244 = vrot.lane.b32.xlu0 %v10773_v60, %s8414_s14  ;;  %v5106_v7 = vsel %vm5019_vm2, %v4984_v42, %v5105_v13 }
 0x5aa   :  { %v2948_v59 = vpop.permute.xlu1 %2947  ;;  %v3818_v31 = vpop.f32.mrf.mxu0  ;;  %v5107_v44 = vsel %vm5021_vm3, %v4985_v4, %v5106_v7 }
 0x5ab   :  { %3112 = vst.msk [vmem:[#allocation4 + $0xe0] sm:$0xff] %vm3083_vm9, %v2948_v59  ;;  %v3819_v43 = vadd.f32 %v10790_v12, %v3818_v31  ;;  %v3333_v1 = vpop.permute.xlu0 %3332  ;;  %v5108_v48 = vsel %vm5023_vm4, %v4986_v37, %v5107_v44  ;;  %v5195_v59 = vld [vmem:[#allocation3 + $0x1] sm:$0xff] }
 0x5ac   :  { %3497 = vst.msk [vmem:[#allocation4 + $0xe0] sm:$0xff] %vm3468_vm10, %v3333_v1 }
 0x5ad   :  { %5159 = vst.msk [vmem:[#allocation3 + $0xf1] sm:$0xff] %vm153_vm12, %v5108_v48  ;;  %v3945_v60 = vmax.f32 %v3819_v43, 0.0  ;;  %v3211_v43 = vld [vmem:[#allocation2 + $0x352] sm:$0xff] }
 0x5af   :  { %v3997_v15 = vmax.f32 %v3943_v47, %v3945_v60  ;;  %2630 = vrot.lane.b32.xlu2 %v2440_v30, %s8415_s15 }
 0x5b0   :  { %2246 = vrot.lane.b32.xlu1 %v10770_v28, %s8414_s14  ;;  %s8420_s14 = smov 56  }
 0x5b1   :  { %v4081_v11 = vrot.slane %v3997_v15, 2  ;;  %v4082_v53 = vrot.slane %v3997_v15, 4  ;;  %v4083_v19 = vrot.slane %v3997_v15, 6  ;;  %v7608_v3 = vrot.slane %v3997_v15, 9  ;;  %v10845_v20 = vpop.permute.xlu2 %3394  ;;  %2632 = vrot.lane.b32.xlu0 %v2441_v22, %s8415_s15 }
 0x5b2   :  { %v3335_v40 = vpop.permute.xlu1 %3334  ;;  %v3820_v10 = vpop.f32.mrf.mxu0 }
 0x5b3   :  { %v7609_v38 = vrot.slane %v4081_v11, 9  ;;  %v7610_v21 = vrot.slane %v4082_v53, 9  ;;  %3498 = vst.msk [vmem:[#allocation4 + $0xe8] sm:$0xff] %vm3468_vm10, %v3335_v40  ;;  %v1854_v9 = vpop.permute.xlu0 %1853  ;;  %v4667_v41 = vmax.f32 %v3997_v15, %v7608_v3  ;;  %v3821_v28 = vadd.f32 %v10790_v12, %v3820_v10  ;;  %v3561_v0 = vld [vmem:[#allocation4 + $0xe0] sm:$0xff] }
 0x5b4   :  { %1987 = vst.msk [vmem:[#allocation4 + $0x1d8] sm:$0xff] %vm1927_vm5, %v1854_v9  ;;  %v10852_v27 = vld [vmem:[#allocation3 + $0xf0] sm:$0xff]  ;;  %v7611_v55 = vrot.slane %v4083_v19, 9  ;;  %v5292_v9 = vld [vmem:[#allocation3 + $0x2] sm:$0xff] }
 0x5b5   :  { %v4668_v52 = vmax.f32 %v4081_v11, %v7609_v38  ;;  %v4669_v18 = vmax.f32 %v4082_v53, %v7610_v21  ;;  %2372 = vst.msk [vmem:[#allocation4 + $0x1d8] sm:$0xff] %vm2312_vm6, %v10813_v32  ;;  %v3946_v45 = vmax.f32 %v3821_v28, 0.0  ;;  %v4923_v5 = vperm.slane %v4667_v41, 0  ;;  %v5196_v53 = vld [vmem:[#allocation3 + $0x11] sm:$0xff] }
 0x5b6   :  { %5192 = vst.msk [vmem:[#allocation5 + $0x68] sm:$0xff] %vm153_vm12, %v10852_v27  ;;  %v4670_v16 = vmax.f32 %v4083_v19, %v7611_v55  ;;  %v5293_v41 = vld [vmem:[#allocation3 + $0x12] sm:$0xff] }
 0x5b7   :  { %v4924_v58 = vperm.slane %v4668_v52, 0  ;;  %3017 = vrot.lane.b32.xlu2 %v2826_v33, %s8416_s16  ;;  %v3998_v62 = vmax.f32 %v3944_v39, %v3946_v45  ;;  %v4925_v6 = vperm.slane %v4669_v18, 0 }
 0x5b8   :  { %3015 = vrot.lane.b32.xlu1 %v2825_v63, %s8416_s16  ;;  %v4926_v1 = vperm.slane %v4670_v16, 0  ;;  %s8421_s16 = smov 64  }
 0x5b9   :  { %v2567_v2 = vpop.permute.xlu2 %2566  ;;  %3400 = vrot.lane.b32.xlu0 %v3210_v24, %s8417_s17  ;;  %v5053_v32 = vsel %vm5011_vm14, %v4924_v58, %v4923_v5  ;;  %v4084_v54 = vrot.slane %v3998_v62, 2  ;;  %v4085_v34 = vrot.slane %v3998_v62, 4  ;;  %v4086_v25 = vrot.slane %v3998_v62, 6  ;;  %v5584_v58 = vld [vmem:[#allocation3 + $0x22] sm:$0xff] }
 0x5ba   :  { %v2237_v50 = vpop.permute.xlu1 %2236  ;;  %v3562_v61 = vld [vmem:[#allocation4 + $0xe8] sm:$0xff]  ;;  %v7612_v42 = vrot.slane %v3998_v62, 9  ;;  %v5054_v31 = vsel %vm5013_vm15, %v4925_v6, %v5053_v32  ;;  %v5779_v6 = vld [vmem:[#allocation3 + $0x31] sm:$0xff] }
 0x5bb   :  { %2371 = vst.msk [vmem:[#allocation4 + $0x1d0] sm:$0xff] %vm2312_vm6, %v2237_v50  ;;  %v3611_v4 = vpack.c.bf16 %v3562_v61, %v3561_v0  ;;  %v2623_v26 = vpop.permute.xlu0 %2622  ;;  %v7613_v13 = vrot.slane %v4084_v54, 9  ;;  %v7614_v37 = vrot.slane %v4085_v34, 9  ;;  %v7615_v7 = vrot.slane %v4086_v25, 9 }
 0x5bc   :  { %2757 = vst.msk [vmem:[#allocation4 + $0x1d0] sm:$0xff] %vm2698_vm8, %v2623_v26  ;;  %v4671_v44 = vmax.f32 %v3998_v62, %v7612_v42  ;;  %v5055_v22 = vsel %vm5015_vm0, %v4926_v1, %v5054_v31 }
 0x5bd   :  { %7550 = vmatmul.msk.bf16.gmra.mxu0 %vm3653_vm11, %v3611_v4  ;;  %3142 = vst.msk [vmem:[#allocation4 + $0x1d0] sm:$0xff] %vm3083_vm9, %v10831_v29  ;;  %v4672_v48 = vmax.f32 %v4084_v54, %v7613_v13  ;;  %v4673_v30 = vmax.f32 %v4085_v34, %v7614_v37  ;;  %v4674_v47 = vmax.f32 %v4086_v25, %v7615_v7  ;;  %v5876_v54 = vld [vmem:[#allocation3 + $0x32] sm:$0xff] }
 0x5be   :  { %v4927_v60 = vperm.slane %v4671_v44, 0 }
 0x5bf   :  { %5227 = vrot.lane.b32.xlu2 %v5195_v59, %s8411_s21  ;;  %v4928_v15 = vperm.slane %v4672_v48, 0  ;;  %v4929_v11 = vperm.slane %v4673_v30, 0  ;;  %v4930_v29 = vperm.slane %v4674_v47, 0 }
 0x5c0   :  { %3402 = vrot.lane.b32.xlu1 %v3211_v43, %s8417_s17  ;;  %v5056_v19 = vsel %vm5017_vm1, %v4927_v60, %v5055_v22 }
 0x5c1   :  { %v2954_v3 = vpop.permute.xlu2 %2953  ;;  %5229 = vrot.lane.b32.xlu0 %v5196_v53, %s8411_s21  ;;  %v5057_v51 = vsel %vm5019_vm2, %v4928_v15, %v5056_v19 }
 0x5c2   :  { %v2625_v40 = vpop.permute.xlu1 %2624  ;;  %v5058_v10 = vsel %vm5021_vm3, %v4929_v11, %v5057_v51  ;;  %v3893_v16 = vpop.f32.mrf.mxu1 }
 0x5c3   :  { %2758 = vst.msk [vmem:[#allocation4 + $0x1d8] sm:$0xff] %vm2698_vm8, %v2625_v40  ;;  %v3010_v38 = vpop.permute.xlu0 %3009  ;;  %v5059_v21 = vsel %vm5023_vm4, %v4930_v29, %v5058_v10  ;;  %v3894_v13 = vadd.f32 %v10790_v12, %v3893_v16 }
 0x5c4   :  { %3143 = vst.msk [vmem:[#allocation4 + $0x1d8] sm:$0xff] %vm3083_vm9, %v3010_v38 }
 0x5c5   :  { %5152 = vst.msk [vmem:[#allocation3 + $0x61] sm:$0xff] %vm153_vm12, %v5059_v21  ;;  %v3975_v43 = vmax.f32 %v3894_v13, 0.0 }
 0x5c6   :  { %3528 = vst.msk [vmem:[#allocation4 + $0x1d8] sm:$0xff] %vm3468_vm10, %v10845_v20 }
 0x5c7   :  { %5326 = vrot.lane.b32.xlu2 %v5293_v41, %s8413_s0 }
 0x5c8   :  { %5324 = vrot.lane.b32.xlu1 %v5292_v9, %s8413_s0 }
 0x5c9   :  { %v1856_v28 = vpop.permute.xlu2 %1855  ;;  %5421 = vrot.lane.b32.xlu0 %v10150_v14, %s8415_s15  ;;  %v5487_v14 = vld [vmem:[#allocation3 + $0x21] sm:$0xff] }
 0x5ca   :  { %1988 = vst.msk [vmem:[#allocation4 + $0x1e0] sm:$0xff] %vm1927_vm5, %v1856_v28  ;;  %v3393_v33 = vpop.permute.xlu1 %3392  ;;  %v3895_v50 = vpop.f32.mrf.mxu1 }
 0x5cb   :  { %3527 = vst.msk [vmem:[#allocation4 + $0x1d0] sm:$0xff] %vm3468_vm10, %v3393_v33  ;;  %v2181_v55 = vpop.permute.xlu0 %2180 }
 0x5cc   :  { %2343 = vst.msk [vmem:[#allocation4 + $0xf0] sm:$0xff] %vm2312_vm6, %v2181_v55  ;;  %v5169_v52 = vld [vmem:[#allocation3 + $0x60] sm:$0xff] }
 0x5cd   :  { %2729 = vst.msk [vmem:[#allocation4 + $0xf0] sm:$0xff] %vm2698_vm8, %v2567_v2  ;;  %v3592_v20 = vld [vmem:[#allocation4 + $0x1d8] sm:$0xff]  ;;  %v10942_v55 = vld [vmem:[#allocation3 + $0x41] sm:$0xff] }
 0x5ce   :  { %5185 = vst.msk [vmem:[#allocation5 + $0x30] sm:$0xff] %vm153_vm12, %v5169_v52 }
 0x5cf   :  { %5518 = vrot.lane.b32.xlu2 %v5196_v53, %s8417_s17  ;;  %v3896_v53 = vadd.f32 %v10790_v12, %v3895_v50 }
 0x5d0   :  { %5423 = vrot.lane.b32.xlu1 %v10243_v35, %s8415_s15 }
 0x5d1   :  { %v2243_v18 = vpop.permute.xlu2 %2242  ;;  %5520 = vrot.lane.b32.xlu0 %v5487_v14, %s8417_s17 }
 0x5d2   :  { %v2183_v63 = vpop.permute.xlu1 %2182  ;;  %v3591_v39 = vld [vmem:[#allocation4 + $0x1d0] sm:$0xff] }
 0x5d3   :  { %2344 = vst.msk [vmem:[#allocation4 + $0xf8] sm:$0xff] %vm2312_vm6, %v2183_v63  ;;  %v3626_v45 = vpack.c.bf16 %v3592_v20, %v3591_v39  ;;  %v2569_v24 = vpop.permute.xlu0 %2568 }
 0x5d4   :  { %2730 = vst.msk [vmem:[#allocation4 + $0xf8] sm:$0xff] %vm2698_vm8, %v2569_v24 }
 0x5d5   :  { %7565 = vmatmul.msk.bf16.gmra.mxu1 %vm3653_vm11, %v3626_v45  ;;  %3115 = vst.msk [vmem:[#allocation4 + $0xf8] sm:$0xff] %vm3083_vm9, %v2954_v3 }
 0x5d7   :  { %5617 = vrot.lane.b32.xlu2 %v5584_v58, %s8418_s30 }
 0x5d8   :  { %5615 = vrot.lane.b32.xlu1 %v5293_v41, %s8418_s30  ;;  %v3976_v41 = vmax.f32 %v3896_v53, 0.0 }
 0x5d9   :  { %v3012_v5 = vpop.permute.xlu2 %3011  ;;  %5713 = vrot.lane.b32.xlu0 %v10243_v35, %s8419_s13 }
 0x5da   :  { %v2952_v62 = vpop.permute.xlu1 %2951  ;;  %v10930_v30 = vpop.f32.mrf.mxu0 }
 0x5db   :  { %3114 = vst.msk [vmem:[#allocation4 + $0xf0] sm:$0xff] %vm3083_vm9, %v2952_v62  ;;  %v3337_v0 = vpop.permute.xlu0 %3336 }
 0x5dc   :  { %3499 = vst.msk [vmem:[#allocation4 + $0xf0] sm:$0xff] %vm3468_vm10, %v3337_v0 }
 0x5df   :  { %5810 = vrot.lane.b32.xlu2 %v5487_v14, %s8420_s14 }
 0x5e0   :  { %5715 = vrot.lane.b32.xlu1 %v10424_v36, %s8419_s13 }
 0x5e1   :  { %v3399_v2 = vpop.permute.xlu2 %3398  ;;  %5812 = vrot.lane.b32.xlu0 %v5779_v6, %s8420_s14 }
 0x5e2   :  { %v3339_v32 = vpop.permute.xlu1 %3338  ;;  %v3825_v24 = vpop.f32.mrf.mxu0 }
 0x5e3   :  { %3500 = vst.msk [vmem:[#allocation4 + $0xf8] sm:$0xff] %vm3468_vm10, %v3339_v32  ;;  %v1858_v35 = vpop.permute.xlu0 %1857  ;;  %v3563_v34 = vld [vmem:[#allocation4 + $0xf0] sm:$0xff] }
 0x5e4   :  { %1989 = vst.msk [vmem:[#allocation4 + $0x1e8] sm:$0xff] %vm1927_vm5, %v1858_v35 }
 0x5e5   :  { %2374 = vst.msk [vmem:[#allocation4 + $0x1e8] sm:$0xff] %vm2312_vm6, %v2243_v18 }
 0x5e7   :  { %5909 = vrot.lane.b32.xlu2 %v5876_v54, %s8421_s16 }
 0x5e8   :  { %5907 = vrot.lane.b32.xlu1 %v5584_v58, %s8421_s16 }
 0x5e9   :  { %v2185_v25 = vpop.permute.xlu2 %2184  ;;  %5231 = vrot.lane.b32.xlu0 %v5487_v14, %s8411_s21  ;;  %v10947_v14 = vld [vmem:[#allocation3 + $0x42] sm:$0xff] }
 0x5ea   :  { %v2241_v61 = vpop.permute.xlu1 %2240  ;;  %v3564_v42 = vld [vmem:[#allocation4 + $0xf8] sm:$0xff] }
 0x5eb   :  { %2373 = vst.msk [vmem:[#allocation4 + $0x1e0] sm:$0xff] %vm2312_vm6, %v2241_v61  ;;  %v3612_v4 = vpack.c.bf16 %v3564_v42, %v3563_v34  ;;  %v2627_v26 = vpop.permute.xlu0 %2626  ;;  %v5163_v42 = vld [vmem:[#allocation3] sm:$0xff] }
 0x5ec   :  { %2759 = vst.msk [vmem:[#allocation4 + $0x1e0] sm:$0xff] %vm2698_vm8, %v2627_v26 }
 0x5ed   :  { %7551 = vmatmul.msk.bf16.gmra.mxu0 %vm3653_vm11, %v3612_v4  ;;  %3144 = vst.msk [vmem:[#allocation4 + $0x1e0] sm:$0xff] %vm3083_vm9, %v3012_v5 }
 0x5ee   :  { %5179 = vst.msk [vmem:[#allocation5] sm:$0xff] %vm153_vm12, %v5163_v42 }
 0x5ef   :  { %5328 = vrot.lane.b32.xlu2 %v5584_v58, %s8413_s0 }
 0x5f0   :  { %5233 = vrot.lane.b32.xlu1 %v5779_v6, %s8411_s21 }
 0x5f1   :  { %v10921_v37 = vpop.permute.xlu2 %2572  ;;  %5330 = vrot.lane.b32.xlu0 %v5876_v54, %s8413_s0 }
 0x5f2   :  { %v2629_v7 = vpop.permute.xlu1 %2628  ;;  %v3898_v59 = vpop.f32.mrf.mxu1 }
 0x5f3   :  { %2760 = vst.msk [vmem:[#allocation4 + $0x1e8] sm:$0xff] %vm2698_vm8, %v2629_v7  ;;  %v3899_v31 = vadd.f32 %v10790_v12, %v3898_v59  ;;  %v3014_v44 = vpop.permute.xlu0 %3013 }
 0x5f4   :  { %3145 = vst.msk [vmem:[#allocation4 + $0x1e8] sm:$0xff] %vm3083_vm9, %v3014_v44 }
 0x5f5   :  { %v3977_v1 = vmax.f32 %v3899_v31, 0.0  ;;  %3530 = vst.msk [vmem:[#allocation4 + $0x1e8] sm:$0xff] %vm3468_vm10, %v3399_v2 }
 0x5f7   :  { %v4013_v48 = vmax.f32 %v3975_v43, %v3977_v1  ;;  %5427 = vrot.lane.b32.xlu2 %v10576_v57, %s8415_s15 }
 0x5f8   :  { %5425 = vrot.lane.b32.xlu1 %v10424_v36, %s8415_s15 }
 0x5f9   :  { %v4129_v47 = vrot.slane %v4013_v48, 2  ;;  %v4130_v60 = vrot.slane %v4013_v48, 4  ;;  %v4131_v22 = vrot.slane %v4013_v48, 6  ;;  %v7672_v15 = vrot.slane %v4013_v48, 9  ;;  %v10934_v11 = vpop.permute.xlu2 %3340  ;;  %5522 = vrot.lane.b32.xlu0 %v5779_v6, %s8417_s17 }
 0x5fa   :  { %v3397_v19 = vpop.permute.xlu1 %3396  ;;  %v3900_v3 = vpop.f32.mrf.mxu1 }
 0x5fb   :  { %v7673_v29 = vrot.slane %v4129_v47, 9  ;;  %v7674_v51 = vrot.slane %v4130_v60, 9  ;;  %3529 = vst.msk [vmem:[#allocation4 + $0x1e0] sm:$0xff] %vm3468_vm10, %v3397_v19  ;;  %v1800_v40 = vpop.permute.xlu0 %1799  ;;  %v4731_v10 = vmax.f32 %v4013_v48, %v7672_v15  ;;  %v3901_v36 = vadd.f32 %v10790_v12, %v3900_v3 }
 0x5fc   :  { %1960 = vst.msk [vmem:[#allocation4 + $0x100] sm:$0xff] %vm1927_vm5, %v1800_v40  ;;  %v7675_v38 = vrot.slane %v4131_v22, 9  ;;  %v3594_v18 = vld [vmem:[#allocation4 + $0x1e8] sm:$0xff]  ;;  %v10981_v40 = vld [vmem:[#allocation3 + $0x51] sm:$0xff] }
 0x5fd   :  { %v4732_v21 = vmax.f32 %v4129_v47, %v7673_v29  ;;  %v4733_v9 = vmax.f32 %v4130_v60, %v7674_v51  ;;  %2345 = vst.msk [vmem:[#allocation4 + $0x100] sm:$0xff] %vm2312_vm6, %v2185_v25  ;;  %v3978_v28 = vmax.f32 %v3901_v36, 0.0  ;;  %v4987_v52 = vperm.slane %v4731_v10, 0  ;;  %v10987_v10 = vld [vmem:[#allocation3 + $0x52] sm:$0xff] }
 0x5fe   :  { %v4734_v63 = vmax.f32 %v4131_v22, %v7675_v38 }
 0x5ff   :  { %v4988_v33 = vperm.slane %v4732_v21, 0  ;;  %5619 = vrot.lane.b32.xlu2 %v5876_v54, %s8418_s30  ;;  %v4014_v20 = vmax.f32 %v3976_v41, %v3978_v28  ;;  %v4989_v39 = vperm.slane %v4733_v9, 0 }
 0x600   :  { %5524 = vrot.lane.b32.xlu1 %v10942_v55, %s8417_s17  ;;  %v4990_v4 = vperm.slane %v4734_v63, 0 }
 0x601   :  { %v1862_v45 = vpop.permute.xlu2 %1861  ;;  %5621 = vrot.lane.b32.xlu0 %v10947_v14, %s8418_s30  ;;  %v5109_v58 = vsel %vm5011_vm14, %v4988_v33, %v4987_v52  ;;  %v4132_v5 = vrot.slane %v4014_v20, 2  ;;  %v4133_v62 = vrot.slane %v4014_v20, 4  ;;  %v4134_v0 = vrot.slane %v4014_v20, 6 }
 0x602   :  { %1991 = vst.msk [vmem:[#allocation4 + $0x1f8] sm:$0xff] %vm1927_vm5, %v1862_v45  ;;  %v1802_v16 = vpop.permute.xlu1 %1801  ;;  %v3593_v6 = vld [vmem:[#allocation4 + $0x1e0] sm:$0xff]  ;;  %v7676_v2 = vrot.slane %v4014_v20, 9  ;;  %v5110_v50 = vsel %vm5013_vm15, %v4989_v39, %v5109_v58 }
 0x603   :  { %1961 = vst.msk [vmem:[#allocation4 + $0x108] sm:$0xff] %vm1927_vm5, %v1802_v16  ;;  %v3627_v32 = vpack.c.bf16 %v3594_v18, %v3593_v6  ;;  %v2187_v35 = vpop.permute.xlu0 %2186  ;;  %v7677_v54 = vrot.slane %v4132_v5, 9  ;;  %v7678_v34 = vrot.slane %v4133_v62, 9  ;;  %v7679_v25 = vrot.slane %v4134_v0, 9 }
 0x604   :  { %2346 = vst.msk [vmem:[#allocation4 + $0x108] sm:$0xff] %vm2312_vm6, %v2187_v35  ;;  %v4735_v61 = vmax.f32 %v4014_v20, %v7676_v2  ;;  %v5111_v31 = vsel %vm5015_vm0, %v4990_v4, %v5110_v50 }
 0x605   :  { %7566 = vmatmul.msk.bf16.gmra.mxu1 %vm3653_vm11, %v3627_v32  ;;  %2732 = vst.msk [vmem:[#allocation4 + $0x108] sm:$0xff] %vm2698_vm8, %v10921_v37  ;;  %v4736_v26 = vmax.f32 %v4132_v5, %v7677_v54  ;;  %v4737_v13 = vmax.f32 %v4133_v62, %v7678_v34  ;;  %v4738_v7 = vmax.f32 %v4134_v0, %v7679_v25 }
 0x606   :  { %v4991_v59 = vperm.slane %v4735_v61, 0  ;;  %v3824_v37 = vadd.f32 %v10790_v12, %v10930_v30 }
 0x607   :  { %5719 = vrot.lane.b32.xlu2 %v10739_v23, %s8419_s13  ;;  %v4992_v44 = vperm.slane %v4736_v26, 0  ;;  %v4993_v43 = vperm.slane %v4737_v13, 0  ;;  %v4994_v47 = vperm.slane %v4738_v7, 0 }
 0x608   :  { %5717 = vrot.lane.b32.xlu1 %v10576_v57, %s8419_s13  ;;  %v5112_v1 = vsel %vm5017_vm1, %v4991_v59, %v5111_v31  ;;  %v3947_v3 = vmax.f32 %v3824_v37, 0.0 }
 0x609   :  { %v10968_v48 = vpop.permute.xlu2 %2630  ;;  %5814 = vrot.lane.b32.xlu0 %v10942_v55, %s8420_s14  ;;  %v5113_v60 = vsel %vm5019_vm2, %v4992_v44, %v5112_v1 }
 0x60a   :  { %v2571_v22 = vpop.permute.xlu1 %2570  ;;  %v3828_v15 = vpop.f32.mrf.mxu0  ;;  %v5114_v53 = vsel %vm5021_vm3, %v4993_v43, %v5113_v60 }
 0x60b   :  { %2731 = vst.msk [vmem:[#allocation4 + $0x100] sm:$0xff] %vm2698_vm8, %v2571_v22  ;;  %v3829_v57 = vadd.f32 %v10790_v12, %v3828_v15  ;;  %v2956_v19 = vpop.permute.xlu0 %2955  ;;  %v5115_v30 = vsel %vm5023_vm4, %v4994_v47, %v5114_v53 }
 0x60c   :  { %3116 = vst.msk [vmem:[#allocation4 + $0x100] sm:$0xff] %vm3083_vm9, %v2956_v19 }
 0x60d   :  { %5160 = vst.msk [vmem:[#allocation3 + $0x101] sm:$0xff] %vm153_vm12, %v5115_v30  ;;  %v3949_v29 = vmax.f32 %v3829_v57, 0.0  ;;  %v5394_v57 = vld [vmem:[#allocation3 + $0x60] sm:$0xff] }
 0x60e   :  { %3501 = vst.msk [vmem:[#allocation4 + $0x100] sm:$0xff] %vm3468_vm10, %v10934_v11  ;;  %v3826_v11 = vadd.f32 %v10790_v12, %v3825_v24 }
 0x60f   :  { %v3999_v51 = vmax.f32 %v3947_v3, %v3949_v29  ;;  %5911 = vrot.lane.b32.xlu2 %v10947_v14, %s8421_s16 }
 0x610   :  { %5816 = vrot.lane.b32.xlu1 %v10981_v40, %s8420_s14  ;;  %v3948_v24 = vmax.f32 %v3826_v11, 0.0 }
 0x611   :  { %v4087_v36 = vrot.slane %v3999_v51, 2  ;;  %v4088_v38 = vrot.slane %v3999_v51, 4  ;;  %v4089_v21 = vrot.slane %v3999_v51, 6  ;;  %v7616_v9 = vrot.slane %v3999_v51, 9  ;;  %v10989_v41 = vpop.permute.xlu2 %3017  ;;  %5913 = vrot.lane.b32.xlu0 %v10987_v10, %s8421_s16 }
 0x612   :  { %v2958_v28 = vpop.permute.xlu1 %2957  ;;  %v3830_v33 = vpop.f32.mrf.mxu0 }
 0x613   :  { %v7617_v52 = vrot.slane %v4087_v36, 9  ;;  %v7618_v20 = vrot.slane %v4088_v38, 9  ;;  %3117 = vst.msk [vmem:[#allocation4 + $0x108] sm:$0xff] %vm3083_vm9, %v2958_v28  ;;  %v3343_v18 = vpop.permute.xlu0 %3342  ;;  %v4675_v63 = vmax.f32 %v3999_v51, %v7616_v9  ;;  %v3831_v39 = vadd.f32 %v10790_v12, %v3830_v33 }
 0x614   :  { %3502 = vst.msk [vmem:[#allocation4 + $0x108] sm:$0xff] %vm3468_vm10, %v3343_v18  ;;  %v10997_v45 = vld [vmem:[#allocation3 + $0x100] sm:$0xff]  ;;  %v7619_v58 = vrot.slane %v4089_v21, 9 }
 0x615   :  { %v4676_v5 = vmax.f32 %v4087_v36, %v7617_v52  ;;  %v4677_v62 = vmax.f32 %v4088_v38, %v7618_v20  ;;  %5193 = vst.msk [vmem:[#allocation5 + $0x70] sm:$0xff] %vm153_vm12, %v10997_v45  ;;  %v3950_v0 = vmax.f32 %v3831_v39, 0.0  ;;  %v4931_v6 = vperm.slane %v4675_v63, 0  ;;  %v3565_v54 = vld [vmem:[#allocation4 + $0x100] sm:$0xff]  ;;  %v11056_v63 = vld [vmem:[#allocation3 + $0xd2] sm:$0xff] }
 0x616   :  { %v4678_v12 = vmax.f32 %v4089_v21, %v7619_v58  ;;  %v11028_v38 = vld [vmem:[#allocation3 + $0x61] sm:$0xff] }
 0x617   :  { %v4932_v16 = vperm.slane %v4676_v5, 0  ;;  %5237 = vrot.lane.b32.xlu2 %v10981_v40, %s8411_s21  ;;  %v4000_v2 = vmax.f32 %v3948_v24, %v3950_v0  ;;  %v4933_v32 = vperm.slane %v4677_v62, 0  ;;  %v11036_v21 = vld [vmem:[#allocation3 + $0xc1] sm:$0xff] }
 0x618   :  { %5235 = vrot.lane.b32.xlu1 %v10942_v55, %s8411_s21  ;;  %v4934_v43 = vperm.slane %v4678_v12, 0  ;;  %v6004_v12 = vld [vmem:[%s12280_s3 + $0x20] sm:$0xf] }
 0x619   :  { %v5228_v35 = vpop.permute.xlu2 %5227  ;;  %5332 = vrot.lane.b32.xlu0 %v10947_v14, %s8413_s0  ;;  %v5060_v34 = vsel %vm5011_vm14, %v4932_v16, %v4931_v6  ;;  %v4090_v25 = vrot.slane %v4000_v2, 2  ;;  %v4091_v50 = vrot.slane %v4000_v2, 4  ;;  %v4092_v61 = vrot.slane %v4000_v2, 6 }
 0x61a   :  { %5276 = vst.msk [vmem:[#allocation5] sm:$0xff] %vm5275_vm13, %v5228_v35  ;;  %v1860_v42 = vpop.permute.xlu1 %1859  ;;  %v7620_v4 = vrot.slane %v4000_v2, 9  ;;  %v5061_v31 = vsel %vm5013_vm15, %v4933_v32, %v5060_v34  ;;  %v6026_v35 = vunpack.c.l.b16 %v6004_v12 }
 0x61b   :  { %1990 = vst.msk [vmem:[#allocation4 + $0x1f0] sm:$0xff] %vm1927_vm5, %v1860_v42  ;;  %v2245_v55 = vpop.permute.xlu0 %2244  ;;  %v3566_v26 = vld [vmem:[#allocation4 + $0x108] sm:$0xff]  ;;  %v7621_v13 = vrot.slane %v4090_v25, 9  ;;  %v7622_v7 = vrot.slane %v4091_v50, 9  ;;  %v7623_v59 = vrot.slane %v4092_v61, 9  ;;  %v5062_v22 = vsel %vm5015_vm0, %v4934_v43, %v5061_v31 }
 0x61c   :  { %2375 = vst.msk [vmem:[#allocation4 + $0x1f0] sm:$0xff] %vm2312_vm6, %v2245_v55  ;;  %v3613_v14 = vpack.c.bf16 %v3566_v26, %v3565_v54  ;;  %v4679_v44 = vmax.f32 %v4000_v2, %v7620_v4  ;;  %vm5372_vm5 = vcmask 195712   ;;  %v8204_v55 = vld [vmem:[%s12280_s3 + $0x10] sm:$0xff] }
 0x61d   :  { %2761 = vst.msk [vmem:[#allocation4 + $0x1f0] sm:$0xff] %vm2698_vm8, %v10968_v48  ;;  %v4680_v37 = vmax.f32 %v4090_v25, %v7621_v13  ;;  %v4681_v1 = vmax.f32 %v4091_v50, %v7622_v7  ;;  %v4682_v47 = vmax.f32 %v4092_v61, %v7623_v59  ;;  %v8205_v25 = vld [vmem:[%s12280_s3 + $0x18] sm:$0xff]  ;;  %v11096_v26 = vld [vmem:[#allocation3 + $0xe1] sm:$0xff]  ;;  %v11110_v59 = vld [vmem:[%s12279_s2] ss:$0 sm:$0xff]  ;;  %s7514_s2 = sshll.u32 %s12289_s12, 4  ;;  %s7515_s2 = int_to_ptr.hbm [resolvable:$true] %s7514_s2 }
 0x61e   :  { %7552 = vmatmul.msk.bf16.gmra.mxu0 %vm3653_vm11, %v3613_v14  ;;  %v4935_v60 = vperm.slane %v4679_v44, 0  ;;  %v8203_v7 = vld [vmem:[%s12280_s3 + $0x8] sm:$0xff] }
 0x61f   :  { %5429 = vrot.lane.b32.xlu2 %v10739_v23, %s8415_s15  ;;  %v4936_v15 = vperm.slane %v4680_v37, 0  ;;  %v4937_v53 = vperm.slane %v4681_v1, 0  ;;  %v4938_v30 = vperm.slane %v4682_v47, 0  ;;  %v8202_v47 = vld [vmem:[%s12280_s3] sm:$0xff] }
 0x620   :  { %5334 = vrot.lane.b32.xlu1 %v10987_v10, %s8413_s0  ;;  %v5063_v48 = vsel %vm5017_vm1, %v4935_v60, %v5062_v22 }
 0x621   :  { %v5327_v19 = vpop.permute.xlu2 %5326  ;;  %5431 = vrot.lane.b32.xlu0 %v5394_v57, %s8415_s15  ;;  %v5064_v3 = vsel %vm5019_vm2, %v4936_v15, %v5063_v48  ;;  %v11124_v15 = vld [vmem:[#allocation3 + $0xe2] sm:$0xff] }
 0x622   :  { %v2247_v29 = vpop.permute.xlu1 %2246  ;;  %v5065_v51 = vsel %vm5021_vm3, %v4937_v53, %v5064_v3  ;;  %v3903_v16 = vpop.f32.mrf.mxu1 }
 0x623   :  { %2376 = vst.msk [vmem:[#allocation4 + $0x1f8] sm:$0xff] %vm2312_vm6, %v2247_v29  ;;  %v2633_v23 = vpop.permute.xlu0 %2632  ;;  %v5066_v36 = vsel %vm5023_vm4, %v4938_v30, %v5065_v51  ;;  %vm12295_vm6 = vcmask 261312   ;;  %v3904_v14 = vadd.f32 %v11110_v59, %v3903_v16 }
 0x624   :  { %2762 = vst.msk [vmem:[#allocation4 + $0x1f8] sm:$0xff] %vm2698_vm8, %v2633_v23  ;;  %vm5566_vm8 = vcmask 326912  }
 0x625   :  { %5153 = vst.msk [vmem:[#allocation3 + $0x71] sm:$0xff] %vm153_vm12, %v5066_v36  ;;  %v3979_v60 = vmax.f32 %v3904_v14, 0.0 }
 0x626   :  { %3147 = vst.msk [vmem:[#allocation4 + $0x1f8] sm:$0xff] %vm3083_vm9, %v10989_v41  ;;  %v5206_v41 = vld [vmem:[#allocation3 + $0xd1] sm:$0xff] }
 0x627   :  { %5528 = vrot.lane.b32.xlu2 %v11028_v38, %s8417_s17 }
 0x628   :  { %5526 = vrot.lane.b32.xlu1 %v10981_v40, %s8417_s17  ;;  %v11049_v40 = vld [vmem:[#allocation3 + $0x62] sm:$0xff] }
 0x629   :  { %v5519_v9 = vpop.permute.xlu2 %5518  ;;  %5247 = vrot.lane.b32.xlu0 %v11036_v21, %s8411_s21 }
 0x62a   :  { %v3016_v11 = vpop.permute.xlu1 %3015  ;;  %v3905_v61 = vpop.f32.mrf.mxu1 }
 0x62b   :  { %3146 = vst.msk [vmem:[#allocation4 + $0x1f0] sm:$0xff] %vm3083_vm9, %v3016_v11  ;;  %v3401_v28 = vpop.permute.xlu0 %3400  ;;  %vm12294_vm9 = vcmask 392512   ;;  %v3906_v51 = vadd.f32 %v11110_v59, %v3905_v61 }
 0x62c   :  { %3531 = vst.msk [vmem:[#allocation4 + $0x1f0] sm:$0xff] %vm3468_vm10, %v3401_v28  ;;  %v11042_v33 = vld [vmem:[#allocation3 + $0x70] sm:$0xff] }
 0x62d   :  { %5186 = vst.msk [vmem:[#allocation5 + $0x38] sm:$0xff] %vm153_vm12, %v11042_v33  ;;  %v11078_v54 = vld [vmem:[#allocation3 + $0x71] sm:$0xff] }
 0x62e   :  { %v11102_v13 = vld [vmem:[#allocation3 + $0x72] sm:$0xff] }
 0x62f   :  { %5623 = vrot.lane.b32.xlu2 %v10987_v10, %s8418_s30  ;;  %v5302_v10 = vld [vmem:[#allocation3 + $0xc2] sm:$0xff] }
 0x630   :  { %5249 = vrot.lane.b32.xlu1 %v5206_v41, %s8411_s21 }
 0x631   :  { %v5618_v52 = vpop.permute.xlu2 %5617  ;;  %5625 = vrot.lane.b32.xlu0 %v11049_v40, %s8418_s30 }
 0x632   :  { %v3403_v20 = vpop.permute.xlu1 %3402 }
 0x633   :  { %3532 = vst.msk [vmem:[#allocation4 + $0x1f8] sm:$0xff] %vm3468_vm10, %v3403_v20  ;;  %v5230_v18 = vpop.permute.xlu0 %5229  ;;  %v3595_v39 = vld [vmem:[#allocation4 + $0x1f0] sm:$0xff]  ;;  %vm6061_vm10 = vcmask 1043456  }
 0x634   :  { %5277 = vst.msk [vmem:[#allocation5 + $0x8] sm:$0xff] %vm5275_vm13, %v5230_v18 }
 0x635   :  { %5374 = vst.msk [vmem:[#allocation5 + $0x8] sm:$0xff] %vm5372_vm5, %v5327_v19 }
 0x637   :  { %5346 = vrot.lane.b32.xlu2 %v11056_v63, %s8413_s0 }
 0x638   :  { %5344 = vrot.lane.b32.xlu1 %v5302_v10, %s8413_s0 }
 0x639   :  { %v5811_v58 = vpop.permute.xlu2 %5810  ;;  %5721 = vrot.lane.b32.xlu0 %v5394_v57, %s8419_s13 }
 0x63a   :  { %v5325_v5 = vpop.permute.xlu1 %5324  ;;  %v3596_v62 = vld [vmem:[#allocation4 + $0x1f8] sm:$0xff]  ;;  %v11128_v57 = vpop.f32.mrf.mxu0 }
 0x63b   :  { %5373 = vst.msk [vmem:[#allocation5] sm:$0xff] %vm5372_vm5, %v5325_v5  ;;  %v3628_v24 = vpack.c.bf16 %v3596_v62, %v3595_v39  ;;  %v5422_v0 = vpop.permute.xlu0 %5421 }
 0x63c   :  { %5470 = vst.msk [vmem:[#allocation5] sm:$0xff] %vm12295_vm6, %v5422_v0 }
 0x63d   :  { %7567 = vmatmul.msk.bf16.gmra.mxu1 %vm3653_vm11, %v3628_v24  ;;  %5567 = vst.msk [vmem:[#allocation5] sm:$0xff] %vm5566_vm8, %v5519_v9  ;;  %vm5761_vm11 = vcmask 458112   ;;  %v11146_v24 = vld [vmem:[#allocation3 + $0xf1] sm:$0xff] }
 0x63f   :  { %5441 = vrot.lane.b32.xlu2 %v10535_v49, %s8415_s15  ;;  %v6031_v49 = vpack.c.b16 %v6026_v35, %v6026_v35 }
 0x640   :  { %5723 = vrot.lane.b32.xlu1 %v11042_v33, %s8419_s13 }
 0x641   :  { %v5910_v6 = vpop.permute.xlu2 %5909  ;;  %5443 = vrot.lane.b32.xlu0 %v10698_v8, %s8415_s15  ;;  %v6063_v34 = vsel %vm6061_vm10, %v6031_v49, 0  ;;  %vm12293_vm10 = vcmask 589312  }
 0x642   :  { %v5424_v2 = vpop.permute.xlu1 %5423  ;;  %6068 = vmatpush.bf16.msra.mxu2 %v6063_v34  ;;  %8321 = vmatpush.bf16.msra.mxu3 %v6063_v34 }
 0x643   :  { %5471 = vst.msk [vmem:[#allocation5 + $0x8] sm:$0xff] %vm12295_vm6, %v5424_v2  ;;  %v5521_v32 = vpop.permute.xlu0 %5520  ;;  %v3835_v2 = vpop.f32.mrf.mxu0 }
 0x644   :  { %5568 = vst.msk [vmem:[#allocation5 + $0x8] sm:$0xff] %vm5566_vm8, %v5521_v32 }
 0x645   :  { %5665 = vst.msk [vmem:[#allocation5 + $0x8] sm:$0xff] %vm12294_vm9, %v5618_v52 }
 0x646   :  { %6069 = vmatpush.bf16.msra.mxu2 %v8205_v25  ;;  %8322 = vmatpush.bf16.msra.mxu3 %v8205_v25 }
 0x647   :  { %5820 = vrot.lane.b32.xlu2 %v11078_v54, %s8420_s14 }
 0x648   :  { %5818 = vrot.lane.b32.xlu1 %v11028_v38, %s8420_s14 }
 0x649   :  { %v11087_v50 = vpop.permute.xlu2 %5328  ;;  %5538 = vrot.lane.b32.xlu0 %v5206_v41, %s8417_s17 }
 0x64a   :  { %v5616_v42 = vpop.permute.xlu1 %5615  ;;  %6070 = vmatpush.bf16.msra.mxu2 %v8204_v55  ;;  %8323 = vmatpush.bf16.msra.mxu3 %v8204_v55 }
 0x64b   :  { %5664 = vst.msk [vmem:[#allocation5] sm:$0xff] %vm12294_vm9, %v5616_v42  ;;  %v5714_v4 = vpop.permute.xlu0 %5713 }
 0x64c   :  { %5762 = vst.msk [vmem:[#allocation5] sm:$0xff] %vm5761_vm11, %v5714_v4 }
 0x64d   :  { %5859 = vst.msk [vmem:[#allocation5] sm:$0xff] %vm5858_vm7, %v5811_v58 }
 0x64e   :  { %6071 = vmatpush.bf16.msra.mxu2 %v8203_v7  ;;  %8324 = vmatpush.bf16.msra.mxu3 %v8203_v7 }
 0x64f   :  { %5915 = vrot.lane.b32.xlu2 %v11049_v40, %s8421_s16 }
 0x650   :  { %5540 = vrot.lane.b32.xlu1 %v11096_v26, %s8417_s17 }
 0x651   :  { %v11113_v31 = vpop.permute.xlu2 %5427  ;;  %5917 = vrot.lane.b32.xlu0 %v11102_v13, %s8421_s16 }
 0x652   :  { %v3908_v44 = vpop.f32.mrf.mxu1  ;;  %v5716_v43 = vpop.permute.xlu1 %5715  ;;  %6072 = vmatpush.bf16.msra.mxu2 %v8202_v47  ;;  %8325 = vmatpush.bf16.msra.mxu3 %v8202_v47 }
 0x653   :  { %v3909_v37 = vadd.f32 %v11110_v59, %v3908_v44  ;;  %5763 = vst.msk [vmem:[#allocation5 + $0x8] sm:$0xff] %vm5761_vm11, %v5716_v43  ;;  %v5813_v1 = vpop.permute.xlu0 %5812 }
 0x654   :  { %5860 = vst.msk [vmem:[#allocation5 + $0x8] sm:$0xff] %vm5858_vm7, %v5813_v1 }
 0x655   :  { %v3981_v22 = vmax.f32 %v3909_v37, 0.0  ;;  %5957 = vst.msk [vmem:[#allocation5 + $0x8] sm:$0xff] %vm12293_vm10, %v5910_v6 }
 0x657   :  { %v4015_v53 = vmax.f32 %v3979_v60, %v3981_v22  ;;  %5637 = vrot.lane.b32.xlu2 %v11124_v15, %s8418_s30  ;;  %v11159_v60 = vld [vmem:[#allocation3 + $0xf2] sm:$0xff] }
 0x658   :  { %5635 = vrot.lane.b32.xlu1 %v11056_v63, %s8418_s30 }
 0x659   :  { %v4135_v48 = vrot.slane %v4015_v53, 2  ;;  %v4136_v19 = vrot.slane %v4015_v53, 4  ;;  %v4137_v30 = vrot.slane %v4015_v53, 6  ;;  %v7680_v3 = vrot.slane %v4015_v53, 9  ;;  %v11132_v29 = vpop.permute.xlu2 %5619  ;;  %5733 = vrot.lane.b32.xlu0 %v10698_v8, %s8419_s13 }
 0x65a   :  { %v3910_v23 = vpop.f32.mrf.mxu1  ;;  %v5908_v36 = vpop.permute.xlu1 %5907  ;;  %v3980_v8 = vmax.f32 %v3906_v51, 0.0 }
 0x65b   :  { %v7681_v9 = vrot.slane %v4135_v48, 9  ;;  %v7682_v11 = vrot.slane %v4136_v19, 9  ;;  %5956 = vst.msk [vmem:[#allocation5] sm:$0xff] %vm12293_vm10, %v5908_v36  ;;  %v5232_v28 = vpop.permute.xlu0 %5231  ;;  %v4739_v41 = vmax.f32 %v4015_v53, %v7680_v3  ;;  %v3911_v52 = vadd.f32 %v11110_v59, %v3910_v23 }
 0x65c   :  { %5278 = vst.msk [vmem:[#allocation5 + $0x10] sm:$0xff] %vm5275_vm13, %v5232_v28  ;;  %v7683_v20 = vrot.slane %v4137_v30, 9  ;;  %v5973_v62 = vld [vmem:[#allocation5 + $0x8] sm:$0xff]  ;;  %vm6036_vm10 = vcmask 588800  }
 0x65d   :  { %v4740_v18 = vmax.f32 %v4135_v48, %v7681_v9  ;;  %v4741_v63 = vmax.f32 %v4136_v19, %v7682_v11  ;;  %5375 = vst.msk [vmem:[#allocation5 + $0x10] sm:$0xff] %vm5372_vm5, %v11087_v50  ;;  %v3982_v10 = vmax.f32 %v3911_v52, 0.0  ;;  %v4995_v58 = vperm.slane %v4739_v41, 0 }
 0x65e   :  { %v4742_v0 = vmax.f32 %v4137_v30, %v7683_v20 }
 0x65f   :  { %v4996_v39 = vperm.slane %v4740_v18, 0  ;;  %5830 = vrot.lane.b32.xlu2 %v11096_v26, %s8420_s14  ;;  %v4016_v5 = vmax.f32 %v3980_v8, %v3982_v10  ;;  %v4997_v16 = vperm.slane %v4741_v63, 0 }
 0x660   :  { %5735 = vrot.lane.b32.xlu1 %v10852_v27, %s8419_s13  ;;  %v4998_v43 = vperm.slane %v4742_v0, 0 }
 0x661   :  { %v11148_v6 = vpop.permute.xlu2 %5719  ;;  %5832 = vrot.lane.b32.xlu0 %v11146_v24, %s8420_s14  ;;  %v5116_v12 = vsel %vm5011_vm14, %v4996_v39, %v4995_v58  ;;  %v4138_v32 = vrot.slane %v4016_v5, 2  ;;  %v4139_v35 = vrot.slane %v4016_v5, 4  ;;  %v4140_v49 = vrot.slane %v4016_v5, 6 }
 0x662   :  { %v5234_v34 = vpop.permute.xlu1 %5233  ;;  %v5972_v25 = vld [vmem:[#allocation5] sm:$0xff]  ;;  %v7684_v50 = vrot.slane %v4016_v5, 9  ;;  %v5117_v14 = vsel %vm5013_vm15, %v4997_v16, %v5116_v12  ;;  %v3836_v58 = vadd.f32 %v11110_v59, %v3835_v2 }
 0x663   :  { %5279 = vst.msk [vmem:[#allocation5 + $0x18] sm:$0xff] %vm5275_vm13, %v5234_v34  ;;  %v5988_v61 = vpack.c.bf16 %v5973_v62, %v5972_v25  ;;  %v5331_v42 = vpop.permute.xlu0 %5330  ;;  %v7685_v4 = vrot.slane %v4138_v32, 9  ;;  %v7686_v55 = vrot.slane %v4139_v35, 9  ;;  %v7687_v7 = vrot.slane %v4140_v49, 9 }
 0x664   :  { %5376 = vst.msk [vmem:[#allocation5 + $0x18] sm:$0xff] %vm5372_vm5, %v5331_v42  ;;  %v4743_v44 = vmax.f32 %v4016_v5, %v7684_v50  ;;  %v5118_v53 = vsel %vm5015_vm0, %v4998_v43, %v5117_v14  ;;  %v3952_v2 = vmax.f32 %v3836_v58, 0.0 }
 0x665   :  { %7712 = vmatmul.msk.bf16.vlgmr.msra.gmra.mxu2 %vm6036_vm10, %v5988_v61  ;;  %5473 = vst.msk [vmem:[#allocation5 + $0x18] sm:$0xff] %vm12295_vm6, %v11113_v31  ;;  %v4744_v37 = vmax.f32 %v4138_v32, %v7685_v4  ;;  %v4745_v1 = vmax.f32 %v4139_v35, %v7686_v55  ;;  %v4746_v47 = vmax.f32 %v4140_v49, %v7687_v7 }
 0x666   :  { %v4999_v22 = vperm.slane %v4743_v44, 0  ;;  %v3834_v31 = vadd.f32 %v11110_v59, %v11128_v57 }
 0x667   :  { %5929 = vrot.lane.b32.xlu2 %v11159_v60, %s8421_s16  ;;  %v5000_v48 = vperm.slane %v4744_v37, 0  ;;  %v5001_v19 = vperm.slane %v4745_v1, 0  ;;  %v5002_v51 = vperm.slane %v4746_v47, 0 }
 0x668   :  { %5927 = vrot.lane.b32.xlu1 %v11124_v15, %s8421_s16  ;;  %v5119_v30 = vsel %vm5017_vm1, %v4999_v22, %v5118_v53  ;;  %v3951_v52 = vmax.f32 %v3834_v31, 0.0 }
 0x669   :  { %v11169_v3 = vpop.permute.xlu2 %5911  ;;  %5239 = vrot.lane.b32.xlu0 %v11028_v38, %s8411_s21  ;;  %v5120_v23 = vsel %vm5019_vm2, %v5000_v48, %v5119_v30 }
 0x66a   :  { %v3838_v36 = vpop.f32.mrf.mxu0  ;;  %v5426_v9 = vpop.permute.xlu1 %5425  ;;  %v5121_v11 = vsel %vm5021_vm3, %v5001_v19, %v5120_v23 }
 0x66b   :  { %v3839_v28 = vadd.f32 %v11110_v59, %v3838_v36  ;;  %5472 = vst.msk [vmem:[#allocation5 + $0x10] sm:$0xff] %vm12295_vm6, %v5426_v9  ;;  %v5523_v41 = vpop.permute.xlu0 %5522  ;;  %v5122_v57 = vsel %vm5023_vm4, %v5002_v51, %v5121_v11 }
 0x66c   :  { %5569 = vst.msk [vmem:[#allocation5 + $0x10] sm:$0xff] %vm5566_vm8, %v5523_v41 }
 0x66d   :  { %5161 = vst.msk [vmem:[#allocation3 + $0x111] sm:$0xff] %vm153_vm12, %v5122_v57  ;;  %v3953_v38 = vmax.f32 %v3839_v28, 0.0 }
 0x66e   :  { %5666 = vst.msk [vmem:[#allocation5 + $0x10] sm:$0xff] %vm12294_vm9, %v11132_v29 }
 0x66f   :  { %v4001_v20 = vmax.f32 %v3951_v52, %v3953_v38  ;;  %5336 = vrot.lane.b32.xlu2 %v11049_v40, %s8413_s0 }
 0x670   :  { %5241 = vrot.lane.b32.xlu1 %v11078_v54, %s8411_s21 }
 0x671   :  { %v4093_v18 = vrot.slane %v4001_v20, 2  ;;  %v4094_v63 = vrot.slane %v4001_v20, 4  ;;  %v4095_v8 = vrot.slane %v4001_v20, 6  ;;  %v7624_v10 = vrot.slane %v4001_v20, 9  ;;  %v5238_v39 = vpop.permute.xlu2 %5237  ;;  %5338 = vrot.lane.b32.xlu0 %v11102_v13, %s8413_s0 }
 0x672   :  { %v3840_v5 = vpop.f32.mrf.mxu0  ;;  %v5525_v62 = vpop.permute.xlu1 %5524  ;;  %5281 = vst.msk [vmem:[#allocation5 + $0x28] sm:$0xff] %vm5275_vm13, %v5238_v39 }
 0x673   :  { %v7625_v29 = vrot.slane %v4093_v18, 9  ;;  %v7626_v0 = vrot.slane %v4094_v63, 9  ;;  %5570 = vst.msk [vmem:[#allocation5 + $0x18] sm:$0xff] %vm5566_vm8, %v5525_v62  ;;  %v5622_v40 = vpop.permute.xlu0 %5621  ;;  %v4683_v16 = vmax.f32 %v4001_v20, %v7624_v10  ;;  %v3841_v12 = vadd.f32 %v11110_v59, %v3840_v5 }
 0x674   :  { %5667 = vst.msk [vmem:[#allocation5 + $0x18] sm:$0xff] %vm12294_vm9, %v5622_v40  ;;  %v11193_v32 = vld [vmem:[#allocation3 + $0x110] sm:$0xff]  ;;  %v7627_v35 = vrot.slane %v4095_v8, 9  ;;  %vm12297_vm9 = vcmask 589312  }
 0x675   :  { %v4684_v49 = vmax.f32 %v4093_v18, %v7625_v29  ;;  %v4685_v34 = vmax.f32 %v4094_v63, %v7626_v0  ;;  %5765 = vst.msk [vmem:[#allocation5 + $0x18] sm:$0xff] %vm5761_vm11, %v11148_v6  ;;  %v3954_v25 = vmax.f32 %v3841_v12, 0.0  ;;  %v4939_v61 = vperm.slane %v4683_v16, 0 }
 0x676   :  { %5194 = vst.msk [vmem:[#allocation5 + $0x78] sm:$0xff] %vm153_vm12, %v11193_v32  ;;  %v4686_v4 = vmax.f32 %v4095_v8, %v7627_v35  ;;  %v3849_v12 = vadd.f32 %v11110_v59, %v10246_v56 }
 0x677   :  { %v4940_v50 = vperm.slane %v4684_v49, 0  ;;  %v4002_v42 = vmax.f32 %v3952_v2, %v3954_v25  ;;  %v4941_v55 = vperm.slane %v4685_v34, 0 }
 0x678   :  { %5433 = vrot.lane.b32.xlu1 %v11042_v33, %s8415_s15  ;;  %v3957_v56 = vmax.f32 %v3849_v12, 0.0 }
 0x679   :  { %v5430_v7 = vpop.permute.xlu2 %5429  ;;  %5530 = vrot.lane.b32.xlu0 %v11078_v54, %s8417_s17  ;;  %v5067_v14 = vsel %vm5011_vm14, %v4940_v50, %v4939_v61  ;;  %v4096_v6 = vrot.slane %v4002_v42, 2  ;;  %v4097_v44 = vrot.slane %v4002_v42, 4  ;;  %v4098_v43 = vrot.slane %v4002_v42, 6  ;;  %v11248_v61 = vld [vmem:[#allocation3 + $0x101] sm:$0xff] }
 0x67a   :  { %v5718_v37 = vpop.permute.xlu1 %5717  ;;  %v7628_v1 = vrot.slane %v4002_v42, 9  ;;  %v5068_v33 = vsel %vm5013_vm15, %v4941_v55, %v5067_v14  ;;  %v4942_v54 = vperm.slane %v4686_v4, 0 }
 0x67b   :  { %5764 = vst.msk [vmem:[#allocation5 + $0x10] sm:$0xff] %vm5761_vm11, %v5718_v37  ;;  %v5815_v47 = vpop.permute.xlu0 %5814  ;;  %v7629_v22 = vrot.slane %v4096_v6, 9  ;;  %v7630_v53 = vrot.slane %v4097_v44, 9  ;;  %v7631_v48 = vrot.slane %v4098_v43, 9 }
 0x67c   :  { %5861 = vst.msk [vmem:[#allocation5 + $0x10] sm:$0xff] %vm5858_vm7, %v5815_v47  ;;  %v4687_v19 = vmax.f32 %v4002_v42, %v7628_v1  ;;  %v5069_v36 = vsel %vm5015_vm0, %v4942_v54, %v5068_v33 }
 0x67d   :  { %5958 = vst.msk [vmem:[#allocation5 + $0x10] sm:$0xff] %vm12297_vm9, %v11169_v3  ;;  %v4688_v31 = vmax.f32 %v4096_v6, %v7629_v22  ;;  %v4689_v30 = vmax.f32 %v4097_v44, %v7630_v53  ;;  %v4690_v51 = vmax.f32 %v4098_v43, %v7631_v48  ;;  %v3851_v6 = vadd.f32 %v11110_v59, %v10261_v17 }
 0x67e   :  { %v4943_v23 = vperm.slane %v4687_v19, 0 }
 0x67f   :  { %v4944_v9 = vperm.slane %v4688_v31, 0  ;;  %v4945_v11 = vperm.slane %v4689_v30, 0  ;;  %v4946_v41 = vperm.slane %v4690_v51, 0  ;;  %v3958_v33 = vmax.f32 %v3851_v6, 0.0 }
 0x680   :  { %v5070_v28 = vsel %vm5017_vm1, %v4943_v23, %v5069_v36 }
 0x681   :  { %5253 = vrot.lane.b32.xlu0 %v11146_v24, %s8411_s21  ;;  %v5071_v57 = vsel %vm5019_vm2, %v4944_v9, %v5070_v28  ;;  %v5529_v38 = vpop.permute.xlu2 %5528 }
 0x682   :  { %v5817_v52 = vpop.permute.xlu1 %5816  ;;  %v5072_v3 = vsel %vm5021_vm3, %v4945_v11, %v5071_v57  ;;  %v3913_v54 = vpop.f32.mrf.mxu1  ;;  %v5785_v11 = vld [vmem:[#allocation3 + $0x91] sm:$0xff] }
 0x683   :  { %5862 = vst.msk [vmem:[#allocation5 + $0x18] sm:$0xff] %vm5858_vm7, %v5817_v52  ;;  %v5914_v20 = vpop.permute.xlu0 %5913  ;;  %v5073_v18 = vsel %vm5023_vm4, %v4946_v41, %v5072_v3 }
 0x684   :  { %5959 = vst.msk [vmem:[#allocation5 + $0x18] sm:$0xff] %vm12297_vm9, %v5914_v20  ;;  %v5974_v10 = vld [vmem:[#allocation5 + $0x10] sm:$0xff]  ;;  %vm12298_vm9 = vcmask 392512  }
 0x685   :  { %5154 = vst.msk [vmem:[#allocation3 + $0x81] sm:$0xff] %vm153_vm12, %v5073_v18 }
 0x689   :  { %5348 = vrot.lane.b32.xlu0 %v11124_v15, %s8413_s0  ;;  %v5624_v58 = vpop.permute.xlu2 %5623  ;;  %v5688_v15 = vld [vmem:[#allocation3 + $0x90] sm:$0xff] }
 0x68a   :  { %v5236_v63 = vpop.permute.xlu1 %5235 }
 0x68b   :  { %5280 = vst.msk [vmem:[#allocation5 + $0x20] sm:$0xff] %vm5275_vm13, %v5236_v63  ;;  %v5333_v8 = vpop.permute.xlu0 %5332  ;;  %v5975_v39 = vld [vmem:[#allocation5 + $0x18] sm:$0xff] }
 0x68c   :  { %v5493_v5 = vld [vmem:[#allocation3 + $0x81] sm:$0xff]  ;;  %5377 = vst.msk [vmem:[#allocation5 + $0x20] sm:$0xff] %vm5372_vm5, %v5333_v8  ;;  %v5989_v29 = vpack.c.bf16 %v5975_v39, %v5974_v10 }
 0x68d   :  { %v5396_v62 = vld [vmem:[#allocation3 + $0x80] sm:$0xff]  ;;  %5532 = vrot.lane.b32.xlu1 %v5493_v5, %s8417_s17  ;;  %5474 = vst.msk [vmem:[#allocation5 + $0x20] sm:$0xff] %vm12295_vm6, %v5430_v7 }
 0x68e   :  { %5435 = vrot.lane.b32.xlu2 %v5396_v62, %s8415_s15  ;;  %7713 = vmatmul.msk.bf16.gmra.mxu2 %vm6036_vm10, %v5989_v29  ;;  %v11240_v2 = vld [vmem:[#allocation3 + $0x82] sm:$0xff] }
 0x691   :  { %5727 = vrot.lane.b32.xlu0 %v5688_v15, %s8419_s13  ;;  %v5347_v16 = vpop.permute.xlu2 %5346 }
 0x692   :  { %v5335_v0 = vpop.permute.xlu1 %5334 }
 0x693   :  { %5378 = vst.msk [vmem:[#allocation5 + $0x28] sm:$0xff] %vm5372_vm5, %v5335_v0  ;;  %v5432_v40 = vpop.permute.xlu0 %5431 }
 0x694   :  { %5475 = vst.msk [vmem:[#allocation5 + $0x28] sm:$0xff] %vm12295_vm6, %v5432_v40  ;;  %v3915_v40 = vpop.f32.mrf.mxu1 }
 0x695   :  { %5627 = vrot.lane.b32.xlu1 %v11102_v13, %s8418_s30  ;;  %5572 = vst.msk [vmem:[#allocation5 + $0x28] sm:$0xff] %vm5566_vm8, %v5529_v38 }
 0x696   :  { %5251 = vrot.lane.b32.xlu2 %v11096_v26, %s8411_s21 }
 0x699   :  { %5822 = vrot.lane.b32.xlu0 %v5493_v5, %s8420_s14  ;;  %v5442_v25 = vpop.permute.xlu2 %5441 }
 0x69a   :  { %v5527_v35 = vpop.permute.xlu1 %5526 }
 0x69b   :  { %5571 = vst.msk [vmem:[#allocation5 + $0x20] sm:$0xff] %vm5566_vm8, %v5527_v35  ;;  %v3843_v49 = vpop.f32.mrf.mxu0  ;;  %v5248_v34 = vpop.permute.xlu0 %5247 }
 0x69c   :  { %5668 = vst.msk [vmem:[#allocation5 + $0x20] sm:$0xff] %vm12298_vm9, %v5624_v58  ;;  %v3844_v13 = vadd.f32 %v11110_v59, %v3843_v49 }
 0x69d   :  { %5350 = vrot.lane.b32.xlu1 %v11159_v60, %s8413_s0  ;;  %5286 = vst.msk [vmem:[#allocation5 + $0x50] sm:$0xff] %vm5275_vm13, %v5248_v34 }
 0x69e   :  { %5629 = vrot.lane.b32.xlu2 %v11240_v2, %s8418_s30  ;;  %v3955_v26 = vmax.f32 %v3844_v13, 0.0 }
 0x6a0   :  { %v4003_v50 = vmax.f32 %v3955_v26, %v3957_v56 }
 0x6a1   :  { %5544 = vrot.lane.b32.xlu0 %v11248_v61, %s8417_s17  ;;  %v5821_v36 = vpop.permute.xlu2 %5820 }
 0x6a2   :  { %v4099_v42 = vrot.slane %v4003_v50, 2  ;;  %v4100_v4 = vrot.slane %v4003_v50, 4  ;;  %v4101_v55 = vrot.slane %v4003_v50, 6  ;;  %v7632_v7 = vrot.slane %v4003_v50, 9  ;;  %v5250_v14 = vpop.permute.xlu1 %5249 }
 0x6a3   :  { %5287 = vst.msk [vmem:[#allocation5 + $0x58] sm:$0xff] %vm5275_vm13, %v5250_v14  ;;  %v3845_v44 = vpop.f32.mrf.mxu0  ;;  %v5626_v43 = vpop.permute.xlu0 %5625 }
 0x6a4   :  { %v7633_v37 = vrot.slane %v4099_v42, 9  ;;  %v7634_v1 = vrot.slane %v4100_v4, 9  ;;  %5384 = vst.msk [vmem:[#allocation5 + $0x58] sm:$0xff] %vm5372_vm5, %v5347_v16  ;;  %v4691_v47 = vmax.f32 %v4003_v50, %v7632_v7  ;;  %v3846_v22 = vadd.f32 %v11110_v59, %v3845_v44 }
 0x6a5   :  { %5445 = vrot.lane.b32.xlu1 %v10852_v27, %s8415_s15  ;;  %5669 = vst.msk [vmem:[#allocation5 + $0x28] sm:$0xff] %vm12298_vm9, %v5626_v43  ;;  %v7635_v53 = vrot.slane %v4101_v55, 9  ;;  %v3914_v50 = vadd.f32 %v11110_v59, %v3913_v54  ;;  %vm12299_vm9 = vcmask 589312  }
 0x6a6   :  { %5725 = vrot.lane.b32.xlu2 %v5396_v62, %s8419_s13  ;;  %v4692_v17 = vmax.f32 %v4099_v42, %v7633_v37  ;;  %v4693_v48 = vmax.f32 %v4100_v4, %v7634_v1  ;;  %v3956_v19 = vmax.f32 %v3846_v22, 0.0  ;;  %v4947_v30 = vperm.slane %v4691_v47, 0 }
 0x6a7   :  { %v4694_v23 = vmax.f32 %v4101_v55, %v7635_v53  ;;  %v5882_v55 = vld [vmem:[#allocation3 + $0x92] sm:$0xff] }
 0x6a8   :  { %v4948_v31 = vperm.slane %v4692_v17, 0  ;;  %v4004_v51 = vmax.f32 %v3956_v19, %v3958_v33  ;;  %v4949_v27 = vperm.slane %v4693_v48, 0  ;;  %v3916_v17 = vadd.f32 %v11110_v59, %v3915_v40 }
 0x6a9   :  { %5639 = vrot.lane.b32.xlu0 %v11159_v60, %s8418_s30  ;;  %v4950_v10 = vperm.slane %v4694_v23, 0  ;;  %v5916_v56 = vpop.permute.xlu2 %5915 }
 0x6aa   :  { %v5345_v9 = vpop.permute.xlu1 %5344  ;;  %v5074_v28 = vsel %vm5011_vm14, %v4948_v31, %v4947_v30  ;;  %v4102_v41 = vrot.slane %v4004_v51, 2  ;;  %v4103_v57 = vrot.slane %v4004_v51, 4  ;;  %v4104_v52 = vrot.slane %v4004_v51, 6 }
 0x6ab   :  { %5383 = vst.msk [vmem:[#allocation5 + $0x50] sm:$0xff] %vm5372_vm5, %v5345_v9  ;;  %v5722_v38 = vpop.permute.xlu0 %5721  ;;  %v7636_v3 = vrot.slane %v4004_v51, 9  ;;  %v5075_v60 = vsel %vm5013_vm15, %v4949_v27, %v5074_v28  ;;  %v3984_v9 = vmax.f32 %v3916_v17, 0.0 }
 0x6ac   :  { %5480 = vst.msk [vmem:[#allocation5 + $0x50] sm:$0xff] %vm12295_vm6, %v5442_v25  ;;  %v7637_v20 = vrot.slane %v4102_v41, 9  ;;  %v7638_v18 = vrot.slane %v4103_v57, 9  ;;  %v7639_v63 = vrot.slane %v4104_v52, 9  ;;  %v5076_v29 = vsel %vm5015_vm0, %v4950_v10, %v5075_v60  ;;  %v11286_v25 = vld [vmem:[#allocation3 + $0x102] sm:$0xff] }
 0x6ad   :  { %5824 = vrot.lane.b32.xlu1 %v5785_v11, %s8420_s14  ;;  %5766 = vst.msk [vmem:[#allocation5 + $0x20] sm:$0xff] %vm5761_vm11, %v5722_v38  ;;  %v4695_v8 = vmax.f32 %v4004_v51, %v7636_v3 }
 0x6ae   :  { %5447 = vrot.lane.b32.xlu2 %v10997_v45, %s8415_s15  ;;  %v4696_v39 = vmax.f32 %v4102_v41, %v7637_v20  ;;  %v4697_v58 = vmax.f32 %v4103_v57, %v7638_v18  ;;  %v4698_v5 = vmax.f32 %v4104_v52, %v7639_v63 }
 0x6af   :  { %v4951_v62 = vperm.slane %v4695_v8, 0 }
 0x6b0   :  { %v4952_v15 = vperm.slane %v4696_v39, 0  ;;  %v4953_v0 = vperm.slane %v4697_v58, 0  ;;  %v4954_v35 = vperm.slane %v4698_v5, 0  ;;  %v11315_v5 = vld [vmem:[#allocation3 + $0x112] sm:$0xff] }
 0x6b1   :  { %5739 = vrot.lane.b32.xlu0 %v11193_v32, %s8419_s13  ;;  %v5077_v16 = vsel %vm5017_vm1, %v4951_v62, %v5076_v29  ;;  %v5638_v44 = vpop.permute.xlu2 %5637  ;;  %v11317_v62 = vld [vmem:[#allocation3 + $0x111] sm:$0xff] }
 0x6b2   :  { %v5724_v12 = vpop.permute.xlu1 %5723  ;;  %v5078_v49 = vsel %vm5019_vm2, %v4952_v15, %v5077_v16 }
 0x6b3   :  { %5767 = vst.msk [vmem:[#allocation5 + $0x28] sm:$0xff] %vm5761_vm11, %v5724_v12  ;;  %v5444_v34 = vpop.permute.xlu0 %5443  ;;  %v5079_v13 = vsel %vm5021_vm3, %v4953_v0, %v5078_v49 }
 0x6b4   :  { %5864 = vst.msk [vmem:[#allocation5 + $0x28] sm:$0xff] %vm5858_vm7, %v5821_v36  ;;  %v5080_v26 = vsel %vm5023_vm4, %v4954_v35, %v5079_v13 }
 0x6b5   :  { %5919 = vrot.lane.b32.xlu1 %v11240_v2, %s8421_s16  ;;  %5481 = vst.msk [vmem:[#allocation5 + $0x58] sm:$0xff] %vm12295_vm6, %v5444_v34  ;;  %vm12301_vm6 = vcmask 589312  }
 0x6b6   :  { %5542 = vrot.lane.b32.xlu2 %v11146_v24, %s8417_s17  ;;  %5155 = vst.msk [vmem:[#allocation3 + $0xb1] sm:$0xff] %vm153_vm12, %v5080_v26  ;;  %v3983_v24 = vmax.f32 %v3914_v50, 0.0 }
 0x6b9   :  { %5931 = vrot.lane.b32.xlu0 %v11286_v25, %s8421_s16  ;;  %v5831_v57 = vpop.permute.xlu2 %5830 }
 0x6ba   :  { %v3918_v42 = vpop.f32.mrf.mxu1  ;;  %v5819_v4 = vpop.permute.xlu1 %5818 }
 0x6bb   :  { %v3919_v7 = vadd.f32 %v11110_v59, %v3918_v42  ;;  %5863 = vst.msk [vmem:[#allocation5 + $0x20] sm:$0xff] %vm5858_vm7, %v5819_v4  ;;  %v5539_v2 = vpop.permute.xlu0 %5538 }
 0x6bc   :  { %5960 = vst.msk [vmem:[#allocation5 + $0x20] sm:$0xff] %vm12299_vm9, %v5916_v56  ;;  %vm12300_vm9 = vcmask 392512  }
 0x6bd   :  { %v3985_v14 = vmax.f32 %v3919_v7, 0.0  ;;  %5641 = vrot.lane.b32.xlu1 %v11286_v25, %s8418_s30  ;;  %5577 = vst.msk [vmem:[#allocation5 + $0x50] sm:$0xff] %vm5566_vm8, %v5539_v2  ;;  %v5397_v6 = vld [vmem:[#allocation3 + $0xb0] sm:$0xff] }
 0x6be   :  { %5921 = vrot.lane.b32.xlu2 %v5882_v55, %s8421_s16  ;;  %5188 = vst.msk [vmem:[#allocation5 + $0x48] sm:$0xff] %vm153_vm12, %v5397_v6  ;;  %v11299_v37 = vld [vmem:[#allocation3 + $0xb1] sm:$0xff] }
 0x6bf   :  { %v4017_v43 = vmax.f32 %v3983_v24, %v3985_v14  ;;  %v5300_v24 = vld [vmem:[#allocation3 + $0xa2] sm:$0xff] }
 0x6c0   :  { %v5203_v14 = vld [vmem:[#allocation3 + $0xa1] sm:$0xff] }
 0x6c1   :  { %v4141_v1 = vrot.slane %v4017_v43, 2  ;;  %v4142_v47 = vrot.slane %v4017_v43, 4  ;;  %v4143_v22 = vrot.slane %v4017_v43, 6  ;;  %v7688_v53 = vrot.slane %v4017_v43, 9  ;;  %5245 = vrot.lane.b32.xlu0 %v11299_v37, %s8411_s21  ;;  %v5930_v7 = vpop.permute.xlu2 %5929 }
 0x6c2   :  { %v3920_v48 = vpop.f32.mrf.mxu1  ;;  %v5541_v33 = vpop.permute.xlu1 %5540 }
 0x6c3   :  { %v7689_v19 = vrot.slane %v4141_v1, 9  ;;  %v7690_v54 = vrot.slane %v4142_v47, 9  ;;  %5578 = vst.msk [vmem:[#allocation5 + $0x58] sm:$0xff] %vm5566_vm8, %v5541_v33  ;;  %v5918_v31 = vpop.permute.xlu0 %5917  ;;  %v4747_v30 = vmax.f32 %v4017_v43, %v7688_v53  ;;  %v3921_v51 = vadd.f32 %v11110_v59, %v3920_v48  ;;  %v5976_v40 = vld [vmem:[#allocation5 + $0x20] sm:$0xff] }
 0x6c4   :  { %5675 = vst.msk [vmem:[#allocation5 + $0x58] sm:$0xff] %vm12300_vm9, %v5638_v44  ;;  %v7691_v23 = vrot.slane %v4143_v22, 9 }
 0x6c5   :  { %v4748_v27 = vmax.f32 %v4141_v1, %v7689_v19  ;;  %v4749_v36 = vmax.f32 %v4142_v47, %v7690_v54  ;;  %5834 = vrot.lane.b32.xlu1 %v11248_v61, %s8420_s14  ;;  %v3986_v11 = vmax.f32 %v3921_v51, 0.0  ;;  %5961 = vst.msk [vmem:[#allocation5 + $0x28] sm:$0xff] %vm12301_vm6, %v5918_v31  ;;  %v5003_v41 = vperm.slane %v4747_v30, 0  ;;  %v11362_v51 = vld [vmem:[%s12281_s4] ss:$0 sm:$0xff] }
 0x6c6   :  { %5737 = vrot.lane.b32.xlu2 %v10997_v45, %s8419_s13  ;;  %v4750_v59 = vmax.f32 %v4143_v22, %v7691_v23  ;;  %v5592_v23 = vld [vmem:[#allocation3 + $0xc2] sm:$0xff] }
 0x6c7   :  { %v5004_v28 = vperm.slane %v4748_v27, 0  ;;  %v4018_v52 = vmax.f32 %v3984_v9, %v3986_v11  ;;  %v5005_v38 = vperm.slane %v4749_v36, 0  ;;  %v5787_v36 = vld [vmem:[#allocation3 + $0xd1] sm:$0xff] }
 0x6c8   :  { %v5006_v29 = vperm.slane %v4750_v59, 0 }
 0x6c9   :  { %5437 = vrot.lane.b32.xlu0 %v5397_v6, %s8415_s15  ;;  %v5123_v3 = vsel %vm5011_vm14, %v5004_v28, %v5003_v41  ;;  %v4144_v20 = vrot.slane %v4018_v52, 2  ;;  %v4145_v18 = vrot.slane %v4018_v52, 4  ;;  %v4146_v63 = vrot.slane %v4018_v52, 6  ;;  %v5337_v22 = vpop.permute.xlu2 %5336 }
 0x6ca   :  { %v5636_v60 = vpop.permute.xlu1 %5635  ;;  %v7692_v8 = vrot.slane %v4018_v52, 9  ;;  %v5124_v15 = vsel %vm5013_vm15, %v5005_v38, %v5123_v3  ;;  %vm12302_vm15 = vmmov %vm12301_vm6  ;;  %v5690_v3 = vld [vmem:[#allocation3 + $0xd0] sm:$0xff] }
 0x6cb   :  { %5674 = vst.msk [vmem:[#allocation5 + $0x50] sm:$0xff] %vm12300_vm9, %v5636_v60  ;;  %v5734_v45 = vpop.permute.xlu0 %5733  ;;  %v7693_v10 = vrot.slane %v4144_v20, 9  ;;  %v7694_v39 = vrot.slane %v4145_v18, 9  ;;  %v7695_v58 = vrot.slane %v4146_v63, 9  ;;  %v5125_v56 = vsel %vm5015_vm0, %v5006_v29, %v5124_v15 }
 0x6cc   :  { %5772 = vst.msk [vmem:[#allocation5 + $0x50] sm:$0xff] %vm5761_vm11, %v5734_v45  ;;  %v4751_v0 = vmax.f32 %v4018_v52, %v7692_v8  ;;  %v5977_v16 = vld [vmem:[#allocation5 + $0x28] sm:$0xff] }
 0x6cd   :  { %5933 = vrot.lane.b32.xlu1 %v11315_v5, %s8421_s16  ;;  %5869 = vst.msk [vmem:[#allocation5 + $0x50] sm:$0xff] %vm5858_vm7, %v5831_v57  ;;  %v4752_v12 = vmax.f32 %v4144_v20, %v7693_v10  ;;  %v4753_v35 = vmax.f32 %v4145_v18, %v7694_v39  ;;  %v4754_v49 = vmax.f32 %v4146_v63, %v7695_v58  ;;  %v5786_v63 = vld [vmem:[#allocation3 + $0xc1] sm:$0xff]  ;;  %v5884_v39 = vld [vmem:[#allocation3 + $0xd2] sm:$0xff] }
 0x6ce   :  { %5836 = vrot.lane.b32.xlu2 %v11317_v62, %s8420_s14  ;;  %v5990_v34 = vpack.c.bf16 %v5977_v16, %v5976_v40  ;;  %v5007_v13 = vperm.slane %v4751_v0, 0  ;;  %v5890_v58 = vld [vmem:[#allocation3 + $0x132] sm:$0xff]  ;;  %v5171_v0 = vld [vmem:[#allocation3 + $0xa0] sm:$0xff] }
 0x6cf   :  { %v5008_v26 = vperm.slane %v4752_v12, 0  ;;  %v5009_v50 = vperm.slane %v4753_v35, 0  ;;  %v5010_v4 = vperm.slane %v4754_v49, 0  ;;  %5187 = vst.msk [vmem:[#allocation5 + $0x40] sm:$0xff] %vm153_vm12, %v5171_v0 }
 0x6d0   :  { %7714 = vmatmul.msk.bf16.gmra.mxu2 %vm6036_vm10, %v5990_v34  ;;  %v5126_v42 = vsel %vm5017_vm1, %v5007_v13, %v5125_v56  ;;  %vm12303_vm1 = vmmov %vm12301_vm6  ;;  %v5793_v34 = vld [vmem:[#allocation3 + $0x131] sm:$0xff] }
 0x6d1   :  { %5536 = vrot.lane.b32.xlu0 %v11036_v21, %s8417_s17  ;;  %v5127_v55 = vsel %vm5019_vm2, %v5008_v26, %v5126_v42  ;;  %v5301_v21 = vld [vmem:[#allocation3 + $0xb2] sm:$0xff] }
 0x6d2   :  { %v5736_v2 = vpop.permute.xlu1 %5735  ;;  %v5128_v6 = vsel %vm5021_vm3, %v5009_v50, %v5127_v55  ;;  %vm12304_vm3 = vcmask 261312   ;;  %v5696_v13 = vld [vmem:[#allocation3 + $0x130] sm:$0xff] }
 0x6d3   :  { %5773 = vst.msk [vmem:[#allocation5 + $0x58] sm:$0xff] %vm5761_vm11, %v5736_v2  ;;  %v5833_v44 = vpop.permute.xlu0 %5832  ;;  %v5129_v43 = vsel %vm5023_vm4, %v5010_v4, %v5128_v6  ;;  %vm12305_vm6 = vmmov %vm12304_vm3 }
 0x6d4   :  { %5870 = vst.msk [vmem:[#allocation5 + $0x58] sm:$0xff] %vm5858_vm7, %v5833_v44 }
 0x6d5   :  { %5162 = vst.msk [vmem:[#allocation3 + $0x121] sm:$0xff] %vm153_vm12, %v5129_v43  ;;  %5340 = vrot.lane.b32.xlu1 %v5300_v24, %s8413_s0  ;;  %vm12309_vm12 = vmmov %vm12300_vm9 }
 0x6d6   :  { %5243 = vrot.lane.b32.xlu2 %v5203_v14, %s8411_s21  ;;  %5967 = vst.msk [vmem:[#allocation5 + $0x58] sm:$0xff] %vm12302_vm15, %v5930_v7  ;;  %vm12306_vm15 = vmmov %vm12300_vm9 }
 0x6d9   :  { %5631 = vrot.lane.b32.xlu0 %v5301_v21, %s8418_s30 }
 0x6da   :  { %v5928_v1 = vpop.permute.xlu1 %5927 }
 0x6db   :  { %5966 = vst.msk [vmem:[#allocation5 + $0x50] sm:$0xff] %vm12303_vm1, %v5928_v1  ;;  %v5240_v47 = vpop.permute.xlu0 %5239  ;;  %vm12307_vm1 = vmmov %vm12304_vm3 }
 0x6dc   :  { %5282 = vst.msk [vmem:[#allocation5 + $0x30] sm:$0xff] %vm5275_vm13, %v5240_v47  ;;  %v5404_v38 = vld [vmem:[#allocation3 + $0x120] sm:$0xff] }
 0x6dd   :  { %5439 = vrot.lane.b32.xlu1 %v10359_v46, %s8415_s15  ;;  %5379 = vst.msk [vmem:[#allocation5 + $0x30] sm:$0xff] %vm5372_vm5, %v5337_v22  ;;  %v5983_v53 = vld [vmem:[#allocation5 + $0x58] sm:$0xff]  ;;  %v5501_v45 = vld [vmem:[#allocation3 + $0x121] sm:$0xff] }
 0x6de   :  { %5342 = vrot.lane.b32.xlu2 %v5301_v21, %s8413_s0 }
 0x6e1   :  { %5354 = vrot.lane.b32.xlu0 %v11315_v5, %s8413_s0 }
 0x6e2   :  { %v5242_v17 = vpop.permute.xlu1 %5241  ;;  %v5982_v48 = vld [vmem:[#allocation5 + $0x50] sm:$0xff] }
 0x6e3   :  { %5283 = vst.msk [vmem:[#allocation5 + $0x38] sm:$0xff] %vm5275_vm13, %v5242_v17  ;;  %v5993_v33 = vpack.c.bf16 %v5983_v53, %v5982_v48  ;;  %v5339_v19 = vpop.permute.xlu0 %5338 }
 0x6e4   :  { %5380 = vst.msk [vmem:[#allocation5 + $0x38] sm:$0xff] %vm5372_vm5, %v5339_v19 }
 0x6e5   :  { %5255 = vrot.lane.b32.xlu1 %v11248_v61, %s8411_s21  ;;  %7717 = vmatmul.msk.bf16.vlgmr.msra.gmra.mxu3 %vm6036_vm10, %v5993_v33 }
 0x6e6   :  { %5534 = vrot.lane.b32.xlu2 %v11299_v37, %s8417_s17 }
 0x6e8   :  { %v5436_v54 = vpop.permute.xlu2 %5435  ;;  %v6074_v31 = vpop.f32.mrf.mxu2 }
 0x6e9   :  { %5477 = vst.msk [vmem:[#allocation5 + $0x38] sm:$0xff] %vm12304_vm3, %v5436_v54  ;;  %5449 = vrot.lane.b32.xlu0 %v11193_v32, %s8415_s15  ;;  %v6075_v37 = vadd.f32 %v11362_v51, %v6074_v31  ;;  %vm12308_vm3 = vmmov %vm12307_vm1 }
 0x6ea   :  { %v5434_v30 = vpop.permute.xlu1 %5433 }
 0x6eb   :  { %5476 = vst.msk [vmem:[#allocation5 + $0x30] sm:$0xff] %vm12305_vm6, %v5434_v30  ;;  %v5531_v61 = vpop.permute.xlu0 %5530  ;;  %v6114_v11 = vmax.f32 %v6075_v37, 0.0  ;;  %vm12310_vm6 = vcmask 589312  }
 0x6ec   :  { %5573 = vst.msk [vmem:[#allocation5 + $0x30] sm:$0xff] %vm5566_vm8, %v5531_v61 }
 0x6ed   :  { %5633 = vrot.lane.b32.xlu1 %v5592_v23, %s8418_s30 }
 0x6ee   :  { %5257 = vrot.lane.b32.xlu2 %v11317_v62, %s8411_s21 }
 0x6f0   :  { %v5252_v32 = vpop.permute.xlu2 %5251  ;;  %v6076_v27 = vpop.f32.mrf.mxu2 }
 0x6f1   :  { %5288 = vst.msk [vmem:[#allocation5 + $0x60] sm:$0xff] %vm5275_vm13, %v5252_v32  ;;  %v6077_v9 = vadd.f32 %v11362_v51, %v6076_v27  ;;  %5828 = vrot.lane.b32.xlu0 %v5787_v36, %s8420_s14 }
 0x6f3   :  { %v6115_v28 = vmax.f32 %v6077_v9, 0.0  ;;  %v5254_v41 = vpop.permute.xlu0 %5253 }
 0x6f4   :  { %5289 = vst.msk [vmem:[#allocation5 + $0x68] sm:$0xff] %vm5275_vm13, %v5254_v41 }
 0x6f5   :  { %v11374_v57 = vmax.f32 %v6114_v11, %v6115_v28  ;;  %5729 = vrot.lane.b32.xlu1 %v10359_v46, %s8419_s13  ;;  %v5598_v46 = vld [vmem:[#allocation3 + $0x122] sm:$0xff] }
 0x6f6   :  { %5352 = vrot.lane.b32.xlu2 %v11286_v25, %s8413_s0 }
 0x6f8   :  { %v5630_v52 = vpop.permute.xlu2 %5629 }
 0x6f9   :  { %5923 = vrot.lane.b32.xlu0 %v5592_v23, %s8421_s16 }
 0x6fb   :  { %v5349_v59 = vpop.permute.xlu0 %5348 }
 0x6fc   :  { %5385 = vst.msk [vmem:[#allocation5 + $0x60] sm:$0xff] %vm5372_vm5, %v5349_v59 }
 0x6fd   :  { %5451 = vrot.lane.b32.xlu1 %v5404_v38, %s8415_s15 }
 0x6fe   :  { %5731 = vrot.lane.b32.xlu2 %v5690_v3, %s8419_s13 }
 0x6ff   :  { %v5533_v20 = vpop.permute.xlu1 %5532 }
 0x700   :  { %v5726_v18 = vpop.permute.xlu2 %5725  ;;  %5574 = vst.msk [vmem:[#allocation5 + $0x38] sm:$0xff] %vm5566_vm8, %v5533_v20 }
 0x701   :  { %5671 = vst.msk [vmem:[#allocation5 + $0x38] sm:$0xff] %vm12300_vm9, %v5630_v52  ;;  %5645 = vrot.lane.b32.xlu0 %v5598_v46, %s8418_s30  ;;  %vm12311_vm9 = vmmov %vm12310_vm6 }
 0x703   :  { %v5728_v25 = vpop.permute.xlu0 %5727 }
 0x704   :  { %5769 = vst.msk [vmem:[#allocation5 + $0x38] sm:$0xff] %vm5761_vm11, %v5728_v25 }
 0x705   :  { %5546 = vrot.lane.b32.xlu1 %v11317_v62, %s8417_s17 }
 0x706   :  { %5826 = vrot.lane.b32.xlu2 %v5786_v63, %s8420_s14 }
 0x707   :  { %v5628_v60 = vpop.permute.xlu1 %5627 }
 0x708   :  { %v5448_v8 = vpop.permute.xlu2 %5447  ;;  %5670 = vst.msk [vmem:[#allocation5 + $0x30] sm:$0xff] %vm12306_vm15, %v5628_v60  ;;  %vm12312_vm15 = vmmov %vm12309_vm12 }
 0x709   :  { %5768 = vst.msk [vmem:[#allocation5 + $0x30] sm:$0xff] %vm5761_vm11, %v5726_v18  ;;  %5838 = vrot.lane.b32.xlu0 %v5501_v45, %s8420_s14 }
 0x70b   :  { %v5823_v10 = vpop.permute.xlu0 %5822 }
 0x70c   :  { %5865 = vst.msk [vmem:[#allocation5 + $0x30] sm:$0xff] %vm5858_vm7, %v5823_v10 }
 0x70d   :  { %5925 = vrot.lane.b32.xlu1 %v5884_v39, %s8421_s16 }
 0x70e   :  { %5548 = vrot.lane.b32.xlu2 %v5501_v45, %s8417_s17 }
 0x70f   :  { %v5351_v62 = vpop.permute.xlu1 %5350 }
 0x710   :  { %v5543_v29 = vpop.permute.xlu2 %5542  ;;  %5386 = vst.msk [vmem:[#allocation5 + $0x68] sm:$0xff] %vm5372_vm5, %v5351_v62 }
 0x711   :  { %5483 = vst.msk [vmem:[#allocation5 + $0x68] sm:$0xff] %vm12307_vm1, %v5448_v8  ;;  %v6079_v15 = vpop.f32.mrf.mxu2  ;;  %5937 = vrot.lane.b32.xlu0 %v5890_v58, %s8421_s16  ;;  %vm12313_vm1 = vmmov %vm12310_vm6 }
 0x712   :  { %v6080_v35 = vadd.f32 %v11362_v51, %v6079_v15 }
 0x713   :  { %v5545_v40 = vpop.permute.xlu0 %5544 }
 0x714   :  { %5580 = vst.msk [vmem:[#allocation5 + $0x68] sm:$0xff] %vm5566_vm8, %v5545_v40  ;;  %v6116_v50 = vmax.f32 %v6080_v35, 0.0 }
 0x715   :  { %5741 = vrot.lane.b32.xlu1 %v5404_v38, %s8419_s13 }
 0x716   :  { %5643 = vrot.lane.b32.xlu2 %v11315_v5, %s8418_s30 }
 0x717   :  { %v5446_v16 = vpop.permute.xlu1 %5445 }
 0x718   :  { %v5922_v12 = vpop.permute.xlu2 %5921  ;;  %5482 = vst.msk [vmem:[#allocation5 + $0x60] sm:$0xff] %vm12308_vm3, %v5446_v16  ;;  %vm12314_vm3 = vmmov %vm12313_vm1 }
 0x719   :  { %5579 = vst.msk [vmem:[#allocation5 + $0x60] sm:$0xff] %vm5566_vm8, %v5543_v29  ;;  %v6081_v49 = vpop.f32.mrf.mxu2 }
 0x71a   :  { %v6082_v56 = vadd.f32 %v11362_v51, %v6081_v49 }
 0x71b   :  { %v5640_v26 = vpop.permute.xlu0 %5639 }
 0x71c   :  { %v6117_v42 = vmax.f32 %v6082_v56, 0.0  ;;  %5676 = vst.msk [vmem:[#allocation5 + $0x60] sm:$0xff] %vm12309_vm12, %v5640_v26  ;;  %vm12315_vm12 = vcmask 261312  }
 0x71d   :  { %5840 = vrot.lane.b32.xlu1 %v5793_v34, %s8420_s14 }
 0x71e   :  { %5743 = vrot.lane.b32.xlu2 %v5696_v13, %s8419_s13  ;;  %v11412_v5 = vmax.f32 %v6116_v50, %v6117_v42 }
 0x71f   :  { %v5825_v4 = vpop.permute.xlu1 %5824 }
 0x720   :  { %v5738_v55 = vpop.permute.xlu2 %5737  ;;  %5866 = vst.msk [vmem:[#allocation5 + $0x38] sm:$0xff] %vm5858_vm7, %v5825_v4  ;;  %v6149_v58 = vrot.slane %v11412_v5, 2  ;;  %v6150_v62 = vrot.slane %v11412_v5, 4  ;;  %v6151_v29 = vrot.slane %v11412_v5, 6  ;;  %v7724_v0 = vrot.slane %v11412_v5, 9 }
 0x721   :  { %5963 = vst.msk [vmem:[#allocation5 + $0x38] sm:$0xff] %vm12310_vm6, %v5922_v12  ;;  %vm12316_vm6 = vmmov %vm12312_vm15 }
 0x722   :  { %5774 = vst.msk [vmem:[#allocation5 + $0x60] sm:$0xff] %vm5761_vm11, %v5738_v55  ;;  %v7725_v13 = vrot.slane %v6149_v58, 9  ;;  %v7726_v56 = vrot.slane %v6150_v62, 9  ;;  %v7727_v26 = vrot.slane %v6151_v29, 9 }
 0x723   :  { %v5740_v7 = vpop.permute.xlu0 %5739 }
 0x726   :  { %5935 = vrot.lane.b32.xlu2 %v5598_v46, %s8421_s16 }
 0x727   :  { %v5920_v2 = vpop.permute.xlu1 %5919 }
 0x728   :  { %v5837_v24 = vpop.permute.xlu2 %5836  ;;  %5962 = vst.msk [vmem:[#allocation5 + $0x30] sm:$0xff] %vm12311_vm9, %v5920_v2  ;;  %v5979_v6 = vld [vmem:[#allocation5 + $0x38] sm:$0xff]  ;;  %vm12317_vm9 = vmmov %vm12315_vm12 }
 0x72b   :  { %v5932_v14 = vpop.permute.xlu0 %5931 }
 0x72f   :  { %v5642_v44 = vpop.permute.xlu1 %5641  ;;  %v5978_v21 = vld [vmem:[#allocation5 + $0x30] sm:$0xff] }
 0x730   :  { %v5244_v43 = vpop.permute.xlu2 %5243  ;;  %5677 = vst.msk [vmem:[#allocation5 + $0x68] sm:$0xff] %vm12312_vm15, %v5642_v44  ;;  %v5991_v1 = vpack.c.bf16 %v5979_v6, %v5978_v21  ;;  %vm12318_vm15 = vmmov %vm12317_vm9  ;;  %v6295_v44 = vmax.f32 %v6149_v58, %v7725_v13  ;;  %v6297_v21 = vmax.f32 %v6151_v29, %v7727_v26 }
 0x731   :  { %5775 = vst.msk [vmem:[#allocation5 + $0x68] sm:$0xff] %vm5761_vm11, %v5740_v7  ;;  %v6294_v7 = vmax.f32 %v11412_v5, %v7724_v0 }
 0x732   :  { %5872 = vst.msk [vmem:[#allocation5 + $0x68] sm:$0xff] %vm5858_vm7, %v5837_v24  ;;  %7715 = vmatmul.msk.bf16.gmra.mxu2 %vm6036_vm10, %v5991_v1 }
 0x733   :  { %5284 = vst.msk [vmem:[#allocation5 + $0x40] sm:$0xff] %vm5275_vm13, %v5244_v43  ;;  %v5246_v47 = vpop.permute.xlu0 %5245  ;;  %v6296_v43 = vmax.f32 %v6150_v62, %v7726_v56 }
 0x734   :  { %5285 = vst.msk [vmem:[#allocation5 + $0x48] sm:$0xff] %vm5275_vm13, %v5246_v47 }
 0x737   :  { %v5835_v22 = vpop.permute.xlu1 %5834 }
 0x738   :  { %v5343_v53 = vpop.permute.xlu2 %5342  ;;  %5871 = vst.msk [vmem:[#allocation5 + $0x60] sm:$0xff] %vm5858_vm7, %v5835_v22 }
 0x739   :  { %5968 = vst.msk [vmem:[#allocation5 + $0x60] sm:$0xff] %vm12313_vm1, %v5932_v14  ;;  %vm12319_vm1 = vmmov %vm12316_vm6 }
 0x73a   :  { %5382 = vst.msk [vmem:[#allocation5 + $0x48] sm:$0xff] %vm5372_vm5, %v5343_v53 }
 0x73b   :  { %v5438_v17 = vpop.permute.xlu0 %5437 }
 0x73f   :  { %v5934_v48 = vpop.permute.xlu1 %5933 }
 0x740   :  { %v5535_v33 = vpop.permute.xlu2 %5534  ;;  %5969 = vst.msk [vmem:[#allocation5 + $0x68] sm:$0xff] %vm12314_vm3, %v5934_v48  ;;  %v5984_v30 = vld [vmem:[#allocation5 + $0x60] sm:$0xff] }
 0x743   :  { %v5537_v19 = vpop.permute.xlu0 %5536 }
 0x747   :  { %v5341_v54 = vpop.permute.xlu1 %5340  ;;  %v5985_v61 = vld [vmem:[#allocation5 + $0x68] sm:$0xff] }
 0x748   :  { %v5258_v31 = vpop.permute.xlu2 %5257  ;;  %5381 = vst.msk [vmem:[#allocation5 + $0x40] sm:$0xff] %vm5372_vm5, %v5341_v54  ;;  %v5994_v23 = vpack.c.bf16 %v5985_v61, %v5984_v30 }
 0x749   :  { %5478 = vst.msk [vmem:[#allocation5 + $0x40] sm:$0xff] %vm12315_vm12, %v5438_v17  ;;  %vm12323_vm12 = vmmov %vm12319_vm1 }
 0x74a   :  { %5575 = vst.msk [vmem:[#allocation5 + $0x40] sm:$0xff] %vm5566_vm8, %v5535_v33  ;;  %7718 = vmatmul.msk.bf16.gmra.mxu3 %vm6036_vm10, %v5994_v23 }
 0x74b   :  { %5291 = vst.msk [vmem:[#allocation5 + $0x78] sm:$0xff] %vm5275_vm13, %v5258_v31  ;;  %v5632_v37 = vpop.permute.xlu0 %5631 }
 0x74c   :  { %5672 = vst.msk [vmem:[#allocation5 + $0x40] sm:$0xff] %vm12316_vm6, %v5632_v37 }
 0x74f   :  { %v5440_v32 = vpop.permute.xlu1 %5439 }
 0x750   :  { %v5353_v27 = vpop.permute.xlu2 %5352  ;;  %5479 = vst.msk [vmem:[#allocation5 + $0x48] sm:$0xff] %vm12317_vm9, %v5440_v32 }
 0x751   :  { %5576 = vst.msk [vmem:[#allocation5 + $0x48] sm:$0xff] %vm5566_vm8, %v5537_v19 }
 0x753   :  { %v5355_v36 = vpop.permute.xlu0 %5354 }
 0x754   :  { %5388 = vst.msk [vmem:[#allocation5 + $0x78] sm:$0xff] %vm5372_vm5, %v5355_v36 }
 0x757   :  { %v5256_v9 = vpop.permute.xlu1 %5255 }
 0x758   :  { %v5732_v11 = vpop.permute.xlu2 %5731  ;;  %5290 = vst.msk [vmem:[#allocation5 + $0x70] sm:$0xff] %vm5275_vm13, %v5256_v9  ;;  %vm12320_vm13 = vmmov %vm12314_vm3 }
 0x759   :  { %5387 = vst.msk [vmem:[#allocation5 + $0x70] sm:$0xff] %vm5372_vm5, %v5353_v27  ;;  %vm12321_vm5 = vmmov %vm12317_vm9 }
 0x75a   :  { %vm12322_vm3 = vmmov %vm12319_vm1 }
 0x75b   :  { %v5450_v28 = vpop.permute.xlu0 %5449 }
 0x75c   :  { %5484 = vst.msk [vmem:[#allocation5 + $0x70] sm:$0xff] %vm12318_vm15, %v5450_v28  ;;  %vm6430_vm15 = vcmask 1042304  }
 0x75f   :  { %v5634_v41 = vpop.permute.xlu1 %5633 }
 0x760   :  { %v5827_v52 = vpop.permute.xlu2 %5826  ;;  %5673 = vst.msk [vmem:[#allocation5 + $0x48] sm:$0xff] %vm12319_vm1, %v5634_v41  ;;  %vm12327_vm1 = vcmask 1041408  }
 0x761   :  { %5771 = vst.msk [vmem:[#allocation5 + $0x48] sm:$0xff] %vm5761_vm11, %v5732_v11 }
 0x763   :  { %v5829_v59 = vpop.permute.xlu0 %5828 }
 0x764   :  { %5868 = vst.msk [vmem:[#allocation5 + $0x48] sm:$0xff] %vm5858_vm7, %v5829_v59 }
 0x767   :  { %v5730_v38 = vpop.permute.xlu1 %5729 }
 0x768   :  { %v5549_v3 = vpop.permute.xlu2 %5548  ;;  %5770 = vst.msk [vmem:[#allocation5 + $0x40] sm:$0xff] %vm5761_vm11, %v5730_v38  ;;  %v6099_v20 = vpop.f32.mrf.mxu3 }
 0x769   :  { %5867 = vst.msk [vmem:[#allocation5 + $0x40] sm:$0xff] %vm5858_vm7, %v5827_v52  ;;  %v6100_v63 = vadd.f32 %v11362_v51, %v6099_v20 }
 0x76b   :  { %v5924_v18 = vpop.permute.xlu0 %5923  ;;  %v6124_v10 = vmax.f32 %v6100_v63, 0.0 }
 0x76c   :  { %5964 = vst.msk [vmem:[#allocation5 + $0x40] sm:$0xff] %vm12320_vm13, %v5924_v18 }
 0x76f   :  { %v5452_v46 = vpop.permute.xlu1 %5451 }
 0x770   :  { %v5644_v25 = vpop.permute.xlu2 %5643  ;;  %5485 = vst.msk [vmem:[#allocation5 + $0x78] sm:$0xff] %vm12321_vm5, %v5452_v46  ;;  %v6101_v60 = vpop.f32.mrf.mxu3  ;;  %vm7494_vm5 = vcmask 254976  }
 0x771   :  { %5582 = vst.msk [vmem:[#allocation5 + $0x78] sm:$0xff] %vm5566_vm8, %v5549_v3  ;;  %v6102_v8 = vadd.f32 %v11362_v51, %v6101_v60  ;;  %v6084_v60 = vpop.f32.mrf.mxu2 }
 0x773   :  { %v5646_v45 = vpop.permute.xlu0 %5645  ;;  %v6125_v39 = vmax.f32 %v6102_v8, 0.0  ;;  %v5980_v52 = vld [vmem:[#allocation5 + $0x40] sm:$0xff] }
 0x774   :  { %5679 = vst.msk [vmem:[#allocation5 + $0x78] sm:$0xff] %vm12322_vm3, %v5646_v45  ;;  %vm12329_vm3 = vmmov %vm12327_vm1 }
 0x775   :  { %v6135_v15 = vmax.f32 %v6124_v10, %v6125_v39  ;;  %v6085_v39 = vadd.f32 %v11362_v51, %v6084_v60 }
 0x777   :  { %v5547_v40 = vpop.permute.xlu1 %5546  ;;  %v6161_v16 = vrot.slane %v6135_v15, 2  ;;  %v7740_v12 = vrot.slane %v6135_v15, 9  ;;  %v6162_v35 = vrot.slane %v6135_v15, 4  ;;  %v6163_v49 = vrot.slane %v6135_v15, 6 }
 0x778   :  { %5581 = vst.msk [vmem:[#allocation5 + $0x70] sm:$0xff] %vm5566_vm8, %v5547_v40  ;;  %v5744_v34 = vpop.permute.xlu2 %5743  ;;  %vm12324_vm8 = vmmov %vm12320_vm13  ;;  %v6118_v62 = vmax.f32 %v6085_v39, 0.0 }
 0x779   :  { %5678 = vst.msk [vmem:[#allocation5 + $0x70] sm:$0xff] %vm12323_vm12, %v5644_v25  ;;  %v7741_v50 = vrot.slane %v6161_v16, 9  ;;  %v6310_v42 = vmax.f32 %v6135_v15, %v7740_v12  ;;  %v7742_v4 = vrot.slane %v6162_v35, 9  ;;  %v7743_v55 = vrot.slane %v6163_v49, 9  ;;  %vm12325_vm6 = vmmov %vm12324_vm8  ;;  %v6086_v8 = vpop.f32.mrf.mxu2 }
 0x77a   :  { %5777 = vst.msk [vmem:[#allocation5 + $0x78] sm:$0xff] %vm5761_vm11, %v5744_v34  ;;  %vm12326_vm9 = vmmov %vm12325_vm6  ;;  %v6087_v45 = vadd.f32 %v11362_v51, %v6086_v8 }
 0x77b   :  { %v6311_v2 = vmax.f32 %v6161_v16, %v7741_v50  ;;  %v6380_v24 = vrot.slane %v6310_v42, 7  ;;  %v6312_v14 = vmax.f32 %v6162_v35, %v7742_v4  ;;  %v6313_v6 = vmax.f32 %v6163_v49, %v7743_v55  ;;  %v5839_v28 = vpop.permute.xlu0 %5838  ;;  %vm12328_vm13 = vmmov %vm12327_vm1 }
 0x77c   :  { %v6119_v58 = vmax.f32 %v6087_v45, 0.0  ;;  %vm12330_vm12 = vmmov %vm12327_vm1 }
 0x77d   :  { %v6394_v1 = vrot.slane %v6311_v2, 7  ;;  %v6381_v47 = vsel %vm5011_vm14, %v6380_v24, %v6294_v7  ;;  %v6408_v22 = vrot.slane %v6312_v14, 7  ;;  %v6422_v53 = vrot.slane %v6313_v6, 7 }
 0x77e   :  { %v6382_v48 = vsel %vm5015_vm0, %v6380_v24, %v6381_v47  ;;  %v6132_v15 = vmax.f32 %v6118_v62, %v6119_v58  ;;  %v6146_v62 = vrot.slane %v11374_v57, 2 }
 0x77f   :  { %v5926_v17 = vpop.permute.xlu1 %5925  ;;  %v6395_v33 = vsel %vm5011_vm14, %v6394_v1, %v6295_v44  ;;  %v6383_v5 = vsel %vm5019_vm2, %v6380_v24, %v6382_v48  ;;  %v6409_v19 = vsel %vm5011_vm14, %v6408_v22, %v6296_v43  ;;  %v6423_v54 = vsel %vm5011_vm14, %v6422_v53, %v6297_v21 }
 0x780   :  { %5965 = vst.msk [vmem:[#allocation5 + $0x48] sm:$0xff] %vm12324_vm8, %v5926_v17  ;;  %v6396_v31 = vsel %vm5015_vm0, %v6394_v1, %v6395_v33  ;;  %v11469_v30 = vsel %vm5023_vm4, %v6380_v24, %v6383_v5  ;;  %v6410_v61 = vsel %vm5015_vm0, %v6408_v22, %v6409_v19  ;;  %v6424_v23 = vsel %vm5015_vm0, %v6422_v53, %v6423_v54  ;;  %v5936_v3 = vpop.permute.xlu2 %5935 }
 0x781   :  { %v6397_v37 = vsel %vm5019_vm2, %v6394_v1, %v6396_v31  ;;  %v6411_v32 = vsel %vm5019_vm2, %v6408_v22, %v6410_v61  ;;  %v6425_v27 = vsel %vm5019_vm2, %v6422_v53, %v6424_v23  ;;  %v6152_v35 = vrot.slane %v6132_v15, 2 }
 0x782   :  { %v11477_v36 = vsel %vm5023_vm4, %v6394_v1, %v6397_v37  ;;  %v11480_v9 = vsel %vm5023_vm4, %v6408_v22, %v6411_v32  ;;  %v11483_v11 = vsel %vm5023_vm4, %v6422_v53, %v6425_v27  ;;  %v6153_v49 = vrot.slane %v6132_v15, 4 }
 0x783   :  { %v5938_v20 = vpop.permute.xlu0 %5937  ;;  %v6154_v34 = vrot.slane %v6132_v15, 6  ;;  %v7728_v56 = vrot.slane %v6132_v15, 9  ;;  %v7729_v55 = vrot.slane %v6152_v35, 9 }
 0x784   :  { %v7730_v2 = vrot.slane %v6153_v49, 9 }
 0x785   :  { %v7731_v7 = vrot.slane %v6154_v34, 9  ;;  %v6298_v43 = vmax.f32 %v6132_v15, %v7728_v56  ;;  %v6299_v53 = vmax.f32 %v6152_v35, %v7729_v55  ;;  %v6148_v15 = vrot.slane %v11374_v57, 6 }
 0x786   :  { %v6300_v48 = vmax.f32 %v6153_v49, %v7730_v2  ;;  %v7721_v56 = vrot.slane %v6146_v62, 9 }
 0x787   :  { %v5742_v41 = vpop.permute.xlu1 %5741  ;;  %v5981_v59 = vld [vmem:[#allocation5 + $0x48] sm:$0xff]  ;;  %v6301_v17 = vmax.f32 %v6154_v34, %v7731_v7  ;;  %v7723_v34 = vrot.slane %v6148_v15, 9 }
 0x788   :  { %5776 = vst.msk [vmem:[#allocation5 + $0x70] sm:$0xff] %vm5761_vm11, %v5742_v41  ;;  %v5992_v38 = vpack.c.bf16 %v5981_v59, %v5980_v52  ;;  %vm6346_vm11 = vcmask 255104  }
 0x789   :  { %5873 = vst.msk [vmem:[#allocation5 + $0x70] sm:$0xff] %vm5858_vm7, %v5839_v28 }
 0x78a   :  { %5970 = vst.msk [vmem:[#allocation5 + $0x70] sm:$0xff] %vm12325_vm6, %v5936_v3  ;;  %7716 = vmatmul.msk.bf16.gmra.mxu2 %vm6036_vm10, %v5992_v38 }
 0x78f   :  { %v5841_v18 = vpop.permute.xlu1 %5840 }
 0x790   :  { %5874 = vst.msk [vmem:[#allocation5 + $0x78] sm:$0xff] %vm5858_vm7, %v5841_v18  ;;  %vm6332_vm7 = vcmask 123904  }
 0x791   :  { %5971 = vst.msk [vmem:[#allocation5 + $0x78] sm:$0xff] %vm12326_vm9, %v5938_v20  ;;  %v5986_v46 = vld [vmem:[#allocation5 + $0x70] sm:$0xff] }
 0x798   :  { %v5987_v25 = vld [vmem:[#allocation5 + $0x78] sm:$0xff] }
 0x799   :  { %v5995_v63 = vpack.c.bf16 %v5987_v25, %v5986_v46 }
 0x79b   :  { %7719 = vmatmul.msk.bf16.gmra.mxu3 %vm6036_vm10, %v5995_v63  ;;  %vm6416_vm10 = vcmask 911104  }
 0x7b5   :  { %v6089_v25 = vpop.f32.mrf.mxu2 }
 0x7bd   :  { %v6091_v63 = vpop.f32.mrf.mxu2 }
 0x7be   :  { %v6092_v2 = vadd.f32 %v11362_v51, %v6091_v63 }
 0x7cd   :  { %v6104_v10 = vpop.f32.mrf.mxu3 }
 0x7ce   :  { %v6105_v29 = vadd.f32 %v11362_v51, %v6104_v10 }
 0x7d0   :  { %v6126_v16 = vmax.f32 %v6105_v29, 0.0  ;;  %v6147_v29 = vrot.slane %v11374_v57, 4 }
 0x7d5   :  { %v6106_v0 = vpop.f32.mrf.mxu3 }
 0x7d6   :  { %v6107_v40 = vadd.f32 %v11362_v51, %v6106_v0 }
 0x7d8   :  { %v6127_v12 = vmax.f32 %v6107_v40, 0.0  ;;  %v7720_v40 = vrot.slane %v11374_v57, 9 }
 0x7da   :  { %v6136_v13 = vmax.f32 %v6126_v16, %v6127_v12  ;;  %v6290_v7 = vmax.f32 %v11374_v57, %v7720_v40 }
 0x7dc   :  { %v6164_v26 = vrot.slane %v6136_v13, 2  ;;  %v6166_v50 = vrot.slane %v6136_v13, 6  ;;  %v6165_v42 = vrot.slane %v6136_v13, 4  ;;  %v7744_v4 = vrot.slane %v6136_v13, 9 }
 0x7de   :  { %v7745_v24 = vrot.slane %v6164_v26, 9  ;;  %v7747_v14 = vrot.slane %v6166_v50, 9  ;;  %v7746_v6 = vrot.slane %v6165_v42, 9  ;;  %v6314_v44 = vmax.f32 %v6136_v13, %v7744_v4 }
 0x7df   :  { %v7722_v13 = vrot.slane %v6147_v29, 9 }
 0x7e0   :  { %v6315_v21 = vmax.f32 %v6164_v26, %v7745_v24  ;;  %v6317_v1 = vmax.f32 %v6166_v50, %v7747_v14  ;;  %v6316_v47 = vmax.f32 %v6165_v42, %v7746_v6  ;;  %v6436_v22 = vrot.slane %v6314_v44, 7 }
 0x7e2   :  { %v6447_v33 = vrot.slane %v6315_v21, 7  ;;  %v6473_v5 = vrot.slane %v6317_v1, 7  ;;  %v6460_v19 = vrot.slane %v6316_v47, 7  ;;  %v6437_v54 = vsel %vm5011_vm14, %v6436_v22, %v6298_v43 }
 0x7e3   :  { %v6438_v31 = vsel %vm5015_vm0, %v6436_v22, %v6437_v54  ;;  %v6090_v43 = vadd.f32 %v11362_v51, %v6089_v25  ;;  %v6293_v21 = vmax.f32 %v6148_v15, %v7723_v34  ;;  %v6292_v1 = vmax.f32 %v6147_v29, %v7722_v13 }
 0x7e4   :  { %v6448_v61 = vsel %vm5011_vm14, %v6447_v33, %v6299_v53  ;;  %v6474_v23 = vsel %vm5011_vm14, %v6473_v5, %v6301_v17  ;;  %v6461_v37 = vsel %vm5011_vm14, %v6460_v19, %v6300_v48  ;;  %v6439_v32 = vsel %vm5019_vm2, %v6436_v22, %v6438_v31 }
 0x7e5   :  { %v6449_v27 = vsel %vm5015_vm0, %v6447_v33, %v6448_v61  ;;  %v6475_v28 = vsel %vm5015_vm0, %v6473_v5, %v6474_v23  ;;  %v6462_v41 = vsel %vm5015_vm0, %v6460_v19, %v6461_v37  ;;  %v6440_v52 = vsel %vm5023_vm4, %v6436_v22, %v6439_v32 }
 0x7e6   :  { %v6450_v59 = vsel %vm5019_vm2, %v6447_v33, %v6449_v27  ;;  %v6476_v38 = vsel %vm5019_vm2, %v6473_v5, %v6475_v28  ;;  %v6463_v3 = vsel %vm5019_vm2, %v6460_v19, %v6462_v41  ;;  %6442 = vst.msk [vmem:[#allocation6 + $0x2] sm:$0x3] %vm6332_vm7, %v6440_v52  ;;  %v6291_v47 = vmax.f32 %v6146_v62, %v7721_v56 }
 0x7e7   :  { %v6451_v20 = vsel %vm5023_vm4, %v6447_v33, %v6450_v59  ;;  %v11512_v18 = vsel %vm5023_vm4, %v6473_v5, %v6476_v38  ;;  %v11515_v46 = vsel %vm5023_vm4, %v6460_v19, %v6463_v3  ;;  %v6121_v33 = vmax.f32 %v6092_v2, 0.0 }
 0x7e8   :  { %6452 = vrot.lane.b32.xlu2 %v6451_v20, %s8413_s0  ;;  %v6120_v28 = vmax.f32 %v6090_v43, 0.0 }
 0x80d   :  { %v6094_v60 = vpop.f32.mrf.mxu2 }
 0x80e   :  { %v6095_v8 = vadd.f32 %v11362_v51, %v6094_v60  ;;  %v6133_v60 = vmax.f32 %v6120_v28, %v6121_v33  ;;  %v8217_v28 = vld [vmem:[%s12282_s5 + $0x54] sm:$0xf0] }
 0x810   :  { %v6122_v39 = vmax.f32 %v6095_v8, 0.0  ;;  %v6155_v62 = vrot.slane %v6133_v60, 2  ;;  %v6156_v29 = vrot.slane %v6133_v60, 4  ;;  %v7732_v15 = vrot.slane %v6133_v60, 9 }
 0x812   :  { %v6302_v13 = vmax.f32 %v6133_v60, %v7732_v15  ;;  %v7734_v56 = vrot.slane %v6156_v29, 9  ;;  %v7770_v15 = vld [vmem:[%s12282_s5 + $0x20] sm:$0xf] }
 0x815   :  { %v6096_v45 = vpop.f32.mrf.mxu2 }
 0x816   :  { %v6097_v10 = vadd.f32 %v11362_v51, %v6096_v45 }
 0x818   :  { %v6123_v58 = vmax.f32 %v6097_v10, 0.0  ;;  %v7810_v10 = vld [vmem:[%s12282_s5 + $0x70] sm:$0xf] }
 0x81a   :  { %v6134_v0 = vmax.f32 %v6122_v39, %v6123_v58 }
 0x81c   :  { %v6160_v16 = vrot.slane %v6134_v0, 6  ;;  %v6159_v12 = vrot.slane %v6134_v0, 4  ;;  %v6158_v35 = vrot.slane %v6134_v0, 2  ;;  %v7736_v49 = vrot.slane %v6134_v0, 9 }
 0x81e   :  { %v6109_v26 = vpop.f32.mrf.mxu3  ;;  %v7739_v50 = vrot.slane %v6160_v16, 9  ;;  %v7738_v42 = vrot.slane %v6159_v12, 9  ;;  %v7737_v4 = vrot.slane %v6158_v35, 9  ;;  %v6306_v55 = vmax.f32 %v6134_v0, %v7736_v49 }
 0x81f   :  { %v6110_v5 = vadd.f32 %v11362_v51, %v6109_v26  ;;  %v7733_v26 = vrot.slane %v6155_v62, 9 }
 0x820   :  { %v6309_v24 = vmax.f32 %v6160_v16, %v7739_v50  ;;  %v6308_v14 = vmax.f32 %v6159_v12, %v7738_v42  ;;  %v6307_v6 = vmax.f32 %v6158_v35, %v7737_v4  ;;  %v6326_v44 = vrot.slane %v6306_v55, 7 }
 0x821   :  { %v6128_v8 = vmax.f32 %v6110_v5, 0.0  ;;  %v6303_v43 = vmax.f32 %v6155_v62, %v7733_v26  ;;  %v7850_v62 = vld [vmem:[%s12282_s5 + $0xc0] sm:$0xf] }
 0x822   :  { %v6366_v22 = vrot.slane %v6309_v24, 7  ;;  %v6352_v53 = vrot.slane %v6308_v14, 7  ;;  %v6338_v17 = vrot.slane %v6307_v6, 7  ;;  %v6327_v48 = vsel %vm5011_vm14, %v6326_v44, %v6290_v7 }
 0x823   :  { %v6328_v57 = vsel %vm5015_vm0, %v6326_v44, %v6327_v48  ;;  %v6157_v7 = vrot.slane %v6133_v60, 6  ;;  %v7866_v60 = vld [vmem:[%s12282_s5 + $0xe0] sm:$0xf] }
 0x824   :  { %v6367_v19 = vsel %vm5011_vm14, %v6366_v22, %v6293_v21  ;;  %v6353_v54 = vsel %vm5011_vm14, %v6352_v53, %v6292_v1  ;;  %v6339_v31 = vsel %vm5011_vm14, %v6338_v17, %v6291_v47  ;;  %v6329_v61 = vsel %vm5019_vm2, %v6326_v44, %v6328_v57 }
 0x825   :  { %v6368_v23 = vsel %vm5015_vm0, %v6366_v22, %v6367_v19  ;;  %v6354_v37 = vsel %vm5015_vm0, %v6352_v53, %v6353_v54  ;;  %v6340_v32 = vsel %vm5015_vm0, %v6338_v17, %v6339_v31  ;;  %v6330_v27 = vsel %vm5023_vm4, %v6326_v44, %v6329_v61 }
 0x826   :  { %v6111_v41 = vpop.f32.mrf.mxu3  ;;  %v6369_v52 = vsel %vm5019_vm2, %v6366_v22, %v6368_v23  ;;  %v6355_v59 = vsel %vm5019_vm2, %v6352_v53, %v6354_v37  ;;  %v6341_v38 = vsel %vm5019_vm2, %v6338_v17, %v6340_v32  ;;  %6333 = vst.msk [vmem:[#allocation6] sm:$0x3] %vm6332_vm7, %v6330_v27  ;;  %v6304_v44 = vmax.f32 %v6156_v29, %v7734_v56  ;;  %v8219_v37 = vld [vmem:[%s12282_s5 + $0x64] sm:$0xf0]  ;;  %v7794_v32 = vld [vmem:[%s12282_s5 + $0x50] sm:$0xf] }
 0x827   :  { %v6112_v3 = vadd.f32 %v11362_v51, %v6111_v41  ;;  %v6370_v20 = vsel %vm5023_vm4, %v6366_v22, %v6369_v52  ;;  %v6356_v25 = vsel %vm5023_vm4, %v6352_v53, %v6355_v59  ;;  %v6342_v63 = vsel %vm5023_vm4, %v6338_v17, %v6341_v38  ;;  %v8221_v51 = vld [vmem:[%s12282_s5 + $0x74] sm:$0xf0]  ;;  %v8215_v52 = vld [vmem:[%s12282_s5 + $0x44] sm:$0xf0]  ;;  %v7874_v59 = vld [vmem:[%s12282_s5 + $0xf0] sm:$0xf] }
 0x828   :  { %6371 = vrot.lane.b32.xlu2 %v6370_v20, %s8419_s13  ;;  %6357 = vrot.lane.b32.xlu0 %v6356_v25, %s8417_s17  ;;  %v7811_v39 = vor.u32 %v8221_v51, %v7810_v10  ;;  %v7735_v22 = vrot.slane %v6157_v7, 9  ;;  %v7795_v41 = vor.u32 %v8217_v28, %v7794_v32  ;;  %v7778_v25 = vld [vmem:[%s12282_s5 + $0x30] sm:$0xf]  ;;  %v8233_v51 = vld [vmem:[%s12282_s5 + $0xd4] sm:$0xf0] }
 0x829   :  { %v6129_v45 = vmax.f32 %v6112_v3, 0.0  ;;  %6343 = vrot.lane.b32.xlu1 %v6342_v63, %s8413_s0  ;;  %s8422_s0 = smov 80   ;;  %v8237_v3 = vld [vmem:[%s12282_s5 + $0xf4] sm:$0xf0]  ;;  %v7858_v10 = vld [vmem:[%s12282_s5 + $0xd0] sm:$0xf] }
 0x82a   :  { %6741 = vmatpush.bf16.msrb.mxu2 %v7811_v39  ;;  %v6305_v33 = vmax.f32 %v6157_v7, %v7735_v22  ;;  %v7875_v20 = vor.u32 %v8237_v3, %v7874_v59  ;;  %v8213_v63 = vld [vmem:[%s12282_s5 + $0x34] sm:$0xf0]  ;;  %v8231_v29 = vld [vmem:[%s12282_s5 + $0xc4] sm:$0xf0]  ;;  %v7762_v56 = vld [vmem:[%s12282_s5 + $0x10] sm:$0xf] }
 0x82b   :  { %v6137_v58 = vmax.f32 %v6128_v8, %v6129_v45  ;;  %v7779_v8 = vor.u32 %v8213_v63, %v7778_v25  ;;  %v8235_v45 = vld [vmem:[%s12282_s5 + $0xe4] sm:$0xf0]  ;;  %v8232_v28 = vld [vmem:[%s12282_s5 + $0xd4] sm:$0xf]  ;;  %v8214_v59 = vld [vmem:[%s12282_s5 + $0x44] sm:$0xf] }
 0x82c   :  { %6754 = vmatpush.bf16.msrb.mxu3 %v7875_v20  ;;  %v7867_v39 = vor.u32 %v8235_v45, %v7866_v60  ;;  %v8230_v3 = vld [vmem:[%s12282_s5 + $0xc4] sm:$0xf]  ;;  %v7852_v20 = vld [vmem:[%s12282_s5 + $0xc8] sm:$0xf0]  ;;  %v7780_v45 = vld [vmem:[%s12282_s5 + $0x38] sm:$0xf0] }
 0x82d   :  { %v7748_v0 = vrot.slane %v6137_v58, 9  ;;  %v6168_v40 = vrot.slane %v6137_v58, 4  ;;  %v6167_v16 = vrot.slane %v6137_v58, 2  ;;  %v6169_v12 = vrot.slane %v6137_v58, 6 }
 0x82e   :  { %v7855_v60 = vor.u32 %v8230_v3, %v7852_v20  ;;  %v8263_v3 = vld [vmem:[%s12284_s7 + $0xc4] sm:$0xf0] }
 0x82f   :  { %v6318_v35 = vmax.f32 %v6137_v58, %v7748_v0  ;;  %v7750_v49 = vrot.slane %v6168_v40, 9  ;;  %v7749_v34 = vrot.slane %v6167_v16, 9  ;;  %v7751_v55 = vrot.slane %v6169_v12, 9 }
 0x830   :  { %6478 = vrot.lane.b32.xlu0 %v11512_v18, %s8419_s13  ;;  %s8424_s13 = smov 112   ;;  %6755 = vmatpush.bf16.msrb.mxu3 %v7867_v39  ;;  %v7859_v58 = vor.u32 %v8233_v51, %v7858_v10  ;;  %v7851_v0 = vor.u32 %v8231_v29, %v7850_v62  ;;  %v8228_v51 = vld [vmem:[%s12282_s5 + $0xb4] sm:$0xf]  ;;  %v7844_v39 = vld [vmem:[%s12282_s5 + $0xb8] sm:$0xf0] }
 0x831   :  { %6465 = vrot.lane.b32.xlu1 %v11515_v46, %s8417_s17  ;;  %v6486_v50 = vrot.slane %v6318_v35, 7  ;;  %v6320_v42 = vmax.f32 %v6168_v40, %v7750_v49  ;;  %v6319_v4 = vmax.f32 %v6167_v16, %v7749_v34  ;;  %v6321_v21 = vmax.f32 %v6169_v12, %v7751_v55  ;;  %s8423_s17 = smov 96   ;;  %v8211_v40 = vld [vmem:[%s12282_s5 + $0x24] sm:$0xf0]  ;;  %v7842_v16 = vld [vmem:[%s12282_s5 + $0xb0] sm:$0xf] }
 0x832   :  { %v8229_v12 = vld [vmem:[%s12282_s5 + $0xb4] sm:$0xf0]  ;;  %v7771_v35 = vor.u32 %v8211_v40, %v7770_v15  ;;  %v7834_v34 = vld [vmem:[%s12282_s5 + $0xa0] sm:$0xf]  ;;  %v7847_v29 = vor.u32 %v8228_v51, %v7844_v39  ;;  %v8210_v15 = vld [vmem:[%s12282_s5 + $0x24] sm:$0xf] }
 0x833   :  { %v6487_v2 = vsel %vm5011_vm14, %v6486_v50, %v6302_v13  ;;  %v6512_v24 = vrot.slane %v6320_v42, 7  ;;  %v6499_v14 = vrot.slane %v6319_v4, 7  ;;  %v6525_v17 = vrot.slane %v6321_v21, 7  ;;  %v8227_v13 = vld [vmem:[%s12282_s5 + $0xa4] sm:$0xf0] }
 0x834   :  { %v6488_v6 = vsel %vm5015_vm0, %v6486_v50, %v6487_v2  ;;  %6756 = vmatpush.bf16.msrb.mxu3 %v7859_v58  ;;  %v7843_v49 = vor.u32 %v8229_v12, %v7842_v16  ;;  %v7835_v26 = vor.u32 %v8227_v13, %v7834_v34  ;;  %v7826_v42 = vld [vmem:[%s12282_s5 + $0x90] sm:$0xf]  ;;  %v8225_v4 = vld [vmem:[%s12282_s5 + $0x94] sm:$0xf0]  ;;  %v8207_v21 = vld [vmem:[%s12282_s5 + $0x4] sm:$0xf0] }
 0x835   :  { %v6489_v18 = vsel %vm5019_vm2, %v6486_v50, %v6488_v6  ;;  %v6513_v46 = vsel %vm5011_vm14, %v6512_v24, %v6304_v44  ;;  %v6500_v47 = vsel %vm5011_vm14, %v6499_v14, %v6303_v43  ;;  %v6526_v19 = vsel %vm5011_vm14, %v6525_v17, %v6305_v33  ;;  %v7754_v43 = vld [vmem:[%s12282_s5] sm:$0xf]  ;;  %v8236_v33 = vld [vmem:[%s12282_s5 + $0xf4] sm:$0xf]  ;;  %v8226_v40 = vld [vmem:[%s12282_s5 + $0xa4] sm:$0xf] }
 0x836   :  { %v6490_v1 = vsel %vm5023_vm4, %v6486_v50, %v6489_v18  ;;  %v6514_v53 = vsel %vm5015_vm0, %v6512_v24, %v6513_v46  ;;  %v6501_v48 = vsel %vm5015_vm0, %v6499_v14, %v6500_v47  ;;  %v6527_v54 = vsel %vm5015_vm0, %v6525_v17, %v6526_v19  ;;  %v8209_v50 = vld [vmem:[%s12282_s5 + $0x14] sm:$0xf0]  ;;  %v7818_v46 = vld [vmem:[%s12282_s5 + $0x80] sm:$0xf]  ;;  %v8223_v47 = vld [vmem:[%s12282_s5 + $0x84] sm:$0xf0] }
 0x837   :  { %6491 = vrot.lane.b32.xlu2 %v6490_v1, %s8421_s16  ;;  %v6515_v5 = vsel %vm5019_vm2, %v6512_v24, %v6514_v53  ;;  %v6502_v57 = vsel %vm5019_vm2, %v6499_v14, %v6501_v48  ;;  %v6528_v61 = vsel %vm5019_vm2, %v6525_v17, %v6527_v54  ;;  %v7763_v55 = vor.u32 %v8209_v50, %v7762_v56  ;;  %v8220_v53 = vld [vmem:[%s12282_s5 + $0x74] sm:$0xf]  ;;  %v7868_v54 = vld [vmem:[%s12282_s5 + $0xe8] sm:$0xf0]  ;;  %v7764_v34 = vld [vmem:[%s12282_s5 + $0x18] sm:$0xf0] }
 0x838   :  { %6399 = vrot.lane.b32.xlu0 %v11477_v36, %s8422_s0  ;;  %v6516_v36 = vsel %vm5023_vm4, %v6512_v24, %v6515_v5  ;;  %v6529_v23 = vsel %vm5023_vm4, %v6525_v17, %v6528_v61  ;;  %6757 = vmatpush.bf16.msrb.mxu3 %v7851_v0  ;;  %v7827_v2 = vor.u32 %v8225_v4, %v7826_v42  ;;  %vm6360_vm14 = vcmask 386304   ;;  %v7812_v17 = vld [vmem:[%s12282_s5 + $0x78] sm:$0xf0]  ;;  %v7772_v0 = vld [vmem:[%s12282_s5 + $0x28] sm:$0xf0] }
 0x839   :  { %6385 = vrot.lane.b32.xlu1 %v11469_v30, %s8421_s16  ;;  %v6503_v30 = vsel %vm5023_vm4, %v6499_v14, %v6502_v57  ;;  %vm6374_vm0 = vcmask 517504   ;;  %vm6388_vm2 = vcmask 648704   ;;  %v7755_v1 = vor.u32 %v8207_v21, %v7754_v43  ;;  %v7876_v5 = vld [vmem:[%s12282_s5 + $0xf8] sm:$0xf0]  ;;  %v8218_v57 = vld [vmem:[%s12282_s5 + $0x64] sm:$0xf] }
 0x83a   :  { %v7819_v22 = vor.u32 %v8223_v47, %v7818_v46  ;;  %v7815_v48 = vor.u32 %v8220_v53, %v7812_v17  ;;  %v7879_v19 = vor.u32 %v8236_v33, %v7876_v5  ;;  %vm6402_vm4 = vcmask 779904   ;;  %v7836_v16 = vld [vmem:[%s12282_s5 + $0xa8] sm:$0xf0]  ;;  %v8224_v56 = vld [vmem:[%s12282_s5 + $0x94] sm:$0xf] }
 0x83b   :  { %v7775_v12 = vor.u32 %v8210_v15, %v7772_v0  ;;  %v8206_v42 = vld [vmem:[%s12282_s5 + $0x4] sm:$0xf]  ;;  %v8180_v43 = vld [vmem:[%s12286_s9 + $0x15c] sm:$0xf0]  ;;  %v7938_v47 = vld [vmem:[%s12284_s7 + $0x70] sm:$0xf] }
 0x83c   :  { %6758 = vmatpush.bf16.msrb.mxu3 %v7843_v49  ;;  %v8208_v49 = vld [vmem:[%s12282_s5 + $0x14] sm:$0xf]  ;;  %v8002_v53 = vld [vmem:[%s12284_s7 + $0xf0] sm:$0xf]  ;;  %v8269_v17 = vld [vmem:[%s12284_s7 + $0xf4] sm:$0xf0] }
 0x83d   :  { %v7767_v50 = vor.u32 %v8208_v49, %v7764_v34  ;;  %v7898_v51 = vld [vmem:[%s12284_s7 + $0x20] sm:$0xf]  ;;  %v8239_v49 = vld [vmem:[%s12284_s7 + $0x4] sm:$0xf0]  ;;  %v8252_v34 = vld [vmem:[%s12284_s7 + $0x74] sm:$0xf] }
 0x83f   :  { %6413 = vrot.lane.b32.xlu2 %v11480_v9, %s8423_s17  ;;  %v7802_v9 = vld [vmem:[%s12282_s5 + $0x60] sm:$0xf] }
 0x840   :  { %6517 = vrot.lane.b32.xlu0 %v6516_v36, %s8423_s17  ;;  %v7803_v27 = vor.u32 %v8219_v37, %v7802_v9  ;;  %6759 = vmatpush.bf16.msrb.mxu3 %v7835_v26  ;;  %v7804_v36 = vld [vmem:[%s12282_s5 + $0x68] sm:$0xf0]  ;;  %v8216_v9 = vld [vmem:[%s12282_s5 + $0x54] sm:$0xf]  ;;  %v7796_v37 = vld [vmem:[%s12282_s5 + $0x58] sm:$0xf0] }
 0x841   :  { %6504 = vrot.lane.b32.xlu1 %v6503_v30, %s8422_s0  ;;  %v8234_v30 = vld [vmem:[%s12282_s5 + $0xe4] sm:$0xf]  ;;  %v7828_v26 = vld [vmem:[%s12282_s5 + $0x98] sm:$0xf0] }
 0x842   :  { %v6453_v31 = vpop.permute.xlu2 %6452  ;;  %6742 = vmatpush.bf16.msrb.mxu2 %v7803_v27  ;;  %v7831_v4 = vor.u32 %v8224_v56, %v7828_v26 }
 0x843   :  { %6455 = vst.msk [vmem:[#allocation6 + $0x2] sm:$0x3] %vm6346_vm11, %v6453_v31  ;;  %v7807_v31 = vor.u32 %v8218_v57, %v7804_v36 }
 0x844   :  { %6760 = vmatpush.bf16.msrb.mxu3 %v7827_v2  ;;  %v8192_v2 = vld [vmem:[%s12286_s9 + $0x174] sm:$0xf0] }
 0x846   :  { %6743 = vmatpush.bf16.msrb.mxu2 %v7795_v41  ;;  %v7860_v41 = vld [vmem:[%s12282_s5 + $0xd8] sm:$0xf0] }
 0x847   :  { %6530 = vrot.lane.b32.xlu2 %v6529_v23, %s8424_s13  ;;  %v7871_v23 = vor.u32 %v8234_v30, %v7868_v54  ;;  %v8251_v54 = vld [vmem:[%s12284_s7 + $0x64] sm:$0xf0] }
 0x848   :  { %6761 = vmatpush.bf16.msrb.mxu3 %v7819_v22  ;;  %v8253_v22 = vld [vmem:[%s12284_s7 + $0x74] sm:$0xf0] }
 0x849   :  { %6427 = vrot.lane.b32.xlu1 %v11483_v11, %s8424_s13  ;;  %v7786_v11 = vld [vmem:[%s12282_s5 + $0x40] sm:$0xf]  ;;  %v7939_v57 = vor.u32 %v8253_v22, %v7938_v47  ;;  %v8255_v22 = vld [vmem:[%s12284_s7 + $0x84] sm:$0xf0] }
 0x84a   :  { %v7787_v38 = vor.u32 %v8215_v52, %v7786_v11  ;;  %v7799_v11 = vor.u32 %v8216_v9, %v7796_v37  ;;  %v7863_v52 = vor.u32 %v8232_v28, %v7860_v41  ;;  %v7922_v9 = vld [vmem:[%s12284_s7 + $0x50] sm:$0xf]  ;;  %v8265_v28 = vld [vmem:[%s12284_s7 + $0xd4] sm:$0xf0] }
 0x84c   :  { %6744 = vmatpush.bf16.msrb.mxu2 %v7787_v38  ;;  %6780 = vmatpush.bf16.msra.mxu3 %v7879_v19  ;;  %v7788_v38 = vld [vmem:[%s12282_s5 + $0x48] sm:$0xf0]  ;;  %v8003_v19 = vor.u32 %v8269_v17, %v8002_v53  ;;  %v8244_v53 = vld [vmem:[%s12284_s7 + $0x34] sm:$0xf] }
 0x84d   :  { %v7791_v25 = vor.u32 %v8214_v59, %v7788_v38  ;;  %v8247_v59 = vld [vmem:[%s12284_s7 + $0x44] sm:$0xf0]  ;;  %v7978_v38 = vld [vmem:[%s12284_s7 + $0xc0] sm:$0xf] }
 0x850   :  { %6745 = vmatpush.bf16.msrb.mxu2 %v7779_v8  ;;  %6781 = vmatpush.bf16.msra.mxu3 %v7871_v23  ;;  %v8212_v8 = vld [vmem:[%s12282_s5 + $0x34] sm:$0xf] }
 0x851   :  { %v7783_v62 = vor.u32 %v8212_v8, %v7780_v45  ;;  %v7970_v8 = vld [vmem:[%s12284_s7 + $0xb0] sm:$0xf]  ;;  %v8261_v45 = vld [vmem:[%s12284_s7 + $0xb4] sm:$0xf0] }
 0x852   :  { %v7971_v39 = vor.u32 %v8261_v45, %v7970_v8  ;;  %v8306_v8 = vld [vmem:[%s12286_s9 + $0x124] sm:$0xf]  ;;  %v8156_v45 = vld [vmem:[%s12286_s9 + $0x12c] sm:$0xf0] }
 0x854   :  { %6746 = vmatpush.bf16.msrb.mxu2 %v7771_v35  ;;  %6782 = vmatpush.bf16.msra.mxu3 %v7863_v52  ;;  %v7839_v35 = vor.u32 %v8226_v40, %v7836_v16  ;;  %v7890_v40 = vld [vmem:[%s12284_s7 + $0x10] sm:$0xf]  ;;  %v8241_v16 = vld [vmem:[%s12284_s7 + $0x14] sm:$0xf0] }
 0x858   :  { %6747 = vmatpush.bf16.msrb.mxu2 %v7763_v55  ;;  %6783 = vmatpush.bf16.msra.mxu3 %v7855_v60  ;;  %v7756_v55 = vld [vmem:[%s12282_s5 + $0x8] sm:$0xf0]  ;;  %v8245_v60 = vld [vmem:[%s12284_s7 + $0x34] sm:$0xf0] }
 0x85c   :  { %6748 = vmatpush.bf16.msrb.mxu2 %v7755_v1  ;;  %6784 = vmatpush.bf16.msra.mxu3 %v7847_v29  ;;  %v8259_v29 = vld [vmem:[%s12284_s7 + $0xa4] sm:$0xf0] }
 0x860   :  { %6767 = vmatpush.bf16.msra.mxu2 %v7815_v48  ;;  %6785 = vmatpush.bf16.msra.mxu3 %v7839_v35  ;;  %v7930_v48 = vld [vmem:[%s12284_s7 + $0x60] sm:$0xf] }
 0x861   :  { %v7931_v23 = vor.u32 %v8251_v54, %v7930_v48  ;;  %v7882_v35 = vld [vmem:[%s12284_s7] sm:$0xf]  ;;  %v7908_v48 = vld [vmem:[%s12284_s7 + $0x38] sm:$0xf0]  ;;  %v8242_v54 = vld [vmem:[%s12284_s7 + $0x24] sm:$0xf] }
 0x862   :  { %v7883_v56 = vor.u32 %v8239_v49, %v7882_v35 }
 0x864   :  { %6768 = vmatpush.bf16.msra.mxu2 %v7807_v31  ;;  %6786 = vmatpush.bf16.msra.mxu3 %v7831_v4  ;;  %v7994_v31 = vld [vmem:[%s12284_s7 + $0xe0] sm:$0xf] }
 0x868   :  { %6769 = vmatpush.bf16.msra.mxu2 %v7799_v11  ;;  %v7914_v11 = vld [vmem:[%s12284_s7 + $0x40] sm:$0xf] }
 0x869   :  { %v7915_v20 = vor.u32 %v8247_v59, %v7914_v11  ;;  %v7884_v11 = vld [vmem:[%s12284_s7 + $0x8] sm:$0xf0]  ;;  %v8262_v59 = vld [vmem:[%s12284_s7 + $0xc4] sm:$0xf] }
 0x86c   :  { %6770 = vmatpush.bf16.msra.mxu2 %v7791_v25  ;;  %v7906_v25 = vld [vmem:[%s12284_s7 + $0x30] sm:$0xf] }
 0x870   :  { %6771 = vmatpush.bf16.msra.mxu2 %v7783_v62  ;;  %v7962_v62 = vld [vmem:[%s12284_s7 + $0xa0] sm:$0xf] }
 0x871   :  { %v7963_v0 = vor.u32 %v8259_v29, %v7962_v62  ;;  %v7964_v62 = vld [vmem:[%s12284_s7 + $0xa8] sm:$0xf0] }
 0x874   :  { %6772 = vmatpush.bf16.msra.mxu2 %v7775_v12  ;;  %v7891_v12 = vor.u32 %v8241_v16, %v7890_v40  ;;  %v8256_v16 = vld [vmem:[%s12284_s7 + $0x94] sm:$0xf] }
 0x878   :  { %6773 = vmatpush.bf16.msra.mxu2 %v7767_v50  ;;  %v8250_v50 = vld [vmem:[%s12284_s7 + $0x64] sm:$0xf] }
 0x882   :  { %v6372_v7 = vpop.permute.xlu2 %6371 }
 0x891   :  { %v6492_v6 = vpop.permute.xlu2 %6491 }
 0x899   :  { %v6414_v32 = vpop.permute.xlu2 %6413 }
 0x89a   :  { %v6358_v24 = vpop.permute.xlu0 %6357 }
 0x89b   :  { %v6344_v14 = vpop.permute.xlu1 %6343 }
 0x89c   :  { %6347 = vst.msk [vmem:[#allocation6] sm:$0x3] %vm6346_vm11, %v6344_v14  ;;  %v7820_v14 = vld [vmem:[%s12282_s5 + $0x88] sm:$0xf0]  ;;  %vm12331_vm11 = vmmov %vm12327_vm1 }
 0x89d   :  { %6361 = vst.msk [vmem:[#allocation6] sm:$0x3] %vm6360_vm14, %v6358_v24  ;;  %v8222_v24 = vld [vmem:[%s12282_s5 + $0x84] sm:$0xf] }
 0x89e   :  { %6375 = vst.msk [vmem:[#allocation6] sm:$0x3] %vm6374_vm0, %v6372_v7  ;;  %v8315_v7 = vld [vmem:[%s12286_s9 + $0x16c] sm:$0xf]  ;;  %v7823_v21 = vor.u32 %v8222_v24, %v7820_v14  ;;  %v8257_v14 = vld [vmem:[%s12284_s7 + $0x94] sm:$0xf0] }
 0x8a0   :  { %6787 = vmatpush.bf16.msra.mxu3 %v7823_v21  ;;  %v8168_v21 = vld [vmem:[%s12286_s9 + $0x144] sm:$0xf0] }
 0x8a1   :  { %v6531_v58 = vpop.permute.xlu2 %6530 }
 0x8a2   :  { %v6479_v44 = vpop.permute.xlu0 %6478 }
 0x8a3   :  { %v6466_v18 = vpop.permute.xlu1 %6465 }
 0x8a4   :  { %6468 = vst.msk [vmem:[#allocation6 + $0x2] sm:$0x3] %vm6360_vm14, %v6466_v18  ;;  %v8312_v18 = vld [vmem:[%s12286_s9 + $0x154] sm:$0xf] }
 0x8a5   :  { %6481 = vst.msk [vmem:[#allocation6 + $0x2] sm:$0x3] %vm6374_vm0, %v6479_v44  ;;  %v7759_v44 = vor.u32 %v8206_v42, %v7756_v55  ;;  %v8183_v1 = vor.u32 %v8312_v18, %v8180_v43  ;;  %v7932_v42 = vld [vmem:[%s12284_s7 + $0x68] sm:$0xf0]  ;;  %v8248_v55 = vld [vmem:[%s12284_s7 + $0x54] sm:$0xf] }
 0x8a6   :  { %6494 = vst.msk [vmem:[#allocation6 + $0x2] sm:$0x3] %vm6388_vm2, %v6492_v6  ;;  %v8195_v6 = vor.u32 %v8315_v7, %v8192_v2  ;;  %v7935_v4 = vor.u32 %v8250_v50, %v7932_v42  ;;  %v7924_v7 = vld [vmem:[%s12284_s7 + $0x58] sm:$0xf0]  ;;  %v7954_v2 = vld [vmem:[%s12284_s7 + $0x90] sm:$0xf] }
 0x8a7   :  { %6774 = vmatpush.bf16.msra.mxu2 %v7759_v44  ;;  %v7927_v24 = vor.u32 %v8248_v55, %v7924_v7  ;;  %v7916_v44 = vld [vmem:[%s12284_s7 + $0x48] sm:$0xf0]  ;;  %v7955_v18 = vor.u32 %v8257_v14, %v7954_v2  ;;  %v8309_v43 = vld [vmem:[%s12286_s9 + $0x13c] sm:$0xf]  ;;  %v8144_v50 = vld [vmem:[%s12286_s9 + $0x114] sm:$0xf0] }
 0x8a8   :  { %7416 = vmatpush.bf16.msrb.mxu1 %v8195_v6  ;;  %v8246_v6 = vld [vmem:[%s12284_s7 + $0x44] sm:$0xf]  ;;  %v8171_v47 = vor.u32 %v8309_v43, %v8168_v21  ;;  %v8300_v42 = vld [vmem:[%s12286_s9 + $0xf4] sm:$0xf]  ;;  %v8132_v2 = vld [vmem:[%s12286_s9 + $0xfc] sm:$0xf0] }
 0x8a9   :  { %v8135_v14 = vor.u32 %v8300_v42, %v8132_v2  ;;  %v8279_v2 = vld [vmem:[%s12286_s9 + $0x4c] sm:$0xf] }
 0x8aa   :  { %v6400_v61 = vpop.permute.xlu0 %6399 }
 0x8ab   :  { %v6386_v27 = vpop.permute.xlu1 %6385 }
 0x8ac   :  { %6389 = vst.msk [vmem:[#allocation6] sm:$0x3] %vm6388_vm2, %v6386_v27  ;;  %7417 = vmatpush.bf16.msrb.mxu1 %v8183_v1  ;;  %v7986_v27 = vld [vmem:[%s12284_s7 + $0xd0] sm:$0xf]  ;;  %v7946_v1 = vld [vmem:[%s12284_s7 + $0x80] sm:$0xf] }
 0x8ad   :  { %6403 = vst.msk [vmem:[#allocation6] sm:$0x3] %vm6402_vm4, %v6400_v61  ;;  %v8267_v61 = vld [vmem:[%s12284_s7 + $0xe4] sm:$0xf0]  ;;  %v7987_v52 = vor.u32 %v8265_v28, %v7986_v27  ;;  %v7947_v17 = vor.u32 %v8255_v22, %v7946_v1  ;;  %v7988_v28 = vld [vmem:[%s12284_s7 + $0xd8] sm:$0xf0] }
 0x8ae   :  { %6417 = vst.msk [vmem:[#allocation6] sm:$0x3] %vm6416_vm10, %v6414_v32  ;;  %v7995_v37 = vor.u32 %v8267_v61, %v7994_v31  ;;  %v8249_v32 = vld [vmem:[%s12284_s7 + $0x54] sm:$0xf0]  ;;  %v7900_v31 = vld [vmem:[%s12284_s7 + $0x28] sm:$0xf0] }
 0x8af   :  { %v7923_v41 = vor.u32 %v8249_v32, %v7922_v9  ;;  %v8240_v9 = vld [vmem:[%s12284_s7 + $0x14] sm:$0xf] }
 0x8b0   :  { %7418 = vmatpush.bf16.msrb.mxu1 %v8171_v47  ;;  %v8264_v32 = vld [vmem:[%s12284_s7 + $0xd4] sm:$0xf]  ;;  %v8094_v47 = vld [vmem:[%s12286_s9 + $0xa8] sm:$0xf] }
 0x8b1   :  { %v8292_v22 = vld [vmem:[%s12286_s9 + $0xb0] sm:$0xf0] }
 0x8b2   :  { %v6518_v63 = vpop.permute.xlu0 %6517 }
 0x8b3   :  { %v6505_v10 = vpop.permute.xlu1 %6504 }
 0x8b4   :  { %6507 = vst.msk [vmem:[#allocation6 + $0x2] sm:$0x3] %vm6402_vm4, %v6505_v10  ;;  %v7907_v10 = vor.u32 %v8245_v60, %v7906_v25  ;;  %v7972_v60 = vld [vmem:[%s12284_s7 + $0xb8] sm:$0xf0] }
 0x8b5   :  { %6520 = vst.msk [vmem:[#allocation6 + $0x2] sm:$0x3] %vm6416_vm10, %v6518_v63  ;;  %v7979_v63 = vor.u32 %v8263_v3, %v7978_v38  ;;  %v7980_v38 = vld [vmem:[%s12284_s7 + $0xc8] sm:$0xf0] }
 0x8b6   :  { %6533 = vst.msk [vmem:[#allocation6 + $0x2] sm:$0x3] %vm6430_vm15, %v6531_v58  ;;  %v8243_v58 = vld [vmem:[%s12284_s7 + $0x24] sm:$0xf0]  ;;  %v7983_v25 = vor.u32 %v8262_v59, %v7980_v38  ;;  %v8280_v59 = vld [vmem:[%s12286_s9 + $0x50] sm:$0xf0] }
 0x8b7   :  { %v7899_v15 = vor.u32 %v8243_v58, %v7898_v51  ;;  %v8258_v58 = vld [vmem:[%s12284_s7 + $0xa4] sm:$0xf] }
 0x8b8   :  { %v7967_v40 = vor.u32 %v8258_v58, %v7964_v62 }
 0x8bb   :  { %v6428_v13 = vpop.permute.xlu1 %6427 }
 0x8bc   :  { %6431 = vst.msk [vmem:[#allocation6] sm:$0x3] %vm6430_vm15, %v6428_v13  ;;  %v7940_v13 = vld [vmem:[%s12284_s7 + $0x78] sm:$0xf0] }
 0x8bd   :  { %v7943_v26 = vor.u32 %v8252_v34, %v7940_v13  ;;  %v8254_v13 = vld [vmem:[%s12284_s7 + $0x84] sm:$0xf] }
 0x8c3   :  { %v6534_v46 = vld [vmem:[#allocation6] sm:$0xf] }
 0x8c4   :  { %6536 = vst [vmem:[#allocation1] ss:$4 sm:$0xff] %v6534_v46  ;;  %v7919_v46 = vor.u32 %v8246_v6, %v7916_v44  ;;  %v8297_v6 = vld [vmem:[%s12286_s9 + $0xdc] sm:$0xf]  ;;  %v8120_v44 = vld [vmem:[%s12286_s9 + $0xe4] sm:$0xf0] }
 0x8c5   :  { %v8123_v43 = vor.u32 %v8297_v6, %v8120_v44  ;;  %v8130_v6 = vld [vmem:[%s12286_s9 + $0xf0] sm:$0xf]  ;;  %v8301_v44 = vld [vmem:[%s12286_s9 + $0xf8] sm:$0xf0] }
 0x8cb   :  { %v6537_v33 = vld.sshfl [vmem:[#allocation1] sm:$0xff pattern:$0x73625140]  ;;  %v6538_v5 = vld.sshfl [vmem:[#allocation1 + $0x8] sm:$0xff pattern:$0x73625140] }
 0x8cc   :  { %v6541_v36 = vpack.c.bf16 %v6537_v33, %v6537_v33  ;;  %v6542_v30 = vpack.c.bf16 %v6538_v5, %v6538_v5  ;;  %v8268_v33 = vld [vmem:[%s12284_s7 + $0xf4] sm:$0xf]  ;;  %v8004_v5 = vld [vmem:[%s12284_s7 + $0xf8] sm:$0xf0] }
 0x8ce   :  { %6749 = vmatmul.bf16.vlgmr.msrb.gmra.mxu2 %v6541_v36  ;;  %6762 = vmatmul.bf16.vlgmr.msrb.gmra.mxu3 %v6542_v30 }
 0x8cf   :  { %6993 = vmatpush.bf16.msrb.mxu2 %v7939_v57  ;;  %7006 = vmatpush.bf16.msrb.mxu3 %v8003_v19  ;;  %v8007_v57 = vor.u32 %v8268_v33, %v8004_v5  ;;  %v8266_v19 = vld [vmem:[%s12284_s7 + $0xe4] sm:$0xf]  ;;  %v8190_v33 = vld [vmem:[%s12286_s9 + $0x168] sm:$0xf]  ;;  %v8316_v5 = vld [vmem:[%s12286_s9 + $0x170] sm:$0xf0] }
 0x8d3   :  { %6994 = vmatpush.bf16.msrb.mxu2 %v7931_v23  ;;  %7007 = vmatpush.bf16.msrb.mxu3 %v7995_v37  ;;  %v7903_v23 = vor.u32 %v8242_v54, %v7900_v31  ;;  %v7892_v37 = vld [vmem:[%s12284_s7 + $0x18] sm:$0xf0] }
 0x8d4   :  { %v7895_v27 = vor.u32 %v8240_v9, %v7892_v37  ;;  %v8313_v54 = vld [vmem:[%s12286_s9 + $0x158] sm:$0xf0]  ;;  %v8070_v37 = vld [vmem:[%s12286_s9 + $0x78] sm:$0xf] }
 0x8d7   :  { %6995 = vmatpush.bf16.msrb.mxu2 %v7923_v41  ;;  %7008 = vmatpush.bf16.msrb.mxu3 %v7987_v52  ;;  %v8238_v41 = vld [vmem:[%s12284_s7 + $0x4] sm:$0xf]  ;;  %v7991_v52 = vor.u32 %v8264_v32, %v7988_v28  ;;  %v8058_v28 = vld [vmem:[%s12286_s9 + $0x60] sm:$0xf] }
 0x8d8   :  { %v7887_v3 = vor.u32 %v8238_v41, %v7884_v11  ;;  %v8286_v32 = vld [vmem:[%s12286_s9 + $0x80] sm:$0xf0]  ;;  %v8283_v41 = vld [vmem:[%s12286_s9 + $0x68] sm:$0xf0] }
 0x8d9   :  { %v8059_v11 = vor.u32 %v8283_v41, %v8058_v28  ;;  %v8290_v28 = vld [vmem:[%s12286_s9 + $0xa0] sm:$0xf0] }
 0x8db   :  { %6996 = vmatpush.bf16.msrb.mxu2 %v7915_v20  ;;  %7009 = vmatpush.bf16.msrb.mxu3 %v7979_v63  ;;  %v6575_v20 = vld [vmem:[%s12283_s6] sm:$0x3]  ;;  %v8260_v63 = vld [vmem:[%s12284_s7 + $0xb4] sm:$0xf] }
 0x8dc   :  { %v6577_v51 = vperm.slane %v6575_v20, 0 }
 0x8de   :  { %6775 = vmatmul.bf16.vlgmr.msra.gmra.mxu2 %v6541_v36  ;;  %6788 = vmatmul.bf16.vlgmr.msra.gmra.mxu3 %v6542_v30  ;;  %v7996_v36 = vld [vmem:[%s12284_s7 + $0xe8] sm:$0xf0]  ;;  %v7911_v30 = vor.u32 %v8244_v53, %v7908_v48  ;;  %v8082_v48 = vld [vmem:[%s12286_s9 + $0x90] sm:$0xf] }
 0x8df   :  { %6997 = vmatpush.bf16.msrb.mxu2 %v7907_v10  ;;  %7010 = vmatpush.bf16.msrb.mxu3 %v7971_v39  ;;  %v7999_v61 = vor.u32 %v8266_v19, %v7996_v36  ;;  %v8159_v10 = vor.u32 %v8306_v8, %v8156_v45  ;;  %v7975_v39 = vor.u32 %v8260_v63, %v7972_v60  ;;  %v8289_v19 = vld [vmem:[%s12286_s9 + $0x98] sm:$0xf0]  ;;  %v8022_v63 = vld [vmem:[%s12286_s9 + $0x18] sm:$0xf]  ;;  %v8274_v60 = vld [vmem:[%s12286_s9 + $0x20] sm:$0xf0] }
 0x8e0   :  { %v8191_v36 = vor.u32 %v8316_v5, %v8190_v33  ;;  %v8023_v8 = vor.u32 %v8274_v60, %v8022_v63  ;;  %v8010_v45 = vld [vmem:[%s12286_s9] sm:$0xf]  ;;  %v8273_v33 = vld [vmem:[%s12286_s9 + $0x1c] sm:$0xf] }
 0x8e1   :  { %7419 = vmatpush.bf16.msrb.mxu1 %v8159_v10  ;;  %v8271_v10 = vld [vmem:[%s12286_s9 + $0x8] sm:$0xf0] }
 0x8e2   :  { %v8011_v58 = vor.u32 %v8271_v10, %v8010_v45  ;;  %v8281_v45 = vld [vmem:[%s12286_s9 + $0x58] sm:$0xf0] }
 0x8e3   :  { %6998 = vmatpush.bf16.msrb.mxu2 %v7899_v15  ;;  %7011 = vmatpush.bf16.msrb.mxu3 %v7963_v0 }
 0x8e7   :  { %6999 = vmatpush.bf16.msrb.mxu2 %v7891_v12  ;;  %7012 = vmatpush.bf16.msrb.mxu3 %v7955_v18  ;;  %v7956_v12 = vld [vmem:[%s12284_s7 + $0x98] sm:$0xf0]  ;;  %v6578_v18 = vperm.slane %v6575_v20, 1 }
 0x8e8   :  { %v7959_v34 = vor.u32 %v8256_v16, %v7956_v12  ;;  %v8277_v20 = vld [vmem:[%s12286_s9 + $0x38] sm:$0xf0]  ;;  %v8310_v16 = vld [vmem:[%s12286_s9 + $0x140] sm:$0xf0] }
 0x8e9   :  { %v8285_v12 = vld [vmem:[%s12286_s9 + $0x7c] sm:$0xf] }
 0x8eb   :  { %7000 = vmatpush.bf16.msrb.mxu2 %v7883_v56  ;;  %7013 = vmatpush.bf16.msrb.mxu3 %v7947_v17  ;;  %v7948_v56 = vld [vmem:[%s12284_s7 + $0x88] sm:$0xf0]  ;;  %v8095_v17 = vor.u32 %v8292_v22, %v8094_v47  ;;  %v8294_v47 = vld [vmem:[%s12286_s9 + $0xc4] sm:$0xf]  ;;  %v8108_v22 = vld [vmem:[%s12286_s9 + $0xcc] sm:$0xf0] }
 0x8ef   :  { %7019 = vmatpush.bf16.msra.mxu2 %v7943_v26  ;;  %7032 = vmatpush.bf16.msra.mxu3 %v8007_v57  ;;  %v8303_v26 = vld [vmem:[%s12286_s9 + $0x10c] sm:$0xf] }
 0x8f0   :  { %v8147_v7 = vor.u32 %v8303_v26, %v8144_v50  ;;  %v8282_v26 = vld [vmem:[%s12286_s9 + $0x64] sm:$0xf]  ;;  %v8060_v50 = vld [vmem:[%s12286_s9 + $0x6c] sm:$0xf0] }
 0x8f2   :  { %7420 = vmatpush.bf16.msrb.mxu1 %v8147_v7  ;;  %v8304_v7 = vld [vmem:[%s12286_s9 + $0x110] sm:$0xf0] }
 0x8f3   :  { %7020 = vmatpush.bf16.msra.mxu2 %v7935_v4  ;;  %7033 = vmatpush.bf16.msra.mxu3 %v7999_v61 }
 0x8f6   :  { %7421 = vmatpush.bf16.msrb.mxu1 %v8135_v14  ;;  %v8048_v14 = vld [vmem:[%s12286_s9 + $0x54] sm:$0xf0] }
 0x8f7   :  { %7021 = vmatpush.bf16.msra.mxu2 %v7927_v24  ;;  %7034 = vmatpush.bf16.msra.mxu3 %v7991_v52  ;;  %v7951_v24 = vor.u32 %v8254_v13, %v7948_v56  ;;  %v8046_v52 = vld [vmem:[%s12286_s9 + $0x48] sm:$0xf]  ;;  %v8307_v13 = vld [vmem:[%s12286_s9 + $0x128] sm:$0xf0] }
 0x8f8   :  { %v8047_v38 = vor.u32 %v8280_v59, %v8046_v52  ;;  %v8078_v52 = vld [vmem:[%s12286_s9 + $0x80] sm:$0xf]  ;;  %v8287_v59 = vld [vmem:[%s12286_s9 + $0x88] sm:$0xf0] }
 0x8fa   :  { %7422 = vmatpush.bf16.msrb.mxu1 %v8123_v43  ;;  %v8276_v43 = vld [vmem:[%s12286_s9 + $0x34] sm:$0xf] }
 0x8fb   :  { %7022 = vmatpush.bf16.msra.mxu2 %v7919_v46  ;;  %7035 = vmatpush.bf16.msra.mxu3 %v7983_v25 }
 0x8ff   :  { %7023 = vmatpush.bf16.msra.mxu2 %v7911_v30  ;;  %7036 = vmatpush.bf16.msra.mxu3 %v7975_v39  ;;  %v8178_v30 = vld [vmem:[%s12286_s9 + $0x150] sm:$0xf]  ;;  %v8096_v39 = vld [vmem:[%s12286_s9 + $0xb4] sm:$0xf0] }
 0x900   :  { %v8179_v9 = vor.u32 %v8313_v54, %v8178_v30  ;;  %v8270_v54 = vld [vmem:[%s12286_s9 + $0x4] sm:$0xf] }
 0x903   :  { %7024 = vmatpush.bf16.msra.mxu2 %v7903_v23  ;;  %7037 = vmatpush.bf16.msra.mxu3 %v7967_v40  ;;  %v8083_v23 = vor.u32 %v8289_v19, %v8082_v48  ;;  %v8166_v40 = vld [vmem:[%s12286_s9 + $0x138] sm:$0xf]  ;;  %v8298_v48 = vld [vmem:[%s12286_s9 + $0xe0] sm:$0xf0]  ;;  %v8106_v19 = vld [vmem:[%s12286_s9 + $0xc0] sm:$0xf] }
 0x907   :  { %7025 = vmatpush.bf16.msra.mxu2 %v7895_v27  ;;  %7038 = vmatpush.bf16.msra.mxu3 %v7959_v34  ;;  %v8071_v27 = vor.u32 %v8286_v32, %v8070_v37  ;;  %v8154_v34 = vld [vmem:[%s12286_s9 + $0x120] sm:$0xf] }
 0x908   :  { %v8155_v42 = vor.u32 %v8307_v13, %v8154_v34 }
 0x90b   :  { %7026 = vmatpush.bf16.msra.mxu2 %v7887_v3  ;;  %7039 = vmatpush.bf16.msra.mxu3 %v7951_v24  ;;  %v8034_v3 = vld [vmem:[%s12286_s9 + $0x30] sm:$0xf] }
 0x90c   :  { %v8035_v25 = vor.u32 %v8277_v20, %v8034_v3  ;;  %v8066_v3 = vld [vmem:[%s12286_s9 + $0x68] sm:$0xf]  ;;  %v8284_v20 = vld [vmem:[%s12286_s9 + $0x70] sm:$0xf0] }
 0x90d   :  { %v8067_v60 = vor.u32 %v8284_v20, %v8066_v3 }
 0x951   :  { %v6750_v29 = vpop.f32.mrf.mxu2  ;;  %v6763_v15 = vpop.f32.mrf.mxu3 }
 0x952   :  { %v6751_v0 = vadd.f32 %v6750_v29, %v6577_v51  ;;  %v8291_v51 = vld [vmem:[%s12286_s9 + $0xac] sm:$0xf]  ;;  %v8288_v29 = vld [vmem:[%s12286_s9 + $0x94] sm:$0xf] }
 0x953   :  { %v8099_v62 = vor.u32 %v8291_v51, %v8096_v39  ;;  %v8042_v39 = vld [vmem:[%s12286_s9 + $0x38] sm:$0xf] }
 0x954   :  { %v6764_v35 = vadd.f32 %v6763_v15, %v6751_v0  ;;  %v8084_v15 = vld [vmem:[%s12286_s9 + $0x9c] sm:$0xf0] }
 0x955   :  { %v8087_v0 = vor.u32 %v8288_v29, %v8084_v15 }
 0x956   :  { %v6793_v49 = vpack.c.bf16 %v6764_v35, %v6764_v35  ;;  %v8167_v35 = vor.u32 %v8310_v16, %v8166_v40 }
 0x958   :  { %7001 = vmatmul.bf16.vlgmr.msrb.gmra.mxu2 %v6793_v49 }
 0x959   :  { %v6752_v4 = vpop.f32.mrf.mxu2  ;;  %v6765_v55 = vpop.f32.mrf.mxu3  ;;  %7390 = vmatpush.bf16.msrb.mxu2 %v8191_v36  ;;  %v8295_v36 = vld [vmem:[%s12286_s9 + $0xc8] sm:$0xf0] }
 0x95a   :  { %v8063_v4 = vor.u32 %v8282_v26, %v8060_v50  ;;  %v8142_v55 = vld [vmem:[%s12286_s9 + $0x108] sm:$0xf] }
 0x95b   :  { %v8143_v24 = vor.u32 %v8304_v7, %v8142_v55  ;;  %v8272_v55 = vld [vmem:[%s12286_s9 + $0x10] sm:$0xf0] }
 0x95d   :  { %7391 = vmatpush.bf16.msrb.mxu2 %v8179_v9  ;;  %v8293_v9 = vld [vmem:[%s12286_s9 + $0xb8] sm:$0xf0] }
 0x961   :  { %v6776_v21 = vpop.f32.mrf.mxu2  ;;  %v6789_v1 = vpop.f32.mrf.mxu3  ;;  %7392 = vmatpush.bf16.msrb.mxu2 %v8167_v35  ;;  %v8030_v35 = vld [vmem:[%s12286_s9 + $0x20] sm:$0xf] }
 0x962   :  { %v6777_v46 = vadd.f32 %v6776_v21, %v6578_v18  ;;  %v8051_v18 = vor.u32 %v8279_v2, %v8048_v14  ;;  %v8036_v21 = vld [vmem:[%s12286_s9 + $0x3c] sm:$0xf0] }
 0x964   :  { %v6790_v53 = vadd.f32 %v6789_v1, %v6777_v46  ;;  %v8131_v1 = vor.u32 %v8301_v44, %v8130_v6  ;;  %v8039_v46 = vor.u32 %v8276_v43, %v8036_v21  ;;  %v8174_v6 = vld [vmem:[%s12286_s9 + $0x140] sm:$0xf]  ;;  %v8311_v44 = vld [vmem:[%s12286_s9 + $0x148] sm:$0xf0]  ;;  %v8162_v21 = vld [vmem:[%s12286_s9 + $0x128] sm:$0xf] }
 0x965   :  { %7393 = vmatpush.bf16.msrb.mxu2 %v8155_v42  ;;  %v8314_v42 = vld [vmem:[%s12286_s9 + $0x160] sm:$0xf0]  ;;  %v8175_v43 = vor.u32 %v8311_v44, %v8174_v6 }
 0x966   :  { %v6794_v57 = vpack.c.bf16 %v6790_v53, %v6790_v53  ;;  %v8111_v53 = vor.u32 %v8294_v47, %v8108_v22 }
 0x968   :  { %7014 = vmatmul.bf16.vlgmr.msrb.gmra.mxu3 %v6794_v57  ;;  %7027 = vmatmul.bf16.vlgmr.msra.gmra.mxu2 %v6793_v49  ;;  %v8072_v49 = vld [vmem:[%s12286_s9 + $0x84] sm:$0xf0] }
 0x969   :  { %v6778_v31 = vpop.f32.mrf.mxu2  ;;  %v6791_v61 = vpop.f32.mrf.mxu3  ;;  %7377 = vmatpush.bf16.msrb.mxu3 %v8095_v17  ;;  %v8075_v56 = vor.u32 %v8285_v12, %v8072_v49  ;;  %7394 = vmatpush.bf16.msrb.mxu2 %v8143_v24  ;;  %v8118_v17 = vld [vmem:[%s12286_s9 + $0xd8] sm:$0xf]  ;;  %v8317_v12 = vld [vmem:[%s12286_s9 + $0x178] sm:$0xf0]  ;;  %v8275_v49 = vld [vmem:[%s12286_s9 + $0x28] sm:$0xf0] }
 0x96a   :  { %v8119_v5 = vor.u32 %v8298_v48, %v8118_v17  ;;  %7423 = vmatpush.bf16.msrb.mxu1 %v8111_v53  ;;  %v8012_v31 = vld [vmem:[%s12286_s9 + $0xc] sm:$0xf0]  ;;  %v8031_v26 = vor.u32 %v8275_v49, %v8030_v35  ;;  %v8305_v48 = vld [vmem:[%s12286_s9 + $0x118] sm:$0xf0] }
 0x96b   :  { %v8102_v61 = vld [vmem:[%s12286_s9 + $0xb0] sm:$0xf]  ;;  %v8015_v37 = vor.u32 %v8270_v54, %v8012_v31  ;;  %v8126_v31 = vld [vmem:[%s12286_s9 + $0xe0] sm:$0xf] }
 0x96c   :  { %v8103_v32 = vor.u32 %v8293_v9, %v8102_v61  ;;  %v8150_v17 = vld [vmem:[%s12286_s9 + $0x110] sm:$0xf]  ;;  %v8299_v61 = vld [vmem:[%s12286_s9 + $0xe8] sm:$0xf0]  ;;  %v8114_v9 = vld [vmem:[%s12286_s9 + $0xc8] sm:$0xf] }
 0x96d   :  { %7378 = vmatpush.bf16.msrb.mxu3 %v8083_v23  ;;  %7395 = vmatpush.bf16.msrb.mxu2 %v8131_v1  ;;  %v8107_v23 = vor.u32 %v8295_v36, %v8106_v19  ;;  %v8308_v1 = vld [vmem:[%s12286_s9 + $0x130] sm:$0xf0]  ;;  %v8138_v19 = vld [vmem:[%s12286_s9 + $0xf8] sm:$0xf]  ;;  %v8302_v36 = vld [vmem:[%s12286_s9 + $0x100] sm:$0xf0] }
 0x96e   :  { %v8163_v22 = vor.u32 %v8308_v1, %v8162_v21  ;;  %v8139_v54 = vor.u32 %v8302_v36, %v8138_v19 }
 0x971   :  { %7379 = vmatpush.bf16.msrb.mxu3 %v8071_v27  ;;  %7396 = vmatpush.bf16.msrb.mxu2 %v8119_v5  ;;  %v8090_v27 = vld [vmem:[%s12286_s9 + $0x98] sm:$0xf]  ;;  %v8151_v5 = vor.u32 %v8305_v48, %v8150_v17 }
 0x972   :  { %v8091_v41 = vor.u32 %v8290_v28, %v8090_v27  ;;  %v7113_v28 = vld [vmem:[%s12287_s10] sm:$0x7] }
 0x975   :  { %7380 = vmatpush.bf16.msrb.mxu3 %v8059_v11  ;;  %7397 = vmatpush.bf16.msrb.mxu2 %v8107_v23  ;;  %v8127_v23 = vor.u32 %v8299_v61, %v8126_v31 }
 0x978   :  { %7040 = vmatmul.bf16.vlgmr.msra.gmra.mxu3 %v6794_v57  ;;  %v8024_v57 = vld [vmem:[%s12286_s9 + $0x24] sm:$0xf0] }
 0x979   :  { %7381 = vmatpush.bf16.msrb.mxu3 %v8047_v38  ;;  %v8027_v30 = vor.u32 %v8273_v33, %v8024_v57  ;;  %7429 = vmatpush.bf16.msra.mxu2 %v8103_v32  ;;  %v8079_v38 = vor.u32 %v8287_v59, %v8078_v52  ;;  %v7116_v59 = vperm.slane %v7113_v28, 1 }
 0x97d   :  { %7382 = vmatpush.bf16.msrb.mxu3 %v8035_v25  ;;  %7430 = vmatpush.bf16.msra.mxu2 %v8091_v41  ;;  %v6827_v25 = vld [vmem:[%s12285_s8] sm:$0x3] }
 0x97e   :  { %v6829_v10 = vperm.slane %v6827_v25, 0 }
 0x981   :  { %7383 = vmatpush.bf16.msrb.mxu3 %v8023_v8  ;;  %7431 = vmatpush.bf16.msra.mxu2 %v8079_v38  ;;  %v8054_v8 = vld [vmem:[%s12286_s9 + $0x50] sm:$0xf] }
 0x982   :  { %v8055_v51 = vor.u32 %v8281_v45, %v8054_v8 }
 0x985   :  { %7384 = vmatpush.bf16.msrb.mxu3 %v8011_v58  ;;  %7432 = vmatpush.bf16.msra.mxu2 %v8067_v60  ;;  %v8278_v58 = vld [vmem:[%s12286_s9 + $0x40] sm:$0xf0] }
 0x986   :  { %v8043_v40 = vor.u32 %v8278_v58, %v8042_v39 }
 0x989   :  { %7403 = vmatpush.bf16.msra.mxu3 %v8099_v62  ;;  %7433 = vmatpush.bf16.msra.mxu2 %v8055_v51 }
 0x98d   :  { %7404 = vmatpush.bf16.msra.mxu3 %v8087_v0  ;;  %v8198_v0 = vld [vmem:[%s12286_s9 + $0x170] sm:$0xf]  ;;  %7434 = vmatpush.bf16.msra.mxu2 %v8043_v40 }
 0x98e   :  { %v8199_v13 = vor.u32 %v8317_v12, %v8198_v0 }
 0x991   :  { %7405 = vmatpush.bf16.msra.mxu3 %v8075_v56  ;;  %v8186_v56 = vld [vmem:[%s12286_s9 + $0x158] sm:$0xf]  ;;  %7435 = vmatpush.bf16.msra.mxu2 %v8031_v26 }
 0x992   :  { %v8187_v24 = vor.u32 %v8314_v42, %v8186_v56 }
 0x995   :  { %7406 = vmatpush.bf16.msra.mxu3 %v8063_v4  ;;  %v8018_v4 = vld [vmem:[%s12286_s9 + $0x8] sm:$0xf] }
 0x996   :  { %v8019_v14 = vor.u32 %v8272_v55, %v8018_v4 }
 0x998   :  { %7436 = vmatpush.bf16.msra.mxu2 %v8019_v14 }
 0x999   :  { %7407 = vmatpush.bf16.msra.mxu3 %v8051_v18  ;;  %v6830_v18 = vperm.slane %v6827_v25, 1 }
 0x99d   :  { %7408 = vmatpush.bf16.msra.mxu3 %v8039_v46 }
 0x9a1   :  { %7409 = vmatpush.bf16.msra.mxu3 %v8027_v30 }
 0x9a5   :  { %7410 = vmatpush.bf16.msra.mxu3 %v8015_v37  ;;  %v8296_v37 = vld [vmem:[%s12286_s9 + $0xd0] sm:$0xf0] }
 0x9a6   :  { %v8115_v32 = vor.u32 %v8296_v37, %v8114_v9 }
 0x9db   :  { %v7002_v11 = vpop.f32.mrf.mxu2 }
 0x9dc   :  { %v7003_v62 = vadd.f32 %v7002_v11, %v6829_v10  ;;  %v7115_v11 = vperm.slane %v7113_v28, 0 }
 0x9e3   :  { %v7004_v63 = vpop.f32.mrf.mxu2 }
 0x9eb   :  { %v7015_v29 = vpop.f32.mrf.mxu3  ;;  %v7028_v15 = vpop.f32.mrf.mxu2 }
 0x9ec   :  { %v7016_v16 = vadd.f32 %v7015_v29, %v7003_v62  ;;  %v7029_v46 = vadd.f32 %v7028_v15, %v6830_v18  ;;  %v7117_v62 = vperm.slane %v7113_v28, 2 }
 0x9ee   :  { %v7045_v34 = vmax.f32 %v7016_v16, 0.0 }
 0x9f0   :  { %v7047_v50 = vpack.c.bf16 %v7045_v34, %v7045_v34 }
 0x9f2   :  { %7385 = vmatmul.bf16.vlgmr.msrb.gmra.mxu3 %v7047_v50 }
 0x9f3   :  { %v7017_v7 = vpop.f32.mrf.mxu3  ;;  %v7030_v2 = vpop.f32.mrf.mxu2  ;;  %7442 = vmatpush.bf16.msrb.mxu3 %v8199_v13 }
 0x9f7   :  { %7443 = vmatpush.bf16.msrb.mxu3 %v8187_v24 }
 0x9fb   :  { %v7041_v47 = vpop.f32.mrf.mxu3  ;;  %7444 = vmatpush.bf16.msrb.mxu3 %v8175_v43 }
 0x9fc   :  { %v7042_v53 = vadd.f32 %v7041_v47, %v7029_v46 }
 0x9fe   :  { %v7046_v33 = vmax.f32 %v7042_v53, 0.0 }
 0x9ff   :  { %7445 = vmatpush.bf16.msrb.mxu3 %v8163_v22 }
 0xa00   :  { %v7048_v57 = vpack.c.bf16 %v7046_v33, %v7046_v33 }
 0xa02   :  { %7398 = vmatmul.bf16.vlgmr.msrb.gmra.mxu2 %v7048_v57  ;;  %7411 = vmatmul.bf16.vlgmr.msra.gmra.mxu3 %v7047_v50 }
 0xa03   :  { %7424 = vmatmul.bf16.vlgmr.msrb.gmra.mxu1 %v7048_v57  ;;  %v7043_v30 = vpop.f32.mrf.mxu3  ;;  %7446 = vmatpush.bf16.msrb.mxu3 %v8151_v5 }
 0xa07   :  { %7447 = vmatpush.bf16.msrb.mxu3 %v8139_v54 }
 0xa0b   :  { %7448 = vmatpush.bf16.msrb.mxu3 %v8127_v23 }
 0xa0f   :  { %7449 = vmatpush.bf16.msrb.mxu3 %v8115_v32 }
 0xa12   :  { %7437 = vmatmul.bf16.vlgmr.msra.gmra.mxu2 %v7047_v50  ;;  %7450 = vmatmul.bf16.vlgmr.msrb.gmra.mxu3 %v7048_v57 }
 0xa75   :  { %v7386_v27 = vpop.f32.mrf.mxu3 }
 0xa76   :  { %v7387_v38 = vadd.f32 %v7386_v27, %v7115_v11 }
 0xa7d   :  { %v7388_v41 = vpop.f32.mrf.mxu3 }
 0xa80   :  { %v7425_v52 = vpop.f32.mrf.mxu1 }
 0xa85   :  { %v7399_v3 = vpop.f32.mrf.mxu2  ;;  %v7412_v20 = vpop.f32.mrf.mxu3 }
 0xa86   :  { %v7400_v25 = vadd.f32 %v7399_v3, %v7387_v38  ;;  %v7413_v63 = vadd.f32 %v7412_v20, %v7116_v59 }
 0xa88   :  { %v7426_v60 = vadd.f32 %v7425_v52, %v7413_v63  ;;  %v7427_v8 = vpop.f32.mrf.mxu1  ;;  %v7455_v45 = vsel %vm12327_vm1, %v7400_v25, -inf }
 0xa8a   :  { %v7456_v10 = vsel %vm12328_vm13, %v7426_v60, -inf }
 0xa8b   :  { %v7457_v51 = vmax.f32 %v7455_v45, %v7456_v10 }
 0xa8d   :  { %v7401_v39 = vpop.f32.mrf.mxu2  ;;  %v7414_v58 = vpop.f32.mrf.mxu3  ;;  %7458 = vmax.xlane.f32.xlu0 %v7457_v51 }
 0xa95   :  { %v7438_v29 = vpop.f32.mrf.mxu2  ;;  %v7451_v15 = vpop.f32.mrf.mxu3 }
 0xa96   :  { %v7439_v0 = vadd.f32 %v7438_v29, %v7117_v62 }
 0xa98   :  { %v7452_v40 = vadd.f32 %v7451_v15, %v7439_v0 }
 0xa9a   :  { %8346 = vtanh.f32 %v7452_v40 }
 0xa9d   :  { %v7440_v16 = vpop.f32.mrf.mxu2  ;;  %v7453_v12 = vpop.f32.mrf.mxu3 }
 0xaa0   :  { %v8347_v35 = vpop.eup %8346 }
 0xaa1   :  { %7495 = vst.msk [vmem:[#allocation7] sm:$0x3] %vm7494_vm5, %v8347_v35 }
 0xaa2   :  { %7506 = dma.vmem_to_hbm [thread:$0]  %s7502_s1, 32, %s7504_s23, [#allocation8]  }
 0xb00   :  { %v7459_v49 = vpop.xlane.xlu0 %7458 }
 0xb01   :  { %v7460_v34 = vsub.f32 %v7400_v25, %v7459_v49  ;;  %v7461_v13 = vsub.f32 %v7426_v60, %v7459_v49 }
 0xb03   :  { %v7462_v56 = vmul.f32 1.442695, %v7460_v34  ;;  %v7464_v26 = vmul.f32 1.442695, %v7461_v13 }
 0xb05   :  { %8348 = vpow2.f32 %v7462_v56 }
 0xb06   :  { %8350 = vpow2.f32 %v7464_v26 }
 0xb0b   :  { %v8349_v50 = vpop.eup %8348 }
 0xb0c   :  { %v8351_v42 = vpop.eup %8350  ;;  %v7466_v4 = vsel %vm12329_vm3, %v8349_v50, 0.0 }
 0xb0d   :  { %v7467_v55 = vsel %vm12330_vm12, %v8351_v42, 0.0 }
 0xb0e   :  { %v7468_v7 = vadd.f32 %v7467_v55, %v7466_v4 }
 0xb10   :  { %7469 = vadd.xlane.f32.xlu1 %v7468_v7 }
 0xb83   :  { %v7470_v2 = vpop.xlane.xlu1 %7469 }
 0xb84   :  { %8352 = vrcp.f32 %v7470_v2  ;;  %v7482_v44 = vand.u32 2147483648, %v7470_v2  ;;  %v7480_v43 = vand.u32 2147483647, %v7470_v2  ;;  %vm7476_vm6 = vweird.f32 %v7470_v2 }
 0xb86   :  { %v7483_v1 = vor.u32 1.1754944e-38, %v7482_v44  ;;  %vm7481_vm7 = vcmp.eq.f32.partialorder %v7480_v43, 8.507059e+37 }
 0xb8a   :  { %v8353_v24 = vpop.eup %8352 }
 0xb8b   :  { %v7472_v14 = vmul.f32 %v8353_v24, %v7470_v2  ;;  %vm7477_vm8 = vweird.f32 %v8353_v24 }
 0xb8c   :  { %vm7478_vm9 = vmor %vm7476_vm6, %vm7477_vm8 }
 0xb8d   :  { %v7473_v6 = vsub.f32 1.0, %v7472_v14 }
 0xb8f   :  { %v7474_v18 = vmul.f32 %v8353_v24, %v7473_v6 }
 0xb91   :  { %v7475_v21 = vadd.f32 %v8353_v24, %v7474_v18 }
 0xb93   :  { %v7479_v46 = vsel %vm7478_vm9, %v8353_v24, %v7475_v21 }
 0xb94   :  { %v7484_v47 = vsel %vm7481_vm7, %v7483_v1, %v7479_v46 }
 0xb95   :  { %v7486_v22 = vmul.f32 %v8351_v42, %v7484_v47  ;;  %v7485_v53 = vmul.f32 %v8349_v50, %v7484_v47 }
 0xb97   :  { %v7489_v17 = vrot.slane %v7486_v22, 6 }
 0xb99   :  { %v7490_v48 = vsel %vm12331_vm11, %v7485_v53, %v7489_v17 }
 0xb9a   :  { %7492 = vst [vmem:[#allocation9] sm:$0xf] %v7490_v48 }
 0xb9b   :  { %7517 = dma.vmem_to_hbm [thread:$0]  %s7513_s25, 64, %s7515_s2, [#allocation10]  }
 0xb9c   :  { %8405 = dma.done.wait [#allocation8], 32  }
 0xb9d   :  { %8406 = vsyncadd [#allocation8], 4294967264 }
 0xb9e   :  { %8407 = dma.done.wait [#allocation10], 64  }
 0xb9f   :  { %8408 = vsyncadd [#allocation10], 4294967232 }
 0xba0   :  { %7526 = vsyncpa [#allocation8], 1 }
 0xba1   :  { %7527 = vsyncpa [#allocation10], 1 }

</bundles_post_ra>
